<compile_context>
chip_gen: v7x
topology: tpu7x:2x2x1
jax: 0.10.0
libtpu: 0.0.40
codegen_flags: <defaults>
</compile_context>

<pallas_src>
import functools

import numpy as np
import jax
import jax.numpy as jnp
from jax.experimental import pallas as pl
from jax.experimental.pallas import tpu as pltpu


def build_grid(resolution):
    """Same as the PyTorch build_grid, returning numpy (H, W, 4) float32."""
    ranges = [np.linspace(0.0, 1.0, num=r) for r in resolution]
    g = np.meshgrid(*ranges, sparse=False, indexing="ij")
    g = np.stack(g, axis=-1).reshape(resolution[0], resolution[1], -1)
    g = np.concatenate([g, 1.0 - g], axis=-1).astype(np.float32)
    return g


# ---------------------------- fused Pallas kernel ----------------------------

def decoder_kernel(x_ref, ge_ref, w1_ref, b1_ref, w2_ref, b2_ref, w3_ref,
                   b3_ref, wb5_ref, bb5_ref, wb3_ref, bb3_ref, o_ref, xp_ref,
                   *, H, W, PAD, OFF3, n5):
    """Stage s of the decoder for one batch slab (grid = (G, n5 + 1)).

    x_ref  : (1, NB, hid)                slot vectors for this batch slab
    ge_ref : (H*W, hid)                  precomputed soft-position embedding
    w*_ref : (in, out), b*_ref: (1, out) proj MLP (pre-transposed, f32)
    wb5_ref: (1, K5, Wp*D, W*D) bf16     banded 5x5 weights for layer min(s, n5-1)
    bb5_ref: (1, 1, W*D)                 x-tiled bias for that layer
    wb3_ref: (K3, Wp*D, W*Cpad) bf16     banded final 3x3 weights (Cout padded)
    bb3_ref: (1, W*Cpad)
    o_ref  : (1, H*NB, W*Cpad)           packed, lane-dense output slab
    xp_ref : VMEM scratch (Hp, NB, Wp*D) zero-ring-padded activation (f32)
    """
    s = pl.program_id(1)
    NB = x_ref.shape[1]
    hid = x_ref.shape[2]
    D = w1_ref.shape[1]
    Hp, Wp = H + 2 * PAD, W + 2 * PAD
    K5 = wb5_ref.shape[1]
    K3 = wb3_ref.shape[0]
    M = H * NB                 # rows of every matmul
    WD = W * D                 # interior lane width
    CP = wb3_ref.shape[2]      # packed output lane width (W * Cpad)
    f32 = jnp.float32

    # ---------------- stage 0: soft-position embed + proj MLP ----------------
    @pl.when(s == 0)
    def _mlp():
        # Zero only the padding ring; the interior is overwritten below.
        xp_ref[0:PAD] = jnp.zeros((PAD, NB, Wp * D), f32)
        xp_ref[PAD + H:Hp] = jnp.zeros((PAD, NB, Wp * D), f32)
        xp_ref[PAD:PAD + H, :, 0:PAD * D] = jnp.zeros((H, NB, PAD * D), f32)
        xp_ref[PAD:PAD + H, :, PAD * D + WD:Wp * D] = (
            jnp.zeros((H, NB, PAD * D), f32))

        ge = ge_ref[...].reshape(H, W, hid)                    # (H, W, hid)
        slots = x_ref[0]                                       # (NB, hid)
        h = ge[:, None, :, :] + slots[None, :, None, :]        # (H, NB, W, hid)
        h = h.reshape(M * W, hid)
        h = jnp.dot(h, w1_ref[...], preferred_element_type=f32) + b1_ref[...]
        h = jnp.maximum(h, 0.0)
        h = jnp.dot(h, w2_ref[...], preferred_element_type=f32) + b2_ref[...]
        h = jnp.maximum(h, 0.0)
        h = jnp.dot(h, w3_ref[...], preferred_element_type=f32) + b3_ref[...]
        h4 = h.reshape(H, NB, W, D)
        # Scatter the per-pixel MLP output into the x-packed interior lanes.
        for x in range(W):
            c0 = (PAD + x) * D
            xp_ref[PAD:PAD + H, :, c0:c0 + D] = h4[:, :, x, :]

    # --------- stages 0..n5-1: one 5x5 transposed conv (banded matmuls) ------
    @pl.when(s < n5)
    def _conv5():
        acc = jnp.zeros((M, WD), f32)
        for ky in range(K5):
            rows = xp_ref[ky:ky + H].reshape(M, Wp * D)        # free reshape
            acc = acc + jnp.dot(rows.astype(jnp.bfloat16), wb5_ref[0, ky],
                                preferred_element_type=f32)
        act = jnp.maximum(acc + bb5_ref[0], 0.0)               # (M, W*D)
        xp_ref[PAD:PAD + H, :, PAD * D:PAD * D + WD] = act.reshape(H, NB, WD)

    # ----------- last stage: final 3x3 transposed conv -> packed lanes -------
    @pl.when(s == n5)
    def _conv3():
        acc = jnp.zeros((M, CP), f32)
        for t in range(K3):
            rows = xp_ref[OFF3 + t:OFF3 + t + H].reshape(M, Wp * D)
            acc = acc + jnp.dot(rows.astype(jnp.bfloat16), wb3_ref[t],
                                preferred_element_type=f32)
        o_ref[0] = acc + bb3_ref[...]


# ---------------------------- host-side preparation ----------------------------

def prepare_decoder(params, resolution):
    """Hoist all weight preprocessing out of the per-call forward.

    ConvTranspose2d(stride=1, padding=p) is rewritten as a regular conv with a
    spatially flipped kernel and zero padding K-1-p, and then packed into
    per-ky block-banded (Toeplitz) matrices (Wp*D, W*Cout) so each layer is
    K full-width matmuls in the kernel.
    """
    H, W = resolution

    def npf(a):
        return np.asarray(jax.device_get(a), dtype=np.float32)

    grid = build_grid(resolution).reshape(H * W, 4)
    we, be = params["emb"]
    ge = (grid @ npf(we).T + npf(be)).astype(np.float32)       # (HW, hid)

    w1, b1 = params["proj1"]
    w2, b2 = params["proj2"]
    w3, b3 = params["proj3"]
    w1, b1, w2, b2, w3, b3 = map(npf, (w1, b1, w2, b2, w3, b3))
    D = w1.shape[0]

    convs = params["convs"]
    assert len(convs) >= 2
    *head, last = convs

    K5 = head[0][2]
    PAD = K5 - 1 - head[0][3]            # padding of the equivalent regular conv
    Wp = W + 2 * PAD

    # Hidden 5x5 layers -> banded weights: column block x reads lanes x*D..+K5*D.
    n5 = len(head)
    wb5 = np.zeros((n5, K5, Wp * D, W * D), np.float32)
    bb5 = np.zeros((n5, 1, W * D), np.float32)
    for li, (w_ct, b, K, p) in enumerate(head):
        assert K == K5 and K - 1 - p == PAD, \
            "all hidden transposed convs must share the same padding ring"
        cin, co = w_ct.shape[0], w_ct.shape[1]
        assert cin == D and co == D
        wk = np.transpose(npf(w_ct)[:, :, ::-1, ::-1], (2, 3, 0, 1))  # (K,K,D,D)
        for ky in range(K):
            for x in range(W):
                for kx in range(K):
                    r0 = (x + kx) * D
                    wb5[li, ky, r0:r0 + D, x * D:(x + 1) * D] = wk[ky, kx]
        bb5[li, 0] = np.tile(npf(b), W)

    # Final 3x3 layer -> banded weights producing x-packed output lanes of
    # width W*Cpad (a multiple of 128 -> one dense, small HBM store).
    w_ct, b, K3, p3 = last
    pad3 = K3 - 1 - p3
    assert 0 <= pad3 <= PAD
    OFF3 = PAD - pad3
    cin, cout = w_ct.shape[0], w_ct.shape[1]
    assert cin == D
    cpad = cout
    while (W * cpad) % 128 != 0:
        cpad += 1
    wk3 = np.transpose(npf(w_ct)[:, :, ::-1, ::-1], (2, 3, 0, 1))     # (K3,K3,D,cout)
    wb3 = np.zeros((K3, Wp * D, W * cpad), np.float32)
    for t in range(K3):
        for x in range(W):
            for kx in range(K3):
                r0 = (x + OFF3 + kx) * D
                wb3[t, r0:r0 + D, x * cpad:x * cpad + cout] = wk3[t, kx]
    bb3 = np.tile(np.pad(npf(b), (0, cpad - cout)), W)[None, :]       # (1, W*cpad)

    tensors = dict(
        ge=jnp.asarray(ge),
        w1=jnp.asarray(w1.T), b1=jnp.asarray(b1[None, :]),
        w2=jnp.asarray(w2.T), b2=jnp.asarray(b2[None, :]),
        w3=jnp.asarray(w3.T), b3=jnp.asarray(b3[None, :]),
        wb5=jnp.asarray(wb5, dtype=jnp.bfloat16),   # bf16: halve weight DMA
        bb5=jnp.asarray(bb5),
        wb3=jnp.asarray(wb3, dtype=jnp.bfloat16),
        bb3=jnp.asarray(bb3),
    )
    statics = dict(K5=K5, K3=K3, PAD=PAD, OFF3=OFF3, n5=n5,
                   cout=cout, cpad=cpad, D=D)
    return tensors, statics


def _num_tensorcores():
    """2 on dual-TensorCore chips (v7x), 1 on v5e/v6e. Best-effort query."""
    try:
        info = pltpu.get_tpu_info()
        for attr in ("num_tensorcores", "tensorcores_per_chip", "num_cores",
                     "core_count"):
            v = getattr(info, attr, None)
            if isinstance(v, int) and v >= 1:
                return min(int(v), 2)
    except Exception:
        pass
    try:
        if "v7" in jax.devices()[0].device_kind.lower():
            return 2
    except Exception:
        pass
    return 1


# ---------------------------- forward ----------------------------

def coco_fixed_decoder_forward(tensors, statics, x, resolution):
    H, W = resolution
    hid = x.shape[-1]
    xf = x.reshape(-1, hid)                      # (N, hid)
    n = xf.shape[0]

    D, PAD, OFF3 = statics["D"], statics["PAD"], statics["OFF3"]
    n5, K5, K3 = statics["n5"], statics["K5"], statics["K3"]
    cout, cpad = statics["cout"], statics["cpad"]
    Hp, Wp = H + 2 * PAD, W + 2 * PAD
    CP = W * cpad

    # One TensorCore -> single grid row (largest M per matmul); split the batch
    # across two grid rows only on dual-core v7x.
    G = _num_tensorcores()
    if n % G != 0 or n < G:
        G = 1
    NB = n // G
    M = H * NB
    S = n5 + 1                                   # stages: [MLP+conv0], conv1.., final

    x3 = xf.reshape(G, NB, hid)

    def const_spec(arr):
        nd = arr.ndim
        return pl.BlockSpec(arr.shape, lambda g, s, _nd=nd: (0,) * _nd)

    wb5, bb5 = tensors["wb5"], tensors["bb5"]
    in_specs = [
        pl.BlockSpec((1, NB, hid), lambda g, s: (g, 0, 0)),            # slots
        const_spec(tensors["ge"]),
        const_spec(tensors["w1"]), const_spec(tensors["b1"]),
        const_spec(tensors["w2"]), const_spec(tensors["b2"]),
        const_spec(tensors["w3"]), const_spec(tensors["b3"]),
        # per-layer banded weights: streamed one conv layer per grid stage
        pl.BlockSpec((1,) + wb5.shape[1:],
                     lambda g, s: (jnp.minimum(s, n5 - 1), 0, 0, 0)),
        pl.BlockSpec((1,) + bb5.shape[1:],
                     lambda g, s: (jnp.minimum(s, n5 - 1), 0, 0)),
        const_spec(tensors["wb3"]), const_spec(tensors["bb3"]),
    ]
    out_specs = pl.BlockSpec((1, M, CP), lambda g, s: (g, 0, 0))

    kern = functools.partial(decoder_kernel, H=H, W=W, PAD=PAD, OFF3=OFF3,
                             n5=n5)

    flops = 2 * n * H * W * (hid * D + 2 * D * D)                        # MLP
    flops += 2 * n * H * (n5 * K5 * (Wp * D) * (W * D) + K3 * (Wp * D) * CP)
    bytes_accessed = G * sum(int(v.nbytes) for v in tensors.values())
    bytes_accessed += int(xf.nbytes) + 4 * G * M * CP
    cost = pl.CostEstimate(flops=flops, transcendentals=0,
                           bytes_accessed=bytes_accessed)

    out = pl.pallas_call(
        kern,
        out_shape=jax.ShapeDtypeStruct((G, M, CP), jnp.float32),
        grid=(G, S),
        in_specs=in_specs,
        out_specs=out_specs,
        scratch_shapes=[pltpu.VMEM((Hp, NB, Wp * D), jnp.float32)],
        compiler_params=pltpu.CompilerParams(
            dimension_semantics=("parallel", "arbitrary")),
        cost_estimate=cost,
    )(x3, tensors["ge"], tensors["w1"], tensors["b1"], tensors["w2"],
      tensors["b2"], tensors["w3"], tensors["b3"], wb5, bb5,
      tensors["wb3"], tensors["bb3"])

    # rows are (y, b)-ordered, lanes are (x, channel)-packed -> unpack outside.
    out = out.reshape(G, H, NB, W, cpad).transpose(0, 2, 1, 3, 4)
    out = out.reshape(n, H, W, cpad)[..., :cout]
    return out                                   # (N, H, W, 4)


# ---------------------------- parameters ----------------------------

def init_params(key, hid_dim, dec_dim, num_conv_layers=5):
    """Deterministic synthetic init, PyTorch tensor conventions:
       Linear weight (out, in); ConvTranspose2d weight (Cin, Cout, K, K)."""
    def linear(k, fin, fout):
        k1, k2 = jax.random.split(k)
        bound = 1.0 / np.sqrt(fin)
        w = jax.random.uniform(k1, (fout, fin), jnp.float32, -bound, bound)
        b = jax.random.uniform(k2, (fout,), jnp.float32, -bound, bound)
        return w, b

    keys = jax.random.split(key, 4 + num_conv_layers)
    params = {
        "emb": linear(keys[0], 4, hid_dim),
        "proj1": linear(keys[1], hid_dim, dec_dim),
        "proj2": linear(keys[2], dec_dim, dec_dim),
        "proj3": linear(keys[3], dec_dim, dec_dim),
    }
    convs = []
    for i in range(num_conv_layers):
        cin = dec_dim
        cout = dec_dim if i < num_conv_layers - 1 else 4
        K = 5 if i < num_conv_layers - 1 else 3
        p = 2 if i < num_conv_layers - 1 else 1          # torch padding arg
        k1, k2 = jax.random.split(keys[4 + i])
        bound = 1.0 / np.sqrt(cin * K * K)
        w = jax.random.uniform(k1, (cin, cout, K, K), jnp.float32, -bound, bound)
        b = jax.random.uniform(k2, (cout,), jnp.float32, -bound, bound)
        convs.append((w, b, K, p))
    params["convs"] = convs
    return params


# ---------------------------- pure-JAX reference ----------------------------

def reference_forward(params, x, resolution):
    H, W = resolution
    hid = x.shape[-1]
    xf = x.reshape(-1, hid)
    grid = jnp.asarray(build_grid(resolution).reshape(H * W, 4))
    we, be = params["emb"]
    h = xf[:, None, :] + (grid @ we.T + be)[None]
    w1, b1 = params["proj1"]
    w2, b2 = params["proj2"]
    w3, b3 = params["proj3"]
    h = jnp.maximum(h @ w1.T + b1, 0.0)
    h = jnp.maximum(h @ w2.T + b2, 0.0)
    h = h @ w3.T + b3
    h = h.reshape(xf.shape[0], H, W, -1)
    nconv = len(params["convs"])
    for i, (w_ct, b, K, p) in enumerate(params["convs"]):
        wk = jnp.transpose(w_ct[:, :, ::-1, ::-1], (2, 3, 0, 1))  # HWIO
        pad = K - 1 - p
        h = jax.lax.conv_general_dilated(
            h, wk, window_strides=(1, 1),
            padding=[(pad, pad), (pad, pad)],
            dimension_numbers=("NHWC", "HWIO", "NHWC")) + b
        if i < nconv - 1:
            h = jnp.maximum(h, 0.0)
    return h


if __name__ == "__main__":
    hid_dim, dec_dim = 32, 32
    resolution = (8, 8)
    num_conv_layers = 5

    key = jax.random.PRNGKey(0)
    pkey, xkey = jax.random.split(key)
    params = init_params(pkey, hid_dim, dec_dim, num_conv_layers)
    # x: (batch, num_slots, hid_dim); forward flattens leading dims -> N = 8
    x = jax.random.normal(xkey, (2, 4, hid_dim), dtype=jnp.float32)

    tensors, statics = prepare_decoder(params, resolution)   # hoisted, once
    out = coco_fixed_decoder_forward(tensors, statics, x, resolution)
    out = jax.block_until_ready(out)
    assert out.shape == (2 * 4, resolution[0], resolution[1], 4), out.shape

    ref = jax.block_until_ready(reference_forward(params, x, resolution))
    err = float(jnp.max(jnp.abs(out - ref)))
    # bf16 matmul operands (f32 accumulation) -> 2e-3 envelope vs the f32 ref.
    assert jnp.allclose(out, ref, atol=2e-3, rtol=2e-3), f"max abs err {err}"

    print("KERNEL_OK")
</pallas_src>

<mosaic_0001>
module attributes {stable_mosaic.version = 11 : i64} {
  func.func @decoder_kernel(%arg0: i32, %arg1: i32, %arg2: memref<1x8x32xf32, #tpu.memory_space<vmem>>, %arg3: memref<64x32xf32, #tpu.memory_space<vmem>>, %arg4: memref<32x32xf32, #tpu.memory_space<vmem>>, %arg5: memref<1x32xf32, #tpu.memory_space<vmem>>, %arg6: memref<32x32xf32, #tpu.memory_space<vmem>>, %arg7: memref<1x32xf32, #tpu.memory_space<vmem>>, %arg8: memref<32x32xf32, #tpu.memory_space<vmem>>, %arg9: memref<1x32xf32, #tpu.memory_space<vmem>>, %arg10: memref<1x5x384x256xbf16, #tpu.memory_space<vmem>>, %arg11: memref<1x1x256xf32, #tpu.memory_space<vmem>>, %arg12: memref<3x384x128xbf16, #tpu.memory_space<vmem>>, %arg13: memref<1x128xf32, #tpu.memory_space<vmem>>, %arg14: memref<1x64x128xf32, #tpu.memory_space<vmem>>, %arg15: memref<12x8x384xf32, #tpu.memory_space<vmem>>) attributes {dimension_semantics = [#tpu.dimension_semantics<parallel>, #tpu.dimension_semantics<arbitrary>], iteration_bounds = array<i64: 1, 5>, scalar_prefetch = 0 : i64, scratch_operands = 1 : i64, tpu.core_type = #tpu.core_type<tc>, window_params = [{transform_indices = @transform_0, window_bounds = array<i64: 1, 8, 32>}, {pipeline_mode = #tpu.pipeline_mode<synchronous>, transform_indices = @transform_1, window_bounds = array<i64: 64, 32>}, {pipeline_mode = #tpu.pipeline_mode<synchronous>, transform_indices = @transform_2, window_bounds = array<i64: 32, 32>}, {pipeline_mode = #tpu.pipeline_mode<synchronous>, transform_indices = @transform_3, window_bounds = array<i64: 1, 32>}, {pipeline_mode = #tpu.pipeline_mode<synchronous>, transform_indices = @transform_4, window_bounds = array<i64: 32, 32>}, {pipeline_mode = #tpu.pipeline_mode<synchronous>, transform_indices = @transform_5, window_bounds = array<i64: 1, 32>}, {pipeline_mode = #tpu.pipeline_mode<synchronous>, transform_indices = @transform_6, window_bounds = array<i64: 32, 32>}, {pipeline_mode = #tpu.pipeline_mode<synchronous>, transform_indices = @transform_7, window_bounds = array<i64: 1, 32>}, {transform_indices = @transform_8, window_bounds = array<i64: 1, 5, 384, 256>}, {transform_indices = @transform_9, window_bounds = array<i64: 1, 1, 256>}, {pipeline_mode = #tpu.pipeline_mode<synchronous>, transform_indices = @transform_10, window_bounds = array<i64: 3, 384, 128>}, {pipeline_mode = #tpu.pipeline_mode<synchronous>, transform_indices = @transform_11, window_bounds = array<i64: 1, 128>}, {transform_indices = @transform_12, window_bounds = array<i64: 1, 64, 128>}]} {
    %c0_i32 = arith.constant 0 : i32
    %0 = arith.cmpi eq, %arg1, %c0_i32 : i32
    %1 = arith.extui %0 : i1 to i32
    %c0_i32_0 = arith.constant 0 : i32
    %2 = arith.cmpi ne, %1, %c0_i32_0 : i32
    scf.if %2 {
      %cst = arith.constant 0.000000e+00 : f32
      %9 = vector.broadcast %cst : f32 to vector<2x8x384xf32>
      %c0 = arith.constant 0 : index
      %c0_4 = arith.constant 0 : index
      %c0_5 = arith.constant 0 : index
      %10 = vector.load %arg15[%c0, %c0_4, %c0_5] : memref<12x8x384xf32, #tpu.memory_space<vmem>>, vector<2x8x384xf32>
      tpu.vector_store %arg15[%c0, %c0_4, %c0_5], %9 {strides = array<i32>} : memref<12x8x384xf32, #tpu.memory_space<vmem>>, vector<2x8x384xf32>,
      %cst_6 = arith.constant 0.000000e+00 : f32
      %11 = vector.broadcast %cst_6 : f32 to vector<2x8x384xf32>
      %c10 = arith.constant 10 : index
      %c0_7 = arith.constant 0 : index
      %c0_8 = arith.constant 0 : index
      %12 = vector.load %arg15[%c10, %c0_7, %c0_8] : memref<12x8x384xf32, #tpu.memory_space<vmem>>, vector<2x8x384xf32>
      tpu.vector_store %arg15[%c10, %c0_7, %c0_8], %11 {strides = array<i32>} : memref<12x8x384xf32, #tpu.memory_space<vmem>>, vector<2x8x384xf32>,
      %cst_9 = arith.constant 0.000000e+00 : f32
      %13 = vector.broadcast %cst_9 : f32 to vector<8x8x64xf32>
      %c2 = arith.constant 2 : index
      %c0_10 = arith.constant 0 : index
      %c0_11 = arith.constant 0 : index
      %14 = vector.load %arg15[%c2, %c0_10, %c0_11] : memref<12x8x384xf32, #tpu.memory_space<vmem>>, vector<8x8x64xf32>
      tpu.vector_store %arg15[%c2, %c0_10, %c0_11], %13 {strides = array<i32>} : memref<12x8x384xf32, #tpu.memory_space<vmem>>, vector<8x8x64xf32>,
      %cst_12 = arith.constant 0.000000e+00 : f32
      %15 = vector.broadcast %cst_12 : f32 to vector<8x8x64xf32>
      %c2_13 = arith.constant 2 : index
      %c0_14 = arith.constant 0 : index
      %c320 = arith.constant 320 : index
      %16 = vector.load %arg15[%c2_13, %c0_14, %c320] : memref<12x8x384xf32, #tpu.memory_space<vmem>>, vector<8x8x64xf32>
      tpu.vector_store %arg15[%c2_13, %c0_14, %c320], %15 {strides = array<i32>} : memref<12x8x384xf32, #tpu.memory_space<vmem>>, vector<8x8x64xf32>,
      %c0_15 = arith.constant 0 : index
      %c0_16 = arith.constant 0 : index
      %17 = vector.load %arg3[%c0_15, %c0_16] : memref<64x32xf32, #tpu.memory_space<vmem>>, vector<64x32xf32>
      %18 = vector.shape_cast %17 : vector<64x32xf32> to vector<8x8x32xf32>
      %c0_17 = arith.constant 0 : index
      %c0_18 = arith.constant 0 : index
      %c0_19 = arith.constant 0 : index
      %19 = vector.load %arg2[%c0_17, %c0_18, %c0_19] : memref<1x8x32xf32, #tpu.memory_space<vmem>>, vector<1x8x32xf32>
      %20 = vector.shape_cast %19 : vector<1x8x32xf32> to vector<8x32xf32>
      %21 = vector.shape_cast %18 : vector<8x8x32xf32> to vector<8x1x8x32xf32>
      %22 = vector.shape_cast %20 : vector<8x32xf32> to vector<1x8x1x32xf32>
      %23 = vector.broadcast %21 : vector<8x1x8x32xf32> to vector<8x8x8x32xf32>
      %24 = vector.broadcast %22 : vector<1x8x1x32xf32> to vector<8x8x8x32xf32>
      %25 = arith.addf %23, %24 : vector<8x8x8x32xf32>
      %26 = vector.shape_cast %25 : vector<8x8x8x32xf32> to vector<512x32xf32>
      %c0_20 = arith.constant 0 : index
      %c0_21 = arith.constant 0 : index
      %27 = vector.load %arg4[%c0_20, %c0_21] : memref<32x32xf32, #tpu.memory_space<vmem>>, vector<32x32xf32>
      %cst_22 = arith.constant dense<0.000000e+00> : vector<512x32xf32>
      %28 = tpu.matmul %26, %27, %cst_22 {dimension_numbers = #tpu.dot_dimension_numbers<[1], [0], [0], [1], [0, 0, 1, 1], [], []>} : vector<512x32xf32>, vector<32x32xf32>, vector<512x32xf32> -> vector<512x32xf32>
      %c0_23 = arith.constant 0 : index
      %c0_24 = arith.constant 0 : index
      %29 = vector.load %arg5[%c0_23, %c0_24] : memref<1x32xf32, #tpu.memory_space<vmem>>, vector<1x32xf32>
      %30 = vector.broadcast %29 : vector<1x32xf32> to vector<512x32xf32>
      %31 = arith.addf %28, %30 : vector<512x32xf32>
      %cst_25 = arith.constant 0.000000e+00 : f32
      %32 = vector.broadcast %cst_25 : f32 to vector<512x32xf32>
      %33 = arith.maximumf %31, %32 : vector<512x32xf32>
      %c0_26 = arith.constant 0 : index
      %c0_27 = arith.constant 0 : index
      %34 = vector.load %arg6[%c0_26, %c0_27] : memref<32x32xf32, #tpu.memory_space<vmem>>, vector<32x32xf32>
      %cst_28 = arith.constant dense<0.000000e+00> : vector<512x32xf32>
      %35 = tpu.matmul %33, %34, %cst_28 {dimension_numbers = #tpu.dot_dimension_numbers<[1], [0], [0], [1], [0, 0, 1, 1], [], []>} : vector<512x32xf32>, vector<32x32xf32>, vector<512x32xf32> -> vector<512x32xf32>
      %c0_29 = arith.constant 0 : index
      %c0_30 = arith.constant 0 : index
      %36 = vector.load %arg7[%c0_29, %c0_30] : memref<1x32xf32, #tpu.memory_space<vmem>>, vector<1x32xf32>
      %37 = vector.broadcast %36 : vector<1x32xf32> to vector<512x32xf32>
      %38 = arith.addf %35, %37 : vector<512x32xf32>
      %cst_31 = arith.constant 0.000000e+00 : f32
      %39 = vector.broadcast %cst_31 : f32 to vector<512x32xf32>
      %40 = arith.maximumf %38, %39 : vector<512x32xf32>
      %c0_32 = arith.constant 0 : index
      %c0_33 = arith.constant 0 : index
      %41 = vector.load %arg8[%c0_32, %c0_33] : memref<32x32xf32, #tpu.memory_space<vmem>>, vector<32x32xf32>
      %cst_34 = arith.constant dense<0.000000e+00> : vector<512x32xf32>
      %42 = tpu.matmul %40, %41, %cst_34 {dimension_numbers = #tpu.dot_dimension_numbers<[1], [0], [0], [1], [0, 0, 1, 1], [], []>} : vector<512x32xf32>, vector<32x32xf32>, vector<512x32xf32> -> vector<512x32xf32>
      %c0_35 = arith.constant 0 : index
      %c0_36 = arith.constant 0 : index
      %43 = vector.load %arg9[%c0_35, %c0_36] : memref<1x32xf32, #tpu.memory_space<vmem>>, vector<1x32xf32>
      %44 = vector.broadcast %43 : vector<1x32xf32> to vector<512x32xf32>
      %45 = arith.addf %42, %44 : vector<512x32xf32>
      %46 = vector.shape_cast %45 : vector<512x32xf32> to vector<8x8x8x32xf32>
      %47 = vector.extract_strided_slice %46 {offsets = [0, 0, 0, 0], sizes = [8, 8, 1, 32], strides = [1, 1, 1, 1]} : vector<8x8x8x32xf32> to vector<8x8x1x32xf32>
      %48 = vector.shape_cast %47 : vector<8x8x1x32xf32> to vector<8x8x32xf32>
      %c2_37 = arith.constant 2 : index
      %c0_38 = arith.constant 0 : index
      %c64 = arith.constant 64 : index
      %49 = vector.load %arg15[%c2_37, %c0_38, %c64] : memref<12x8x384xf32, #tpu.memory_space<vmem>>, vector<8x8x32xf32>
      tpu.vector_store %arg15[%c2_37, %c0_38, %c64], %48 {strides = array<i32>} : memref<12x8x384xf32, #tpu.memory_space<vmem>>, vector<8x8x32xf32>,
      %50 = vector.extract_strided_slice %46 {offsets = [0, 0, 1, 0], sizes = [8, 8, 1, 32], strides = [1, 1, 1, 1]} : vector<8x8x8x32xf32> to vector<8x8x1x32xf32>
      %51 = vector.shape_cast %50 : vector<8x8x1x32xf32> to vector<8x8x32xf32>
      %c2_39 = arith.constant 2 : index
      %c0_40 = arith.constant 0 : index
      %c96 = arith.constant 96 : index
      %52 = vector.load %arg15[%c2_39, %c0_40, %c96] : memref<12x8x384xf32, #tpu.memory_space<vmem>>, vector<8x8x32xf32>
      tpu.vector_store %arg15[%c2_39, %c0_40, %c96], %51 {strides = array<i32>} : memref<12x8x384xf32, #tpu.memory_space<vmem>>, vector<8x8x32xf32>,
      %53 = vector.extract_strided_slice %46 {offsets = [0, 0, 2, 0], sizes = [8, 8, 1, 32], strides = [1, 1, 1, 1]} : vector<8x8x8x32xf32> to vector<8x8x1x32xf32>
      %54 = vector.shape_cast %53 : vector<8x8x1x32xf32> to vector<8x8x32xf32>
      %c2_41 = arith.constant 2 : index
      %c0_42 = arith.constant 0 : index
      %c128 = arith.constant 128 : index
      %55 = vector.load %arg15[%c2_41, %c0_42, %c128] : memref<12x8x384xf32, #tpu.memory_space<vmem>>, vector<8x8x32xf32>
      tpu.vector_store %arg15[%c2_41, %c0_42, %c128], %54 {strides = array<i32>} : memref<12x8x384xf32, #tpu.memory_space<vmem>>, vector<8x8x32xf32>,
      %56 = vector.extract_strided_slice %46 {offsets = [0, 0, 3, 0], sizes = [8, 8, 1, 32], strides = [1, 1, 1, 1]} : vector<8x8x8x32xf32> to vector<8x8x1x32xf32>
      %57 = vector.shape_cast %56 : vector<8x8x1x32xf32> to vector<8x8x32xf32>
      %c2_43 = arith.constant 2 : index
      %c0_44 = arith.constant 0 : index
      %c160 = arith.constant 160 : index
      %58 = vector.load %arg15[%c2_43, %c0_44, %c160] : memref<12x8x384xf32, #tpu.memory_space<vmem>>, vector<8x8x32xf32>
      tpu.vector_store %arg15[%c2_43, %c0_44, %c160], %57 {strides = array<i32>} : memref<12x8x384xf32, #tpu.memory_space<vmem>>, vector<8x8x32xf32>,
      %59 = vector.extract_strided_slice %46 {offsets = [0, 0, 4, 0], sizes = [8, 8, 1, 32], strides = [1, 1, 1, 1]} : vector<8x8x8x32xf32> to vector<8x8x1x32xf32>
      %60 = vector.shape_cast %59 : vector<8x8x1x32xf32> to vector<8x8x32xf32>
      %c2_45 = arith.constant 2 : index
      %c0_46 = arith.constant 0 : index
      %c192 = arith.constant 192 : index
      %61 = vector.load %arg15[%c2_45, %c0_46, %c192] : memref<12x8x384xf32, #tpu.memory_space<vmem>>, vector<8x8x32xf32>
      tpu.vector_store %arg15[%c2_45, %c0_46, %c192], %60 {strides = array<i32>} : memref<12x8x384xf32, #tpu.memory_space<vmem>>, vector<8x8x32xf32>,
      %62 = vector.extract_strided_slice %46 {offsets = [0, 0, 5, 0], sizes = [8, 8, 1, 32], strides = [1, 1, 1, 1]} : vector<8x8x8x32xf32> to vector<8x8x1x32xf32>
      %63 = vector.shape_cast %62 : vector<8x8x1x32xf32> to vector<8x8x32xf32>
      %c2_47 = arith.constant 2 : index
      %c0_48 = arith.constant 0 : index
      %c224 = arith.constant 224 : index
      %64 = vector.load %arg15[%c2_47, %c0_48, %c224] : memref<12x8x384xf32, #tpu.memory_space<vmem>>, vector<8x8x32xf32>
      tpu.vector_store %arg15[%c2_47, %c0_48, %c224], %63 {strides = array<i32>} : memref<12x8x384xf32, #tpu.memory_space<vmem>>, vector<8x8x32xf32>,
      %65 = vector.extract_strided_slice %46 {offsets = [0, 0, 6, 0], sizes = [8, 8, 1, 32], strides = [1, 1, 1, 1]} : vector<8x8x8x32xf32> to vector<8x8x1x32xf32>
      %66 = vector.shape_cast %65 : vector<8x8x1x32xf32> to vector<8x8x32xf32>
      %c2_49 = arith.constant 2 : index
      %c0_50 = arith.constant 0 : index
      %c256 = arith.constant 256 : index
      %67 = vector.load %arg15[%c2_49, %c0_50, %c256] : memref<12x8x384xf32, #tpu.memory_space<vmem>>, vector<8x8x32xf32>
      tpu.vector_store %arg15[%c2_49, %c0_50, %c256], %66 {strides = array<i32>} : memref<12x8x384xf32, #tpu.memory_space<vmem>>, vector<8x8x32xf32>,
      %68 = vector.extract_strided_slice %46 {offsets = [0, 0, 7, 0], sizes = [8, 8, 1, 32], strides = [1, 1, 1, 1]} : vector<8x8x8x32xf32> to vector<8x8x1x32xf32>
      %69 = vector.shape_cast %68 : vector<8x8x1x32xf32> to vector<8x8x32xf32>
      %c2_51 = arith.constant 2 : index
      %c0_52 = arith.constant 0 : index
      %c288 = arith.constant 288 : index
      %70 = vector.load %arg15[%c2_51, %c0_52, %c288] : memref<12x8x384xf32, #tpu.memory_space<vmem>>, vector<8x8x32xf32>
      tpu.vector_store %arg15[%c2_51, %c0_52, %c288], %69 {strides = array<i32>} : memref<12x8x384xf32, #tpu.memory_space<vmem>>, vector<8x8x32xf32>,
    } else {
    }
    %c4_i32 = arith.constant 4 : i32
    %3 = arith.cmpi slt, %arg1, %c4_i32 : i32
    %4 = arith.extui %3 : i1 to i32
    %c0_i32_1 = arith.constant 0 : i32
    %5 = arith.cmpi ne, %4, %c0_i32_1 : i32
    scf.if %5 {
      %cst = arith.constant 0.000000e+00 : f32
      %9 = vector.broadcast %cst : f32 to vector<64x256xf32>
      %c0 = arith.constant 0 : index
      %c0_4 = arith.constant 0 : index
      %c0_5 = arith.constant 0 : index
      %10 = vector.load %arg15[%c0, %c0_4, %c0_5] : memref<12x8x384xf32, #tpu.memory_space<vmem>>, vector<8x8x384xf32>
      %11 = vector.shape_cast %10 : vector<8x8x384xf32> to vector<64x384xf32>
      %12 = arith.truncf %11 : vector<64x384xf32> to vector<64x384xbf16>
      %c0_6 = arith.constant 0 : index
      %c0_7 = arith.constant 0 : index
      %c0_8 = arith.constant 0 : index
      %c0_9 = arith.constant 0 : index
      %13 = vector.load %arg10[%c0_6, %c0_7, %c0_8, %c0_9] : memref<1x5x384x256xbf16, #tpu.memory_space<vmem>>, vector<1x1x384x256xbf16>
      %14 = vector.shape_cast %13 : vector<1x1x384x256xbf16> to vector<384x256xbf16>
      %cst_10 = arith.constant dense<0.000000e+00> : vector<64x256xf32>
      %15 = tpu.matmul %12, %14, %cst_10 {dimension_numbers = #tpu.dot_dimension_numbers<[1], [0], [0], [1], [0, 0, 1, 1], [], []>} : vector<64x384xbf16>, vector<384x256xbf16>, vector<64x256xf32> -> vector<64x256xf32>
      %16 = arith.addf %9, %15 : vector<64x256xf32>
      %c1 = arith.constant 1 : index
      %c0_11 = arith.constant 0 : index
      %c0_12 = arith.constant 0 : index
      %17 = vector.load %arg15[%c1, %c0_11, %c0_12] : memref<12x8x384xf32, #tpu.memory_space<vmem>>, vector<8x8x384xf32>
      %18 = vector.shape_cast %17 : vector<8x8x384xf32> to vector<64x384xf32>
      %19 = arith.truncf %18 : vector<64x384xf32> to vector<64x384xbf16>
      %c0_13 = arith.constant 0 : index
      %c1_14 = arith.constant 1 : index
      %c0_15 = arith.constant 0 : index
      %c0_16 = arith.constant 0 : index
      %20 = vector.load %arg10[%c0_13, %c1_14, %c0_15, %c0_16] : memref<1x5x384x256xbf16, #tpu.memory_space<vmem>>, vector<1x1x384x256xbf16>
      %21 = vector.shape_cast %20 : vector<1x1x384x256xbf16> to vector<384x256xbf16>
      %cst_17 = arith.constant dense<0.000000e+00> : vector<64x256xf32>
      %22 = tpu.matmul %19, %21, %cst_17 {dimension_numbers = #tpu.dot_dimension_numbers<[1], [0], [0], [1], [0, 0, 1, 1], [], []>} : vector<64x384xbf16>, vector<384x256xbf16>, vector<64x256xf32> -> vector<64x256xf32>
      %23 = arith.addf %16, %22 : vector<64x256xf32>
      %c2 = arith.constant 2 : index
      %c0_18 = arith.constant 0 : index
      %c0_19 = arith.constant 0 : index
      %24 = vector.load %arg15[%c2, %c0_18, %c0_19] : memref<12x8x384xf32, #tpu.memory_space<vmem>>, vector<8x8x384xf32>
      %25 = vector.shape_cast %24 : vector<8x8x384xf32> to vector<64x384xf32>
      %26 = arith.truncf %25 : vector<64x384xf32> to vector<64x384xbf16>
      %c0_20 = arith.constant 0 : index
      %c2_21 = arith.constant 2 : index
      %c0_22 = arith.constant 0 : index
      %c0_23 = arith.constant 0 : index
      %27 = vector.load %arg10[%c0_20, %c2_21, %c0_22, %c0_23] : memref<1x5x384x256xbf16, #tpu.memory_space<vmem>>, vector<1x1x384x256xbf16>
      %28 = vector.shape_cast %27 : vector<1x1x384x256xbf16> to vector<384x256xbf16>
      %cst_24 = arith.constant dense<0.000000e+00> : vector<64x256xf32>
      %29 = tpu.matmul %26, %28, %cst_24 {dimension_numbers = #tpu.dot_dimension_numbers<[1], [0], [0], [1], [0, 0, 1, 1], [], []>} : vector<64x384xbf16>, vector<384x256xbf16>, vector<64x256xf32> -> vector<64x256xf32>
      %30 = arith.addf %23, %29 : vector<64x256xf32>
      %c3 = arith.constant 3 : index
      %c0_25 = arith.constant 0 : index
      %c0_26 = arith.constant 0 : index
      %31 = vector.load %arg15[%c3, %c0_25, %c0_26] : memref<12x8x384xf32, #tpu.memory_space<vmem>>, vector<8x8x384xf32>
      %32 = vector.shape_cast %31 : vector<8x8x384xf32> to vector<64x384xf32>
      %33 = arith.truncf %32 : vector<64x384xf32> to vector<64x384xbf16>
      %c0_27 = arith.constant 0 : index
      %c3_28 = arith.constant 3 : index
      %c0_29 = arith.constant 0 : index
      %c0_30 = arith.constant 0 : index
      %34 = vector.load %arg10[%c0_27, %c3_28, %c0_29, %c0_30] : memref<1x5x384x256xbf16, #tpu.memory_space<vmem>>, vector<1x1x384x256xbf16>
      %35 = vector.shape_cast %34 : vector<1x1x384x256xbf16> to vector<384x256xbf16>
      %cst_31 = arith.constant dense<0.000000e+00> : vector<64x256xf32>
      %36 = tpu.matmul %33, %35, %cst_31 {dimension_numbers = #tpu.dot_dimension_numbers<[1], [0], [0], [1], [0, 0, 1, 1], [], []>} : vector<64x384xbf16>, vector<384x256xbf16>, vector<64x256xf32> -> vector<64x256xf32>
      %37 = arith.addf %30, %36 : vector<64x256xf32>
      %c4 = arith.constant 4 : index
      %c0_32 = arith.constant 0 : index
      %c0_33 = arith.constant 0 : index
      %38 = vector.load %arg15[%c4, %c0_32, %c0_33] : memref<12x8x384xf32, #tpu.memory_space<vmem>>, vector<8x8x384xf32>
      %39 = vector.shape_cast %38 : vector<8x8x384xf32> to vector<64x384xf32>
      %40 = arith.truncf %39 : vector<64x384xf32> to vector<64x384xbf16>
      %c0_34 = arith.constant 0 : index
      %c4_35 = arith.constant 4 : index
      %c0_36 = arith.constant 0 : index
      %c0_37 = arith.constant 0 : index
      %41 = vector.load %arg10[%c0_34, %c4_35, %c0_36, %c0_37] : memref<1x5x384x256xbf16, #tpu.memory_space<vmem>>, vector<1x1x384x256xbf16>
      %42 = vector.shape_cast %41 : vector<1x1x384x256xbf16> to vector<384x256xbf16>
      %cst_38 = arith.constant dense<0.000000e+00> : vector<64x256xf32>
      %43 = tpu.matmul %40, %42, %cst_38 {dimension_numbers = #tpu.dot_dimension_numbers<[1], [0], [0], [1], [0, 0, 1, 1], [], []>} : vector<64x384xbf16>, vector<384x256xbf16>, vector<64x256xf32> -> vector<64x256xf32>
      %44 = arith.addf %37, %43 : vector<64x256xf32>
      %c0_39 = arith.constant 0 : index
      %c0_40 = arith.constant 0 : index
      %c0_41 = arith.constant 0 : index
      %45 = vector.load %arg11[%c0_39, %c0_40, %c0_41] : memref<1x1x256xf32, #tpu.memory_space<vmem>>, vector<1x1x256xf32>
      %46 = vector.shape_cast %45 : vector<1x1x256xf32> to vector<1x256xf32>
      %47 = vector.broadcast %46 : vector<1x256xf32> to vector<64x256xf32>
      %48 = arith.addf %44, %47 : vector<64x256xf32>
      %cst_42 = arith.constant 0.000000e+00 : f32
      %49 = vector.broadcast %cst_42 : f32 to vector<64x256xf32>
      %50 = arith.maximumf %48, %49 : vector<64x256xf32>
      %51 = vector.shape_cast %50 : vector<64x256xf32> to vector<8x8x256xf32>
      %c2_43 = arith.constant 2 : index
      %c0_44 = arith.constant 0 : index
      %c64 = arith.constant 64 : index
      %52 = vector.load %arg15[%c2_43, %c0_44, %c64] : memref<12x8x384xf32, #tpu.memory_space<vmem>>, vector<8x8x256xf32>
      tpu.vector_store %arg15[%c2_43, %c0_44, %c64], %51 {strides = array<i32>} : memref<12x8x384xf32, #tpu.memory_space<vmem>>, vector<8x8x256xf32>,
    } else {
    }
    %c4_i32_2 = arith.constant 4 : i32
    %6 = arith.cmpi eq, %arg1, %c4_i32_2 : i32
    %7 = arith.extui %6 : i1 to i32
    %c0_i32_3 = arith.constant 0 : i32
    %8 = arith.cmpi ne, %7, %c0_i32_3 : i32
    scf.if %8 {
      %cst = arith.constant 0.000000e+00 : f32
      %9 = vector.broadcast %cst : f32 to vector<64x128xf32>
      %c1 = arith.constant 1 : index
      %c0 = arith.constant 0 : index
      %c0_4 = arith.constant 0 : index
      %10 = vector.load %arg15[%c1, %c0, %c0_4] : memref<12x8x384xf32, #tpu.memory_space<vmem>>, vector<8x8x384xf32>
      %11 = vector.shape_cast %10 : vector<8x8x384xf32> to vector<64x384xf32>
      %12 = arith.truncf %11 : vector<64x384xf32> to vector<64x384xbf16>
      %c0_5 = arith.constant 0 : index
      %c0_6 = arith.constant 0 : index
      %c0_7 = arith.constant 0 : index
      %13 = vector.load %arg12[%c0_5, %c0_6, %c0_7] : memref<3x384x128xbf16, #tpu.memory_space<vmem>>, vector<1x384x128xbf16>
      %14 = vector.shape_cast %13 : vector<1x384x128xbf16> to vector<384x128xbf16>
      %cst_8 = arith.constant dense<0.000000e+00> : vector<64x128xf32>
      %15 = tpu.matmul %12, %14, %cst_8 {dimension_numbers = #tpu.dot_dimension_numbers<[1], [0], [0], [1], [0, 0, 1, 1], [], []>} : vector<64x384xbf16>, vector<384x128xbf16>, vector<64x128xf32> -> vector<64x128xf32>
      %16 = arith.addf %9, %15 : vector<64x128xf32>
      %c2 = arith.constant 2 : index
      %c0_9 = arith.constant 0 : index
      %c0_10 = arith.constant 0 : index
      %17 = vector.load %arg15[%c2, %c0_9, %c0_10] : memref<12x8x384xf32, #tpu.memory_space<vmem>>, vector<8x8x384xf32>
      %18 = vector.shape_cast %17 : vector<8x8x384xf32> to vector<64x384xf32>
      %19 = arith.truncf %18 : vector<64x384xf32> to vector<64x384xbf16>
      %c1_11 = arith.constant 1 : index
      %c0_12 = arith.constant 0 : index
      %c0_13 = arith.constant 0 : index
      %20 = vector.load %arg12[%c1_11, %c0_12, %c0_13] : memref<3x384x128xbf16, #tpu.memory_space<vmem>>, vector<1x384x128xbf16>
      %21 = vector.shape_cast %20 : vector<1x384x128xbf16> to vector<384x128xbf16>
      %cst_14 = arith.constant dense<0.000000e+00> : vector<64x128xf32>
      %22 = tpu.matmul %19, %21, %cst_14 {dimension_numbers = #tpu.dot_dimension_numbers<[1], [0], [0], [1], [0, 0, 1, 1], [], []>} : vector<64x384xbf16>, vector<384x128xbf16>, vector<64x128xf32> -> vector<64x128xf32>
      %23 = arith.addf %16, %22 : vector<64x128xf32>
      %c3 = arith.constant 3 : index
      %c0_15 = arith.constant 0 : index
      %c0_16 = arith.constant 0 : index
      %24 = vector.load %arg15[%c3, %c0_15, %c0_16] : memref<12x8x384xf32, #tpu.memory_space<vmem>>, vector<8x8x384xf32>
      %25 = vector.shape_cast %24 : vector<8x8x384xf32> to vector<64x384xf32>
      %26 = arith.truncf %25 : vector<64x384xf32> to vector<64x384xbf16>
      %c2_17 = arith.constant 2 : index
      %c0_18 = arith.constant 0 : index
      %c0_19 = arith.constant 0 : index
      %27 = vector.load %arg12[%c2_17, %c0_18, %c0_19] : memref<3x384x128xbf16, #tpu.memory_space<vmem>>, vector<1x384x128xbf16>
      %28 = vector.shape_cast %27 : vector<1x384x128xbf16> to vector<384x128xbf16>
      %cst_20 = arith.constant dense<0.000000e+00> : vector<64x128xf32>
      %29 = tpu.matmul %26, %28, %cst_20 {dimension_numbers = #tpu.dot_dimension_numbers<[1], [0], [0], [1], [0, 0, 1, 1], [], []>} : vector<64x384xbf16>, vector<384x128xbf16>, vector<64x128xf32> -> vector<64x128xf32>
      %30 = arith.addf %23, %29 : vector<64x128xf32>
      %c0_21 = arith.constant 0 : index
      %c0_22 = arith.constant 0 : index
      %31 = vector.load %arg13[%c0_21, %c0_22] : memref<1x128xf32, #tpu.memory_space<vmem>>, vector<1x128xf32>
      %32 = vector.broadcast %31 : vector<1x128xf32> to vector<64x128xf32>
      %33 = arith.addf %30, %32 : vector<64x128xf32>
      %c0_23 = arith.constant 0 : index
      %c0_24 = arith.constant 0 : index
      %c0_25 = arith.constant 0 : index
      %34 = vector.load %arg14[%c0_23, %c0_24, %c0_25] : memref<1x64x128xf32, #tpu.memory_space<vmem>>, vector<1x64x128xf32>
      %35 = vector.shape_cast %34 : vector<1x64x128xf32> to vector<64x128xf32>
      %36 = vector.shape_cast %33 : vector<64x128xf32> to vector<1x64x128xf32>
      tpu.vector_store %arg14[%c0_23, %c0_24, %c0_25], %36 {strides = array<i32>} : memref<1x64x128xf32, #tpu.memory_space<vmem>>, vector<1x64x128xf32>,
    } else {
    }
    return
  }
  func.func @transform_0(%arg0: i32, %arg1: i32) -> (i32, i32, i32) {
    %c0_i32 = arith.constant 0 : i32
    %c0_i32_0 = arith.constant 0 : i32
    %c0_i32_1 = arith.constant 0 : i32
    return %arg0, %c0_i32, %c0_i32_0 : i32, i32, i32
  }
  func.func @transform_1(%arg0: i32, %arg1: i32) -> (i32, i32) {
    %c0_i32 = arith.constant 0 : i32
    %c0_i32_0 = arith.constant 0 : i32
    %c0_i32_1 = arith.constant 0 : i32
    return %c0_i32, %c0_i32_0 : i32, i32
  }
  func.func @transform_2(%arg0: i32, %arg1: i32) -> (i32, i32) {
    %c0_i32 = arith.constant 0 : i32
    %c0_i32_0 = arith.constant 0 : i32
    %c0_i32_1 = arith.constant 0 : i32
    return %c0_i32, %c0_i32_0 : i32, i32
  }
  func.func @transform_3(%arg0: i32, %arg1: i32) -> (i32, i32) {
    %c0_i32 = arith.constant 0 : i32
    %c0_i32_0 = arith.constant 0 : i32
    %c0_i32_1 = arith.constant 0 : i32
    return %c0_i32, %c0_i32_0 : i32, i32
  }
  func.func @transform_4(%arg0: i32, %arg1: i32) -> (i32, i32) {
    %c0_i32 = arith.constant 0 : i32
    %c0_i32_0 = arith.constant 0 : i32
    %c0_i32_1 = arith.constant 0 : i32
    return %c0_i32, %c0_i32_0 : i32, i32
  }
  func.func @transform_5(%arg0: i32, %arg1: i32) -> (i32, i32) {
    %c0_i32 = arith.constant 0 : i32
    %c0_i32_0 = arith.constant 0 : i32
    %c0_i32_1 = arith.constant 0 : i32
    return %c0_i32, %c0_i32_0 : i32, i32
  }
  func.func @transform_6(%arg0: i32, %arg1: i32) -> (i32, i32) {
    %c0_i32 = arith.constant 0 : i32
    %c0_i32_0 = arith.constant 0 : i32
    %c0_i32_1 = arith.constant 0 : i32
    return %c0_i32, %c0_i32_0 : i32, i32
  }
  func.func @transform_7(%arg0: i32, %arg1: i32) -> (i32, i32) {
    %c0_i32 = arith.constant 0 : i32
    %c0_i32_0 = arith.constant 0 : i32
    %c0_i32_1 = arith.constant 0 : i32
    return %c0_i32, %c0_i32_0 : i32, i32
  }
  func.func @transform_8(%arg0: i32, %arg1: i32) -> (i32, i32, i32, i32) {
    %c3_i32 = arith.constant 3 : i32
    %0 = arith.minsi %arg1, %c3_i32 : i32
    %c0_i32 = arith.constant 0 : i32
    %c0_i32_0 = arith.constant 0 : i32
    %c0_i32_1 = arith.constant 0 : i32
    %c0_i32_2 = arith.constant 0 : i32
    return %0, %c0_i32, %c0_i32_0, %c0_i32_1 : i32, i32, i32, i32
  }
  func.func @transform_9(%arg0: i32, %arg1: i32) -> (i32, i32, i32) {
    %c3_i32 = arith.constant 3 : i32
    %0 = arith.minsi %arg1, %c3_i32 : i32
    %c0_i32 = arith.constant 0 : i32
    %c0_i32_0 = arith.constant 0 : i32
    %c0_i32_1 = arith.constant 0 : i32
    return %0, %c0_i32, %c0_i32_0 : i32, i32, i32
  }
  func.func @transform_10(%arg0: i32, %arg1: i32) -> (i32, i32, i32) {
    %c0_i32 = arith.constant 0 : i32
    %c0_i32_0 = arith.constant 0 : i32
    %c0_i32_1 = arith.constant 0 : i32
    %c0_i32_2 = arith.constant 0 : i32
    return %c0_i32, %c0_i32_0, %c0_i32_1 : i32, i32, i32
  }
  func.func @transform_11(%arg0: i32, %arg1: i32) -> (i32, i32) {
    %c0_i32 = arith.constant 0 : i32
    %c0_i32_0 = arith.constant 0 : i32
    %c0_i32_1 = arith.constant 0 : i32
    return %c0_i32, %c0_i32_0 : i32, i32
  }
  func.func @transform_12(%arg0: i32, %arg1: i32) -> (i32, i32, i32) {
    %c0_i32 = arith.constant 0 : i32
    %c0_i32_0 = arith.constant 0 : i32
    %c0_i32_1 = arith.constant 0 : i32
    return %arg0, %c0_i32, %c0_i32_0 : i32, i32, i32
  }
}

</mosaic_0001>

<bundles_post_ra>
// kernel: tpu_custom_call.1
= control target key start
LH: loop header
LB: loop body
LE: loop exit
PB: predicated region body
PF: predicated region fallthrough
CT: control target
= control target key end

     0   :  { %s13509_s0 = inlined_call_operand.hbm [shape: f32[1,8,32], index: 0, kind: input, shape index: {}]   ;;  %s13510_s1 = inlined_call_operand.vmem [shape: f32[64,32], index: 1, kind: input, shape index: {}]   ;;  %s13511_s2 = inlined_call_operand.hbm [shape: f32[32,32], index: 2, kind: input, shape index: {}]   ;;  %s13512_s3 = inlined_call_operand.hbm [shape: f32[1,32], index: 3, kind: input, shape index: {}]   ;;  %s13513_s4 = inlined_call_operand.hbm [shape: f32[32,32], index: 4, kind: input, shape index: {}]   ;;  %s13514_s5 = inlined_call_operand.hbm [shape: f32[1,32], index: 5, kind: input, shape index: {}]   ;;  %s13515_s6 = inlined_call_operand.hbm [shape: f32[32,32], index: 6, kind: input, shape index: {}]   ;;  %s13516_s7 = inlined_call_operand.hbm [shape: f32[1,32], index: 7, kind: input, shape index: {}]   ;;  %s13517_s8 = inlined_call_operand.hbm [shape: bf16[4,5,384,256], index: 8, kind: input, shape index: {}]   ;;  %s13518_s9 = inlined_call_operand.hbm [shape: f32[4,1,256], index: 9, kind: input, shape index: {}]   ;;  %s13519_s10 = inlined_call_operand.hbm [shape: bf16[3,384,128], index: 10, kind: input, shape index: {}]   ;;  %s13520_s11 = inlined_call_operand.hbm [shape: f32[1,128], index: 11, kind: input, shape index: {}]   ;;  %s13521_s12 = inlined_call_operand.hbm [shape: f32[1,64,128], index: 12, kind: output, shape index: {}]  }
   0x1   :  { %13596 = sst [smem:[#allocation60_spill]] %s13509_s0 }
   0x2   :  { %13597 = sst [smem:[#allocation61_spill]] %s13510_s1 }
   0x3   :  { %13598 = sst [smem:[#allocation62_spill]] %s13511_s2 }
   0x4   :  { %13599 = sst [smem:[#allocation63_spill]] %s13513_s4 }
   0x5   :  { %13600 = sst [smem:[#allocation64_spill]] %s13515_s6 }
   0x6   :  { %13601 = sst [smem:[#allocation65_spill]] %s13517_s8 }
   0x7   :  { %13602 = sst [smem:[#allocation66_spill]] %s13518_s9 }
   0x8   :  { %13603 = sst [smem:[#allocation67_spill]] %s13520_s11 }
   0x9   :  { %13604 = sst [smem:[#allocation68_spill]] %s13521_s12 }
   0xa   :  { %17 = vsyncpa [#allocation4], 0 }
   0xb   :  { %18 = vsyncpa [#allocation7], 0 }
   0xc   :  { %19 = vsyncpa [#allocation10], 0 }
   0xd   :  { %20 = vsyncpa [#allocation13], 0 }
   0xe   :  { %21 = vsyncpa [#allocation16], 0 }
   0xf   :  { %23 = vsyncpa [#allocation16 + $0x1], 0 }
  0x10   :  { %24 = vsyncpa [#allocation19], 0 }
  0x11   :  { %25 = vsyncpa [#allocation5], 0  ;;  %s10580_s21 = smov 0   ;;  %s10582_s22 = smov 0  }
  0x12   :  { %s10584_s23 = smov 0   ;;  %s10586_s24 = smov 0  }
  0x13   :  { %s10588_s25 = smov 0   ;;  %s10590_s26 = smov 0  }
  0x14 LB: > { %13605 = sst [smem:[#allocation29_spill]] %s10480_s24  ;;  %s10490_s27 = smov [#allocation6]   ;;  %s10488_s26 = sphi %s10590_s26, %s31_s26   ;;  %s10484_s25 = sphi %s10588_s25, %s13709_s25   ;;  %s10480_s24 = sphi %s10586_s24, %s13708_s24   ;;  %s10476_s23 = sphi %s10584_s23, %s13707_s23   ;;  %s10472_s22 = sphi %s10582_s22, %s13706_s22   ;;  %s10468_s21 = sphi %s10580_s21, %s13705_s21  }
  0x15   : > { %s377_s28 = sshll.u32 %s10490_s27, 4  ;;  %s10611_s29 = sadd.s32 4294967295, %s10488_s26   ;;  %s10616_s28 = int_to_ptr.vmem [resolvable:$true] %s377_s28 }
  0x16   : > { %p7761_p0 = scmp.ge.s32.totalorder %s10488_s26, 1  ;;  %p13527_p1 = scmp.eq.s32.totalorder %s10611_s29, 0 }
  0x17   : > { %p349_p2 = scmp.lt.s32.totalorder %s10488_s26, 6  ;;  %s10491_s13 = smov [#allocation9]  }
  0x18   : > { %s401_s14 = sshll.u32 %s10491_s13, 4  ;;  %s10492_s16 = smov [#allocation12]   ;;  %s10630_s14 = int_to_ptr.vmem [resolvable:$true] %s401_s14 }
  0x19   : > { %p10618_p3 = pnand %p7761_p0, %p349_p2  ;;  %s425_s17 = sshll.u32 %s10492_s16, 4  ;;  %s10632_s17 = int_to_ptr.vmem [resolvable:$true] %s425_s17 }
  0x1a   : > { %s13609_s2 = sld [smem:[#allocation62_spill]] }
  0x1b   : > { %s13606_s30 = scalar_select %p10618_p3, 1, 0 }
  0x1c   : > { %p9514_p4 = pneg %p10618_p3 }
  0x1d   : > { %13607 = sst [smem:[#allocation30_spill]] %s13606_s30 }
  0x1e   : > { %p10626_p5 = pnand %p9514_p4, %p13527_p1 }
  0x20   : > { %s13608_s15 = scalar_select %p10626_p5, 1, 0 }
  0x21   : > { %s10076_s20 = scalar_lea.hbm %s13609_s2, 512  ;;  %p10642_p7 = pneg %p10626_p5 }
  0x22   : > { %p10077_p6 = scmp.ne.s32.totalorder %s13609_s2, %s10076_s20  ;;  %p10083_p10 = scmp.lt.u32.totalorder %s10076_s20, %s13609_s2 }
  0x24   : > { %p10079_p8 = pnand %p10642_p7, %p10077_p6 }
  0x26   : > { %p10080_p9 = pneg %p10079_p8 }
  0x28   : > { %p10085_p11 = pnand %p10083_p10, %p10080_p9 }
  0x2a   : > { %10088 = shalt.err (!%p10085_p11)
}
  0x2b   : > { %s10089_s12 = scalar_lea.vmem %s10616_s28, 512  ;;  %p10097_p2 = scmp.lt.s32.totalorder %s10616_s28, %s10616_s28 }
  0x2c   : > { %p10090_p12 = scmp.ne.s32.totalorder %s10616_s28, %s10089_s12  ;;  %p10098_p4 = scmp.lt.s32.totalorder %s10089_s12, %s10089_s12 }
  0x2e   : > { %p10092_p13 = pnand %p10090_p12, %p10642_p7  ;;  %p10099_p6 = por %p10098_p4, %p10097_p2 }
  0x30   : > { %p10093_p0 = pneg %p10092_p13 }
  0x32   : > { %p10100_p8 = pnand %p10099_p6, %p10093_p0 }
  0x34   : > { %10103 = shalt.err (!%p10100_p8)
}
  0x35   : > { %s13529_s18 = smov 128   ;;  %s13530_s1 = smov 8  }
  0x36   : > { %9520 = dma.hbm_to_vmem [thread:$0]  (!%p10626_p5), %s13609_s2, 512, %s10616_s28, [#allocation7], %s13529_s18, %s13529_s18, %s13530_s1  }
  0x37   : > { %s13611_s4 = sld [smem:[#allocation63_spill]] }
  0x3d   : > { %s10104_s12 = scalar_lea.hbm %s13611_s4, 512 }
  0x3e   : > { %p10105_p9 = scmp.ne.s32.totalorder %s13611_s4, %s10104_s12  ;;  %p10111_p12 = scmp.lt.u32.totalorder %s10104_s12, %s13611_s4 }
  0x40   : > { %p10107_p10 = pnand %p10105_p9, %p10642_p7 }
  0x42   : > { %p10108_p11 = pneg %p10107_p10 }
  0x44   : > { %p10113_p13 = pnand %p10111_p12, %p10108_p11 }
  0x46   : > { %10116 = shalt.err (!%p10113_p13)
}
  0x47   : > { %s10117_s28 = scalar_lea.vmem %s10630_s14, 512  ;;  %p10125_p6 = scmp.lt.s32.totalorder %s10630_s14, %s10630_s14 }
  0x48   : > { %p10118_p0 = scmp.ne.s32.totalorder %s10630_s14, %s10117_s28  ;;  %p10126_p8 = scmp.lt.s32.totalorder %s10117_s28, %s10117_s28 }
  0x4a   : > { %p10120_p2 = pnand %p10118_p0, %p10642_p7  ;;  %p10127_p9 = por %p10126_p8, %p10125_p6 }
  0x4c   : > { %p10121_p4 = pneg %p10120_p2 }
  0x4e   : > { %p10128_p10 = pnand %p10127_p9, %p10121_p4 }
  0x50   : > { %10131 = shalt.err (!%p10128_p10)
}
  0x51   : > { %9526 = dma.hbm_to_vmem [thread:$0]  (!%p10626_p5), %s13611_s4, 512, %s10630_s14, [#allocation10], %s13529_s18, %s13529_s18, %s13530_s1  }
  0x52   : > { %s13612_s6 = sld [smem:[#allocation64_spill]] }
  0x58   : > { %s10132_s19 = scalar_lea.hbm %s13612_s6, 512 }
  0x59   : > { %p10133_p11 = scmp.ne.s32.totalorder %s13612_s6, %s10132_s19  ;;  %p10139_p0 = scmp.lt.u32.totalorder %s10132_s19, %s13612_s6 }
  0x5b   : > { %p10135_p12 = pnand %p10133_p11, %p10642_p7 }
  0x5d   : > { %p10136_p13 = pneg %p10135_p12 }
  0x5f   : > { %p10141_p2 = pnand %p10139_p0, %p10136_p13 }
  0x61   : > { %10144 = shalt.err (!%p10141_p2)
}
  0x62   : > { %s10145_s14 = scalar_lea.vmem %s10632_s17, 512  ;;  %p10153_p9 = scmp.lt.s32.totalorder %s10632_s17, %s10632_s17 }
  0x63   : > { %p10146_p4 = scmp.ne.s32.totalorder %s10632_s17, %s10145_s14  ;;  %p10154_p10 = scmp.lt.s32.totalorder %s10145_s14, %s10145_s14 }
  0x65   : > { %p10148_p6 = pnand %p10146_p4, %p10642_p7  ;;  %p10155_p11 = por %p10154_p10, %p10153_p9 }
  0x67   : > { %p10149_p8 = pneg %p10148_p6 }
  0x69   : > { %p10156_p12 = pnand %p10155_p11, %p10149_p8 }
  0x6b   : > { %10159 = shalt.err (!%p10156_p12)
}
  0x6c   : > { %9532 = dma.hbm_to_vmem [thread:$0]  (!%p10626_p5), %s13612_s6, 512, %s10632_s17, [#allocation13], %s13529_s18, %s13529_s18, %s13530_s1  }
  0x6d   : > { %s10495_s11 = smov [#allocation18]   ;;  %s10160_s20 = scalar_lea.hbm %s13519_s10, 9216 }
  0x6e   : > { %s449_s24 = sshll.u32 %s10495_s11, 4  ;;  %p10161_p13 = scmp.ne.s32.totalorder %s13519_s10, %s10160_s20  ;;  %s450_s24 = int_to_ptr.vmem [resolvable:$true] %s449_s24 }
  0x6f   : > { %p10167_p4 = scmp.lt.u32.totalorder %s10160_s20, %s13519_s10 }
  0x70   : > { %p10163_p0 = pnand %p10161_p13, %p10642_p7 }
  0x72   : > { %p10164_p2 = pneg %p10163_p0 }
  0x74   : > { %p10169_p6 = pnand %p10167_p4, %p10164_p2 }
  0x76   : > { %10172 = shalt.err (!%p10169_p6)
}
  0x77   : > { %s10173_s17 = scalar_lea.vmem %s450_s24, 9216  ;;  %p10181_p11 = scmp.lt.s32.totalorder %s450_s24, %s450_s24 }
  0x78   : > { %p10174_p8 = scmp.ne.s32.totalorder %s450_s24, %s10173_s17  ;;  %p10182_p12 = scmp.lt.s32.totalorder %s10173_s17, %s10173_s17 }
  0x7a   : > { %p10176_p9 = pnand %p10174_p8, %p10642_p7  ;;  %p10183_p1 = por %p10182_p12, %p10181_p11 }
  0x7c   : > { %p10177_p10 = pneg %p10176_p9 }
  0x7e   : > { %p10184_p3 = pnand %p10183_p1, %p10177_p10 }
  0x80   : > { %10187 = shalt.err (!%p10184_p3)
}
  0x81   : > { %s10496_s28 = smov 64   ;;  %s10497_s9 = smov 4  }
  0x82   : > { %9538 = dma.hbm_to_vmem [thread:$0]  (!%p10626_p5), %s13519_s10, 9216, %s450_s24, [#allocation19], %s10496_s28, %s10496_s28, %s10497_s9  }
  0x83   : > { %s40_s19 = sadd.s32 1, %s10484_s25  ;;  %p220_p1 = scmp.lt.s32.totalorder %s10484_s25, 3 }
  0x84   : > { %p41_p3 = scmp.ge.s32.totalorder %s40_s19, 5  ;;  %s227_s20 = sadd.s32 1, %s10476_s23 }
  0x85   : > { %s10740_s27 = scalar_select %p220_p1, %s10484_s25, 3 }
  0x86   : > { %s13711_s19 = smov (%p41_p3, %s40_s19), 0  ;;  %p234_p13 = scmp.ne.s32.totalorder %s10476_s23, %s10472_s22 }
  0x87   : > { %p235_p0 = scmp.eq.s32.totalorder %s10488_s26, 0  ;;  %p222_p2 = scmp.lt.s32.totalorder %s13711_s19, 3 }
  0x88   : > { %p240_p4 = scmp.ne.s32.totalorder %s10472_s22, %s10468_s21  ;;  %p9558_p8 = scmp.lt.s32.totalorder %s10488_s26, 5 }
  0x89   : > { %p236_p6 = por %p235_p0, %p234_p13  ;;  %p13613_p9 = scmp.eq.s32.totalorder %s10611_s29, 0 }
  0x8a   : > { %s223_s24 = scalar_select %p222_p2, %s13711_s19, 3 }
  0x8b   : > { %p10754_p10 = por %p13613_p9, %p240_p4  ;;  %s474_s12 = sand.u32 1, %s10488_s26  }
  0x8c   : > { %s224_s14 = ssub.s32 %s10740_s27, %s223_s24  ;;  %s13534_s17 = sand.u32 1, %s10476_s23  }
  0x8d   : > { %s13614_s16 = scalar_select %p10754_p10, 1, 0 }
  0x8e   : > { %p225_p11 = scmp.eq.s32.totalorder %s224_s14, 0  ;;  %s9467_s28 = smul.u32 1920, %s13534_s17 }
  0x8f   : > { %p10763_p12 = pnand %p9558_p8, %p236_p6  ;;  %s9468_s11 = smul.u32 30720, %s10740_s27 }
  0x90   : > { %s10768_s21 = scalar_select %p225_p11, %s10476_s23, %s227_s20  }
  0x91   : > { %s13615_s9 = scalar_select %p10763_p12, 1, 0 }
  0x92   : > { %s478_s30 = scalar_lea.vmem [#allocation15], %s9467_s28  ;;  %s13616_s8 = sld [smem:[#allocation65_spill]] }
  0x93   : > { %s487_s18 = sshll.u32 %s478_s30, 4  ;;  %s10778_s24 = scalar_lea.sflag [#allocation16], %s474_s12  ;;  %s10776_s18 = int_to_ptr.vmem [resolvable:$true] %s487_s18 }
  0x94   : > { %p13535_p3 = pneg %p10763_p12 }
  0x98   : > { %s10774_s4 = scalar_lea.hbm %s13616_s8, %s9468_s11  ;;  %s10193_s1 = scalar_lea.hbm %s13616_s8, 122880 }
  0x99   : > { %s10188_s14 = scalar_lea.hbm %s10774_s4, 30720  ;;  %p10194_p2 = scmp.lt.u32.totalorder %s10774_s4, %s13616_s8 }
  0x9a   : > { %p10189_p1 = scmp.ne.s32.totalorder %s10774_s4, %s10188_s14  ;;  %p10195_p4 = scmp.lt.u32.totalorder %s10193_s1, %s10188_s14 }
  0x9b   : > { %p10197_p8 = scmp.lt.u32.totalorder %s10188_s14, %s10774_s4 }
  0x9c   : > { %p10191_p13 = pnand %p13535_p3, %p10189_p1  ;;  %p10196_p6 = por %p10195_p4, %p10194_p2 }
  0x9e   : > { %p10192_p0 = pneg %p10191_p13  ;;  %p10198_p9 = por %p10197_p8, %p10196_p6 }
  0xa0   : > { %p10199_p11 = pnand %p10198_p9, %p10192_p0 }
  0xa2   : > { %10202 = shalt.err (!%p10199_p11)
}
  0xa3   : > { %s10203_s12 = scalar_lea.vmem %s10776_s18, 30720  ;;  %s10498_s30 = smov [#allocation15]  }
  0xa4   : > { %p10204_p1 = scmp.ne.s32.totalorder %s10776_s18, %s10203_s12  ;;  %s10208_s20 = sshll.u32 %s10498_s30, 4  ;;  %s10209_s20 = int_to_ptr.vmem [resolvable:$false] %s10208_s20 }
  0xa5   : > { %s10210_s2 = scalar_lea.vmem %s10209_s20, 61440  ;;  %p10211_p5 = scmp.lt.s32.totalorder %s10776_s18, %s10209_s20 }
  0xa6   : > { %p10206_p13 = pnand %p10204_p1, %p13535_p3  ;;  %p10212_p2 = scmp.lt.s32.totalorder %s10210_s2, %s10203_s12 }
  0xa8   : > { %p10207_p10 = pneg %p10206_p13  ;;  %p10213_p4 = por %p10212_p2, %p10211_p5 }
  0xaa   : > { %p10214_p6 = pnand %p10213_p4, %p10207_p10 }
  0xac   : > { %10217 = shalt.err (!%p10214_p6)
}
  0xad   : > { %s13617_s14 = smov 8   ;;  %s13618_s1 = smov 128  }
  0xae   : > { %9545 = dma.hbm_to_vmem [thread:$0]  (!%p10763_p12), %s10774_s4, 30720, %s10776_s18, %s10778_s24, %s13618_s1, %s13618_s1, %s13617_s14  }
  0xaf   : > { %s10499_s28 = smov [#allocation3]   ;;  %s13619_s0 = sld [smem:[#allocation60_spill]] }
  0xb0   : > { %s364_s11 = sshll.u32 %s10499_s28, 4  ;;  %s365_s11 = int_to_ptr.vmem [resolvable:$true] %s364_s11 }
  0xb5   : > { %s10218_s12 = scalar_lea.hbm %s13619_s0, 128 }
  0xb6   : > { %p10219_p5 = scmp.ne.s32.totalorder %s13619_s0, %s10218_s12  ;;  %p10225_p8 = scmp.lt.u32.totalorder %s10218_s12, %s13619_s0 }
  0xb8   : > { %p10221_p10 = pnand %p10219_p5, %p10642_p7 }
  0xba   : > { %p10222_p0 = pneg %p10221_p10 }
  0xbc   : > { %p10227_p9 = pnand %p10225_p8, %p10222_p0 }
  0xbe   : > { %10230 = shalt.err (!%p10227_p9)
}
  0xbf   : > { %s10231_s4 = scalar_lea.vmem %s365_s11, 128  ;;  %p10239_p2 = scmp.lt.s32.totalorder %s365_s11, %s365_s11 }
  0xc0   : > { %p10232_p11 = scmp.ne.s32.totalorder %s365_s11, %s10231_s4  ;;  %p10240_p4 = scmp.lt.s32.totalorder %s10231_s4, %s10231_s4 }
  0xc2   : > { %p10234_p1 = pnand %p10232_p11, %p10642_p7  ;;  %p10241_p6 = por %p10240_p4, %p10239_p2 }
  0xc4   : > { %p10235_p13 = pneg %p10234_p1 }
  0xc6   : > { %p10242_p3 = pnand %p10241_p6, %p10235_p13 }
  0xc8   : > { %10245 = shalt.err (!%p10242_p3)
}
  0xc9   : > { %p13620_p5 = scmp.ne.s32.totalorder %s13608_s15, 0  ;;  %s10500_s6 = smov [#allocation8]  }
  0xca   : > { %s391_s8 = sshll.u32 %s10500_s6, 4  ;;  %s10501_s14 = smov [#allocation11]   ;;  %s392_s8 = int_to_ptr.vmem [resolvable:$true] %s391_s8 }
  0xcb   : > { %9517 = dma.hbm_to_vmem [thread:$0]  (!%p13620_p5), %s13619_s0, 128, %s365_s11, [#allocation4]  }
  0xcc   : > { %s415_s1 = sshll.u32 %s10501_s14, 4  ;;  %s10246_s12 = scalar_lea.hbm %s13512_s3, 16  ;;  %s416_s1 = int_to_ptr.vmem [resolvable:$true] %s415_s1 }
  0xcd   : > { %p10247_p3 = scmp.ne.s32.totalorder %s13512_s3, %s10246_s12  ;;  %p10253_p8 = scmp.lt.u32.totalorder %s10246_s12, %s13512_s3 }
  0xcf   : > { %p10249_p10 = pnand %p10247_p3, %p10642_p7 }
  0xd1   : > { %p10250_p0 = pneg %p10249_p10 }
  0xd3   : > { %p10255_p9 = pnand %p10253_p8, %p10250_p0 }
  0xd5   : > { %10258 = shalt.err (!%p10255_p9)
}
  0xd6   : > { %s10259_s11 = scalar_lea.vmem %s392_s8, 16  ;;  %s10266_s17 = scalar_lea.vmem %s392_s8, 32 }
  0xd7   : > { %p10260_p11 = scmp.ne.s32.totalorder %s392_s8, %s10259_s11  ;;  %p10267_p2 = scmp.lt.s32.totalorder %s392_s8, %s392_s8 }
  0xd8   : > { %p10268_p4 = scmp.lt.s32.totalorder %s10266_s17, %s10259_s11 }
  0xd9   : > { %p10262_p1 = pnand %p10260_p11, %p10642_p7 }
  0xda   : > { %p10269_p6 = por %p10268_p4, %p10267_p2 }
  0xdb   : > { %p10263_p13 = pneg %p10262_p1 }
  0xdd   : > { %p10270_p12 = pnand %p10269_p6, %p10263_p13 }
  0xdf   : > { %10273 = shalt.err (!%p10270_p12)
}
  0xe0   : > { %9523 = dma.hbm_to_vmem [thread:$0]  (!%p13620_p5), %s13512_s3, 16, %s392_s8, [#allocation7]  }
  0xe1   : > { %s10274_s12 = scalar_lea.hbm %s13514_s5, 16 }
  0xe2   : > { %p10275_p3 = scmp.ne.s32.totalorder %s13514_s5, %s10274_s12  ;;  %p10281_p12 = scmp.lt.u32.totalorder %s10274_s12, %s13514_s5 }
  0xe4   : > { %p10277_p10 = pnand %p10275_p3, %p10642_p7 }
  0xe6   : > { %p10278_p0 = pneg %p10277_p10 }
  0xe8   : > { %p10283_p8 = pnand %p10281_p12, %p10278_p0 }
  0xea   : > { %10286 = shalt.err (!%p10283_p8)
}
  0xeb   : > { %s10287_s11 = scalar_lea.vmem %s416_s1, 16  ;;  %s10294_s8 = scalar_lea.vmem %s416_s1, 32 }
  0xec   : > { %p10288_p9 = scmp.ne.s32.totalorder %s416_s1, %s10287_s11  ;;  %p10295_p13 = scmp.lt.s32.totalorder %s416_s1, %s416_s1 }
  0xed   : > { %p10296_p2 = scmp.lt.s32.totalorder %s10294_s8, %s10287_s11 }
  0xee   : > { %p10290_p11 = pnand %p10288_p9, %p10642_p7 }
  0xef   : > { %p10297_p4 = por %p10296_p2, %p10295_p13 }
  0xf0   : > { %p10291_p1 = pneg %p10290_p11 }
  0xf2   : > { %p10298_p6 = pnand %p10297_p4, %p10291_p1 }
  0xf4   : > { %10301 = shalt.err (!%p10298_p6)
}
  0xf5   : > { %9529 = dma.hbm_to_vmem [thread:$0]  (!%p13620_p5), %s13514_s5, 16, %s416_s1, [#allocation10]  }
  0xf6   : > { %s10502_s14 = smov [#allocation14]   ;;  %s10503_s30 = smov [#allocation20]  }
  0xf7   : > { %s439_s28 = sshll.u32 %s10502_s14, 4  ;;  %s463_s12 = sshll.u32 %s10503_s30, 4  ;;  %s440_s28 = int_to_ptr.vmem [resolvable:$true] %s439_s28  ;;  %s464_s12 = int_to_ptr.vmem [resolvable:$true] %s463_s12 }
  0xf8   : > { %s10302_s4 = scalar_lea.hbm %s13516_s7, 16 }
  0xf9   : > { %p10303_p3 = scmp.ne.s32.totalorder %s13516_s7, %s10302_s4  ;;  %p10309_p12 = scmp.lt.u32.totalorder %s10302_s4, %s13516_s7 }
  0xfb   : > { %p10305_p10 = pnand %p10303_p3, %p10642_p7 }
  0xfd   : > { %p10306_p0 = pneg %p10305_p10 }
  0xff   : > { %p10311_p8 = pnand %p10309_p12, %p10306_p0 }
 0x101   : > { %10314 = shalt.err (!%p10311_p8)
}
 0x102   : > { %s10315_s1 = scalar_lea.vmem %s440_s28, 16  ;;  %s10322_s6 = scalar_lea.vmem %s440_s28, 32 }
 0x103   : > { %p10316_p9 = scmp.ne.s32.totalorder %s440_s28, %s10315_s1  ;;  %p10323_p13 = scmp.lt.s32.totalorder %s440_s28, %s440_s28 }
 0x104   : > { %p10324_p2 = scmp.lt.s32.totalorder %s10322_s6, %s10315_s1 }
 0x105   : > { %p10318_p11 = pnand %p10316_p9, %p10642_p7 }
 0x106   : > { %p10325_p4 = por %p10324_p2, %p10323_p13 }
 0x107   : > { %p10319_p1 = pneg %p10318_p11 }
 0x109   : > { %p10326_p6 = pnand %p10325_p4, %p10319_p1 }
 0x10b   : > { %10329 = shalt.err (!%p10326_p6)
}
 0x10c   : > { %9535 = dma.hbm_to_vmem [thread:$0]  (!%p13620_p5), %s13516_s7, 16, %s440_s28, [#allocation13]  }
 0x10d   : > { %s13621_s20 = sand.u32 1, %s10476_s23   ;;  %s13622_s11 = sld [smem:[#allocation67_spill]] }
 0x10e   : > { %s7773_s2 = sshll.u32 %s13621_s20, 1 }
 0x113   : > { %s10330_s8 = scalar_lea.hbm %s13622_s11, 16 }
 0x114   : > { %p10331_p3 = scmp.ne.s32.totalorder %s13622_s11, %s10330_s8  ;;  %p10337_p12 = scmp.lt.u32.totalorder %s10330_s8, %s13622_s11 }
 0x116   : > { %p10333_p10 = pnand %p10331_p3, %p10642_p7 }
 0x118   : > { %p10334_p0 = pneg %p10333_p10 }
 0x11a   : > { %p10339_p8 = pnand %p10337_p12, %p10334_p0 }
 0x11c   : > { %10342 = shalt.err (!%p10339_p8)
}
 0x11d   : > { %s10343_s28 = scalar_lea.vmem %s464_s12, 16  ;;  %s10350_s14 = scalar_lea.vmem %s464_s12, 32 }
 0x11e   : > { %p10344_p9 = scmp.ne.s32.totalorder %s464_s12, %s10343_s28  ;;  %p10351_p13 = scmp.lt.s32.totalorder %s464_s12, %s464_s12 }
 0x11f   : > { %p10352_p2 = scmp.lt.s32.totalorder %s10350_s14, %s10343_s28 }
 0x120   : > { %p10346_p11 = pnand %p10344_p9, %p10642_p7 }
 0x121   : > { %p10353_p4 = por %p10352_p2, %p10351_p13 }
 0x122   : > { %p10347_p1 = pneg %p10346_p11 }
 0x124   : > { %p10354_p6 = pnand %p10353_p4, %p10347_p1 }
 0x126   : > { %10357 = shalt.err (!%p10354_p6)
}
 0x127   : > { %9541 = dma.hbm_to_vmem [thread:$0]  (!%p13620_p5), %s13622_s11, 16, %s464_s12, [#allocation19]  }
 0x128   : > { %s8494_s0 = sshll.u32 %s10740_s27, 5  ;;  %s13623_s13 = sld [smem:[#allocation66_spill]] }
 0x129   : > { %s501_s17 = scalar_lea.vmem [#allocation17], %s7773_s2  ;;  %p13624_p3 = scmp.ne.s32.totalorder %s13615_s9, 0 }
 0x12a   : > { %s511_s1 = sshll.u32 %s501_s17, 4  ;;  %s512_s1 = int_to_ptr.vmem [resolvable:$true] %s511_s1 }
 0x12b   : > { %p13625_p10 = pneg %p13624_p3 }
 0x12e   : > { %s10905_s8 = scalar_lea.hbm %s13623_s13, %s8494_s0  ;;  %s10363_s6 = scalar_lea.hbm %s13623_s13, 128 }
 0x12f   : > { %s10358_s15 = scalar_lea.hbm %s10905_s8, 32  ;;  %p10364_p5 = scmp.lt.u32.totalorder %s10905_s8, %s13623_s13 }
 0x130   : > { %p10359_p7 = scmp.ne.s32.totalorder %s10905_s8, %s10358_s15  ;;  %p10365_p8 = scmp.lt.u32.totalorder %s10363_s6, %s10358_s15 }
 0x131   : > { %p10367_p11 = scmp.lt.u32.totalorder %s10358_s15, %s10905_s8 }
 0x132   : > { %p10361_p0 = pnand %p10359_p7, %p13625_p10  ;;  %p10366_p9 = por %p10365_p8, %p10364_p5 }
 0x134   : > { %p10362_p12 = pneg %p10361_p0  ;;  %p10368_p1 = por %p10367_p11, %p10366_p9 }
 0x136   : > { %p10369_p13 = pnand %p10368_p1, %p10362_p12 }
 0x138   : > { %10372 = shalt.err (!%p10369_p13)
}
 0x139   : > { %s10373_s2 = scalar_lea.vmem %s512_s1, 32  ;;  %p13626_p4 = pmov %p13625_p10 }
 0x13a   : > { %p10374_p2 = scmp.ne.s32.totalorder %s512_s1, %s10373_s2  ;;  %s10504_s30 = smov [#allocation17]  }
 0x13b   : > { %s10378_s20 = sshll.u32 %s10504_s30, 4  ;;  %s10379_s20 = int_to_ptr.vmem [resolvable:$false] %s10378_s20 }
 0x13c   : > { %p10376_p6 = pnand %p10374_p2, %p13626_p4  ;;  %s10380_s0 = scalar_lea.vmem %s10379_s20, 64 }
 0x13d   : > { %p10381_p10 = scmp.lt.s32.totalorder %s512_s1, %s10379_s20  ;;  %p10382_p0 = scmp.lt.s32.totalorder %s10380_s0, %s10373_s2 }
 0x13e   : > { %p10377_p7 = pneg %p10376_p6 }
 0x13f   : > { %p10383_p5 = por %p10382_p0, %p10381_p10 }
 0x141   : > { %p10384_p8 = pnand %p10383_p5, %p10377_p7 }
 0x143   : > { %10387 = shalt.err (!%p10384_p8)
}
 0x144   : > { %9548 = dma.hbm_to_vmem [thread:$0]  (!%p13624_p3), %s10905_s8, 32, %s512_s1, %s10778_s24  }
 0x145   : > { %s13627_s4 = sld [smem:[#allocation30_spill]] }
 0x14b   : > { %p13628_p12 = scmp.ne.s32.totalorder %s13627_s4, 0 }
 0x14c   : > { %p13629_p9 = scmp.eq.s32.totalorder (!%p13628_p12), %s10611_s29, 0 }
 0x14d   : > { %520 = sbr.rel (%p13628_p12) target bundleno = 2361 (0x939), region = 68 }
 0x154   : > { %10439 = dma.done.wait (%p13629_p9), [#allocation4], 128   ;;  %p13630_p11 = pmov %p13629_p9 }
 0x155   : > { %p13631_p1 = pmov %p13629_p9 }
 0x156   : > { %10441 = vsyncadd (%p13630_p11), [#allocation4], 4294967168 }
 0x157   : > { %10443 = dma.done.wait (%p13631_p1), [#allocation7], 528   ;;  %p13632_p13 = pmov %p13631_p1 }
 0x158   : > { %p13633_p2 = pmov %p13631_p1 }
 0x159   : > { %10445 = vsyncadd (%p13632_p13), [#allocation7], 4294966768 }
 0x15a   : > { %10447 = dma.done.wait (%p13633_p2), [#allocation10], 528   ;;  %p13634_p3 = pmov %p13631_p1 }
 0x15b   : > { %p13635_p4 = pmov %p13631_p1 }
 0x15c   : > { %10449 = vsyncadd (%p13634_p3), [#allocation10], 4294966768 }
 0x15d   : > { %10451 = dma.done.wait (%p13635_p4), [#allocation13], 528   ;;  %p13636_p6 = pmov %p13631_p1 }
 0x15e   : > { %s550_s9 = sand.u32 1, %s10611_s29   ;;  %s552_s24 = sand.u32 1, %s10472_s22  }
 0x15f   : > { %10453 = vsyncadd (%p13636_p6), [#allocation13], 4294966768  ;;  %s9469_s18 = smul.u32 1920, %s552_s24  ;;  %s551_s8 = scalar_lea.sflag [#allocation16], %s550_s9 }
 0x160   : > { %p13637_p7 = scmp.ne.s32.totalorder %s13614_s16, 0 }
 0x161   : > { %s10947_s17 = scalar_lea.vmem [#allocation15], %s9469_s18 }
 0x162   : > { %10455 = dma.done.wait (%p13637_p7), %s551_s8, 30752  }
 0x163   : > { %10457 = vsyncadd (%p13637_p7), %s551_s8, 4294936544  ;;  %s10953_s1 = sshll.u32 %s552_s24, 1  ;;  %p13638_p10 = pmov %p13631_p1 }
 0x164   : > { %s563_s15 = scalar_lea.vmem [#allocation17], %s10953_s1 }
 0x165   : > { %10459 = dma.done.wait (%p13638_p10), [#allocation19], 9232   ;;  %p13639_p0 = pmov %p13631_p1 }
 0x166   : > { %s13640_s12 = sld [smem:[#allocation29_spill]] }
 0x167   : > { %10461 = vsyncadd (%p13639_p0), [#allocation19], 4294958064 }
 0x16c   : > { %p7787_p5 = scmp.ne.s32.totalorder %s13640_s12, 0 }
 0x16e   : > { %620 = sbr.rel (%p7787_p5) target bundleno = 1348 (0x544), region = 116 }
 0x175   : > { %v816_v0 = vld [vmem:[#allocation6] sm:$0xff]  ;;  %v817_v1 = vld [vmem:[#allocation6 + $0x8] sm:$0xff]  ;;  %v818_v2 = vld [vmem:[#allocation6 + $0x10] sm:$0xff]  ;;  %v667_v3 = vlaneseq  ;;  %v10505_v6 = vmov 1966171168   ;;  %s13641_s6 = sld [smem:[#allocation61_spill]] }
 0x176   : > { %v9239_v4 = vpack.c.bf16 %v817_v1, %v816_v0  ;;  %v819_v5 = vld [vmem:[#allocation6 + $0x18] sm:$0xff]  ;;  %v665_v7 = vunpack.c.l.s4 %v10505_v6  ;;  %v1469_v13 = vld [vmem:[#allocation9] sm:$0xff]  ;;  %v1470_v14 = vld [vmem:[#allocation9 + $0x8] sm:$0xff]  ;;  %vm827_vm0 = vcmask 261120   ;;  %vm2774_vm1 = vcmask 1041409   ;;  %s10507_s28 = smov 64  }
 0x177   : > { %v9243_v8 = vpack.c.bf16 %v819_v5, %v818_v2  ;;  %v661_v9 = vld [vmem:[#allocation3] sm:$0xff]  ;;  %v668_v10 = vshrl.u32 %v667_v3, 7  ;;  %v9247_v16 = vpack.c.bf16 %v1470_v14, %v1469_v13  ;;  %vm2777_vm2 = vcmask 1042434   ;;  %s10508_s14 = smov 96   ;;  %s10509_s2 = smov 32  }
 0x178   : > { %9240 = vmatprep.subr.bf16.mxu0 %v9239_v4  ;;  %v663_v11 = vcombine.high %v661_v9, %v661_v9  ;;  %v666_v12 = vunpack.c.0.s8 %v665_v7  ;;  %9263 = vmatprep.subr.bf16.mxu1 %v9239_v4  ;;  %v1471_v51 = vld [vmem:[#allocation9 + $0x10] sm:$0xff]  ;;  %v1472_v52 = vld [vmem:[#allocation9 + $0x18] sm:$0xff]  ;;  %vm2780_vm3 = vcmask 1043459   ;;  %vm2783_vm4 = vcmask 1044484  }
 0x179   : > { %9242 = vmatpush3.bf16.msra.mxu0 %v9239_v4  ;;  %9265 = vmatpush3.bf16.msra.mxu1 %v9239_v4  ;;  %v714_v19 = vsub.s32 0, %v668_v10  ;;  %v9251_v57 = vpack.c.bf16 %v1472_v52, %v1471_v51  ;;  %vm2786_vm5 = vcmask 1045509   ;;  %vm2789_vm6 = vcmask 1046534  }
 0x17a   : > { %9244 = vmatprep.subr.bf16.mxu0 %v9243_v8  ;;  %v669_v15 = vsub.s32 %v666_v12, %v668_v10  ;;  %9264 = vmatprep.subr.bf16.mxu1 %v9243_v8  ;;  %vm2792_vm7 = vcmask 1047559   ;;  %vm2916_vm8 = vcmask 785920   ;;  %vm635_vm9 = vcmask 523264  }
 0x17b   : > { %v653_v23 = vld [vmem:[%s13641_s6] sm:$0xff]  ;;  %v654_v47 = vld [vmem:[%s13641_s6 + $0x8] sm:$0xff]  ;;  %v655_v6 = vld [vmem:[%s13641_s6 + $0x10] sm:$0xff]  ;;  %vm3061_vm10 = vcmask 1048320   ;;  %vm3334_vm11 = vcmask 523520   ;;  %vm644_vm12 = vcmask 1048064  }
 0x17c   : > { %v670_v17 = vrot.slane %v661_v9, %v669_v15  ;;  %v677_v18 = vrot.slane %v663_v11, %v669_v15  ;;  %v657_v43 = vld [vmem:[%s13641_s6 + $0x20] sm:$0xff]  ;;  %v658_v62 = vld [vmem:[%s13641_s6 + $0x28] sm:$0xff] }
 0x17d   : > { %9246 = vmatpush3.bf16.msra.mxu0 %v9243_v8  ;;  %9266 = vmatpush3.bf16.msra.mxu1 %v9243_v8 }
 0x17e   : > { %v678_v20 = vcombine.high %v670_v17, %v670_v17  ;;  %v686_v21 = vrot.slane %v670_v17, %v669_v15  ;;  %v679_v22 = vcombine.high %v677_v18, %v677_v18  ;;  %9248 = vmatprep.subr.bf16.mxu1 %v9247_v16  ;;  %v693_v24 = vrot.slane %v677_v18, %v669_v15 }
 0x180   : > { %v708_v25 = vcombine.high %v686_v21, %v686_v21  ;;  %v10964_v26 = vrot.slane %v686_v21, %v714_v19  ;;  %v700_v27 = vrot.slane %v678_v20, %v669_v15  ;;  %v707_v28 = vrot.slane %v679_v22, %v669_v15 }
 0x181   : > { %v10971_v33 = vrot.slane %v693_v24, %v714_v19  ;;  %v709_v34 = vcombine.high %v693_v24, %v693_v24  ;;  %v656_v24 = vld [vmem:[%s13641_s6 + $0x18] sm:$0xff] }
 0x182   : > { %v752_v29 = vadd.f32 %v10964_v26, %v653_v23  ;;  %v10967_v30 = vrot.slane %v700_v27, %v714_v19  ;;  %v10969_v31 = vrot.slane %v708_v25, %v714_v19  ;;  %v710_v32 = vcombine.high %v700_v27, %v700_v27 }
 0x183   : > { %v10980_v39 = vrot.slane %v707_v28, %v714_v19  ;;  %v711_v40 = vcombine.high %v707_v28, %v707_v28  ;;  %v756_v41 = vadd.f32 %v10971_v33, %v653_v23  ;;  %v10984_v42 = vrot.slane %v709_v34, %v714_v19 }
 0x184   : > { %8863 = vmatprep.mubr.msk.f32.mxu0 %vm827_vm0, %v752_v29  ;;  %v753_v35 = vadd.f32 %v10967_v30, %v653_v23  ;;  %v754_v36 = vadd.f32 %v10969_v31, %v653_v23  ;;  %v10976_v37 = vrot.slane %v710_v32, %v714_v19  ;;  %v784_v48 = vadd.f32 %v10964_v26, %v657_v43 }
 0x185   : > { %v757_v44 = vadd.f32 %v10980_v39, %v653_v23  ;;  %v10991_v45 = vrot.slane %v711_v40, %v714_v19  ;;  %v758_v46 = vadd.f32 %v10984_v42, %v653_v23  ;;  %v785_v49 = vadd.f32 %v10967_v30, %v657_v43  ;;  %v660_v40 = vld [vmem:[%s13641_s6 + $0x38] sm:$0xff] }
 0x186   : > { %8864 = vmatmul.mubr.msk.f32.vlgmr.msra.gmra.mrb[0].mxu0 %vm827_vm0, %v753_v35  ;;  %v755_v38 = vadd.f32 %v10976_v37, %v653_v23  ;;  %v786_v50 = vadd.f32 %v10969_v31, %v657_v43  ;;  %8911 = vmatprep.mubr.msk.f32.mxu1 %vm827_vm0, %v784_v48  ;;  %v760_v54 = vadd.f32 %v10964_v26, %v654_v47 }
 0x187   : > { %8866 = vmatprep.mubr.msk.f32.mxu0 %vm827_vm0, %v754_v36  ;;  %v759_v53 = vadd.f32 %v10991_v45, %v653_v23  ;;  %8912 = vmatmul.mubr.msk.f32.vlgmr.msra.gmra.mrb[0].mxu1 %vm827_vm0, %v785_v49  ;;  %v787_v55 = vadd.f32 %v10976_v37, %v657_v43  ;;  %v788_v56 = vadd.f32 %v10971_v33, %v657_v43 }
 0x188   : > { %8914 = vmatprep.mubr.msk.f32.mxu1 %vm827_vm0, %v786_v50  ;;  %9250 = vmatpush3.bf16.msra.mxu1 %v9247_v16  ;;  %v761_v58 = vadd.f32 %v10967_v30, %v654_v47  ;;  %v762_v59 = vadd.f32 %v10969_v31, %v654_v47  ;;  %v789_v60 = vadd.f32 %v10980_v39, %v657_v43  ;;  %v659_v16 = vld [vmem:[%s13641_s6 + $0x30] sm:$0xff] }
 0x189   : > { %v790_v61 = vadd.f32 %v10984_v42, %v657_v43  ;;  %9252 = vmatprep.subr.bf16.mxu1 %v9251_v57  ;;  %v763_v63 = vadd.f32 %v10976_v37, %v654_v47  ;;  %v764_v0 = vadd.f32 %v10971_v33, %v654_v47  ;;  %v791_v1 = vadd.f32 %v10991_v45, %v657_v43 }
 0x18a   : > { %8867 = vmatmul.mubr.msk.f32.gmra.mrb[2].mxu0 %vm827_vm0, %v755_v38  ;;  %v792_v2 = vadd.f32 %v10964_v26, %v658_v62  ;;  %v765_v3 = vadd.f32 %v10980_v39, %v654_v47  ;;  %v766_v4 = vadd.f32 %v10984_v42, %v654_v47  ;;  %v793_v5 = vadd.f32 %v10967_v30, %v658_v62 }
 0x18b   : > { %8869 = vmatprep.mubr.msk.f32.mxu0 %vm827_vm0, %v756_v41  ;;  %8915 = vmatmul.mubr.msk.f32.gmra.mrb[2].mxu1 %vm827_vm0, %v787_v55  ;;  %v794_v7 = vadd.f32 %v10969_v31, %v658_v62  ;;  %v767_v8 = vadd.f32 %v10991_v45, %v654_v47  ;;  %v768_v9 = vadd.f32 %v10964_v26, %v655_v6 }
 0x18c   : > { %8917 = vmatprep.mubr.msk.f32.mxu1 %vm827_vm0, %v788_v56  ;;  %9254 = vmatpush3.bf16.msra.mxu1 %v9251_v57  ;;  %v795_v10 = vadd.f32 %v10976_v37, %v658_v62  ;;  %v796_v11 = vadd.f32 %v10971_v33, %v658_v62  ;;  %v769_v12 = vadd.f32 %v10967_v30, %v655_v6  ;;  %v2121_v56 = vld [vmem:[#allocation12] sm:$0xff]  ;;  %v2122_v57 = vld [vmem:[#allocation12 + $0x8] sm:$0xff] }
 0x18d   : > { %v770_v13 = vadd.f32 %v10969_v31, %v655_v6  ;;  %v797_v14 = vadd.f32 %v10980_v39, %v658_v62  ;;  %v798_v15 = vadd.f32 %v10984_v42, %v658_v62  ;;  %v771_v17 = vadd.f32 %v10976_v37, %v655_v6 }
 0x18e   : > { %8870 = vmatmul.mubr.msk.f32.gmra.mrb[4].mxu0 %vm827_vm0, %v757_v44  ;;  %v772_v18 = vadd.f32 %v10971_v33, %v655_v6  ;;  %v799_v19 = vadd.f32 %v10991_v45, %v658_v62  ;;  %v800_v20 = vadd.f32 %v10964_v26, %v659_v16  ;;  %v773_v21 = vadd.f32 %v10980_v39, %v655_v6 }
 0x18f   : > { %8872 = vmatprep.mubr.msk.f32.mxu0 %vm827_vm0, %v758_v46  ;;  %8918 = vmatmul.mubr.msk.f32.gmra.mrb[4].mxu1 %vm827_vm0, %v789_v60  ;;  %v774_v22 = vadd.f32 %v10984_v42, %v655_v6  ;;  %v801_v23 = vadd.f32 %v10967_v30, %v659_v16  ;;  %v802_v25 = vadd.f32 %v10969_v31, %v659_v16 }
 0x190   : > { %8920 = vmatprep.mubr.msk.f32.mxu1 %vm827_vm0, %v790_v61  ;;  %v775_v27 = vadd.f32 %v10991_v45, %v655_v6  ;;  %v776_v28 = vadd.f32 %v10964_v26, %v656_v24  ;;  %v803_v29 = vadd.f32 %v10976_v37, %v659_v16  ;;  %v804_v32 = vadd.f32 %v10971_v33, %v659_v16  ;;  %v2124_v61 = vld [vmem:[#allocation12 + $0x18] sm:$0xff] }
 0x191   : > { %v777_v34 = vadd.f32 %v10967_v30, %v656_v24  ;;  %v778_v35 = vadd.f32 %v10969_v31, %v656_v24  ;;  %v805_v36 = vadd.f32 %v10980_v39, %v659_v16  ;;  %v806_v38 = vadd.f32 %v10984_v42, %v659_v16 }
 0x192   : > { %8873 = vmatmul.mubr.msk.f32.gmra.mrb[6].mxu0 %vm827_vm0, %v759_v53  ;;  %v779_v41 = vadd.f32 %v10976_v37, %v656_v24  ;;  %v780_v43 = vadd.f32 %v10971_v33, %v656_v24  ;;  %v807_v44 = vadd.f32 %v10991_v45, %v659_v16  ;;  %v808_v46 = vadd.f32 %v10964_v26, %v660_v40 }
 0x193   : > { %8875 = vmatprep.mubr.msk.f32.mxu0 %vm827_vm0, %v760_v54  ;;  %8921 = vmatmul.mubr.msk.f32.gmra.mrb[6].mxu1 %vm827_vm0, %v791_v1  ;;  %v781_v47 = vadd.f32 %v10980_v39, %v656_v24  ;;  %v782_v48 = vadd.f32 %v10984_v42, %v656_v24  ;;  %v809_v49 = vadd.f32 %v10967_v30, %v660_v40 }
 0x194   : > { %8923 = vmatprep.mubr.msk.f32.mxu1 %vm827_vm0, %v792_v2  ;;  %v810_v50 = vadd.f32 %v10969_v31, %v660_v40  ;;  %v783_v26 = vadd.f32 %v10991_v45, %v656_v24  ;;  %v811_v51 = vadd.f32 %v10976_v37, %v660_v40  ;;  %v812_v52 = vadd.f32 %v10971_v33, %v660_v40  ;;  %v11129_v37 = vld [vmem:[#allocation8] ss:$0 sm:$0xff] }
 0x195   : > { %v813_v30 = vadd.f32 %v10980_v39, %v660_v40  ;;  %v814_v31 = vadd.f32 %v10984_v42, %v660_v40  ;;  %v815_v53 = vadd.f32 %v10991_v45, %v660_v40  ;;  %v9255_v60 = vpack.c.bf16 %v2122_v57, %v2121_v56 }
 0x196   : > { %8876 = vmatmul.mubr.msk.f32.gmra.mrb[8].mxu0 %vm827_vm0, %v761_v58  ;;  %v2123_v58 = vld [vmem:[#allocation12 + $0x10] sm:$0xff] }
 0x197   : > { %8878 = vmatprep.mubr.msk.f32.mxu0 %vm827_vm0, %v762_v59  ;;  %8924 = vmatmul.mubr.msk.f32.gmra.mrb[8].mxu1 %vm827_vm0, %v793_v5 }
 0x198   : > { %8926 = vmatprep.mubr.msk.f32.mxu1 %vm827_vm0, %v794_v7  ;;  %9256 = vmatprep.subr.bf16.mxu0 %v9255_v60 }
 0x199   : > { %9258 = vmatpush3.bf16.msra.mxu0 %v9255_v60 }
 0x19a   : > { %8879 = vmatmul.mubr.msk.f32.gmra.mrb[10].mxu0 %vm827_vm0, %v763_v63 }
 0x19b   : > { %8881 = vmatprep.mubr.msk.f32.mxu0 %vm827_vm0, %v764_v0  ;;  %8927 = vmatmul.mubr.msk.f32.gmra.mrb[10].mxu1 %vm827_vm0, %v795_v10  ;;  %v9259_v0 = vpack.c.bf16 %v2124_v61, %v2123_v58 }
 0x19c   : > { %8929 = vmatprep.mubr.msk.f32.mxu1 %vm827_vm0, %v796_v11 }
 0x19d   : > { %9260 = vmatprep.subr.bf16.mxu0 %v9259_v0 }
 0x19e   : > { %8882 = vmatmul.mubr.msk.f32.gmra.mrb[12].mxu0 %vm827_vm0, %v765_v3 }
 0x19f   : > { %8884 = vmatprep.mubr.msk.f32.mxu0 %vm827_vm0, %v766_v4  ;;  %8930 = vmatmul.mubr.msk.f32.gmra.mrb[12].mxu1 %vm827_vm0, %v797_v14 }
 0x1a0   : > { %8932 = vmatprep.mubr.msk.f32.mxu1 %vm827_vm0, %v798_v15  ;;  %9262 = vmatpush3.bf16.msra.mxu0 %v9259_v0 }
 0x1a2   : > { %8885 = vmatmul.mubr.msk.f32.gmra.mrb[14].mxu0 %vm827_vm0, %v767_v8 }
 0x1a3   : > { %8887 = vmatprep.mubr.msk.f32.mxu0 %vm827_vm0, %v768_v9  ;;  %8933 = vmatmul.mubr.msk.f32.gmra.mrb[14].mxu1 %vm827_vm0, %v799_v19 }
 0x1a4   : > { %8935 = vmatprep.mubr.msk.f32.mxu1 %vm827_vm0, %v800_v20 }
 0x1a6   : > { %8888 = vmatmul.mubr.msk.f32.gmra.mrb[16].mxu0 %vm827_vm0, %v769_v12 }
 0x1a7   : > { %8890 = vmatprep.mubr.msk.f32.mxu0 %vm827_vm0, %v770_v13  ;;  %8936 = vmatmul.mubr.msk.f32.gmra.mrb[16].mxu1 %vm827_vm0, %v801_v23 }
 0x1a8   : > { %8938 = vmatprep.mubr.msk.f32.mxu1 %vm827_vm0, %v802_v25 }
 0x1aa   : > { %8891 = vmatmul.mubr.msk.f32.gmra.mrb[18].mxu0 %vm827_vm0, %v771_v17 }
 0x1ab   : > { %8893 = vmatprep.mubr.msk.f32.mxu0 %vm827_vm0, %v772_v18  ;;  %8939 = vmatmul.mubr.msk.f32.gmra.mrb[18].mxu1 %vm827_vm0, %v803_v29 }
 0x1ac   : > { %8941 = vmatprep.mubr.msk.f32.mxu1 %vm827_vm0, %v804_v32 }
 0x1ae   : > { %8894 = vmatmul.mubr.msk.f32.gmra.mrb[20].mxu0 %vm827_vm0, %v773_v21 }
 0x1af   : > { %8896 = vmatprep.mubr.msk.f32.mxu0 %vm827_vm0, %v774_v22  ;;  %8942 = vmatmul.mubr.msk.f32.gmra.mrb[20].mxu1 %vm827_vm0, %v805_v36 }
 0x1b0   : > { %8944 = vmatprep.mubr.msk.f32.mxu1 %vm827_vm0, %v806_v38 }
 0x1b2   : > { %8897 = vmatmul.mubr.msk.f32.gmra.mrb[22].mxu0 %vm827_vm0, %v775_v27 }
 0x1b3   : > { %8899 = vmatprep.mubr.msk.f32.mxu0 %vm827_vm0, %v776_v28  ;;  %8945 = vmatmul.mubr.msk.f32.gmra.mrb[22].mxu1 %vm827_vm0, %v807_v44 }
 0x1b4   : > { %8947 = vmatprep.mubr.msk.f32.mxu1 %vm827_vm0, %v808_v46 }
 0x1b6   : > { %8900 = vmatmul.mubr.msk.f32.gmra.mrb[24].mxu0 %vm827_vm0, %v777_v34 }
 0x1b7   : > { %8902 = vmatprep.mubr.msk.f32.mxu0 %vm827_vm0, %v778_v35  ;;  %8948 = vmatmul.mubr.msk.f32.gmra.mrb[24].mxu1 %vm827_vm0, %v809_v49 }
 0x1b8   : > { %8950 = vmatprep.mubr.msk.f32.mxu1 %vm827_vm0, %v810_v50 }
 0x1ba   : > { %8903 = vmatmul.mubr.msk.f32.gmra.mrb[26].mxu0 %vm827_vm0, %v779_v41 }
 0x1bb   : > { %8905 = vmatprep.mubr.msk.f32.mxu0 %vm827_vm0, %v780_v43  ;;  %8951 = vmatmul.mubr.msk.f32.gmra.mrb[26].mxu1 %vm827_vm0, %v811_v51 }
 0x1bc   : > { %8953 = vmatprep.mubr.msk.f32.mxu1 %vm827_vm0, %v812_v52 }
 0x1be   : > { %8906 = vmatmul.mubr.msk.f32.gmra.mrb[28].mxu0 %vm827_vm0, %v781_v47 }
 0x1bf   : > { %8908 = vmatprep.mubr.msk.f32.mxu0 %vm827_vm0, %v782_v48  ;;  %8954 = vmatmul.mubr.msk.f32.gmra.mrb[28].mxu1 %vm827_vm0, %v813_v30 }
 0x1c0   : > { %8956 = vmatprep.mubr.msk.f32.mxu1 %vm827_vm0, %v814_v31 }
 0x1c2   : > { %8909 = vmatmul.mubr.msk.f32.gmra.mrb[30].mxu0 %vm827_vm0, %v783_v26 }
 0x1c3   : > { %8957 = vmatmul.mubr.msk.f32.gmra.mrb[30].mxu1 %vm827_vm0, %v815_v53 }
 0x259   : > { %v8865_v33 = vpop.f32.mrb[0].mxu0 }
 0x25a   : > { %v1092_v54 = vadd.f32 %v8865_v33, %v11129_v37  ;;  %v1086_v55 = vpop.f32.mrb[1].mxu0  ;;  %v11138_v7 = vpop.f32.mrb[0].mxu1 }
 0x25b   : > { %v1087_v39 = vadd.f32 %v11129_v37, %v1086_v55  ;;  %v11142_v9 = vpop.f32.mrb[1].mxu1 }
 0x25c   : > { %v1406_v45 = vmax.f32 %v1092_v54, 0.0 }
 0x25d   : > { %v1405_v42 = vmax.f32 %v1087_v39, 0.0  ;;  %v8868_v59 = vpop.f32.mrb[2].mxu0 }
 0x25e   : > { %v1102_v62 = vadd.f32 %v8868_v59, %v11129_v37  ;;  %v1096_v63 = vpop.f32.mrb[3].mxu0  ;;  %v11146_v15 = vpop.f32.mrb[2].mxu1 }
 0x25f   : > { %v1097_v1 = vadd.f32 %v11129_v37, %v1096_v63  ;;  %8967 = vmatprep.mubr.msk.f32.mxu1 %vm827_vm0, %v1405_v42  ;;  %v11150_v17 = vpop.f32.mrb[3].mxu1 }
 0x260   : > { %8968 = vmatmul.mubr.msk.f32.vlgmr.msra.gmra.mrb[32].mxu1 %vm827_vm0, %v1406_v45  ;;  %v1408_v4 = vmax.f32 %v1102_v62, 0.0 }
 0x261   : > { %v1407_v2 = vmax.f32 %v1097_v1, 0.0  ;;  %v8871_v3 = vpop.f32.mrb[4].mxu0 }
 0x262   : > { %v1112_v5 = vadd.f32 %v8871_v3, %v11129_v37  ;;  %v1106_v6 = vpop.f32.mrb[5].mxu0  ;;  %v11154_v23 = vpop.f32.mrb[4].mxu1 }
 0x263   : > { %v1107_v8 = vadd.f32 %v11129_v37, %v1106_v6  ;;  %8970 = vmatprep.mubr.msk.f32.mxu1 %vm827_vm0, %v1407_v2  ;;  %v11158_v25 = vpop.f32.mrb[5].mxu1 }
 0x264   : > { %8971 = vmatmul.mubr.msk.f32.gmra.mrb[34].mxu1 %vm827_vm0, %v1408_v4  ;;  %v1410_v12 = vmax.f32 %v1112_v5, 0.0 }
 0x265   : > { %v1409_v10 = vmax.f32 %v1107_v8, 0.0  ;;  %v8874_v11 = vpop.f32.mrb[6].mxu0 }
 0x266   : > { %v1122_v13 = vadd.f32 %v8874_v11, %v11129_v37  ;;  %v1116_v14 = vpop.f32.mrb[7].mxu0  ;;  %v11162_v35 = vpop.f32.mrb[6].mxu1 }
 0x267   : > { %v1117_v16 = vadd.f32 %v11129_v37, %v1116_v14  ;;  %8973 = vmatprep.mubr.msk.f32.mxu1 %vm827_vm0, %v1409_v10  ;;  %v11166_v38 = vpop.f32.mrb[7].mxu1 }
 0x268   : > { %8974 = vmatmul.mubr.msk.f32.gmra.mrb[36].mxu1 %vm827_vm0, %v1410_v12  ;;  %v1412_v20 = vmax.f32 %v1122_v13, 0.0 }
 0x269   : > { %v1411_v18 = vmax.f32 %v1117_v16, 0.0  ;;  %v8877_v19 = vpop.f32.mrb[8].mxu0 }
 0x26a   : > { %v1132_v21 = vadd.f32 %v8877_v19, %v11129_v37  ;;  %v1126_v22 = vpop.f32.mrb[9].mxu0  ;;  %v11170_v47 = vpop.f32.mrb[8].mxu1 }
 0x26b   : > { %v1127_v24 = vadd.f32 %v11129_v37, %v1126_v22  ;;  %8976 = vmatprep.mubr.msk.f32.mxu1 %vm827_vm0, %v1411_v18  ;;  %v11174_v49 = vpop.f32.mrb[9].mxu1 }
 0x26c   : > { %8977 = vmatmul.mubr.msk.f32.gmra.mrb[38].mxu1 %vm827_vm0, %v1412_v20  ;;  %v1414_v29 = vmax.f32 %v1132_v21, 0.0 }
 0x26d   : > { %v1413_v27 = vmax.f32 %v1127_v24, 0.0  ;;  %v8880_v28 = vpop.f32.mrb[10].mxu0 }
 0x26e   : > { %v1142_v32 = vadd.f32 %v8880_v28, %v11129_v37  ;;  %v1136_v34 = vpop.f32.mrb[11].mxu0  ;;  %v11178_v31 = vpop.f32.mrb[10].mxu1 }
 0x26f   : > { %v1137_v36 = vadd.f32 %v11129_v37, %v1136_v34  ;;  %8979 = vmatprep.mubr.msk.f32.mxu1 %vm827_vm0, %v1413_v27  ;;  %v11182_v33 = vpop.f32.mrb[11].mxu1 }
 0x270   : > { %8980 = vmatmul.mubr.msk.f32.gmra.mrb[40].mxu1 %vm827_vm0, %v1414_v29  ;;  %v1416_v43 = vmax.f32 %v1142_v32, 0.0 }
 0x271   : > { %v1415_v40 = vmax.f32 %v1137_v36, 0.0  ;;  %v8883_v41 = vpop.f32.mrb[12].mxu0 }
 0x272   : > { %v1152_v44 = vadd.f32 %v8883_v41, %v11129_v37  ;;  %v1146_v46 = vpop.f32.mrb[13].mxu0  ;;  %v11186_v58 = vpop.f32.mrb[12].mxu1 }
 0x273   : > { %v1147_v48 = vadd.f32 %v11129_v37, %v1146_v46  ;;  %8982 = vmatprep.mubr.msk.f32.mxu1 %vm827_vm0, %v1415_v40  ;;  %v11190_v59 = vpop.f32.mrb[13].mxu1 }
 0x274   : > { %8983 = vmatmul.mubr.msk.f32.gmra.mrb[42].mxu1 %vm827_vm0, %v1416_v43  ;;  %v1418_v51 = vmax.f32 %v1152_v44, 0.0 }
 0x275   : > { %v1417_v50 = vmax.f32 %v1147_v48, 0.0  ;;  %v8886_v26 = vpop.f32.mrb[14].mxu0 }
 0x276   : > { %v1162_v52 = vadd.f32 %v8886_v26, %v11129_v37  ;;  %v1156_v30 = vpop.f32.mrb[15].mxu0  ;;  %v11194_v0 = vpop.f32.mrb[14].mxu1 }
 0x277   : > { %v1157_v53 = vadd.f32 %v11129_v37, %v1156_v30  ;;  %8985 = vmatprep.mubr.msk.f32.mxu1 %vm827_vm0, %v1417_v50  ;;  %v11198_v2 = vpop.f32.mrb[15].mxu1 }
 0x278   : > { %8986 = vmatmul.mubr.msk.f32.gmra.mrb[44].mxu1 %vm827_vm0, %v1418_v51  ;;  %v1420_v39 = vmax.f32 %v1162_v52, 0.0 }
 0x279   : > { %v1419_v54 = vmax.f32 %v1157_v53, 0.0  ;;  %v8889_v55 = vpop.f32.mrb[16].mxu0 }
 0x27a   : > { %v1172_v56 = vadd.f32 %v8889_v55, %v11129_v37  ;;  %v1166_v57 = vpop.f32.mrb[17].mxu0  ;;  %v11202_v10 = vpop.f32.mrb[16].mxu1 }
 0x27b   : > { %v1167_v42 = vadd.f32 %v11129_v37, %v1166_v57  ;;  %8988 = vmatprep.mubr.msk.f32.mxu1 %vm827_vm0, %v1419_v54  ;;  %v11206_v12 = vpop.f32.mrb[17].mxu1 }
 0x27c   : > { %8989 = vmatmul.mubr.msk.f32.gmra.mrb[46].mxu1 %vm827_vm0, %v1420_v39  ;;  %v1422_v45 = vmax.f32 %v1172_v56, 0.0 }
 0x27d   : > { %v1421_v60 = vmax.f32 %v1167_v42, 0.0  ;;  %v8892_v61 = vpop.f32.mrb[18].mxu0 }
 0x27e   : > { %v1182_v62 = vadd.f32 %v8892_v61, %v11129_v37  ;;  %v1176_v63 = vpop.f32.mrb[19].mxu0  ;;  %v11210_v20 = vpop.f32.mrb[18].mxu1  ;;  %v1247_v61 = vadd.f32 %v11129_v37, %v11142_v9 }
 0x27f   : > { %v1177_v1 = vadd.f32 %v11129_v37, %v1176_v63  ;;  %8991 = vmatprep.mubr.msk.f32.mxu1 %vm827_vm0, %v1421_v60  ;;  %v11214_v22 = vpop.f32.mrb[19].mxu1 }
 0x280   : > { %8992 = vmatmul.mubr.msk.f32.gmra.mrb[48].mxu1 %vm827_vm0, %v1422_v45  ;;  %v1424_v5 = vmax.f32 %v1182_v62, 0.0 }
 0x281   : > { %v1423_v3 = vmax.f32 %v1177_v1, 0.0  ;;  %v8895_v4 = vpop.f32.mrb[20].mxu0 }
 0x282   : > { %v1192_v6 = vadd.f32 %v8895_v4, %v11129_v37  ;;  %v1186_v8 = vpop.f32.mrb[21].mxu0  ;;  %v11218_v34 = vpop.f32.mrb[20].mxu1 }
 0x283   : > { %v1187_v11 = vadd.f32 %v11129_v37, %v1186_v8  ;;  %8994 = vmatprep.mubr.msk.f32.mxu1 %vm827_vm0, %v1423_v3  ;;  %v11222_v40 = vpop.f32.mrb[21].mxu1  ;;  %v1257_v8 = vadd.f32 %v11129_v37, %v11150_v17  ;;  %v1262_v17 = vadd.f32 %v11146_v15, %v11129_v37  ;;  %v1287_v15 = vadd.f32 %v11129_v37, %v11174_v49 }
 0x284   : > { %8995 = vmatmul.mubr.msk.f32.gmra.mrb[50].mxu1 %vm827_vm0, %v1424_v5  ;;  %v1426_v16 = vmax.f32 %v1192_v6, 0.0  ;;  %v1437_v6 = vmax.f32 %v1247_v61, 0.0 }
 0x285   : > { %v1425_v13 = vmax.f32 %v1187_v11, 0.0  ;;  %v8898_v14 = vpop.f32.mrb[22].mxu0  ;;  %v1252_v11 = vadd.f32 %v11138_v7, %v11129_v37 }
 0x286   : > { %v1202_v18 = vadd.f32 %v8898_v14, %v11129_v37  ;;  %v1196_v19 = vpop.f32.mrb[23].mxu0  ;;  %v11226_v50 = vpop.f32.mrb[22].mxu1 }
 0x287   : > { %v1197_v21 = vadd.f32 %v11129_v37, %v1196_v19  ;;  %8997 = vmatprep.mubr.msk.f32.mxu1 %vm827_vm0, %v1425_v13  ;;  %v11230_v51 = vpop.f32.mrb[23].mxu1  ;;  %v1438_v19 = vmax.f32 %v1252_v11, 0.0 }
 0x288   : > { %8998 = vmatmul.mubr.msk.f32.gmra.mrb[52].mxu1 %vm827_vm0, %v1426_v16  ;;  %v1428_v28 = vmax.f32 %v1202_v18, 0.0  ;;  %v1439_v16 = vmax.f32 %v1257_v8, 0.0  ;;  %v1267_v18 = vadd.f32 %v11129_v37, %v11158_v25  ;;  %v1272_v25 = vadd.f32 %v11154_v23, %v11129_v37 }
 0x289   : > { %v1427_v24 = vmax.f32 %v1197_v21, 0.0  ;;  %v8901_v27 = vpop.f32.mrb[24].mxu0  ;;  %v1297_v23 = vadd.f32 %v11129_v37, %v11182_v33 }
 0x28a   : > { %v1212_v29 = vadd.f32 %v8901_v27, %v11129_v37  ;;  %v1206_v32 = vpop.f32.mrb[25].mxu0  ;;  %v11234_v39 = vpop.f32.mrb[24].mxu1  ;;  %v1277_v27 = vadd.f32 %v11129_v37, %v11166_v38 }
 0x28b   : > { %v1207_v36 = vadd.f32 %v11129_v37, %v1206_v32  ;;  %9000 = vmatprep.mubr.msk.f32.mxu1 %vm827_vm0, %v1427_v24  ;;  %v11238_v57 = vpop.f32.mrb[25].mxu1  ;;  %v1441_v24 = vmax.f32 %v1267_v18, 0.0  ;;  %v1442_v32 = vmax.f32 %v1272_v25, 0.0 }
 0x28c   : > { %9001 = vmatmul.mubr.msk.f32.gmra.mrb[54].mxu1 %vm827_vm0, %v1428_v28  ;;  %v1430_v44 = vmax.f32 %v1212_v29, 0.0  ;;  %v1440_v28 = vmax.f32 %v1262_v17, 0.0  ;;  %v1443_v29 = vmax.f32 %v1277_v27, 0.0 }
 0x28d   : > { %v1429_v41 = vmax.f32 %v1207_v36, 0.0  ;;  %v8904_v43 = vpop.f32.mrb[26].mxu0  ;;  %v1282_v36 = vadd.f32 %v11162_v35, %v11129_v37  ;;  %v1307_v35 = vadd.f32 %v11129_v37, %v11190_v59 }
 0x28e   : > { %v1222_v46 = vadd.f32 %v8904_v43, %v11129_v37  ;;  %v1216_v48 = vpop.f32.mrb[27].mxu0  ;;  %v11244_v1 = vpop.f32.mrb[26].mxu1  ;;  %v1292_v43 = vadd.f32 %v11170_v47, %v11129_v37  ;;  %v1317_v47 = vadd.f32 %v11129_v37, %v11198_v2 }
 0x28f   : > { %v1217_v26 = vadd.f32 %v11129_v37, %v1216_v48  ;;  %9003 = vmatprep.mubr.msk.f32.mxu1 %vm827_vm0, %v1429_v41  ;;  %v11248_v4 = vpop.f32.mrb[27].mxu1  ;;  %v1445_v41 = vmax.f32 %v1287_v15, 0.0  ;;  %v1444_v38 = vmax.f32 %v1282_v36, 0.0  ;;  %v1449_v48 = vmax.f32 %v1307_v35, 0.0 }
 0x290   : > { %9004 = vmatmul.mubr.msk.f32.gmra.mrb[56].mxu1 %vm827_vm0, %v1430_v44  ;;  %v1432_v53 = vmax.f32 %v1222_v46, 0.0  ;;  %v1447_v44 = vmax.f32 %v1297_v23, 0.0  ;;  %v1446_v49 = vmax.f32 %v1292_v43, 0.0  ;;  %v1302_v46 = vadd.f32 %v11178_v31, %v11129_v37 }
 0x291   : > { %v1431_v52 = vmax.f32 %v1217_v26, 0.0  ;;  %v8907_v30 = vpop.f32.mrb[28].mxu0  ;;  %v1312_v26 = vadd.f32 %v11186_v58, %v11129_v37  ;;  %v1327_v31 = vadd.f32 %v11129_v37, %v11206_v12  ;;  %v1337_v58 = vadd.f32 %v11129_v37, %v11214_v22 }
 0x292   : > { %v1232_v54 = vadd.f32 %v8907_v30, %v11129_v37  ;;  %v1226_v55 = vpop.f32.mrb[29].mxu0  ;;  %v11255_v13 = vpop.f32.mrb[28].mxu1  ;;  %v1448_v33 = vmax.f32 %v1302_v46, 0.0  ;;  %v1322_v30 = vadd.f32 %v11194_v0, %v11129_v37  ;;  %v1347_v0 = vadd.f32 %v11129_v37, %v11222_v40 }
 0x293   : > { %v1227_v56 = vadd.f32 %v11129_v37, %v1226_v55  ;;  %9006 = vmatprep.mubr.msk.f32.mxu1 %vm827_vm0, %v1431_v52  ;;  %v11258_v14 = vpop.f32.mrb[29].mxu1  ;;  %v1451_v52 = vmax.f32 %v1317_v47, 0.0  ;;  %v1450_v59 = vmax.f32 %v1312_v26, 0.0  ;;  %v1455_v55 = vmax.f32 %v1337_v58, 0.0 }
 0x294   : > { %9007 = vmatmul.mubr.msk.f32.gmra.mrb[58].mxu1 %vm827_vm0, %v1432_v53  ;;  %v1434_v45 = vmax.f32 %v1232_v54, 0.0  ;;  %v1453_v53 = vmax.f32 %v1327_v31, 0.0  ;;  %v1452_v2 = vmax.f32 %v1322_v30, 0.0  ;;  %v1332_v54 = vadd.f32 %v11202_v10, %v11129_v37 }
 0x295   : > { %v1433_v42 = vmax.f32 %v1227_v56, 0.0  ;;  %v8910_v60 = vpop.f32.mrb[30].mxu0  ;;  %v1342_v56 = vadd.f32 %v11210_v20, %v11129_v37  ;;  %v1357_v10 = vadd.f32 %v11129_v37, %v11230_v51  ;;  %v1367_v20 = vadd.f32 %v11129_v37, %v11238_v57 }
 0x296   : > { %v1242_v62 = vadd.f32 %v8910_v60, %v11129_v37  ;;  %v1236_v63 = vpop.f32.mrb[31].mxu0  ;;  %v11266_v21 = vpop.f32.mrb[30].mxu1  ;;  %v1454_v12 = vmax.f32 %v1332_v54, 0.0  ;;  %v1352_v60 = vadd.f32 %v11218_v34, %v11129_v37  ;;  %v1377_v34 = vadd.f32 %v11129_v37, %v11248_v4 }
 0x297   : > { %v1237_v3 = vadd.f32 %v11129_v37, %v1236_v63  ;;  %9009 = vmatprep.mubr.msk.f32.mxu1 %vm827_vm0, %v1433_v42  ;;  %v11268_v7 = vpop.f32.mrb[31].mxu1  ;;  %v1457_v42 = vmax.f32 %v1347_v0, 0.0  ;;  %v1456_v22 = vmax.f32 %v1342_v56, 0.0  ;;  %v1459_v61 = vmax.f32 %v1357_v10, 0.0 }
 0x298   : > { %9010 = vmatmul.mubr.msk.f32.gmra.mrb[60].mxu1 %vm827_vm0, %v1434_v45  ;;  %v1436_v9 = vmax.f32 %v1242_v62, 0.0  ;;  %v1458_v40 = vmax.f32 %v1352_v60, 0.0  ;;  %v1362_v45 = vadd.f32 %v11226_v50, %v11129_v37  ;;  %v1461_v62 = vmax.f32 %v1367_v20, 0.0 }
 0x299   : > { %v1435_v5 = vmax.f32 %v1237_v3, 0.0  ;;  %v1372_v63 = vadd.f32 %v11234_v39, %v11129_v37  ;;  %v1463_v3 = vmax.f32 %v1377_v34, 0.0  ;;  %v1387_v50 = vadd.f32 %v11129_v37, %v11258_v14 }
 0x29a   : > { %v1460_v51 = vmax.f32 %v1362_v45, 0.0  ;;  %v1397_v39 = vadd.f32 %v11129_v37, %v11268_v7  ;;  %v1392_v8 = vadd.f32 %v11255_v13, %v11129_v37 }
 0x29b   : > { %9012 = vmatprep.mubr.msk.f32.mxu1 %vm827_vm0, %v1435_v5  ;;  %v1462_v57 = vmax.f32 %v1372_v63, 0.0  ;;  %v1382_v5 = vadd.f32 %v11244_v1, %v11129_v37  ;;  %v1402_v1 = vadd.f32 %v11266_v21, %v11129_v37 }
 0x29c   : > { %9013 = vmatmul.mubr.msk.f32.gmra.mrb[62].mxu1 %vm827_vm0, %v1436_v9  ;;  %v1467_v9 = vmax.f32 %v1397_v39, 0.0  ;;  %v1466_v11 = vmax.f32 %v1392_v8, 0.0 }
 0x29d   : > { %9015 = vmatprep.mubr.msk.f32.mxu1 %vm827_vm0, %v1437_v6  ;;  %v1465_v6 = vmax.f32 %v1387_v50, 0.0  ;;  %v1464_v4 = vmax.f32 %v1382_v5, 0.0  ;;  %v1468_v14 = vmax.f32 %v1402_v1, 0.0 }
 0x2a0   : > { %9016 = vmatmul.mubr.msk.f32.gmra.mrb[64].mxu1 %vm827_vm0, %v1438_v19 }
 0x2a1   : > { %9018 = vmatprep.mubr.msk.f32.mxu1 %vm827_vm0, %v1439_v16  ;;  %v11355_v16 = vld [vmem:[#allocation11] ss:$0 sm:$0xff] }
 0x2a4   : > { %9019 = vmatmul.mubr.msk.f32.gmra.mrb[66].mxu1 %vm827_vm0, %v1440_v28 }
 0x2a5   : > { %9021 = vmatprep.mubr.msk.f32.mxu1 %vm827_vm0, %v1441_v24 }
 0x2a8   : > { %9022 = vmatmul.mubr.msk.f32.gmra.mrb[68].mxu1 %vm827_vm0, %v1442_v32 }
 0x2a9   : > { %9024 = vmatprep.mubr.msk.f32.mxu1 %vm827_vm0, %v1443_v29 }
 0x2ac   : > { %9025 = vmatmul.mubr.msk.f32.gmra.mrb[70].mxu1 %vm827_vm0, %v1444_v38 }
 0x2ad   : > { %9027 = vmatprep.mubr.msk.f32.mxu1 %vm827_vm0, %v1445_v41 }
 0x2b0   : > { %9028 = vmatmul.mubr.msk.f32.gmra.mrb[72].mxu1 %vm827_vm0, %v1446_v49 }
 0x2b1   : > { %9030 = vmatprep.mubr.msk.f32.mxu1 %vm827_vm0, %v1447_v44 }
 0x2b4   : > { %9031 = vmatmul.mubr.msk.f32.gmra.mrb[74].mxu1 %vm827_vm0, %v1448_v33 }
 0x2b5   : > { %9033 = vmatprep.mubr.msk.f32.mxu1 %vm827_vm0, %v1449_v48 }
 0x2b8   : > { %9034 = vmatmul.mubr.msk.f32.gmra.mrb[76].mxu1 %vm827_vm0, %v1450_v59 }
 0x2b9   : > { %9036 = vmatprep.mubr.msk.f32.mxu1 %vm827_vm0, %v1451_v52 }
 0x2bc   : > { %9037 = vmatmul.mubr.msk.f32.gmra.mrb[78].mxu1 %vm827_vm0, %v1452_v2 }
 0x2bd   : > { %9039 = vmatprep.mubr.msk.f32.mxu1 %vm827_vm0, %v1453_v53 }
 0x2c0   : > { %9040 = vmatmul.mubr.msk.f32.gmra.mrb[80].mxu1 %vm827_vm0, %v1454_v12 }
 0x2c1   : > { %9042 = vmatprep.mubr.msk.f32.mxu1 %vm827_vm0, %v1455_v55 }
 0x2c4   : > { %9043 = vmatmul.mubr.msk.f32.gmra.mrb[82].mxu1 %vm827_vm0, %v1456_v22 }
 0x2c5   : > { %9045 = vmatprep.mubr.msk.f32.mxu1 %vm827_vm0, %v1457_v42 }
 0x2c8   : > { %9046 = vmatmul.mubr.msk.f32.gmra.mrb[84].mxu1 %vm827_vm0, %v1458_v40 }
 0x2c9   : > { %9048 = vmatprep.mubr.msk.f32.mxu1 %vm827_vm0, %v1459_v61 }
 0x2cc   : > { %9049 = vmatmul.mubr.msk.f32.gmra.mrb[86].mxu1 %vm827_vm0, %v1460_v51 }
 0x2cd   : > { %9051 = vmatprep.mubr.msk.f32.mxu1 %vm827_vm0, %v1461_v62 }
 0x2d0   : > { %9052 = vmatmul.mubr.msk.f32.gmra.mrb[88].mxu1 %vm827_vm0, %v1462_v57 }
 0x2d1   : > { %9054 = vmatprep.mubr.msk.f32.mxu1 %vm827_vm0, %v1463_v3 }
 0x2d4   : > { %9055 = vmatmul.mubr.msk.f32.gmra.mrb[90].mxu1 %vm827_vm0, %v1464_v4 }
 0x2d5   : > { %9057 = vmatprep.mubr.msk.f32.mxu1 %vm827_vm0, %v1465_v6 }
 0x2d8   : > { %9058 = vmatmul.mubr.msk.f32.gmra.mrb[92].mxu1 %vm827_vm0, %v1466_v11 }
 0x2d9   : > { %9060 = vmatprep.mubr.msk.f32.mxu1 %vm827_vm0, %v1467_v9 }
 0x2dc   : > { %9061 = vmatmul.mubr.msk.f32.gmra.mrb[94].mxu1 %vm827_vm0, %v1468_v14 }
 0x333   : > { %v8969_v18 = vpop.f32.mrb[32].mxu1 }
 0x334   : > { %v1744_v13 = vadd.f32 %v8969_v18, %v11355_v16  ;;  %v1738_v19 = vpop.f32.mrb[33].mxu1 }
 0x335   : > { %v1739_v17 = vadd.f32 %v11355_v16, %v1738_v19 }
 0x336   : > { %v2058_v27 = vmax.f32 %v1744_v13, 0.0 }
 0x337   : > { %v2057_v7 = vmax.f32 %v1739_v17, 0.0  ;;  %v8972_v24 = vpop.f32.mrb[34].mxu1 }
 0x338   : > { %v1754_v37 = vadd.f32 %v8972_v24, %v11355_v16  ;;  %v1748_v21 = vpop.f32.mrb[35].mxu1 }
 0x339   : > { %v1749_v28 = vadd.f32 %v11355_v16, %v1748_v21  ;;  %9071 = vmatprep.mubr.msk.f32.mxu0 %vm827_vm0, %v2057_v7 }
 0x33a   : > { %9072 = vmatmul.mubr.msk.f32.vlgmr.msra.gmra.mrb[32].mxu0 %vm827_vm0, %v2058_v27  ;;  %v2060_v15 = vmax.f32 %v1754_v37, 0.0 }
 0x33b   : > { %v2059_v25 = vmax.f32 %v1749_v28, 0.0  ;;  %v8975_v29 = vpop.f32.mrb[36].mxu1 }
 0x33c   : > { %v1764_v32 = vadd.f32 %v8975_v29, %v11355_v16  ;;  %v1758_v36 = vpop.f32.mrb[37].mxu1 }
 0x33d   : > { %v1759_v41 = vadd.f32 %v11355_v16, %v1758_v36  ;;  %9074 = vmatprep.mubr.msk.f32.mxu0 %vm827_vm0, %v2059_v25 }
 0x33e   : > { %9075 = vmatmul.mubr.msk.f32.gmra.mrb[34].mxu0 %vm827_vm0, %v2060_v15  ;;  %v2062_v43 = vmax.f32 %v1764_v32, 0.0 }
 0x33f   : > { %v2061_v23 = vmax.f32 %v1759_v41, 0.0  ;;  %v8978_v38 = vpop.f32.mrb[38].mxu1 }
 0x340   : > { %v1774_v44 = vadd.f32 %v8978_v38, %v11355_v16  ;;  %v1768_v35 = vpop.f32.mrb[39].mxu1 }
 0x341   : > { %v1769_v49 = vadd.f32 %v11355_v16, %v1768_v35  ;;  %9077 = vmatprep.mubr.msk.f32.mxu0 %vm827_vm0, %v2061_v23 }
 0x342   : > { %9078 = vmatmul.mubr.msk.f32.gmra.mrb[36].mxu0 %vm827_vm0, %v2062_v43  ;;  %v2064_v47 = vmax.f32 %v1774_v44, 0.0 }
 0x343   : > { %v2063_v46 = vmax.f32 %v1769_v49, 0.0  ;;  %v8981_v48 = vpop.f32.mrb[40].mxu1 }
 0x344   : > { %v1784_v33 = vadd.f32 %v8981_v48, %v11355_v16  ;;  %v1778_v26 = vpop.f32.mrb[41].mxu1 }
 0x345   : > { %v1779_v52 = vadd.f32 %v11355_v16, %v1778_v26  ;;  %9080 = vmatprep.mubr.msk.f32.mxu0 %vm827_vm0, %v2063_v46 }
 0x346   : > { %9081 = vmatmul.mubr.msk.f32.gmra.mrb[38].mxu0 %vm827_vm0, %v2064_v47  ;;  %v2066_v30 = vmax.f32 %v1784_v33, 0.0 }
 0x347   : > { %v2065_v31 = vmax.f32 %v1779_v52, 0.0  ;;  %v8984_v59 = vpop.f32.mrb[42].mxu1 }
 0x348   : > { %v1794_v53 = vadd.f32 %v8984_v59, %v11355_v16  ;;  %v1788_v58 = vpop.f32.mrb[43].mxu1 }
 0x349   : > { %v1789_v2 = vadd.f32 %v11355_v16, %v1788_v58  ;;  %9083 = vmatprep.mubr.msk.f32.mxu0 %vm827_vm0, %v2065_v31 }
 0x34a   : > { %9084 = vmatmul.mubr.msk.f32.gmra.mrb[40].mxu0 %vm827_vm0, %v2066_v30  ;;  %v2068_v0 = vmax.f32 %v1794_v53, 0.0 }
 0x34b   : > { %v2067_v54 = vmax.f32 %v1789_v2, 0.0  ;;  %v8987_v55 = vpop.f32.mrb[44].mxu1 }
 0x34c   : > { %v1804_v12 = vadd.f32 %v8987_v55, %v11355_v16  ;;  %v1798_v56 = vpop.f32.mrb[45].mxu1 }
 0x34d   : > { %v1799_v42 = vadd.f32 %v11355_v16, %v1798_v56  ;;  %9086 = vmatprep.mubr.msk.f32.mxu0 %vm827_vm0, %v2067_v54 }
 0x34e   : > { %9087 = vmatmul.mubr.msk.f32.gmra.mrb[42].mxu0 %vm827_vm0, %v2068_v0  ;;  %v2070_v60 = vmax.f32 %v1804_v12, 0.0 }
 0x34f   : > { %v2069_v10 = vmax.f32 %v1799_v42, 0.0  ;;  %v8990_v22 = vpop.f32.mrb[46].mxu1 }
 0x350   : > { %v1814_v61 = vadd.f32 %v8990_v22, %v11355_v16  ;;  %v1808_v20 = vpop.f32.mrb[47].mxu1 }
 0x351   : > { %v1809_v40 = vadd.f32 %v11355_v16, %v1808_v20  ;;  %9089 = vmatprep.mubr.msk.f32.mxu0 %vm827_vm0, %v2069_v10 }
 0x352   : > { %9090 = vmatmul.mubr.msk.f32.gmra.mrb[44].mxu0 %vm827_vm0, %v2070_v60  ;;  %v2072_v34 = vmax.f32 %v1814_v61, 0.0 }
 0x353   : > { %v2071_v45 = vmax.f32 %v1809_v40, 0.0  ;;  %v8993_v62 = vpop.f32.mrb[48].mxu1 }
 0x354   : > { %v1824_v51 = vadd.f32 %v8993_v62, %v11355_v16  ;;  %v1818_v63 = vpop.f32.mrb[49].mxu1 }
 0x355   : > { %v1819_v3 = vadd.f32 %v11355_v16, %v1818_v63  ;;  %9092 = vmatprep.mubr.msk.f32.mxu0 %vm827_vm0, %v2071_v45 }
 0x356   : > { %9093 = vmatmul.mubr.msk.f32.gmra.mrb[46].mxu0 %vm827_vm0, %v2072_v34  ;;  %v2074_v5 = vmax.f32 %v1824_v51, 0.0 }
 0x357   : > { %v2073_v50 = vmax.f32 %v1819_v3, 0.0  ;;  %v8996_v57 = vpop.f32.mrb[50].mxu1 }
 0x358   : > { %v1834_v6 = vadd.f32 %v8996_v57, %v11355_v16  ;;  %v1828_v39 = vpop.f32.mrb[51].mxu1 }
 0x359   : > { %v1829_v4 = vadd.f32 %v11355_v16, %v1828_v39  ;;  %9095 = vmatprep.mubr.msk.f32.mxu0 %vm827_vm0, %v2073_v50 }
 0x35a   : > { %9096 = vmatmul.mubr.msk.f32.gmra.mrb[48].mxu0 %vm827_vm0, %v2074_v5  ;;  %v2076_v11 = vmax.f32 %v1834_v6, 0.0 }
 0x35b   : > { %v2075_v8 = vmax.f32 %v1829_v4, 0.0  ;;  %v8999_v9 = vpop.f32.mrb[52].mxu1 }
 0x35c   : > { %v1844_v1 = vadd.f32 %v8999_v9, %v11355_v16  ;;  %v1838_v14 = vpop.f32.mrb[53].mxu1 }
 0x35d   : > { %v1839_v18 = vadd.f32 %v11355_v16, %v1838_v14  ;;  %9098 = vmatprep.mubr.msk.f32.mxu0 %vm827_vm0, %v2075_v8 }
 0x35e   : > { %9099 = vmatmul.mubr.msk.f32.gmra.mrb[50].mxu0 %vm827_vm0, %v2076_v11  ;;  %v2078_v17 = vmax.f32 %v1844_v1, 0.0 }
 0x35f   : > { %v2077_v13 = vmax.f32 %v1839_v18, 0.0  ;;  %v9002_v19 = vpop.f32.mrb[54].mxu1 }
 0x360   : > { %v1854_v7 = vadd.f32 %v9002_v19, %v11355_v16  ;;  %v1848_v24 = vpop.f32.mrb[55].mxu1 }
 0x361   : > { %v1849_v27 = vadd.f32 %v11355_v16, %v1848_v24  ;;  %9101 = vmatprep.mubr.msk.f32.mxu0 %vm827_vm0, %v2077_v13 }
 0x362   : > { %9102 = vmatmul.mubr.msk.f32.gmra.mrb[52].mxu0 %vm827_vm0, %v2078_v17  ;;  %v2080_v28 = vmax.f32 %v1854_v7, 0.0 }
 0x363   : > { %v2079_v37 = vmax.f32 %v1849_v27, 0.0  ;;  %v9005_v21 = vpop.f32.mrb[56].mxu1 }
 0x364   : > { %v1864_v25 = vadd.f32 %v9005_v21, %v11355_v16  ;;  %v1858_v29 = vpop.f32.mrb[57].mxu1 }
 0x365   : > { %v1859_v15 = vadd.f32 %v11355_v16, %v1858_v29  ;;  %9104 = vmatprep.mubr.msk.f32.mxu0 %vm827_vm0, %v2079_v37 }
 0x366   : > { %9105 = vmatmul.mubr.msk.f32.gmra.mrb[54].mxu0 %vm827_vm0, %v2080_v28  ;;  %v2082_v41 = vmax.f32 %v1864_v25, 0.0 }
 0x367   : > { %v2081_v32 = vmax.f32 %v1859_v15, 0.0  ;;  %v9008_v36 = vpop.f32.mrb[58].mxu1 }
 0x368   : > { %v1874_v23 = vadd.f32 %v9008_v36, %v11355_v16  ;;  %v1868_v38 = vpop.f32.mrb[59].mxu1 }
 0x369   : > { %v1869_v43 = vadd.f32 %v11355_v16, %v1868_v38  ;;  %9107 = vmatprep.mubr.msk.f32.mxu0 %vm827_vm0, %v2081_v32 }
 0x36a   : > { %9108 = vmatmul.mubr.msk.f32.gmra.mrb[56].mxu0 %vm827_vm0, %v2082_v41  ;;  %v2084_v49 = vmax.f32 %v1874_v23, 0.0 }
 0x36b   : > { %v2083_v44 = vmax.f32 %v1869_v43, 0.0  ;;  %v9011_v35 = vpop.f32.mrb[60].mxu1 }
 0x36c   : > { %v1884_v46 = vadd.f32 %v9011_v35, %v11355_v16  ;;  %v1878_v48 = vpop.f32.mrb[61].mxu1 }
 0x36d   : > { %v1879_v47 = vadd.f32 %v11355_v16, %v1878_v48  ;;  %9110 = vmatprep.mubr.msk.f32.mxu0 %vm827_vm0, %v2083_v44 }
 0x36e   : > { %9111 = vmatmul.mubr.msk.f32.gmra.mrb[58].mxu0 %vm827_vm0, %v2084_v49  ;;  %v2086_v52 = vmax.f32 %v1884_v46, 0.0 }
 0x36f   : > { %v2085_v33 = vmax.f32 %v1879_v47, 0.0  ;;  %v9014_v26 = vpop.f32.mrb[62].mxu1 }
 0x370   : > { %v1894_v31 = vadd.f32 %v9014_v26, %v11355_v16  ;;  %v1888_v59 = vpop.f32.mrb[63].mxu1 }
 0x371   : > { %v1889_v30 = vadd.f32 %v11355_v16, %v1888_v59  ;;  %9113 = vmatprep.mubr.msk.f32.mxu0 %vm827_vm0, %v2085_v33 }
 0x372   : > { %9114 = vmatmul.mubr.msk.f32.gmra.mrb[60].mxu0 %vm827_vm0, %v2086_v52  ;;  %v2088_v2 = vmax.f32 %v1894_v31, 0.0 }
 0x373   : > { %v2087_v53 = vmax.f32 %v1889_v30, 0.0  ;;  %v9017_v58 = vpop.f32.mrb[64].mxu1 }
 0x374   : > { %v1904_v54 = vadd.f32 %v9017_v58, %v11355_v16  ;;  %v1898_v55 = vpop.f32.mrb[65].mxu1 }
 0x375   : > { %v1899_v0 = vadd.f32 %v11355_v16, %v1898_v55  ;;  %9116 = vmatprep.mubr.msk.f32.mxu0 %vm827_vm0, %v2087_v53 }
 0x376   : > { %9117 = vmatmul.mubr.msk.f32.gmra.mrb[62].mxu0 %vm827_vm0, %v2088_v2  ;;  %v2090_v42 = vmax.f32 %v1904_v54, 0.0 }
 0x377   : > { %v2089_v12 = vmax.f32 %v1899_v0, 0.0  ;;  %v9020_v56 = vpop.f32.mrb[66].mxu1 }
 0x378   : > { %v1914_v10 = vadd.f32 %v9020_v56, %v11355_v16  ;;  %v1908_v22 = vpop.f32.mrb[67].mxu1 }
 0x379   : > { %v1909_v60 = vadd.f32 %v11355_v16, %v1908_v22  ;;  %9119 = vmatprep.mubr.msk.f32.mxu0 %vm827_vm0, %v2089_v12 }
 0x37a   : > { %9120 = vmatmul.mubr.msk.f32.gmra.mrb[64].mxu0 %vm827_vm0, %v2090_v42  ;;  %v2092_v40 = vmax.f32 %v1914_v10, 0.0 }
 0x37b   : > { %v2091_v61 = vmax.f32 %v1909_v60, 0.0  ;;  %v9023_v20 = vpop.f32.mrb[68].mxu1 }
 0x37c   : > { %v1924_v45 = vadd.f32 %v9023_v20, %v11355_v16  ;;  %v1918_v62 = vpop.f32.mrb[69].mxu1 }
 0x37d   : > { %v1919_v34 = vadd.f32 %v11355_v16, %v1918_v62  ;;  %9122 = vmatprep.mubr.msk.f32.mxu0 %vm827_vm0, %v2091_v61 }
 0x37e   : > { %9123 = vmatmul.mubr.msk.f32.gmra.mrb[66].mxu0 %vm827_vm0, %v2092_v40  ;;  %v2094_v3 = vmax.f32 %v1924_v45, 0.0 }
 0x37f   : > { %v2093_v51 = vmax.f32 %v1919_v34, 0.0  ;;  %v9026_v63 = vpop.f32.mrb[70].mxu1 }
 0x380   : > { %v1934_v50 = vadd.f32 %v9026_v63, %v11355_v16  ;;  %v1928_v57 = vpop.f32.mrb[71].mxu1 }
 0x381   : > { %v1929_v5 = vadd.f32 %v11355_v16, %v1928_v57  ;;  %9125 = vmatprep.mubr.msk.f32.mxu0 %vm827_vm0, %v2093_v51 }
 0x382   : > { %9126 = vmatmul.mubr.msk.f32.gmra.mrb[68].mxu0 %vm827_vm0, %v2094_v3  ;;  %v2096_v4 = vmax.f32 %v1934_v50, 0.0 }
 0x383   : > { %v2095_v6 = vmax.f32 %v1929_v5, 0.0  ;;  %v9029_v39 = vpop.f32.mrb[72].mxu1 }
 0x384   : > { %v1944_v8 = vadd.f32 %v9029_v39, %v11355_v16  ;;  %v1938_v9 = vpop.f32.mrb[73].mxu1 }
 0x385   : > { %v1939_v11 = vadd.f32 %v11355_v16, %v1938_v9  ;;  %9128 = vmatprep.mubr.msk.f32.mxu0 %vm827_vm0, %v2095_v6 }
 0x386   : > { %9129 = vmatmul.mubr.msk.f32.gmra.mrb[70].mxu0 %vm827_vm0, %v2096_v4  ;;  %v2098_v18 = vmax.f32 %v1944_v8, 0.0 }
 0x387   : > { %v2097_v1 = vmax.f32 %v1939_v11, 0.0  ;;  %v9032_v14 = vpop.f32.mrb[74].mxu1 }
 0x388   : > { %v1954_v13 = vadd.f32 %v9032_v14, %v11355_v16  ;;  %v1948_v19 = vpop.f32.mrb[75].mxu1 }
 0x389   : > { %v1949_v17 = vadd.f32 %v11355_v16, %v1948_v19  ;;  %9131 = vmatprep.mubr.msk.f32.mxu0 %vm827_vm0, %v2097_v1 }
 0x38a   : > { %9132 = vmatmul.mubr.msk.f32.gmra.mrb[72].mxu0 %vm827_vm0, %v2098_v18  ;;  %v2100_v27 = vmax.f32 %v1954_v13, 0.0 }
 0x38b   : > { %v2099_v7 = vmax.f32 %v1949_v17, 0.0  ;;  %v9035_v24 = vpop.f32.mrb[76].mxu1  ;;  %v10506_v17 = vmov 0.0  }
 0x38c   : > { %v1964_v37 = vadd.f32 %v9035_v24, %v11355_v16  ;;  %v1958_v21 = vpop.f32.mrb[77].mxu1  ;;  %621 = vst [vmem:[#allocation2] sm:$0xff] %v10506_v17  ;;  %622 = vst [vmem:[#allocation2 + $0x8] sm:$0xff] %v10506_v17 }
 0x38d   : > { %v1959_v28 = vadd.f32 %v11355_v16, %v1958_v21  ;;  %9134 = vmatprep.mubr.msk.f32.mxu0 %vm827_vm0, %v2099_v7  ;;  %623 = vst [vmem:[#allocation2 + $0x10] sm:$0xff] %v10506_v17  ;;  %624 = vst [vmem:[#allocation2 + $0x18] sm:$0xff] %v10506_v17 }
 0x38e   : > { %9135 = vmatmul.mubr.msk.f32.gmra.mrb[74].mxu0 %vm827_vm0, %v2100_v27  ;;  %v2102_v15 = vmax.f32 %v1964_v37, 0.0  ;;  %625 = vst [vmem:[#allocation2 + $0x20] sm:$0xff] %v10506_v17  ;;  %626 = vst [vmem:[#allocation2 + $0x28] sm:$0xff] %v10506_v17 }
 0x38f   : > { %v2101_v25 = vmax.f32 %v1959_v28, 0.0  ;;  %v9038_v29 = vpop.f32.mrb[78].mxu1  ;;  %628 = vst [vmem:[#allocation2 + $0xf0] sm:$0xff] %v10506_v17  ;;  %629 = vst [vmem:[#allocation2 + $0xf8] sm:$0xff] %v10506_v17 }
 0x390   : > { %v1974_v32 = vadd.f32 %v9038_v29, %v11355_v16  ;;  %v1968_v36 = vpop.f32.mrb[79].mxu1  ;;  %630 = vst [vmem:[#allocation2 + $0x100] sm:$0xff] %v10506_v17  ;;  %631 = vst [vmem:[#allocation2 + $0x108] sm:$0xff] %v10506_v17 }
 0x391   : > { %v1969_v41 = vadd.f32 %v11355_v16, %v1968_v36  ;;  %9137 = vmatprep.mubr.msk.f32.mxu0 %vm827_vm0, %v2101_v25  ;;  %632 = vst [vmem:[#allocation2 + $0x110] sm:$0xff] %v10506_v17  ;;  %633 = vst [vmem:[#allocation2 + $0x118] sm:$0xff] %v10506_v17 }
 0x392   : > { %9138 = vmatmul.mubr.msk.f32.gmra.mrb[76].mxu0 %vm827_vm0, %v2102_v15  ;;  %v2104_v43 = vmax.f32 %v1974_v32, 0.0 }
 0x393   : > { %v2103_v23 = vmax.f32 %v1969_v41, 0.0  ;;  %v9041_v38 = vpop.f32.mrb[80].mxu1 }
 0x394   : > { %v1984_v44 = vadd.f32 %v9041_v38, %v11355_v16  ;;  %v1978_v35 = vpop.f32.mrb[81].mxu1 }
 0x395   : > { %v1979_v49 = vadd.f32 %v11355_v16, %v1978_v35  ;;  %9140 = vmatprep.mubr.msk.f32.mxu0 %vm827_vm0, %v2103_v23 }
 0x396   : > { %9141 = vmatmul.mubr.msk.f32.gmra.mrb[78].mxu0 %vm827_vm0, %v2104_v43  ;;  %v2106_v47 = vmax.f32 %v1984_v44, 0.0 }
 0x397   : > { %v2105_v46 = vmax.f32 %v1979_v49, 0.0  ;;  %v9044_v48 = vpop.f32.mrb[82].mxu1 }
 0x398   : > { %v1994_v33 = vadd.f32 %v9044_v48, %v11355_v16  ;;  %v1988_v26 = vpop.f32.mrb[83].mxu1 }
 0x399   : > { %v1989_v52 = vadd.f32 %v11355_v16, %v1988_v26  ;;  %9143 = vmatprep.mubr.msk.f32.mxu0 %vm827_vm0, %v2105_v46 }
 0x39a   : > { %9144 = vmatmul.mubr.msk.f32.gmra.mrb[80].mxu0 %vm827_vm0, %v2106_v47  ;;  %v2108_v30 = vmax.f32 %v1994_v33, 0.0 }
 0x39b   : > { %v2107_v31 = vmax.f32 %v1989_v52, 0.0  ;;  %v9047_v59 = vpop.f32.mrb[84].mxu1 }
 0x39c   : > { %v2004_v53 = vadd.f32 %v9047_v59, %v11355_v16  ;;  %v1998_v58 = vpop.f32.mrb[85].mxu1 }
 0x39d   : > { %v1999_v2 = vadd.f32 %v11355_v16, %v1998_v58  ;;  %9146 = vmatprep.mubr.msk.f32.mxu0 %vm827_vm0, %v2107_v31 }
 0x39e   : > { %9147 = vmatmul.mubr.msk.f32.gmra.mrb[82].mxu0 %vm827_vm0, %v2108_v30  ;;  %v2110_v0 = vmax.f32 %v2004_v53, 0.0 }
 0x39f   : > { %v2109_v54 = vmax.f32 %v1999_v2, 0.0  ;;  %v9050_v55 = vpop.f32.mrb[86].mxu1 }
 0x3a0   : > { %v2014_v12 = vadd.f32 %v9050_v55, %v11355_v16  ;;  %v2008_v56 = vpop.f32.mrb[87].mxu1 }
 0x3a1   : > { %v2009_v42 = vadd.f32 %v11355_v16, %v2008_v56  ;;  %9149 = vmatprep.mubr.msk.f32.mxu0 %vm827_vm0, %v2109_v54 }
 0x3a2   : > { %9150 = vmatmul.mubr.msk.f32.gmra.mrb[84].mxu0 %vm827_vm0, %v2110_v0  ;;  %v2112_v60 = vmax.f32 %v2014_v12, 0.0 }
 0x3a3   : > { %v2111_v10 = vmax.f32 %v2009_v42, 0.0  ;;  %v9053_v22 = vpop.f32.mrb[88].mxu1 }
 0x3a4   : > { %v2024_v61 = vadd.f32 %v9053_v22, %v11355_v16  ;;  %v2018_v20 = vpop.f32.mrb[89].mxu1 }
 0x3a5   : > { %v2019_v40 = vadd.f32 %v11355_v16, %v2018_v20  ;;  %9152 = vmatprep.mubr.msk.f32.mxu0 %vm827_vm0, %v2111_v10 }
 0x3a6   : > { %9153 = vmatmul.mubr.msk.f32.gmra.mrb[86].mxu0 %vm827_vm0, %v2112_v60  ;;  %v2114_v34 = vmax.f32 %v2024_v61, 0.0 }
 0x3a7   : > { %v2113_v45 = vmax.f32 %v2019_v40, 0.0  ;;  %v9056_v62 = vpop.f32.mrb[90].mxu1 }
 0x3a8   : > { %v2034_v51 = vadd.f32 %v9056_v62, %v11355_v16  ;;  %v2028_v63 = vpop.f32.mrb[91].mxu1 }
 0x3a9   : > { %v2029_v3 = vadd.f32 %v11355_v16, %v2028_v63  ;;  %9155 = vmatprep.mubr.msk.f32.mxu0 %vm827_vm0, %v2113_v45 }
 0x3aa   : > { %9156 = vmatmul.mubr.msk.f32.gmra.mrb[88].mxu0 %vm827_vm0, %v2114_v34  ;;  %v2116_v5 = vmax.f32 %v2034_v51, 0.0 }
 0x3ab   : > { %v2115_v50 = vmax.f32 %v2029_v3, 0.0  ;;  %v9059_v57 = vpop.f32.mrb[92].mxu1 }
 0x3ac   : > { %v2044_v6 = vadd.f32 %v9059_v57, %v11355_v16  ;;  %v2038_v39 = vpop.f32.mrb[93].mxu1 }
 0x3ad   : > { %v2039_v4 = vadd.f32 %v11355_v16, %v2038_v39  ;;  %9158 = vmatprep.mubr.msk.f32.mxu0 %vm827_vm0, %v2115_v50 }
 0x3ae   : > { %9159 = vmatmul.mubr.msk.f32.gmra.mrb[90].mxu0 %vm827_vm0, %v2116_v5  ;;  %v2118_v11 = vmax.f32 %v2044_v6, 0.0 }
 0x3af   : > { %v2117_v8 = vmax.f32 %v2039_v4, 0.0  ;;  %v9062_v9 = vpop.f32.mrb[94].mxu1 }
 0x3b0   : > { %v2054_v1 = vadd.f32 %v9062_v9, %v11355_v16  ;;  %v2048_v14 = vpop.f32.mrb[95].mxu1 }
 0x3b1   : > { %v2049_v18 = vadd.f32 %v11355_v16, %v2048_v14  ;;  %9161 = vmatprep.mubr.msk.f32.mxu0 %vm827_vm0, %v2117_v8  ;;  %v11485_v16 = vld [vmem:[#allocation14] ss:$0 sm:$0xff] }
 0x3b2   : > { %9162 = vmatmul.mubr.msk.f32.gmra.mrb[92].mxu0 %vm827_vm0, %v2118_v11  ;;  %v2120_v19 = vmax.f32 %v2054_v1, 0.0 }
 0x3b3   : > { %v2119_v13 = vmax.f32 %v2049_v18, 0.0 }
 0x3b5   : > { %9164 = vmatprep.mubr.msk.f32.mxu0 %vm827_vm0, %v2119_v13 }
 0x3b6   : > { %9165 = vmatmul.mubr.msk.f32.gmra.mrb[94].mxu0 %vm827_vm0, %v2120_v19 }
 0x40d   : > { %v9073_v7 = vpop.f32.mrb[32].mxu0 }
 0x40e   : > { %v11488_v24 = vadd.f32 %v9073_v7, %v11485_v16  ;;  %v2390_v27 = vpop.f32.mrb[33].mxu0 }
 0x40f   : > { %v11491_v37 = vadd.f32 %v11485_v16, %v2390_v27 }
 0x410   : > { %v2773_v21 = vrot.slane %v11488_v24, 7  ;;  %v3199_v28 = vrot.slane %v11488_v24, 2  ;;  %v3344_v25 = vrot.slane %v11488_v24, 3  ;;  %v3488_v29 = vrot.slane %v11488_v24, 4 }
 0x411   : > { %v9076_v15 = vpop.f32.mrb[34].mxu0  ;;  %v2925_v32 = vrot.slane %v11491_v37, 1  ;;  %v3198_v36 = vrot.slane %v11491_v37, 3  ;;  %v3343_v41 = vrot.slane %v11491_v37, 4  ;;  %v3487_v23 = vrot.slane %v11491_v37, 5 }
 0x412   : > { %v11502_v38 = vadd.f32 %v9076_v15, %v11485_v16  ;;  %v2400_v43 = vpop.f32.mrb[35].mxu0  ;;  %v2775_v44 = vsel %vm2774_vm1, %v2773_v21, %v11491_v37  ;;  %v3759_v35 = vrot.slane %v11491_v37, 7  ;;  %v3760_v49 = vrot.slane %v11488_v24, 6 }
 0x413   : > { %v11509_v46 = vadd.f32 %v11485_v16, %v2400_v43  ;;  %v2926_v48 = vsel %vm2774_vm1, %v11488_v24, %v2925_v32  ;;  %v3200_v47 = vsel %vm2774_vm1, %v3199_v28, %v3198_v36  ;;  %v3345_v33 = vsel %vm2774_vm1, %v3344_v25, %v3343_v41 }
 0x414   : > { %v2779_v26 = vrot.slane %v11502_v38, 5  ;;  %v2929_v52 = vrot.slane %v11502_v38, 6  ;;  %v3348_v31 = vrot.slane %v11502_v38, 1  ;;  %v11519_v59 = vsel %vm2774_vm1, %v3488_v29, %v3487_v23 }
 0x415   : > { %v9079_v30 = vpop.f32.mrb[36].mxu0  ;;  %v2776_v53 = vrot.slane %v11509_v46, 6  ;;  %v2927_v58 = vrot.slane %v11509_v46, 7  ;;  %v3201_v2 = vrot.slane %v11509_v46, 1  ;;  %v3346_v54 = vrot.slane %v11509_v46, 2 }
 0x416   : > { %v11526_v55 = vadd.f32 %v9079_v30, %v11485_v16  ;;  %v2410_v0 = vpop.f32.mrb[37].mxu0  ;;  %v3490_v12 = vrot.slane %v11509_v46, 3  ;;  %v3492_v56 = vrot.slane %v11502_v38, 2  ;;  %v11531_v42 = vsel %vm2774_vm1, %v3760_v49, %v3759_v35 }
 0x417   : > { %v11534_v10 = vadd.f32 %v11485_v16, %v2410_v0  ;;  %v2778_v22 = vsel %vm2777_vm2, %v2776_v53, %v2775_v44  ;;  %v2928_v60 = vsel %vm2777_vm2, %v2927_v58, %v2926_v48  ;;  %v3202_v61 = vsel %vm2777_vm2, %v3201_v2, %v3200_v47 }
 0x418   : > { %v2781_v20 = vsel %vm2780_vm3, %v2779_v26, %v2778_v22  ;;  %v2785_v40 = vrot.slane %v11526_v55, 3  ;;  %v2930_v45 = vsel %vm2780_vm3, %v2929_v52, %v2928_v60  ;;  %v2933_v62 = vrot.slane %v11526_v55, 4 }
 0x419   : > { %v9082_v34 = vpop.f32.mrb[38].mxu0  ;;  %v2782_v51 = vrot.slane %v11534_v10, 4  ;;  %v2931_v63 = vrot.slane %v11534_v10, 5  ;;  %v3203_v3 = vsel %vm2780_vm3, %v11502_v38, %v3202_v61  ;;  %v3204_v50 = vrot.slane %v11534_v10, 7 }
 0x41a   : > { %v11549_v57 = vadd.f32 %v9082_v34, %v11485_v16  ;;  %v2420_v5 = vpop.f32.mrb[39].mxu0  ;;  %v3206_v6 = vrot.slane %v11526_v55, 6  ;;  %v3347_v39 = vsel %vm2777_vm2, %v3346_v54, %v3345_v33  ;;  %v3351_v4 = vrot.slane %v11526_v55, 7 }
 0x41b   : > { %v11555_v8 = vadd.f32 %v11485_v16, %v2420_v5  ;;  %v2784_v9 = vsel %vm2783_vm4, %v2782_v51, %v2781_v20  ;;  %v2932_v11 = vsel %vm2783_vm4, %v2931_v63, %v2930_v45  ;;  %v3205_v1 = vsel %vm2783_vm4, %v3204_v50, %v3203_v3 }
 0x41c   : > { %v2787_v14 = vsel %vm2786_vm5, %v2785_v40, %v2784_v9  ;;  %v2791_v18 = vrot.slane %v11549_v57, 1  ;;  %v2934_v13 = vsel %vm2786_vm5, %v2933_v62, %v2932_v11  ;;  %v2937_v19 = vrot.slane %v11549_v57, 2 }
 0x41d   : > { %v9085_v17 = vpop.f32.mrb[40].mxu0  ;;  %v2788_v7 = vrot.slane %v11555_v8, 2  ;;  %v2935_v27 = vrot.slane %v11555_v8, 3  ;;  %v3207_v21 = vsel %vm2786_vm5, %v3206_v6, %v3205_v1  ;;  %v3208_v28 = vrot.slane %v11555_v8, 5 }
 0x41e   : > { %v11569_v25 = vadd.f32 %v9085_v17, %v11485_v16  ;;  %v2430_v29 = vpop.f32.mrb[41].mxu0  ;;  %v3210_v15 = vrot.slane %v11549_v57, 4  ;;  %v3349_v32 = vsel %vm2780_vm3, %v3348_v31, %v3347_v39  ;;  %v3353_v36 = vrot.slane %v11555_v8, 6 }
 0x41f   : > { %v11575_v41 = vadd.f32 %v11485_v16, %v2430_v29  ;;  %v2790_v23 = vsel %vm2789_vm6, %v2788_v7, %v2787_v14  ;;  %v2936_v43 = vsel %vm2789_vm6, %v2935_v27, %v2934_v13  ;;  %v3209_v44 = vsel %vm2789_vm6, %v3208_v28, %v3207_v21 }
 0x420   : > { %v2793_v35 = vsel %vm2792_vm7, %v2791_v18, %v2790_v23  ;;  %v2938_v49 = vsel %vm2792_vm7, %v2937_v19, %v2936_v43  ;;  %v3211_v48 = vsel %vm2792_vm7, %v3210_v15, %v3209_v44  ;;  %v3350_v47 = vsel %vm2783_vm4, %v11534_v10, %v3349_v32 }
 0x421   : > { %v9088_v33 = vpop.f32.mrb[42].mxu0  ;;  %2892 = vrot.lane.b32.xlu0 %v2793_v35, %s10507_s28  ;;  %v3352_v26 = vsel %vm2786_vm5, %v3351_v4, %v3350_v47  ;;  %v3355_v52 = vrot.slane %v11549_v57, 5  ;;  %v2939_v31 = vrot.slane %v11575_v41, 1  ;;  %v3491_v30 = vsel %vm2777_vm2, %v3490_v12, %v11519_v59 }
 0x422   : > { %v11592_v53 = vadd.f32 %v9088_v33, %v11485_v16  ;;  %v2440_v58 = vpop.f32.mrb[43].mxu0  ;;  %v3354_v2 = vsel %vm2789_vm6, %v3353_v36, %v3352_v26  ;;  %v3493_v54 = vsel %vm2780_vm3, %v3492_v56, %v3491_v30  ;;  %v3494_v0 = vrot.slane %v11534_v10, 1 }
 0x423   : > { %v11598_v22 = vadd.f32 %v11485_v16, %v2440_v58  ;;  %v3356_v60 = vsel %vm2792_vm7, %v3355_v52, %v3354_v2  ;;  %v2940_v61 = vsel %vm2774_vm1, %v11569_v25, %v2939_v31  ;;  %v3497_v59 = vrot.slane %v11555_v8, 7 }
 0x424   : > { %v2943_v12 = vrot.slane %v11592_v53, 6  ;;  %v3495_v20 = vsel %vm2783_vm4, %v3494_v0, %v3493_v54  ;;  %v3499_v40 = vrot.slane %v11549_v57, 6  ;;  %v3212_v56 = vrot.slane %v11575_v41, 3 }
 0x425   : > { %v9091_v45 = vpop.f32.mrb[44].mxu0  ;;  %3037 = vrot.lane.b32.xlu0 %v2938_v49, %s10508_s14  ;;  %v2941_v62 = vrot.slane %v11598_v22, 7  ;;  %v3496_v34 = vsel %vm2786_vm5, %v11526_v55, %v3495_v20  ;;  %v3213_v51 = vrot.slane %v11569_v25, 2  ;;  %v3215_v63 = vrot.slane %v11598_v22, 1 }
 0x426   : > { %v11615_v3 = vadd.f32 %v9091_v45, %v11485_v16  ;;  %v2450_v50 = vpop.f32.mrb[45].mxu0  ;;  %v3498_v5 = vsel %vm2789_vm6, %v3497_v59, %v3496_v34  ;;  %v3762_v6 = vrot.slane %v11509_v46, 5  ;;  %v3764_v39 = vrot.slane %v11502_v38, 4 }
 0x427   : > { %v11621_v4 = vadd.f32 %v11485_v16, %v2450_v50  ;;  %v2942_v9 = vsel %vm2777_vm2, %v2941_v62, %v2940_v61  ;;  %v3500_v11 = vsel %vm2792_vm7, %v3499_v40, %v3498_v5  ;;  %v3214_v1 = vsel %vm2774_vm1, %v3213_v51, %v3212_v56 }
 0x428   : > { %v2944_v14 = vsel %vm2780_vm3, %v2943_v12, %v2942_v9  ;;  %v2947_v18 = vrot.slane %v11615_v3, 4  ;;  %v3216_v13 = vsel %vm2777_vm2, %v3215_v63, %v3214_v1  ;;  %v3220_v19 = vrot.slane %v11615_v3, 6 }
 0x429   : > { %v9094_v17 = vpop.f32.mrb[46].mxu0  ;;  %3310 = vrot.lane.b32.xlu0 %v3211_v48, %s10509_s2  ;;  %v2945_v7 = vrot.slane %v11621_v4, 5  ;;  %v3217_v27 = vsel %vm2780_vm3, %v11592_v53, %v3216_v13  ;;  %v3218_v21 = vrot.slane %v11621_v4, 7  ;;  %v3763_v28 = vsel %vm2777_vm2, %v3762_v6, %v11531_v42 }
 0x42a   : > { %v11638_v29 = vadd.f32 %v9094_v17, %v11485_v16  ;;  %v2460_v15 = vpop.f32.mrb[47].mxu0  ;;  %v3765_v32 = vsel %vm2780_vm3, %v3764_v39, %v3763_v28  ;;  %v3766_v36 = vrot.slane %v11534_v10, 3  ;;  %v3768_v23 = vrot.slane %v11526_v55, 2 }
 0x42b   : > { %v11644_v43 = vadd.f32 %v11485_v16, %v2460_v15  ;;  %v2946_v44 = vsel %vm2783_vm4, %v2945_v7, %v2944_v14  ;;  %v3219_v35 = vsel %vm2783_vm4, %v3218_v21, %v3217_v27  ;;  %v3770_v49 = vrot.slane %v11555_v8, 1 }
 0x42c   : > { %13642 = vst [vmem:[#allocation31_spill] sm:$0xff] %v11638_v29  ;;  %v2948_v42 = vsel %vm2786_vm5, %v2947_v18, %v2946_v44  ;;  %v2951_v48 = vrot.slane %v11638_v29, 2  ;;  %v3221_v47 = vsel %vm2786_vm5, %v3220_v19, %v3219_v35  ;;  %v3224_v33 = vrot.slane %v11638_v29, 4 }
 0x42d   : > { %v9097_v26 = vpop.f32.mrb[48].mxu0  ;;  %3455 = vrot.lane.b32.xlu0 %v3356_v60, %s10507_s28  ;;  %v2949_v52 = vrot.slane %v11644_v43, 3  ;;  %v3222_v31 = vrot.slane %v11644_v43, 5  ;;  %v3767_v30 = vsel %vm2783_vm4, %v3766_v36, %v3765_v32  ;;  %v3357_v58 = vrot.slane %v11575_v41, 4 }
 0x42e   : > { %v11659_v2 = vadd.f32 %v9097_v26, %v11485_v16  ;;  %v2470_v54 = vpop.f32.mrb[49].mxu0  ;;  %v3769_v0 = vsel %vm2786_vm5, %v3768_v23, %v3767_v30  ;;  %v3358_v61 = vrot.slane %v11569_v25, 3  ;;  %v3360_v59 = vrot.slane %v11598_v22, 2 }
 0x42f   : > { %v11665_v60 = vadd.f32 %v11485_v16, %v2470_v54  ;;  %v2950_v12 = vsel %vm2789_vm6, %v2949_v52, %v2948_v42  ;;  %v3223_v20 = vsel %vm2789_vm6, %v3222_v31, %v3221_v47  ;;  %v3771_v40 = vsel %vm2789_vm6, %v3770_v49, %v3769_v0 }
 0x430   : > { %13643 = vst [vmem:[#allocation32_spill] sm:$0xff] %v11659_v2  ;;  %v2952_v56 = vsel %vm2792_vm7, %v2951_v48, %v2950_v12  ;;  %v3225_v45 = vsel %vm2792_vm7, %v3224_v33, %v3223_v20  ;;  %v3772_v62 = vsel %vm2792_vm7, %v11549_v57, %v3771_v40  ;;  %v3359_v34 = vsel %vm2774_vm1, %v3358_v61, %v3357_v58 }
 0x431   : > { %13644 = vst [vmem:[#allocation33_spill] sm:$0xff] %v11665_v60  ;;  %v9100_v51 = vpop.f32.mrb[50].mxu0  ;;  %3039 = vrot.lane.b32.xlu1 %v2952_v56, %s10508_s14  ;;  %3599 = vrot.lane.b32.xlu0 %v3500_v11, %s10508_s14  ;;  %v3361_v63 = vsel %vm2777_vm2, %v3360_v59, %v3359_v34  ;;  %v3362_v50 = vrot.slane %v11592_v53, 1  ;;  %v3365_v5 = vrot.slane %v11615_v3, 7  ;;  %v3367_v6 = vrot.slane %v11644_v43, 6 }
 0x432   : > { %v11682_v39 = vadd.f32 %v9100_v51, %v11485_v16  ;;  %v2480_v9 = vpop.f32.mrb[51].mxu0  ;;  %v3369_v1 = vrot.slane %v11638_v29, 5  ;;  %v2794_v14 = vrot.slane %v11569_v25, 7  ;;  %v2796_v18 = vrot.slane %v11598_v22, 6 }
 0x433   : > { %v11688_v11 = vadd.f32 %v11485_v16, %v2480_v9  ;;  %v3363_v13 = vsel %vm2780_vm3, %v3362_v50, %v3361_v63  ;;  %v2798_v19 = vrot.slane %v11592_v53, 5  ;;  %v2800_v17 = vrot.slane %v11621_v4, 4 }
 0x434   : > { %13645 = vst [vmem:[#allocation34_spill] sm:$0xff] %v11682_v39  ;;  %v3364_v7 = vsel %vm2783_vm4, %v11621_v4, %v3363_v13  ;;  %v2795_v27 = vsel %vm2774_vm1, %v2794_v14, %v11575_v41  ;;  %v2802_v21 = vrot.slane %v11615_v3, 3  ;;  %v2804_v28 = vrot.slane %v11644_v43, 2 }
 0x435   : > { %13646 = vst [vmem:[#allocation35_spill] sm:$0xff] %v11688_v11  ;;  %v9103_v15 = vpop.f32.mrb[52].mxu0  ;;  %3312 = vrot.lane.b32.xlu1 %v3225_v45, %s10509_s2  ;;  %3871 = vrot.lane.b32.xlu0 %v3772_v62, %s10509_s2  ;;  %v3366_v32 = vsel %vm2786_vm5, %v3365_v5, %v3364_v7  ;;  %v2797_v36 = vsel %vm2777_vm2, %v2796_v18, %v2795_v27  ;;  %v2806_v23 = vrot.slane %v11638_v29, 1  ;;  %v3501_v44 = vrot.slane %v11575_v41, 5 }
 0x436   : > { %v11706_v35 = vadd.f32 %v9103_v15, %v11485_v16  ;;  %v2490_v49 = vpop.f32.mrb[53].mxu0  ;;  %v3368_v42 = vsel %vm2789_vm6, %v3367_v6, %v3366_v32  ;;  %v2799_v48 = vsel %vm2780_vm3, %v2798_v19, %v2797_v36  ;;  %v3502_v47 = vrot.slane %v11569_v25, 4 }
 0x437   : > { %v11712_v33 = vadd.f32 %v11485_v16, %v2490_v49  ;;  %v3370_v26 = vsel %vm2792_vm7, %v3369_v1, %v3368_v42  ;;  %v2801_v52 = vsel %vm2783_vm4, %v2800_v17, %v2799_v48  ;;  %v3504_v31 = vrot.slane %v11598_v22, 3 }
 0x438   : > { %13647 = vst [vmem:[#allocation36_spill] sm:$0xff] %v11706_v35  ;;  %v2803_v30 = vsel %vm2786_vm5, %v2802_v21, %v2801_v52  ;;  %v3503_v58 = vsel %vm2774_vm1, %v3502_v47, %v3501_v44  ;;  %v3506_v54 = vrot.slane %v11592_v53, 2  ;;  %v3508_v0 = vrot.slane %v11621_v4, 1 }
 0x439   : > { %13648 = vst [vmem:[#allocation37_spill] sm:$0xff] %v11712_v33  ;;  %v9106_v61 = vpop.f32.mrb[54].mxu0  ;;  %3457 = vrot.lane.b32.xlu1 %v3370_v26, %s10507_s28  ;;  %v2805_v59 = vsel %vm2789_vm6, %v2804_v28, %v2803_v30  ;;  %v3505_v12 = vsel %vm2777_vm2, %v3504_v31, %v3503_v58  ;;  %v3511_v20 = vrot.slane %v11644_v43, 7  ;;  %v3513_v40 = vrot.slane %v11638_v29, 6 }
 0x43a   : > { %v11727_v56 = vadd.f32 %v9106_v61, %v11485_v16  ;;  %v2807_v45 = vsel %vm2792_vm7, %v2806_v23, %v2805_v59  ;;  %v2500_v62 = vpop.f32.mrb[55].mxu0  ;;  %v3507_v34 = vsel %vm2780_vm3, %v3506_v54, %v3505_v12  ;;  %v3773_v51 = vrot.slane %v11575_v41, 7 }
 0x43b   : > { %2894 = vrot.lane.b32.xlu0 %v2807_v45, %s10507_s28  ;;  %v11734_v63 = vadd.f32 %v11485_v16, %v2500_v62  ;;  %v3509_v50 = vsel %vm2783_vm4, %v3508_v0, %v3507_v34  ;;  %v3774_v5 = vrot.slane %v11569_v25, 6  ;;  %v3776_v6 = vrot.slane %v11598_v22, 5 }
 0x43c   : > { %13649 = vst [vmem:[#allocation38_spill] sm:$0xff] %v11727_v56  ;;  %v3510_v9 = vsel %vm2786_vm5, %v11615_v3, %v3509_v50  ;;  %v3778_v1 = vrot.slane %v11592_v53, 4  ;;  %v3780_v14 = vrot.slane %v11621_v4, 3  ;;  %v3782_v18 = vrot.slane %v11615_v3, 2 }
 0x43d   : > { %13650 = vst [vmem:[#allocation39_spill] sm:$0xff] %v11734_v63  ;;  %v9109_v13 = vpop.f32.mrb[56].mxu0  ;;  %v3512_v19 = vsel %vm2789_vm6, %v3511_v20, %v3510_v9  ;;  %v3775_v17 = vsel %vm2774_vm1, %v3774_v5, %v3773_v51  ;;  %v3784_v7 = vrot.slane %v11644_v43, 1  ;;  %v2953_v27 = vrot.slane %v11665_v60, 1 }
 0x43e   : > { %v11749_v21 = vadd.f32 %v9109_v13, %v11485_v16  ;;  %v3514_v28 = vsel %vm2792_vm7, %v3513_v40, %v3512_v19  ;;  %v2510_v15 = vpop.f32.mrb[57].mxu0  ;;  %v3777_v32 = vsel %vm2777_vm2, %v3776_v6, %v3775_v17  ;;  %v2955_v36 = vrot.slane %v11688_v11, 7 }
 0x43f   : > { %3601 = vrot.lane.b32.xlu1 %v3514_v28, %s10508_s14  ;;  %v11756_v23 = vadd.f32 %v11485_v16, %v2510_v15  ;;  %v3779_v44 = vsel %vm2780_vm3, %v3778_v1, %v3777_v32  ;;  %v2954_v49 = vsel %vm2774_vm1, %v11659_v2, %v2953_v27  ;;  %v2957_v42 = vrot.slane %v11682_v39, 6 }
 0x440   : > { %13651 = vst [vmem:[#allocation40_spill] sm:$0xff] %v11749_v21  ;;  %v3781_v48 = vsel %vm2783_vm4, %v3780_v14, %v3779_v44  ;;  %v2956_v47 = vsel %vm2777_vm2, %v2955_v36, %v2954_v49  ;;  %v2959_v26 = vrot.slane %v11712_v33, 5  ;;  %v2961_v52 = vrot.slane %v11706_v35, 4 }
 0x441   : > { %13652 = vst [vmem:[#allocation41_spill] sm:$0xff] %v11756_v23  ;;  %v9112_v31 = vpop.f32.mrb[58].mxu0  ;;  %v3783_v30 = vsel %vm2786_vm5, %v3782_v18, %v3781_v48  ;;  %v2958_v58 = vsel %vm2780_vm3, %v2957_v42, %v2956_v47  ;;  %v2963_v54 = vrot.slane %v11734_v63, 3  ;;  %v2965_v0 = vrot.slane %v11727_v56, 2 }
 0x442   : > { %v11771_v61 = vadd.f32 %v9112_v31, %v11485_v16  ;;  %v3785_v59 = vsel %vm2789_vm6, %v3784_v7, %v3783_v30  ;;  %v2960_v12 = vsel %vm2783_vm4, %v2959_v26, %v2958_v58  ;;  %v2520_v20 = vpop.f32.mrb[59].mxu0  ;;  %v2808_v40 = vrot.slane %v11659_v2, 7 }
 0x443   : > { %v3786_v45 = vsel %vm2792_vm7, %v11638_v29, %v3785_v59  ;;  %v2962_v62 = vsel %vm2786_vm5, %v2961_v52, %v2960_v12  ;;  %v11780_v34 = vadd.f32 %v11485_v16, %v2520_v20  ;;  %v2810_v51 = vrot.slane %v11688_v11, 6 }
 0x444   : > { %13653 = vst [vmem:[#allocation42_spill] sm:$0xff] %v11771_v61  ;;  %3873 = vrot.lane.b32.xlu1 %v3786_v45, %s10509_s2  ;;  %v2964_v50 = vsel %vm2789_vm6, %v2963_v54, %v2962_v62  ;;  %v2809_v5 = vsel %vm2774_vm1, %v2808_v40, %v11665_v60  ;;  %v2812_v6 = vrot.slane %v11682_v39, 5  ;;  %v2814_v9 = vrot.slane %v11712_v33, 4 }
 0x445   : > { %13654 = vst [vmem:[#allocation43_spill] sm:$0xff] %v11780_v34  ;;  %v2966_v1 = vsel %vm2792_vm7, %v2965_v0, %v2964_v50  ;;  %v9115_v14 = vpop.f32.mrb[60].mxu0  ;;  %v2811_v18 = vsel %vm2777_vm2, %v2810_v51, %v2809_v5  ;;  %v2816_v13 = vrot.slane %v11706_v35, 3  ;;  %v2818_v19 = vrot.slane %v11734_v63, 2 }
 0x446   : > { %3041 = vrot.lane.b32.xlu0 %v2966_v1, %s10508_s14  ;;  %v11795_v17 = vadd.f32 %v9115_v14, %v11485_v16  ;;  %v2813_v7 = vsel %vm2780_vm3, %v2812_v6, %v2811_v18  ;;  %v2820_v27 = vrot.slane %v11727_v56, 1  ;;  %v3226_v28 = vrot.slane %v11665_v60, 3  ;;  %v2530_v15 = vpop.f32.mrb[61].mxu0 }
 0x447   : > { %v2815_v32 = vsel %vm2783_vm4, %v2814_v9, %v2813_v7  ;;  %v3227_v36 = vrot.slane %v11659_v2, 2  ;;  %v3229_v44 = vrot.slane %v11688_v11, 1  ;;  %v3232_v49 = vrot.slane %v11712_v33, 7 }
 0x448   : > { %13655 = vst [vmem:[#allocation44_spill] sm:$0xff] %v11795_v17  ;;  %v2817_v42 = vsel %vm2786_vm5, %v2816_v13, %v2815_v32  ;;  %v3234_v48 = vrot.slane %v11706_v35, 6  ;;  %v3236_v47 = vrot.slane %v11734_v63, 5  ;;  %v3238_v26 = vrot.slane %v11727_v56, 4 }
 0x449   : > { %v2819_v52 = vsel %vm2789_vm6, %v2818_v19, %v2817_v42  ;;  %v3228_v31 = vsel %vm2774_vm1, %v3227_v36, %v3226_v28  ;;  %v11811_v30 = vadd.f32 %v11485_v16, %v2530_v15  ;;  %v9118_v58 = vpop.f32.mrb[62].mxu0  ;;  %v3371_v54 = vrot.slane %v11665_v60, 4 }
 0x44a   : > { %v2821_v0 = vsel %vm2792_vm7, %v2820_v27, %v2819_v52  ;;  %v3230_v59 = vsel %vm2777_vm2, %v3229_v44, %v3228_v31  ;;  %v11817_v12 = vadd.f32 %v9118_v58, %v11485_v16  ;;  %v3372_v20 = vrot.slane %v11659_v2, 3  ;;  %v2540_v40 = vpop.f32.mrb[63].mxu0 }
 0x44b   : > { %13656 = vst [vmem:[#allocation45_spill] sm:$0xff] %v11811_v30  ;;  %2896 = vrot.lane.b32.xlu1 %v2821_v0, %s10507_s28  ;;  %v3231_v45 = vsel %vm2780_vm3, %v11682_v39, %v3230_v59  ;;  %v3374_v62 = vrot.slane %v11688_v11, 2  ;;  %v3376_v51 = vrot.slane %v11682_v39, 1  ;;  %v3379_v50 = vrot.slane %v11706_v35, 7 }
 0x44c   : > { %13657 = vst [vmem:[#allocation46_spill] sm:$0xff] %v11817_v12  ;;  %v3233_v5 = vsel %vm2783_vm4, %v3232_v49, %v3231_v45  ;;  %v3373_v6 = vsel %vm2774_vm1, %v3372_v20, %v3371_v54  ;;  %v3381_v9 = vrot.slane %v11734_v63, 6  ;;  %v3383_v1 = vrot.slane %v11727_v56, 5 }
 0x44d   : > { %v3235_v14 = vsel %vm2786_vm5, %v3234_v48, %v3233_v5  ;;  %v3375_v18 = vsel %vm2777_vm2, %v3374_v62, %v3373_v6  ;;  %v11833_v13 = vadd.f32 %v11485_v16, %v2540_v40  ;;  %v9121_v19 = vpop.f32.mrb[64].mxu0  ;;  %v3515_v7 = vrot.slane %v11665_v60, 5 }
 0x44e   : > { %v3237_v27 = vsel %vm2789_vm6, %v3236_v47, %v3235_v14  ;;  %v3377_v28 = vsel %vm2780_vm3, %v3376_v51, %v3375_v18  ;;  %v11839_v15 = vadd.f32 %v9121_v19, %v11485_v16  ;;  %v3516_v32 = vrot.slane %v11659_v2, 4  ;;  %v2550_v36 = vpop.f32.mrb[65].mxu0 }
 0x44f   : > { %13658 = vst [vmem:[#allocation47_spill] sm:$0xff] %v11833_v13  ;;  %v3239_v44 = vsel %vm2792_vm7, %v3238_v26, %v3237_v27  ;;  %v3378_v49 = vsel %vm2783_vm4, %v11712_v33, %v3377_v28  ;;  %v3518_v42 = vrot.slane %v11688_v11, 3  ;;  %v3520_v48 = vrot.slane %v11682_v39, 2 }
 0x450   : > { %3314 = vrot.lane.b32.xlu0 %v3239_v44, %s10509_s2  ;;  %v3380_v47 = vsel %vm2786_vm5, %v3379_v50, %v3378_v49  ;;  %v3517_v52 = vsel %vm2774_vm1, %v3516_v32, %v3515_v7  ;;  %v3522_v31 = vrot.slane %v11712_v33, 1  ;;  %v3525_v58 = vrot.slane %v11734_v63, 7 }
 0x451   : > { %v3382_v54 = vsel %vm2789_vm6, %v3381_v9, %v3380_v47  ;;  %v3519_v26 = vsel %vm2777_vm2, %v3518_v42, %v3517_v52  ;;  %v3527_v0 = vrot.slane %v11727_v56, 6  ;;  %v11856_v59 = vadd.f32 %v11485_v16, %v2550_v36  ;;  %v9124_v20 = vpop.f32.mrb[66].mxu0 }
 0x452   : > { %v3384_v40 = vsel %vm2792_vm7, %v3383_v1, %v3382_v54  ;;  %v3521_v45 = vsel %vm2780_vm3, %v3520_v48, %v3519_v26  ;;  %v11861_v62 = vadd.f32 %v9124_v20, %v11485_v16  ;;  %v2822_v51 = vrot.slane %v11749_v21, 7  ;;  %v2560_v50 = vpop.f32.mrb[67].mxu0 }
 0x453   : > { %v3523_v5 = vsel %vm2783_vm4, %v3522_v31, %v3521_v45  ;;  %v2824_v6 = vrot.slane %v11780_v34, 6  ;;  %v2826_v9 = vrot.slane %v11771_v61, 5  ;;  %v2828_v14 = vrot.slane %v11811_v30, 4 }
 0x454   : > { %3459 = vrot.lane.b32.xlu0 %v3384_v40, %s10507_s28  ;;  %v3524_v1 = vsel %vm2786_vm5, %v11706_v35, %v3523_v5  ;;  %v2823_v18 = vsel %vm2774_vm1, %v2822_v51, %v11756_v23  ;;  %v2830_v19 = vrot.slane %v11795_v17, 3  ;;  %v2832_v7 = vrot.slane %v11833_v13, 2 }
 0x455   : > { %v3526_v27 = vsel %vm2789_vm6, %v3525_v58, %v3524_v1  ;;  %v2825_v28 = vsel %vm2777_vm2, %v2824_v6, %v2823_v18  ;;  %v2834_v32 = vrot.slane %v11817_v12, 1  ;;  %v3787_v36 = vrot.slane %v11665_v60, 7  ;;  %v9127_v44 = vpop.f32.mrb[68].mxu0 }
 0x456   : > { %v3528_v49 = vsel %vm2792_vm7, %v3527_v0, %v3526_v27  ;;  %v2827_v42 = vsel %vm2780_vm3, %v2826_v9, %v2825_v28  ;;  %v3788_v48 = vrot.slane %v11659_v2, 6  ;;  %v3790_v47 = vrot.slane %v11688_v11, 5  ;;  %v2570_v52 = vpop.f32.mrb[69].mxu0 }
 0x457   : > { %v2829_v31 = vsel %vm2783_vm4, %v2828_v14, %v2827_v42  ;;  %v3792_v58 = vrot.slane %v11682_v39, 4  ;;  %v3794_v54 = vrot.slane %v11712_v33, 3  ;;  %v3796_v26 = vrot.slane %v11706_v35, 2 }
 0x458   : > { %3603 = vrot.lane.b32.xlu0 %v3528_v49, %s10508_s14  ;;  %v2831_v20 = vsel %vm2786_vm5, %v2830_v19, %v2829_v31  ;;  %v3789_v0 = vsel %vm2774_vm1, %v3788_v48, %v3787_v36  ;;  %v3798_v40 = vrot.slane %v11734_v63, 1  ;;  %v11892_v45 = vadd.f32 %v11485_v16, %v2560_v50 }
 0x459   : > { %v2833_v51 = vsel %vm2789_vm6, %v2832_v7, %v2831_v20  ;;  %v3791_v5 = vsel %vm2777_vm2, %v3790_v47, %v3789_v0  ;;  %v11897_v6 = vadd.f32 %v9127_v44, %v11485_v16  ;;  %v2967_v9 = vrot.slane %v11756_v23, 1  ;;  %v9130_v14 = vpop.f32.mrb[70].mxu0 }
 0x45a   : > { %13659 = vst [vmem:[#allocation48_spill] sm:$0xff] %v11892_v45  ;;  %v2835_v1 = vsel %vm2792_vm7, %v2834_v32, %v2833_v51  ;;  %v3793_v18 = vsel %vm2780_vm3, %v3792_v58, %v3791_v5  ;;  %v2969_v19 = vrot.slane %v11780_v34, 7  ;;  %v2971_v27 = vrot.slane %v11771_v61, 6  ;;  %v2580_v50 = vpop.f32.mrb[71].mxu0 }
 0x45b   : > { %13660 = vst [vmem:[#allocation49_spill] sm:$0xff] %v11897_v6  ;;  %2898 = vrot.lane.b32.xlu1 %v2835_v1, %s10507_s28  ;;  %v3795_v7 = vsel %vm2783_vm4, %v3794_v54, %v3793_v18  ;;  %v2968_v28 = vsel %vm2774_vm1, %v11749_v21, %v2967_v9  ;;  %v2973_v36 = vrot.slane %v11811_v30, 5  ;;  %v2975_v44 = vrot.slane %v11795_v17, 4 }
 0x45c   : > { %v3797_v32 = vsel %vm2786_vm5, %v3796_v26, %v3795_v7  ;;  %v2970_v49 = vsel %vm2777_vm2, %v2969_v19, %v2968_v28  ;;  %v2977_v42 = vrot.slane %v11833_v13, 3  ;;  %v2979_v48 = vrot.slane %v11817_v12, 2 }
 0x45d   : > { %v3799_v47 = vsel %vm2789_vm6, %v3798_v40, %v3797_v32  ;;  %v2972_v31 = vsel %vm2780_vm3, %v2971_v27, %v2970_v49  ;;  %v11917_v58 = vadd.f32 %v11485_v16, %v2570_v52  ;;  %v11920_v54 = vadd.f32 %v9130_v14, %v11485_v16  ;;  %v9133_v20 = vpop.f32.mrb[72].mxu0 }
 0x45e   : > { %v3800_v26 = vsel %vm2792_vm7, %v11727_v56, %v3799_v47  ;;  %v2974_v0 = vsel %vm2783_vm4, %v2973_v36, %v2972_v31  ;;  %v3240_v51 = vrot.slane %v11756_v23, 3  ;;  %v3241_v5 = vrot.slane %v11749_v21, 2  ;;  %v2590_v9 = vpop.f32.mrb[73].mxu0 }
 0x45f   : > { %13661 = vst [vmem:[#allocation50_spill] sm:$0xff] %v11917_v58  ;;  %13662 = vst [vmem:[#allocation51_spill] sm:$0xff] %v11920_v54  ;;  %3875 = vrot.lane.b32.xlu0 %v3800_v26, %s10509_s2  ;;  %v2976_v40 = vsel %vm2786_vm5, %v2975_v44, %v2974_v0  ;;  %v3243_v52 = vrot.slane %v11780_v34, 1  ;;  %v3246_v14 = vrot.slane %v11811_v30, 7  ;;  %v3248_v1 = vrot.slane %v11795_v17, 6 }
 0x460   : > { %v2978_v18 = vsel %vm2789_vm6, %v2977_v42, %v2976_v40  ;;  %v3242_v19 = vsel %vm2774_vm1, %v3241_v5, %v3240_v51  ;;  %v3250_v27 = vrot.slane %v11833_v13, 5  ;;  %v3252_v7 = vrot.slane %v11817_v12, 4 }
 0x461   : > { %v2980_v28 = vsel %vm2792_vm7, %v2979_v48, %v2978_v18  ;;  %v3244_v36 = vsel %vm2777_vm2, %v3243_v52, %v3242_v19  ;;  %v11939_v44 = vadd.f32 %v11485_v16, %v2580_v50  ;;  %v11942_v32 = vadd.f32 %v9133_v20, %v11485_v16  ;;  %v9136_v49 = vpop.f32.mrb[74].mxu0 }
 0x462   : > { %3043 = vrot.lane.b32.xlu1 %v2980_v28, %s10508_s14  ;;  %v3245_v42 = vsel %vm2780_vm3, %v11771_v61, %v3244_v36  ;;  %v3385_v47 = vrot.slane %v11756_v23, 4  ;;  %v3386_v31 = vrot.slane %v11749_v21, 3  ;;  %v3388_v48 = vrot.slane %v11780_v34, 2  ;;  %v2600_v26 = vpop.f32.mrb[75].mxu0 }
 0x463   : > { %13663 = vst [vmem:[#allocation52_spill] sm:$0xff] %v11939_v44  ;;  %13664 = vst [vmem:[#allocation53_spill] sm:$0xff] %v11942_v32  ;;  %v3247_v0 = vsel %vm2783_vm4, %v3246_v14, %v3245_v42  ;;  %v3390_v50 = vrot.slane %v11771_v61, 1  ;;  %v3393_v20 = vrot.slane %v11795_v17, 7  ;;  %v3395_v51 = vrot.slane %v11833_v13, 6 }
 0x464   : > { %v3249_v5 = vsel %vm2786_vm5, %v3248_v1, %v3247_v0  ;;  %v3387_v40 = vsel %vm2774_vm1, %v3386_v31, %v3385_v47  ;;  %v3397_v52 = vrot.slane %v11817_v12, 5  ;;  %v11958_v18 = vadd.f32 %v11485_v16, %v2590_v9 }
 0x465   : > { %v3251_v19 = vsel %vm2789_vm6, %v3250_v27, %v3249_v5  ;;  %v3389_v28 = vsel %vm2777_vm2, %v3388_v48, %v3387_v40  ;;  %v11963_v14 = vadd.f32 %v9136_v49, %v11485_v16  ;;  %v3529_v36 = vrot.slane %v11756_v23, 5  ;;  %v9139_v42 = vpop.f32.mrb[76].mxu0 }
 0x466   : > { %v3253_v11 = vsel %vm2792_vm7, %v3252_v7, %v3251_v19  ;;  %v3391_v1 = vsel %vm2780_vm3, %v3390_v50, %v3389_v28  ;;  %v3530_v47 = vrot.slane %v11749_v21, 4  ;;  %v3532_v31 = vrot.slane %v11780_v34, 3  ;;  %v2610_v9 = vpop.f32.mrb[77].mxu0 }
 0x467   : > { %13665 = vst [vmem:[#allocation54_spill] sm:$0xff] %v11963_v14  ;;  %3316 = vrot.lane.b32.xlu1 %v3253_v11, %s10509_s2  ;;  %v3392_v27 = vsel %vm2783_vm4, %v11811_v30, %v3391_v1  ;;  %v3534_v49 = vrot.slane %v11771_v61, 2  ;;  %v3536_v48 = vrot.slane %v11811_v30, 1  ;;  %v3539_v0 = vrot.slane %v11833_v13, 7 }
 0x468   : > { %v3394_v7 = vsel %vm2786_vm5, %v3393_v20, %v3392_v27  ;;  %v3531_v50 = vsel %vm2774_vm1, %v3530_v47, %v3529_v36  ;;  %v3541_v5 = vrot.slane %v11817_v12, 6  ;;  %v2836_v40 = vrot.slane %v11839_v15, 7 }
 0x469   : > { %v3396_v19 = vsel %vm2789_vm6, %v3395_v51, %v3394_v7  ;;  %v3533_v11 = vsel %vm2777_vm2, %v3532_v31, %v3531_v50  ;;  %v2838_v28 = vrot.slane %v11892_v45, 6  ;;  %v2840_v1 = vrot.slane %v11861_v62, 5  ;;  %v9142_v56 = vpop.f32.mrb[78].mxu0 }
 0x46a   : > { %v3398_v63 = vsel %vm2792_vm7, %v3397_v52, %v3396_v19  ;;  %v3535_v35 = vsel %vm2780_vm3, %v3534_v49, %v3533_v11  ;;  %v2837_v20 = vsel %vm2774_vm1, %v2836_v40, %v11856_v59  ;;  %v2842_v36 = vrot.slane %v11917_v58, 4  ;;  %v11989_v47 = vpop.f32.mrb[79].mxu0 }
 0x46b   : > { %3461 = vrot.lane.b32.xlu1 %v3398_v63, %s10507_s28  ;;  %v3537_v51 = vsel %vm2783_vm4, %v3536_v48, %v3535_v35  ;;  %v2839_v31 = vsel %vm2777_vm2, %v2838_v28, %v2837_v20  ;;  %v2844_v27 = vrot.slane %v11897_v6, 3  ;;  %v2846_v7 = vrot.slane %v11939_v44, 2 }
 0x46c   : > { %v3538_v52 = vsel %vm2786_vm5, %v11795_v17, %v3537_v51  ;;  %v2841_v49 = vsel %vm2780_vm3, %v2840_v1, %v2839_v31  ;;  %v2848_v50 = vrot.slane %v11920_v54, 1  ;;  %v12001_v40 = vadd.f32 %v11485_v16, %v2600_v26 }
 0x46d   : > { %v3540_v63 = vsel %vm2789_vm6, %v3539_v0, %v3538_v52  ;;  %v2843_v35 = vsel %vm2783_vm4, %v2842_v36, %v2841_v49  ;;  %v12006_v48 = vadd.f32 %v9139_v42, %v11485_v16  ;;  %v3801_v19 = vrot.slane %v11756_v23, 7  ;;  %v9145_v11 = vpop.f32.mrb[80].mxu0 }
 0x46e   : > { %13666 = vst [vmem:[#allocation55_spill] sm:$0xff] %v12001_v40  ;;  %v3542_v28 = vsel %vm2792_vm7, %v3541_v5, %v3540_v63  ;;  %v2845_v20 = vsel %vm2786_vm5, %v2844_v27, %v2843_v35  ;;  %v3802_v1 = vrot.slane %v11749_v21, 6  ;;  %v3804_v51 = vrot.slane %v11780_v34, 5  ;;  %v12013_v26 = vpop.f32.mrb[81].mxu0 }
 0x46f   : > { %13667 = vst [vmem:[#allocation56_spill] sm:$0xff] %v12006_v48  ;;  %3605 = vrot.lane.b32.xlu1 %v3542_v28, %s10508_s14  ;;  %v2847_v0 = vsel %vm2789_vm6, %v2846_v7, %v2845_v20  ;;  %v3806_v42 = vrot.slane %v11771_v61, 4  ;;  %v3808_v36 = vrot.slane %v11811_v30, 3  ;;  %v3810_v31 = vrot.slane %v11795_v17, 2 }
 0x470   : > { %v2849_v5 = vsel %vm2792_vm7, %v2848_v50, %v2847_v0  ;;  %v3803_v27 = vsel %vm2774_vm1, %v3802_v1, %v3801_v19  ;;  %v3812_v52 = vrot.slane %v11833_v13, 1  ;;  %v2981_v49 = vrot.slane %v11856_v59, 1 }
 0x471   : > { %2900 = vrot.lane.b32.xlu0 %v2849_v5, %s10507_s28  ;;  %v3805_v63 = vsel %vm2777_vm2, %v3804_v51, %v3803_v27  ;;  %v2983_v7 = vrot.slane %v11892_v45, 7  ;;  %v2985_v35 = vrot.slane %v11861_v62, 6  ;;  %v2987_v28 = vrot.slane %v11917_v58, 5  ;;  %v9148_v20 = vpop.f32.mrb[82].mxu0 }
 0x472   : > { %v3807_v34 = vsel %vm2780_vm3, %v3806_v42, %v3805_v63  ;;  %v2982_v50 = vsel %vm2774_vm1, %v11839_v15, %v2981_v49  ;;  %v2989_v19 = vrot.slane %v11897_v6, 4  ;;  %v2991_v1 = vrot.slane %v11939_v44, 3  ;;  %v12034_v0 = vpop.f32.mrb[83].mxu0 }
 0x473   : > { %v3809_v51 = vsel %vm2783_vm4, %v3808_v36, %v3807_v34  ;;  %v2984_v5 = vsel %vm2777_vm2, %v2983_v7, %v2982_v50  ;;  %v2993_v27 = vrot.slane %v11920_v54, 2  ;;  %v12040_v13 = vadd.f32 %v11485_v16, %v2610_v9 }
 0x474   : > { %v3811_v42 = vsel %vm2786_vm5, %v3810_v31, %v3809_v51  ;;  %v2986_v63 = vsel %vm2780_vm3, %v2985_v35, %v2984_v5  ;;  %v12045_v49 = vadd.f32 %v9142_v56, %v11485_v16  ;;  %v3254_v17 = vrot.slane %v11856_v59, 3 }
 0x475   : > { %13668 = vst [vmem:[#allocation57_spill] sm:$0xff] %v12040_v13  ;;  %v3813_v30 = vsel %vm2789_vm6, %v3812_v52, %v3811_v42  ;;  %v2988_v34 = vsel %vm2783_vm4, %v2987_v28, %v2986_v63  ;;  %v3255_v36 = vrot.slane %v11839_v15, 2  ;;  %v3257_v7 = vrot.slane %v11892_v45, 1  ;;  %v12052_v50 = vpop.f32.mrb[84].mxu0 }
 0x476   : > { %13669 = vst [vmem:[#allocation58_spill] sm:$0xff] %v12045_v49  ;;  %v3814_v9 = vsel %vm2792_vm7, %v11817_v12, %v3813_v30  ;;  %v2990_v31 = vsel %vm2786_vm5, %v2989_v19, %v2988_v34  ;;  %v3260_v56 = vrot.slane %v11917_v58, 7  ;;  %v3262_v35 = vrot.slane %v11897_v6, 6  ;;  %v12059_v51 = vpop.f32.mrb[85].mxu0 }
 0x477   : > { %3877 = vrot.lane.b32.xlu1 %v3814_v9, %s10509_s2  ;;  %v2992_v52 = vsel %vm2789_vm6, %v2991_v1, %v2990_v31  ;;  %v3256_v28 = vsel %vm2774_vm1, %v3255_v36, %v3254_v17  ;;  %v3264_v5 = vrot.slane %v11939_v44, 5  ;;  %v3266_v42 = vrot.slane %v11920_v54, 4 }
 0x478   : > { %v2994_v30 = vsel %vm2792_vm7, %v2993_v27, %v2992_v52  ;;  %v3258_v19 = vsel %vm2777_vm2, %v3257_v7, %v3256_v28  ;;  %v12070_v63 = vadd.f32 %v11485_v16, %v11989_v47  ;;  %v12073_v34 = vadd.f32 %v9145_v11, %v11485_v16 }
 0x479   : > { %3045 = vrot.lane.b32.xlu0 %v2994_v30, %s10508_s14  ;;  %v3259_v17 = vsel %vm2780_vm3, %v11861_v62, %v3258_v19  ;;  %v3399_v1 = vrot.slane %v11856_v59, 4  ;;  %v3400_v36 = vrot.slane %v11839_v15, 3  ;;  %v3402_v27 = vrot.slane %v11892_v45, 2  ;;  %v12081_v9 = vpop.f32.mrb[86].mxu0  ;;  %v12092_v19 = vld [vmem:[#allocation14] ss:$0 sm:$0xff] }
 0x47a   : > { %13670 = vst [vmem:[#allocation59_spill] sm:$0xff] %v12070_v63  ;;  %v3261_v7 = vsel %vm2783_vm4, %v3260_v56, %v3259_v17  ;;  %v3404_v47 = vrot.slane %v11861_v62, 1  ;;  %v3407_v16 = vrot.slane %v11897_v6, 7  ;;  %v3409_v11 = vrot.slane %v11939_v44, 6  ;;  %v12087_v31 = vpop.f32.mrb[87].mxu0 }
 0x47b   : > { %v3263_v52 = vsel %vm2786_vm5, %v3262_v35, %v3261_v7  ;;  %v3401_v28 = vsel %vm2774_vm1, %v3400_v36, %v3399_v1  ;;  %v3411_v30 = vrot.slane %v11920_v54, 5  ;;  %v12096_v12 = vadd.f32 %v12092_v19, %v12013_v26 }
 0x47c   : > { %v3265_v56 = vsel %vm2789_vm6, %v3264_v5, %v3263_v52  ;;  %v3403_v17 = vsel %vm2777_vm2, %v3402_v27, %v3401_v28  ;;  %v12101_v61 = vadd.f32 %v12092_v19, %v9148_v20  ;;  %v2850_v21 = vrot.slane %v11942_v32, 7 }
 0x47d   : > { %v3267_v35 = vsel %vm2792_vm7, %v3266_v42, %v3265_v56  ;;  %v3405_v1 = vsel %vm2780_vm3, %v3404_v47, %v3403_v17  ;;  %v2852_v36 = vrot.slane %v12001_v40, 6  ;;  %v2854_v7 = vrot.slane %v11963_v14, 5  ;;  %v12108_v23 = vpop.f32.mrb[88].mxu0 }
 0x47e   : > { %3318 = vrot.lane.b32.xlu0 %v3267_v35, %s10509_s2  ;;  %v3406_v26 = vsel %vm2783_vm4, %v11917_v58, %v3405_v1  ;;  %v2851_v20 = vsel %vm2774_vm1, %v2850_v21, %v11958_v18  ;;  %v2856_v5 = vrot.slane %v12040_v13, 4  ;;  %v2858_v42 = vrot.slane %v12006_v48, 3  ;;  %v12117_v27 = vpop.f32.mrb[89].mxu0 }
 0x47f   : > { %v3408_v47 = vsel %vm2786_vm5, %v3407_v16, %v3406_v26  ;;  %v2853_v52 = vsel %vm2777_vm2, %v2852_v36, %v2851_v20  ;;  %v2860_v28 = vrot.slane %v12070_v63, 2  ;;  %v2862_v56 = vrot.slane %v12045_v49, 1 }
 0x480   : > { %v3410_v17 = vsel %vm2789_vm6, %v3409_v11, %v3408_v47  ;;  %v2855_v35 = vsel %vm2780_vm3, %v2854_v7, %v2853_v52  ;;  %v3543_v21 = vrot.slane %v11856_v59, 5  ;;  %v3544_v1 = vrot.slane %v11839_v15, 4 }
 0x481   : > { %v3412_v33 = vsel %vm2792_vm7, %v3411_v30, %v3410_v17  ;;  %v2857_v39 = vsel %vm2783_vm4, %v2856_v5, %v2855_v35  ;;  %v3546_v16 = vrot.slane %v11892_v45, 3  ;;  %v3548_v36 = vrot.slane %v11861_v62, 2  ;;  %v12131_v26 = vpop.f32.mrb[90].mxu0 }
 0x482   : > { %3463 = vrot.lane.b32.xlu0 %v3412_v33, %s10507_s28  ;;  %v2859_v11 = vsel %vm2786_vm5, %v2858_v42, %v2857_v39  ;;  %v3545_v7 = vsel %vm2774_vm1, %v3544_v1, %v3543_v21  ;;  %v3550_v20 = vrot.slane %v11917_v58, 1  ;;  %v3553_v47 = vrot.slane %v11939_v44, 7  ;;  %v12138_v52 = vpop.f32.mrb[91].mxu0 }
 0x483   : > { %v2861_v30 = vsel %vm2789_vm6, %v2860_v28, %v2859_v11  ;;  %v3547_v5 = vsel %vm2777_vm2, %v3546_v16, %v3545_v7  ;;  %v3555_v17 = vrot.slane %v11920_v54, 6  ;;  %v12145_v35 = vadd.f32 %v12092_v19, %v12034_v0 }
 0x484   : > { %v2863_v39 = vsel %vm2792_vm7, %v2862_v56, %v2861_v30  ;;  %v3549_v33 = vsel %vm2780_vm3, %v3548_v36, %v3547_v5  ;;  %v12151_v42 = vadd.f32 %v12092_v19, %v12052_v50  ;;  %v2995_v21 = vrot.slane %v11958_v18, 1 }
 0x485   : > { %2902 = vrot.lane.b32.xlu1 %v2863_v39, %s10507_s28  ;;  %v3551_v28 = vsel %vm2783_vm4, %v3550_v20, %v3549_v33  ;;  %v2997_v1 = vrot.slane %v12001_v40, 7  ;;  %v2999_v16 = vrot.slane %v11963_v14, 6  ;;  %v3001_v0 = vrot.slane %v12040_v13, 5  ;;  %v12159_v11 = vpop.f32.mrb[92].mxu0 }
 0x486   : > { %v3552_v56 = vsel %vm2786_vm5, %v11897_v6, %v3551_v28  ;;  %v2996_v50 = vsel %vm2774_vm1, %v11942_v32, %v2995_v21  ;;  %v3003_v36 = vrot.slane %v12006_v48, 4  ;;  %v3005_v7 = vrot.slane %v12070_v63, 3  ;;  %v12167_v30 = vpop.f32.mrb[93].mxu0 }
 0x487   : > { %v3554_v20 = vsel %vm2789_vm6, %v3553_v47, %v3552_v56  ;;  %v2998_v5 = vsel %vm2777_vm2, %v2997_v1, %v2996_v50  ;;  %v3007_v39 = vrot.slane %v12045_v49, 2  ;;  %v3815_v33 = vrot.slane %v11856_v59, 7 }
 0x488   : > { %v3556_v2 = vsel %vm2792_vm7, %v3555_v17, %v3554_v20  ;;  %v3000_v28 = vsel %vm2780_vm3, %v2999_v16, %v2998_v5  ;;  %v3816_v21 = vrot.slane %v11839_v15, 6  ;;  %v3818_v60 = vrot.slane %v11892_v45, 5 }
 0x489   : > { %3607 = vrot.lane.b32.xlu0 %v3556_v2, %s10508_s14  ;;  %v3002_v29 = vsel %vm2783_vm4, %v3001_v0, %v3000_v28  ;;  %v3820_v47 = vrot.slane %v11861_v62, 4  ;;  %v3822_v1 = vrot.slane %v11917_v58, 3  ;;  %v3824_v56 = vrot.slane %v11897_v6, 2  ;;  %v12182_v50 = vpop.f32.mrb[94].mxu0 }
 0x48a   : > { %v3004_v17 = vsel %vm2786_vm5, %v3003_v36, %v3002_v29  ;;  %v3817_v16 = vsel %vm2774_vm1, %v3816_v21, %v3815_v33  ;;  %v3826_v20 = vrot.slane %v11939_v44, 1  ;;  %v12189_v5 = vadd.f32 %v12092_v19, %v12059_v51  ;;  %v12191_v2 = vpop.f32.mrb[95].mxu0 }
 0x48b   : > { %v3006_v0 = vsel %vm2789_vm6, %v3005_v7, %v3004_v17  ;;  %v3819_v28 = vsel %vm2777_vm2, %v3818_v60, %v3817_v16  ;;  %v12197_v45 = vadd.f32 %v12092_v19, %v12081_v9  ;;  %v3268_v29 = vrot.slane %v11958_v18, 3 }
 0x48c   : > { %v3008_v36 = vsel %vm2792_vm7, %v3007_v39, %v3006_v0  ;;  %v3821_v33 = vsel %vm2780_vm3, %v3820_v47, %v3819_v28  ;;  %v3269_v21 = vrot.slane %v11942_v32, 2  ;;  %v3271_v51 = vrot.slane %v12001_v40, 1 }
 0x48d   : > { %3047 = vrot.lane.b32.xlu1 %v3008_v36, %s10508_s14  ;;  %v3823_v7 = vsel %vm2783_vm4, %v3822_v1, %v3821_v33  ;;  %v3274_v60 = vrot.slane %v12040_v13, 7  ;;  %v3276_v17 = vrot.slane %v12006_v48, 6  ;;  %v3278_v9 = vrot.slane %v12070_v63, 5 }
 0x48e   : > { %v3825_v16 = vsel %vm2786_vm5, %v3824_v56, %v3823_v7  ;;  %v3270_v39 = vsel %vm2774_vm1, %v3269_v21, %v3268_v29  ;;  %v3280_v47 = vrot.slane %v12045_v49, 4  ;;  %v12214_v0 = vadd.f32 %v12092_v19, %v12087_v31 }
 0x48f   : > { %v3827_v28 = vsel %vm2789_vm6, %v3826_v20, %v3825_v16  ;;  %v3272_v1 = vsel %vm2777_vm2, %v3271_v51, %v3270_v39  ;;  %v12220_v36 = vadd.f32 %v12092_v19, %v12108_v23  ;;  %v3413_v33 = vrot.slane %v11958_v18, 4 }
 0x490   : > { %v3828_v56 = vsel %vm2792_vm7, %v11920_v54, %v3827_v28  ;;  %v3273_v29 = vsel %vm2780_vm3, %v11963_v14, %v3272_v1  ;;  %v3414_v21 = vrot.slane %v11942_v32, 3  ;;  %v3416_v31 = vrot.slane %v12001_v40, 2 }
 0x491   : > { %3879 = vrot.lane.b32.xlu0 %v3828_v56, %s10509_s2  ;;  %v3275_v20 = vsel %vm2783_vm4, %v3274_v60, %v3273_v29  ;;  %v3418_v51 = vrot.slane %v11963_v14, 1  ;;  %v3421_v23 = vrot.slane %v12006_v48, 7  ;;  %v3423_v7 = vrot.slane %v12070_v63, 6 }
 0x492   : > { %v3277_v16 = vsel %vm2786_vm5, %v3276_v17, %v3275_v20  ;;  %v3415_v39 = vsel %vm2774_vm1, %v3414_v21, %v3413_v33  ;;  %v3425_v28 = vrot.slane %v12045_v49, 5  ;;  %v12239_v1 = vadd.f32 %v12092_v19, %v12117_v27 }
 0x493   : > { %v3279_v56 = vsel %vm2789_vm6, %v3278_v9, %v3277_v16  ;;  %v3417_v60 = vsel %vm2777_vm2, %v3416_v31, %v3415_v39  ;;  %v12245_v29 = vadd.f32 %v12092_v19, %v12131_v26  ;;  %v3557_v54 = vrot.slane %v11958_v18, 5  ;;  %v12248_v44 = vpop.permute.xlu0 %2892 }
 0x494   : > { %v3281_v17 = vsel %vm2792_vm7, %v3280_v47, %v3279_v56  ;;  %v3419_v33 = vsel %vm2780_vm3, %v3418_v51, %v3417_v60  ;;  %v3558_v21 = vrot.slane %v11942_v32, 4  ;;  %v3560_v27 = vrot.slane %v12001_v40, 3 }
 0x495   : > { %3320 = vrot.lane.b32.xlu1 %v3281_v17, %s10509_s2  ;;  %v3420_v9 = vsel %vm2783_vm4, %v12040_v13, %v3419_v33  ;;  %v3562_v26 = vrot.slane %v11963_v14, 2  ;;  %v3564_v31 = vrot.slane %v12040_v13, 1  ;;  %v3567_v20 = vrot.slane %v12070_v63, 7 }
 0x496   : > { %v3422_v16 = vsel %vm2786_vm5, %v3421_v23, %v3420_v9  ;;  %v3559_v47 = vsel %vm2774_vm1, %v3558_v21, %v3557_v54  ;;  %v3569_v51 = vrot.slane %v12045_v49, 6  ;;  %v2864_v39 = vrot.slane %v12073_v34, 7 }
 0x497   : > { %v3424_v56 = vsel %vm2789_vm6, %v3423_v7, %v3422_v16  ;;  %v3561_v60 = vsel %vm2777_vm2, %v3560_v27, %v3559_v47  ;;  %v2866_v17 = vrot.slane %v12145_v35, 6  ;;  %v2868_v33 = vrot.slane %v12101_v61, 5  ;;  %v12268_v6 = vpop.permute.xlu0 %3037 }
 0x498   : > { %v3426_v58 = vsel %vm2792_vm7, %v3425_v28, %v3424_v56  ;;  %v3563_v23 = vsel %vm2780_vm3, %v3562_v26, %v3561_v60  ;;  %v2865_v54 = vsel %vm2774_vm1, %v2864_v39, %v12096_v12  ;;  %v2870_v21 = vrot.slane %v12189_v5, 4 }
 0x499   : > { %3465 = vrot.lane.b32.xlu1 %v3426_v58, %s10507_s28  ;;  %v3565_v7 = vsel %vm2783_vm4, %v3564_v31, %v3563_v23  ;;  %v2867_v27 = vsel %vm2777_vm2, %v2866_v17, %v2865_v54  ;;  %v2872_v9 = vrot.slane %v12151_v42, 3  ;;  %v2874_v16 = vrot.slane %v12214_v0, 2 }
 0x49a   : > { %v3566_v28 = vsel %vm2786_vm5, %v12006_v48, %v3565_v7  ;;  %v2869_v26 = vsel %vm2780_vm3, %v2868_v33, %v2867_v27  ;;  %v2876_v47 = vrot.slane %v12197_v45, 1  ;;  %v12286_v39 = vadd.f32 %v12092_v19, %v12138_v52 }
 0x49b   : > { %v3568_v58 = vsel %vm2789_vm6, %v3567_v20, %v3566_v28  ;;  %v2871_v31 = vsel %vm2783_vm4, %v2870_v21, %v2869_v26  ;;  %v12292_v56 = vadd.f32 %v12092_v19, %v12159_v11  ;;  %v3829_v60 = vrot.slane %v11958_v18, 7  ;;  %v12295_v17 = vpop.permute.xlu0 %3310 }
 0x49c   : > { %v3570_v33 = vsel %vm2792_vm7, %v3569_v51, %v3568_v58  ;;  %v2873_v23 = vsel %vm2786_vm5, %v2872_v9, %v2871_v31  ;;  %v3830_v54 = vrot.slane %v11942_v32, 6  ;;  %v3832_v52 = vrot.slane %v12001_v40, 5 }
 0x49d   : > { %3609 = vrot.lane.b32.xlu1 %v3570_v33, %s10508_s14  ;;  %v2875_v20 = vsel %vm2789_vm6, %v2874_v16, %v2873_v23  ;;  %v3834_v21 = vrot.slane %v11963_v14, 4  ;;  %v3836_v11 = vrot.slane %v12040_v13, 3  ;;  %v3838_v7 = vrot.slane %v12006_v48, 2 }
 0x49e   : > { %v2877_v27 = vsel %vm2792_vm7, %v2876_v47, %v2875_v20  ;;  %v3831_v51 = vsel %vm2774_vm1, %v3830_v54, %v3829_v60  ;;  %v3840_v9 = vrot.slane %v12070_v63, 1  ;;  %v3009_v28 = vrot.slane %v12096_v12, 1 }
 0x49f   : > { %2904 = vrot.lane.b32.xlu0 %v2877_v27, %s10507_s28  ;;  %v3833_v26 = vsel %vm2777_vm2, %v3832_v52, %v3831_v51  ;;  %v3011_v16 = vrot.slane %v12145_v35, 7  ;;  %v3013_v58 = vrot.slane %v12101_v61, 6  ;;  %v3015_v31 = vrot.slane %v12189_v5, 5  ;;  %v12315_v33 = vpop.permute.xlu0 %3455 }
 0x4a0   : > { %v3835_v47 = vsel %vm2780_vm3, %v3834_v21, %v3833_v26  ;;  %v3010_v60 = vsel %vm2774_vm1, %v12073_v34, %v3009_v28  ;;  %v3017_v23 = vrot.slane %v12151_v42, 4  ;;  %v3019_v54 = vrot.slane %v12214_v0, 3 }
 0x4a1   : > { %v3837_v20 = vsel %vm2783_vm4, %v3836_v11, %v3835_v47  ;;  %v3012_v52 = vsel %vm2777_vm2, %v3011_v16, %v3010_v60  ;;  %v3021_v27 = vrot.slane %v12197_v45, 2  ;;  %v12327_v51 = vadd.f32 %v12092_v19, %v12167_v30 }
 0x4a2   : > { %v3839_v40 = vsel %vm2786_vm5, %v3838_v7, %v3837_v20  ;;  %v3014_v21 = vsel %vm2780_vm3, %v3013_v58, %v3012_v52  ;;  %v12333_v28 = vadd.f32 %v12092_v19, %v12182_v50  ;;  %v3282_v26 = vrot.slane %v12096_v12, 3 }
 0x4a3   : > { %v3841_v11 = vsel %vm2789_vm6, %v3840_v9, %v3839_v40  ;;  %v3016_v16 = vsel %vm2783_vm4, %v3015_v31, %v3014_v21  ;;  %v3283_v47 = vrot.slane %v12073_v34, 2  ;;  %v3285_v60 = vrot.slane %v12145_v35, 1  ;;  %v12340_v30 = vpop.permute.xlu1 %3039  ;;  %v12347_v52 = vpop.permute.xlu0 %3599 }
 0x4a4   : > { %v3842_v7 = vsel %vm2792_vm7, %v12045_v49, %v3841_v11  ;;  %v3018_v58 = vsel %vm2786_vm5, %v3017_v23, %v3016_v16  ;;  %v3288_v50 = vrot.slane %v12189_v5, 7  ;;  %v3290_v20 = vrot.slane %v12151_v42, 6 }
 0x4a5   : > { %3881 = vrot.lane.b32.xlu1 %v3842_v7, %s10509_s2  ;;  %v3020_v40 = vsel %vm2789_vm6, %v3019_v54, %v3018_v58  ;;  %v3284_v9 = vsel %vm2774_vm1, %v3283_v47, %v3282_v26  ;;  %v3292_v31 = vrot.slane %v12214_v0, 5  ;;  %v3294_v21 = vrot.slane %v12197_v45, 4 }
 0x4a6   : > { %v3022_v11 = vsel %vm2792_vm7, %v3021_v27, %v3020_v40  ;;  %v3286_v23 = vsel %vm2777_vm2, %v3285_v60, %v3284_v9  ;;  %v12358_v16 = vadd.f32 %v12092_v19, %v12191_v2  ;;  %v3427_v49 = vrot.slane %v12096_v12, 4 }
 0x4a7   : > { %3049 = vrot.lane.b32.xlu0 %v3022_v11, %s10508_s14  ;;  %v3287_v54 = vsel %vm2780_vm3, %v12101_v61, %v3286_v23  ;;  %v3428_v26 = vrot.slane %v12073_v34, 3  ;;  %v3430_v47 = vrot.slane %v12145_v35, 2  ;;  %v3432_v7 = vrot.slane %v12101_v61, 1  ;;  %v12367_v27 = vpop.permute.xlu1 %3312  ;;  %v12381_v13 = vpop.permute.xlu0 %3871 }
 0x4a8   : > { %v3289_v60 = vsel %vm2783_vm4, %v3288_v50, %v3287_v54  ;;  %v3435_v19 = vrot.slane %v12151_v42, 7  ;;  %v3437_v2 = vrot.slane %v12214_v0, 6  ;;  %v3439_v58 = vrot.slane %v12197_v45, 5 }
 0x4a9   : > { %v3291_v40 = vsel %vm2786_vm5, %v3290_v20, %v3289_v60  ;;  %v3429_v9 = vsel %vm2774_vm1, %v3428_v26, %v3427_v49  ;;  %v2878_v11 = vrot.slane %v12220_v36, 7  ;;  %v2880_v23 = vrot.slane %v12286_v39, 6 }
 0x4aa   : > { %v3293_v63 = vsel %vm2789_vm6, %v3292_v31, %v3291_v40  ;;  %v3431_v48 = vsel %vm2777_vm2, %v3430_v47, %v3429_v9  ;;  %v2882_v50 = vrot.slane %v12245_v29, 5  ;;  %v2884_v54 = vrot.slane %v12327_v51, 4 }
 0x4ab   : > { %v3295_v14 = vsel %vm2792_vm7, %v3294_v21, %v3293_v63  ;;  %v3433_v20 = vsel %vm2780_vm3, %v3432_v7, %v3431_v48  ;;  %v2879_v49 = vsel %vm2774_vm1, %v2878_v11, %v12239_v1  ;;  %v2886_v26 = vrot.slane %v12292_v56, 3  ;;  %v12388_v60 = vpop.permute.xlu1 %3457 }
 0x4ac   : > { %3322 = vrot.lane.b32.xlu0 %v3295_v14, %s10509_s2  ;;  %v3434_v31 = vsel %vm2783_vm4, %v12189_v5, %v3433_v20  ;;  %v2881_v47 = vsel %vm2777_vm2, %v2880_v23, %v2879_v49  ;;  %v2888_v40 = vrot.slane %v12358_v16, 2  ;;  %v2890_v63 = vrot.slane %v12333_v28, 1 }
 0x4ad   : > { %v3436_v48 = vsel %vm2786_vm5, %v3435_v19, %v3434_v31  ;;  %v2883_v21 = vsel %vm2780_vm3, %v2882_v50, %v2881_v47  ;;  %v3571_v7 = vrot.slane %v12096_v12, 5  ;;  %v3572_v9 = vrot.slane %v12073_v34, 4 }
 0x4ae   : > { %v3438_v11 = vsel %vm2789_vm6, %v3437_v2, %v3436_v48  ;;  %v2885_v14 = vsel %vm2783_vm4, %v2884_v54, %v2883_v21  ;;  %v3574_v20 = vrot.slane %v12145_v35, 3  ;;  %v3576_v23 = vrot.slane %v12101_v61, 2  ;;  %v2895_v48 = vpop.permute.xlu0 %2894 }
 0x4af   : > { %v3440_v49 = vsel %vm2792_vm7, %v3439_v58, %v3438_v11  ;;  %v2887_v32 = vsel %vm2786_vm5, %v2886_v26, %v2885_v14  ;;  %v3573_v19 = vsel %vm2774_vm1, %v3572_v9, %v3571_v7  ;;  %v3578_v50 = vrot.slane %v12189_v5, 1 }
 0x4b0   : > { %3467 = vrot.lane.b32.xlu0 %v3440_v49, %s10507_s28  ;;  %v2889_v31 = vsel %vm2789_vm6, %v2888_v40, %v2887_v32  ;;  %v3575_v2 = vsel %vm2777_vm2, %v3574_v20, %v3573_v19  ;;  %v3581_v54 = vrot.slane %v12214_v0, 7  ;;  %v3583_v47 = vrot.slane %v12197_v45, 6  ;;  %v12419_v32 = vld [vmem:[#allocation2] sm:$0xff] }
 0x4b1   : > { %v2891_v21 = vsel %vm2792_vm7, %v2890_v63, %v2889_v31  ;;  %v3577_v58 = vsel %vm2780_vm3, %v3576_v23, %v3575_v2  ;;  %v12415_v26 = vpop.permute.xlu1 %3601  ;;  %636 = vst.msk [vmem:[#allocation2 + $0x30] sm:$0xff] %vm635_vm9, %v12419_v32  ;;  %637 = vst.msk [vmem:[#allocation2 + $0x48] sm:$0xff] %vm635_vm9, %v12419_v32  ;;  %v3023_v40 = vrot.slane %v12239_v1, 1  ;;  %v3025_v63 = vrot.slane %v12286_v39, 7 }
 0x4b2   : > { %2906 = vrot.lane.b32.xlu1 %v2891_v21, %s10507_s28  ;;  %v3579_v7 = vsel %vm2783_vm4, %v3578_v50, %v3577_v58  ;;  %638 = vst.msk [vmem:[#allocation2 + $0x60] sm:$0xff] %vm635_vm9, %v12419_v32  ;;  %639 = vst.msk [vmem:[#allocation2 + $0x78] sm:$0xff] %vm635_vm9, %v12419_v32  ;;  %v3027_v9 = vrot.slane %v12245_v29, 6  ;;  %v3029_v14 = vrot.slane %v12327_v51, 5  ;;  %v3031_v20 = vrot.slane %v12292_v56, 4 }
 0x4b3   : > { %640 = vst.msk [vmem:[#allocation2 + $0x90] sm:$0xff] %vm635_vm9, %v12419_v32  ;;  %641 = vst.msk [vmem:[#allocation2 + $0xa8] sm:$0xff] %vm635_vm9, %v12419_v32  ;;  %v3580_v11 = vsel %vm2786_vm5, %v12151_v42, %v3579_v7  ;;  %v3033_v23 = vrot.slane %v12358_v16, 3  ;;  %v3024_v19 = vsel %vm2774_vm1, %v12220_v36, %v3023_v40  ;;  %v3035_v50 = vrot.slane %v12333_v28, 2 }
 0x4b4   : > { %642 = vst.msk [vmem:[#allocation2 + $0xc0] sm:$0xff] %vm635_vm9, %v12419_v32  ;;  %643 = vst.msk [vmem:[#allocation2 + $0xd8] sm:$0xff] %vm635_vm9, %v12419_v32  ;;  %v3582_v49 = vsel %vm2789_vm6, %v3581_v54, %v3580_v11  ;;  %v3843_v31 = vrot.slane %v12096_v12, 7  ;;  %v3844_v21 = vrot.slane %v12073_v34, 6  ;;  %v3846_v58 = vrot.slane %v12145_v35, 5 }
 0x4b5   : > { %2917 = vst.msk [vmem:[#allocation2 + $0x30] sm:$0xff] %vm2916_vm8, %v12248_v44  ;;  %2918 = vst.msk [vmem:[#allocation2 + $0x48] sm:$0xff] %vm2916_vm8, %v2895_v48  ;;  %v3584_v2 = vsel %vm2792_vm7, %v3583_v47, %v3582_v49  ;;  %v3026_v44 = vsel %vm2777_vm2, %v3025_v63, %v3024_v19  ;;  %v3848_v54 = vrot.slane %v12101_v61, 4  ;;  %v3850_v7 = vrot.slane %v12189_v5, 3 }
 0x4b6   : > { %3611 = vrot.lane.b32.xlu0 %v3584_v2, %s10508_s14  ;;  %v3028_v48 = vsel %vm2780_vm3, %v3027_v9, %v3026_v44  ;;  %v3852_v40 = vrot.slane %v12151_v42, 2  ;;  %v3845_v47 = vsel %vm2774_vm1, %v3844_v21, %v3843_v31  ;;  %v3854_v63 = vrot.slane %v12214_v0, 1  ;;  %v12457_v49 = vpop.permute.xlu1 %3873  ;;  %3062 = vst.msk [vmem:[#allocation2 + $0x30] sm:$0xff] %vm3061_vm10, %v12268_v6  ;;  %3063 = vst.msk [vmem:[#allocation2 + $0x48] sm:$0xff] %vm3061_vm10, %v12340_v30 }
 0x4b7   : > { %v3030_v11 = vsel %vm2783_vm4, %v3029_v14, %v3028_v48  ;;  %v3847_v2 = vsel %vm2777_vm2, %v3846_v58, %v3845_v47  ;;  %v3296_v9 = vrot.slane %v12239_v1, 3  ;;  %v3297_v44 = vrot.slane %v12220_v36, 2  ;;  %645 = vst.msk [vmem:[#allocation2 + $0x40] sm:$0xff] %vm644_vm12, %v12419_v32  ;;  %646 = vst.msk [vmem:[#allocation2 + $0x58] sm:$0xff] %vm644_vm12, %v12419_v32 }
 0x4b8   : > { %v3032_v19 = vsel %vm2786_vm5, %v3031_v20, %v3030_v11  ;;  %v3849_v31 = vsel %vm2780_vm3, %v3848_v54, %v3847_v2  ;;  %v3299_v21 = vrot.slane %v12286_v39, 1  ;;  %v3302_v20 = vrot.slane %v12327_v51, 7  ;;  %647 = vst.msk [vmem:[#allocation2 + $0x70] sm:$0xff] %vm644_vm12, %v12419_v32  ;;  %648 = vst.msk [vmem:[#allocation2 + $0x88] sm:$0xff] %vm644_vm12, %v12419_v32 }
 0x4b9   : > { %v3034_v14 = vsel %vm2789_vm6, %v3033_v23, %v3032_v19  ;;  %v3851_v48 = vsel %vm2783_vm4, %v3850_v7, %v3849_v31  ;;  %v3298_v6 = vsel %vm2774_vm1, %v3297_v44, %v3296_v9  ;;  %v3304_v11 = vrot.slane %v12292_v56, 6  ;;  %649 = vst.msk [vmem:[#allocation2 + $0xa0] sm:$0xff] %vm644_vm12, %v12419_v32  ;;  %650 = vst.msk [vmem:[#allocation2 + $0xb8] sm:$0xff] %vm644_vm12, %v12419_v32 }
 0x4ba   : > { %v3036_v58 = vsel %vm2792_vm7, %v3035_v50, %v3034_v14  ;;  %v3853_v30 = vsel %vm2786_vm5, %v3852_v40, %v3851_v48  ;;  %v3300_v23 = vsel %vm2777_vm2, %v3299_v21, %v3298_v6  ;;  %v3306_v54 = vrot.slane %v12358_v16, 5  ;;  %v3042_v6 = vpop.permute.xlu0 %3041  ;;  %651 = vst.msk [vmem:[#allocation2 + $0xd0] sm:$0xff] %vm644_vm12, %v12419_v32  ;;  %652 = vst.msk [vmem:[#allocation2 + $0xe8] sm:$0xff] %vm644_vm12, %v12419_v32 }
 0x4bb   : > { %3051 = vrot.lane.b32.xlu1 %v3036_v58, %s10508_s14  ;;  %v3308_v47 = vrot.slane %v12333_v28, 4  ;;  %v3855_v19 = vsel %vm2789_vm6, %v3854_v63, %v3853_v30  ;;  %v3301_v50 = vsel %vm2780_vm3, %v12245_v29, %v3300_v23  ;;  %v3070_v7 = vrot.slane %v11491_v37, 2 }
 0x4bc   : > { %v3071_v2 = vrot.slane %v11488_v24, 1  ;;  %v3856_v9 = vsel %vm2792_vm7, %v12197_v45, %v3855_v19  ;;  %v3303_v40 = vsel %vm2783_vm4, %v3302_v20, %v3301_v50  ;;  %v3074_v44 = vrot.slane %v11502_v38, 7 }
 0x4bd   : > { %v3076_v14 = vrot.slane %v11534_v10, 6  ;;  %v2897_v31 = vpop.permute.xlu1 %2896  ;;  %3883 = vrot.lane.b32.xlu0 %v3856_v9, %s10509_s2  ;;  %v3305_v63 = vsel %vm2786_vm5, %v3304_v11, %v3303_v40  ;;  %v3078_v58 = vrot.slane %v11526_v55, 5  ;;  %v3080_v48 = vrot.slane %v11555_v8, 4 }
 0x4be   : > { %v3072_v21 = vsel %vm2774_vm1, %v3071_v2, %v3070_v7  ;;  %2919 = vst.msk [vmem:[#allocation2 + $0x60] sm:$0xff] %vm2916_vm8, %v2897_v31  ;;  %v3307_v20 = vsel %vm2789_vm6, %v3306_v54, %v3305_v63  ;;  %v3082_v23 = vrot.slane %v11549_v57, 3  ;;  %v3441_v50 = vrot.slane %v12239_v1, 4 }
 0x4bf   : > { %v3073_v30 = vsel %vm2777_vm2, %v11509_v46, %v3072_v21  ;;  %3064 = vst.msk [vmem:[#allocation2 + $0x60] sm:$0xff] %vm3061_vm10, %v3042_v6  ;;  %v3309_v11 = vsel %vm2792_vm7, %v3308_v47, %v3307_v20  ;;  %v3442_v7 = vrot.slane %v12220_v36, 3  ;;  %v3444_v2 = vrot.slane %v12286_v39, 2 }
 0x4c0   : > { %v3075_v19 = vsel %vm2780_vm3, %v3074_v44, %v3073_v30  ;;  %3324 = vrot.lane.b32.xlu1 %v3309_v11, %s10509_s2  ;;  %v3446_v9 = vrot.slane %v12245_v29, 1  ;;  %v3449_v40 = vrot.slane %v12292_v56, 7  ;;  %v3451_v44 = vrot.slane %v12358_v16, 6 }
 0x4c1   : > { %v3077_v54 = vsel %vm2783_vm4, %v3076_v14, %v3075_v19  ;;  %v3443_v47 = vsel %vm2774_vm1, %v3442_v7, %v3441_v50  ;;  %v3453_v63 = vrot.slane %v12333_v28, 5  ;;  %v3585_v14 = vrot.slane %v12239_v1, 5 }
 0x4c2   : > { %v3079_v31 = vsel %vm2786_vm5, %v3078_v58, %v3077_v54  ;;  %v3445_v6 = vsel %vm2777_vm2, %v3444_v2, %v3443_v47  ;;  %v3586_v20 = vrot.slane %v12220_v36, 4  ;;  %v3588_v58 = vrot.slane %v12286_v39, 3 }
 0x4c3   : > { %v3081_v21 = vsel %vm2789_vm6, %v3080_v48, %v3079_v31  ;;  %v3447_v11 = vsel %vm2780_vm3, %v3446_v9, %v3445_v6  ;;  %v3590_v19 = vrot.slane %v12245_v29, 2  ;;  %v3592_v7 = vrot.slane %v12327_v51, 1 }
 0x4c4   : > { %v3083_v30 = vsel %vm2792_vm7, %v3082_v23, %v3081_v21  ;;  %v3448_v50 = vsel %vm2783_vm4, %v12327_v51, %v3447_v11  ;;  %v3587_v48 = vsel %vm2774_vm1, %v3586_v20, %v3585_v14  ;;  %v3595_v54 = vrot.slane %v12358_v16, 7 }
 0x4c5   : > { %3190 = vst.msk [vmem:[#allocation2 + $0x38] sm:$0xff] %vm827_vm0, %v3083_v30  ;;  %v3450_v23 = vsel %vm2786_vm5, %v3449_v40, %v3448_v50  ;;  %v3589_v2 = vsel %vm2777_vm2, %v3588_v58, %v3587_v48  ;;  %v3597_v9 = vrot.slane %v12333_v28, 6  ;;  %v3857_v31 = vrot.slane %v12239_v1, 7 }
 0x4c6   : > { %3335 = vst.msk [vmem:[#allocation2 + $0x38] sm:$0xff] %vm3334_vm11, %v12295_v17  ;;  %v3452_v47 = vsel %vm2789_vm6, %v3451_v44, %v3450_v23  ;;  %v3591_v21 = vsel %vm2780_vm3, %v3590_v19, %v3589_v2  ;;  %v3858_v6 = vrot.slane %v12220_v36, 6  ;;  %v3860_v14 = vrot.slane %v12286_v39, 5 }
 0x4c7   : > { %3479 = vst.msk [vmem:[#allocation2 + $0x38] sm:$0xff] %vm2916_vm8, %v12315_v33  ;;  %v3454_v17 = vsel %vm2792_vm7, %v3453_v63, %v3452_v47  ;;  %v3593_v40 = vsel %vm2783_vm4, %v3592_v7, %v3591_v21  ;;  %v3862_v20 = vrot.slane %v12245_v29, 4  ;;  %v3864_v44 = vrot.slane %v12327_v51, 3 }
 0x4c8   : > { %3623 = vst.msk [vmem:[#allocation2 + $0x38] sm:$0xff] %vm3061_vm10, %v12347_v52  ;;  %3469 = vrot.lane.b32.xlu1 %v3454_v17, %s10507_s28  ;;  %v3594_v33 = vsel %vm2786_vm5, %v12292_v56, %v3593_v40  ;;  %v3859_v30 = vsel %vm2774_vm1, %v3858_v6, %v3857_v31  ;;  %v3866_v11 = vrot.slane %v12292_v56, 2  ;;  %v3868_v63 = vrot.slane %v12358_v16, 1 }
 0x4c9   : > { %v3596_v58 = vsel %vm2789_vm6, %v3595_v54, %v3594_v33  ;;  %v3861_v19 = vsel %vm2777_vm2, %v3860_v14, %v3859_v30  ;;  %v3084_v52 = vrot.slane %v11575_v41, 2  ;;  %v3085_v50 = vrot.slane %v11569_v25, 1  ;;  %v13671_v14 = vld [vmem:[#allocation31_spill] sm:$0xff] }
 0x4ca   : > { %v3598_v48 = vsel %vm2792_vm7, %v3597_v9, %v3596_v58  ;;  %v3863_v7 = vsel %vm2780_vm3, %v3862_v20, %v3861_v19  ;;  %v3088_v23 = vrot.slane %v11592_v53, 7  ;;  %v3090_v2 = vrot.slane %v11621_v4, 6  ;;  %v12570_v20 = vpop.permute.xlu0 %3314 }
 0x4cb   : > { %v3865_v31 = vsel %vm2783_vm4, %v3864_v44, %v3863_v7  ;;  %v3086_v47 = vsel %vm2774_vm1, %v3085_v50, %v3084_v52  ;;  %v3092_v54 = vrot.slane %v11615_v3, 5  ;;  %v3094_v21 = vrot.slane %v11644_v43, 4 }
 0x4cc   : > { %3613 = vrot.lane.b32.xlu1 %v3598_v48, %s10508_s14  ;;  %v3867_v6 = vsel %vm2786_vm5, %v3866_v11, %v3865_v31  ;;  %v3087_v9 = vsel %vm2777_vm2, %v11598_v22, %v3086_v47  ;;  %v3096_v17 = vrot.slane %v13671_v14, 3  ;;  %v3631_v40 = vrot.slane %v11491_v37, 6 }
 0x4cd   : > { %v2899_v44 = vpop.permute.xlu1 %2898  ;;  %v3869_v33 = vsel %vm2789_vm6, %v3868_v63, %v3867_v6  ;;  %v3089_v30 = vsel %vm2780_vm3, %v3088_v23, %v3087_v9  ;;  %v3632_v58 = vrot.slane %v11488_v24, 5  ;;  %v3634_v19 = vrot.slane %v11509_v46, 4  ;;  %v13672_v6 = vld [vmem:[#allocation33_spill] sm:$0xff] }
 0x4ce   : > { %2920 = vst.msk [vmem:[#allocation2 + $0x78] sm:$0xff] %vm2916_vm8, %v2899_v44  ;;  %v3870_v11 = vsel %vm2792_vm7, %v12333_v28, %v3869_v33  ;;  %v3091_v52 = vsel %vm2783_vm4, %v3090_v2, %v3089_v30  ;;  %v3636_v37 = vrot.slane %v11502_v38, 3  ;;  %v3638_v50 = vrot.slane %v11534_v10, 2  ;;  %v13675_v30 = vld [vmem:[#allocation37_spill] sm:$0xff] }
 0x4cf   : > { %v3093_v48 = vsel %vm2786_vm5, %v3092_v54, %v3091_v52  ;;  %v3633_v63 = vsel %vm2774_vm1, %v3632_v58, %v3631_v40  ;;  %v3640_v7 = vrot.slane %v11526_v55, 1  ;;  %v3643_v24 = vrot.slane %v11549_v57, 7  ;;  %v13676_v58 = vld [vmem:[#allocation36_spill] sm:$0xff]  ;;  %v13677_v52 = vld [vmem:[#allocation39_spill] sm:$0xff] }
 0x4d0   : > { %3885 = vrot.lane.b32.xlu1 %v3870_v11, %s10509_s2  ;;  %v3095_v46 = vsel %vm2789_vm6, %v3094_v21, %v3093_v48  ;;  %v3635_v23 = vsel %vm2777_vm2, %v3634_v19, %v3633_v63  ;;  %v3645_v2 = vrot.slane %v11575_v41, 6  ;;  %v3646_v55 = vrot.slane %v11569_v25, 5  ;;  %v12607_v21 = vpop.permute.xlu0 %3459  ;;  %v13679_v63 = vld [vmem:[#allocation35_spill] sm:$0xff] }
 0x4d1   : > { %v3097_v38 = vsel %vm2792_vm7, %v3096_v17, %v3095_v46  ;;  %v3637_v10 = vsel %vm2780_vm3, %v3636_v37, %v3635_v23  ;;  %v3648_v57 = vrot.slane %v11598_v22, 4  ;;  %v3650_v31 = vrot.slane %v11592_v53, 3 }
 0x4d2   : > { %3191 = vst.msk [vmem:[#allocation2 + $0x50] sm:$0xff] %vm827_vm0, %v3097_v38  ;;  %v3639_v41 = vsel %vm2783_vm4, %v3638_v50, %v3637_v10  ;;  %v3652_v47 = vrot.slane %v11621_v4, 2  ;;  %v3654_v54 = vrot.slane %v11615_v3, 1  ;;  %v3647_v25 = vsel %vm2774_vm1, %v3646_v55, %v3645_v2  ;;  %v13673_v4 = vld [vmem:[#allocation32_spill] sm:$0xff]  ;;  %v13678_v50 = vld [vmem:[#allocation38_spill] sm:$0xff] }
 0x4d3   : > { %3336 = vst.msk [vmem:[#allocation2 + $0x50] sm:$0xff] %vm3334_vm11, %v12367_v27  ;;  %v3641_v32 = vsel %vm2786_vm5, %v3640_v7, %v3639_v41  ;;  %v3657_v22 = vrot.slane %v13671_v14, 7  ;;  %v3098_v9 = vrot.slane %v13672_v6, 2  ;;  %v3649_v3 = vsel %vm2777_vm2, %v3648_v57, %v3647_v25  ;;  %v13674_v27 = vld [vmem:[#allocation34_spill] sm:$0xff] }
 0x4d4   : > { %v3044_v17 = vpop.permute.xlu1 %3043  ;;  %v3642_v53 = vsel %vm2789_vm6, %v11555_v8, %v3641_v32  ;;  %3480 = vst.msk [vmem:[#allocation2 + $0x50] sm:$0xff] %vm2916_vm8, %v12388_v60  ;;  %v3099_v40 = vrot.slane %v13673_v4, 1  ;;  %v3102_v44 = vrot.slane %v13674_v27, 7  ;;  %v3651_v14 = vsel %vm2780_vm3, %v3650_v31, %v3649_v3  ;;  %v3604_v38 = vpop.permute.xlu0 %3603 }
 0x4d5   : > { %3065 = vst.msk [vmem:[#allocation2 + $0x78] sm:$0xff] %vm3061_vm10, %v3044_v17  ;;  %v3644_v33 = vsel %vm2792_vm7, %v3643_v24, %v3642_v53  ;;  %3624 = vst.msk [vmem:[#allocation2 + $0x50] sm:$0xff] %vm3061_vm10, %v12415_v26  ;;  %v3104_v8 = vrot.slane %v13675_v30, 6  ;;  %v3106_v19 = vrot.slane %v13676_v58, 5  ;;  %v3653_v60 = vsel %vm2783_vm4, %v3652_v47, %v3651_v14  ;;  %v13681_v53 = vld [vmem:[#allocation40_spill] sm:$0xff] }
 0x4d6   : > { %3751 = vst.msk [vmem:[#allocation2 + $0x40] sm:$0xff] %vm827_vm0, %v3644_v33  ;;  %v3100_v11 = vsel %vm2774_vm1, %v3099_v40, %v3098_v9  ;;  %v3108_v37 = vrot.slane %v13677_v52, 4  ;;  %v3110_v48 = vrot.slane %v13678_v50, 3  ;;  %v3655_v26 = vsel %vm2786_vm5, %v3654_v54, %v3653_v60  ;;  %v13680_v9 = vld [vmem:[#allocation41_spill] sm:$0xff]  ;;  %v13685_v60 = vld [vmem:[#allocation47_spill] sm:$0xff] }
 0x4d7   : > { %3895 = vst.msk [vmem:[#allocation2 + $0x40] sm:$0xff] %vm3334_vm11, %v12381_v13  ;;  %v3101_v7 = vsel %vm2777_vm2, %v13679_v63, %v3100_v11  ;;  %v3659_v24 = vrot.slane %v13672_v6, 6  ;;  %v3660_v46 = vrot.slane %v13673_v4, 5  ;;  %v3656_v23 = vsel %vm2789_vm6, %v11644_v43, %v3655_v26  ;;  %v13683_v33 = vld [vmem:[#allocation45_spill] sm:$0xff] }
 0x4d8   : > { %v3103_v2 = vsel %vm2780_vm3, %v3102_v44, %v3101_v7  ;;  %v3662_v10 = vrot.slane %v13679_v63, 4  ;;  %v3664_v55 = vrot.slane %v13674_v27, 3  ;;  %v3658_v57 = vsel %vm2792_vm7, %v3657_v22, %v3656_v23  ;;  %v13682_v27 = vld [vmem:[#allocation42_spill] sm:$0xff] }
 0x4d9   : > { %v12646_v13 = vpop.permute.xlu1 %3316  ;;  %v3105_v41 = vsel %vm2783_vm4, %v3104_v8, %v3103_v2  ;;  %v3661_v31 = vsel %vm2774_vm1, %v3660_v46, %v3659_v24  ;;  %v3666_v47 = vrot.slane %v13675_v30, 2  ;;  %3752 = vst.msk [vmem:[#allocation2 + $0x58] sm:$0xff] %vm827_vm0, %v3658_v57  ;;  %v3668_v32 = vrot.slane %v13676_v58, 1  ;;  %v13684_v58 = vld [vmem:[#allocation44_spill] sm:$0xff]  ;;  %v13687_v63 = vld [vmem:[#allocation46_spill] sm:$0xff] }
 0x4da   : > { %v3107_v43 = vsel %vm2786_vm5, %v3106_v19, %v3105_v41  ;;  %v3663_v54 = vsel %vm2777_vm2, %v3662_v10, %v3661_v31  ;;  %v3671_v25 = vrot.slane %v13678_v50, 7  ;;  %3896 = vst.msk [vmem:[#allocation2 + $0x58] sm:$0xff] %vm3334_vm11, %v12457_v49  ;;  %v3112_v17 = vrot.slane %v13680_v9, 2  ;;  %v3876_v50 = vpop.permute.xlu0 %3875 }
 0x4db   : > { %v3109_v22 = vsel %vm2789_vm6, %v3108_v37, %v3107_v43  ;;  %v3665_v6 = vsel %vm2780_vm3, %v3664_v55, %v3663_v54  ;;  %v3113_v3 = vrot.slane %v13681_v53, 1  ;;  %v3116_v44 = vrot.slane %v13682_v27, 7 }
 0x4dc   : > { %v3111_v4 = vsel %vm2792_vm7, %v3110_v48, %v3109_v22  ;;  %v3667_v40 = vsel %vm2783_vm4, %v3666_v47, %v3665_v6  ;;  %v3118_v14 = vrot.slane %v13683_v33, 6  ;;  %v3120_v19 = vrot.slane %v13684_v58, 5  ;;  %v13686_v48 = vld [vmem:[#allocation43_spill] sm:$0xff] }
 0x4dd   : > { %v3462_v30 = vpop.permute.xlu1 %3461  ;;  %3192 = vst.msk [vmem:[#allocation2 + $0x68] sm:$0xff] %vm827_vm0, %v3111_v4  ;;  %v3669_v49 = vsel %vm2786_vm5, %v3668_v32, %v3667_v40  ;;  %v3114_v8 = vsel %vm2774_vm1, %v3113_v3, %v3112_v17  ;;  %v3122_v11 = vrot.slane %v13685_v60, 4  ;;  %v3124_v7 = vrot.slane %v13687_v63, 3  ;;  %v13688_v17 = vld [vmem:[#allocation50_spill] sm:$0xff]  ;;  %v13689_v3 = vld [vmem:[#allocation49_spill] sm:$0xff] }
 0x4de   : > { %3337 = vst.msk [vmem:[#allocation2 + $0x68] sm:$0xff] %vm3334_vm11, %v12570_v20  ;;  %v3670_v37 = vsel %vm2789_vm6, %v13677_v52, %v3669_v49  ;;  %v3115_v26 = vsel %vm2777_vm2, %v13686_v48, %v3114_v8  ;;  %v3673_v24 = vrot.slane %v13680_v9, 6  ;;  %v3674_v20 = vrot.slane %v13681_v53, 5 }
 0x4df   : > { %3481 = vst.msk [vmem:[#allocation2 + $0x68] sm:$0xff] %vm2916_vm8, %v12607_v21  ;;  %v3672_v46 = vsel %vm2792_vm7, %v3671_v25, %v3670_v37  ;;  %v3117_v23 = vsel %vm2780_vm3, %v3116_v44, %v3115_v26  ;;  %v3676_v2 = vrot.slane %v13686_v48, 4  ;;  %v3678_v10 = vrot.slane %v13682_v27, 3  ;;  %v13690_v44 = vld [vmem:[#allocation52_spill] sm:$0xff] }
 0x4e0   : > { %3625 = vst.msk [vmem:[#allocation2 + $0x68] sm:$0xff] %vm3061_vm10, %v3604_v38  ;;  %v3119_v52 = vsel %vm2783_vm4, %v3118_v14, %v3117_v23  ;;  %v3680_v55 = vrot.slane %v13683_v33, 2  ;;  %v3682_v21 = vrot.slane %v13684_v58, 1  ;;  %v3675_v41 = vsel %vm2774_vm1, %v3674_v20, %v3673_v24  ;;  %v13691_v14 = vld [vmem:[#allocation51_spill] sm:$0xff]  ;;  %v13692_v58 = vld [vmem:[#allocation48_spill] sm:$0xff] }
 0x4e1   : > { %3753 = vst.msk [vmem:[#allocation2 + $0x70] sm:$0xff] %vm827_vm0, %v3672_v46  ;;  %v3121_v57 = vsel %vm2786_vm5, %v3120_v19, %v3119_v52  ;;  %v3685_v31 = vrot.slane %v13687_v63, 7  ;;  %v3126_v38 = vrot.slane %v11856_v59, 2  ;;  %v3606_v43 = vpop.permute.xlu1 %3605  ;;  %v3677_v32 = vsel %vm2777_vm2, %v3676_v2, %v3675_v41  ;;  %v13693_v52 = vld [vmem:[#allocation53_spill] sm:$0xff]  ;;  %v13694_v41 = vld [vmem:[#allocation54_spill] sm:$0xff] }
 0x4e2   : > { %3897 = vst.msk [vmem:[#allocation2 + $0x70] sm:$0xff] %vm3334_vm11, %v3876_v50  ;;  %v3123_v47 = vsel %vm2789_vm6, %v3122_v11, %v3121_v57  ;;  %v3127_v25 = vrot.slane %v11839_v15, 1  ;;  %v3130_v22 = vrot.slane %v11861_v62, 7  ;;  %v3679_v9 = vsel %vm2780_vm3, %v3678_v10, %v3677_v32  ;;  %v13696_v32 = vld [vmem:[#allocation56_spill] sm:$0xff] }
 0x4e3   : > { %v2901_v54 = vpop.permute.xlu0 %2900  ;;  %v3125_v6 = vsel %vm2792_vm7, %v3124_v7, %v3123_v47  ;;  %v3132_v53 = vrot.slane %v13688_v17, 6  ;;  %v3134_v4 = vrot.slane %v13689_v3, 5  ;;  %v3681_v40 = vsel %vm2783_vm4, %v3680_v55, %v3679_v9 }
 0x4e4   : > { %2921 = vst.msk [vmem:[#allocation2 + $0x90] sm:$0xff] %vm2916_vm8, %v2901_v54  ;;  %v3128_v27 = vsel %vm2774_vm1, %v3127_v25, %v3126_v38  ;;  %v3136_v33 = vrot.slane %v13690_v44, 4  ;;  %v3138_v49 = vrot.slane %v13691_v14, 3  ;;  %v3683_v8 = vsel %vm2786_vm5, %v3682_v21, %v3681_v40  ;;  %v13695_v38 = vld [vmem:[#allocation57_spill] sm:$0xff] }
 0x4e5   : > { %3193 = vst.msk [vmem:[#allocation2 + $0x80] sm:$0xff] %vm827_vm0, %v3125_v6  ;;  %v3129_v19 = vsel %vm2777_vm2, %v13692_v58, %v3128_v27  ;;  %v3687_v11 = vrot.slane %v11856_v59, 6  ;;  %v3688_v37 = vrot.slane %v11839_v15, 5  ;;  %v3684_v50 = vsel %vm2789_vm6, %v13685_v60, %v3683_v8 }
 0x4e6   : > { %3338 = vst.msk [vmem:[#allocation2 + $0x80] sm:$0xff] %vm3334_vm11, %v12646_v13  ;;  %v3131_v48 = vsel %vm2780_vm3, %v3130_v22, %v3129_v19  ;;  %v3690_v26 = vrot.slane %v13692_v58, 4  ;;  %v3692_v13 = vrot.slane %v11861_v62, 3  ;;  %v3686_v63 = vsel %vm2792_vm7, %v3685_v31, %v3684_v50  ;;  %v13697_v22 = vld [vmem:[#allocation59_spill] sm:$0xff] }
 0x4e7   : > { %3482 = vst.msk [vmem:[#allocation2 + $0x80] sm:$0xff] %vm2916_vm8, %v3462_v30  ;;  %v3133_v7 = vsel %vm2783_vm4, %v3132_v53, %v3131_v48  ;;  %v3689_v59 = vsel %vm2774_vm1, %v3688_v37, %v3687_v11  ;;  %v3694_v15 = vrot.slane %v13688_v17, 2  ;;  %v3696_v46 = vrot.slane %v13689_v3, 1  ;;  %v13698_v17 = vld [vmem:[#allocation55_spill] sm:$0xff]  ;;  %v13699_v3 = vld [vmem:[#allocation58_spill] sm:$0xff] }
 0x4e8   : > { %3626 = vst.msk [vmem:[#allocation2 + $0x80] sm:$0xff] %vm3061_vm10, %v3606_v43  ;;  %v3135_v60 = vsel %vm2786_vm5, %v3134_v4, %v3133_v7  ;;  %v3691_v24 = vsel %vm2777_vm2, %v3690_v26, %v3689_v59  ;;  %v3699_v62 = vrot.slane %v13691_v14, 7  ;;  %v3140_v2 = vrot.slane %v11958_v18, 2 }
 0x4e9   : > { %v3878_v30 = vpop.permute.xlu1 %3877  ;;  %3754 = vst.msk [vmem:[#allocation2 + $0x88] sm:$0xff] %vm827_vm0, %v3686_v63  ;;  %v3137_v23 = vsel %vm2789_vm6, %v3136_v33, %v3135_v60  ;;  %v3693_v20 = vsel %vm2780_vm3, %v3692_v13, %v3691_v24  ;;  %v3141_v10 = vrot.slane %v13693_v52, 1  ;;  %v3144_v31 = vrot.slane %v13694_v41, 7 }
 0x4ea   : > { %3898 = vst.msk [vmem:[#allocation2 + $0x88] sm:$0xff] %vm3334_vm11, %v3878_v30  ;;  %v3139_v21 = vsel %vm2792_vm7, %v3138_v49, %v3137_v23  ;;  %v3695_v57 = vsel %vm2783_vm4, %v3694_v15, %v3693_v20  ;;  %v3146_v47 = vrot.slane %v13695_v38, 6  ;;  %v3148_v25 = vrot.slane %v13696_v32, 5 }
 0x4eb   : > { %v3046_v55 = vpop.permute.xlu0 %3045  ;;  %3194 = vst.msk [vmem:[#allocation2 + $0x98] sm:$0xff] %vm827_vm0, %v3139_v21  ;;  %v3697_v43 = vsel %vm2786_vm5, %v3696_v46, %v3695_v57  ;;  %v3142_v54 = vsel %vm2774_vm1, %v3141_v10, %v3140_v2  ;;  %v3150_v6 = vrot.slane %v13697_v22, 4  ;;  %v3152_v4 = vrot.slane %v13699_v3, 3 }
 0x4ec   : > { %3066 = vst.msk [vmem:[#allocation2 + $0x90] sm:$0xff] %vm3061_vm10, %v3046_v55  ;;  %v3698_v9 = vsel %vm2789_vm6, %v13690_v44, %v3697_v43  ;;  %v3143_v53 = vsel %vm2777_vm2, %v13698_v17, %v3142_v54  ;;  %v3701_v40 = vrot.slane %v11958_v18, 6  ;;  %v3702_v14 = vrot.slane %v13693_v52, 5 }
 0x4ed   : > { %v3700_v27 = vsel %vm2792_vm7, %v3699_v62, %v3698_v9  ;;  %v3145_v33 = vsel %vm2780_vm3, %v3144_v31, %v3143_v53  ;;  %v3704_v49 = vrot.slane %v13698_v17, 4  ;;  %v3706_v44 = vrot.slane %v13694_v41, 3 }
 0x4ee   : > { %3755 = vst.msk [vmem:[#allocation2 + $0xa0] sm:$0xff] %vm827_vm0, %v3700_v27  ;;  %v3147_v8 = vsel %vm2783_vm4, %v3146_v47, %v3145_v33  ;;  %v3708_v58 = vrot.slane %v13695_v38, 2  ;;  %v3710_v19 = vrot.slane %v13696_v32, 1  ;;  %v3703_v37 = vsel %vm2774_vm1, %v3702_v14, %v3701_v40 }
 0x4ef   : > { %v3149_v18 = vsel %vm2786_vm5, %v3148_v25, %v3147_v8  ;;  %v3713_v50 = vrot.slane %v13699_v3, 7  ;;  %v3154_v48 = vrot.slane %v12096_v12, 2  ;;  %v3705_v13 = vsel %vm2777_vm2, %v3704_v49, %v3703_v37 }
 0x4f0   : > { %v3319_v11 = vpop.permute.xlu0 %3318  ;;  %v3151_v26 = vsel %vm2789_vm6, %v3150_v6, %v3149_v18  ;;  %v3155_v63 = vrot.slane %v12073_v34, 1  ;;  %v3158_v7 = vrot.slane %v12101_v61, 7  ;;  %v3707_v15 = vsel %vm2780_vm3, %v3706_v44, %v3705_v13 }
 0x4f1   : > { %3339 = vst.msk [vmem:[#allocation2 + $0x98] sm:$0xff] %vm3334_vm11, %v3319_v11  ;;  %v3153_v59 = vsel %vm2792_vm7, %v3152_v4, %v3151_v26  ;;  %v3160_v30 = vrot.slane %v12189_v5, 6  ;;  %v3162_v60 = vrot.slane %v12151_v42, 5  ;;  %v3709_v24 = vsel %vm2783_vm4, %v3708_v58, %v3707_v15 }
 0x4f2   : > { %3195 = vst.msk [vmem:[#allocation2 + $0xb0] sm:$0xff] %vm827_vm0, %v3153_v59  ;;  %v3156_v46 = vsel %vm2774_vm1, %v3155_v63, %v3154_v48  ;;  %v3164_v62 = vrot.slane %v12214_v0, 4  ;;  %v3166_v23 = vrot.slane %v12197_v45, 3  ;;  %v3711_v2 = vsel %vm2786_vm5, %v3710_v19, %v3709_v24 }
 0x4f3   : > { %v3157_v52 = vsel %vm2777_vm2, %v12145_v35, %v3156_v46  ;;  %v3715_v10 = vrot.slane %v12096_v12, 6  ;;  %v3716_v55 = vrot.slane %v12073_v34, 5  ;;  %v3712_v21 = vsel %vm2789_vm6, %v13697_v22, %v3711_v2 }
 0x4f4   : > { %v3464_v20 = vpop.permute.xlu0 %3463  ;;  %v3159_v57 = vsel %vm2780_vm3, %v3158_v7, %v3157_v52  ;;  %v3718_v41 = vrot.slane %v12145_v35, 4  ;;  %v3720_v31 = vrot.slane %v12101_v61, 3  ;;  %v3714_v38 = vsel %vm2792_vm7, %v3713_v50, %v3712_v21 }
 0x4f5   : > { %3483 = vst.msk [vmem:[#allocation2 + $0x98] sm:$0xff] %vm2916_vm8, %v3464_v20  ;;  %v3161_v47 = vsel %vm2783_vm4, %v3160_v30, %v3159_v57  ;;  %v3717_v43 = vsel %vm2774_vm1, %v3716_v55, %v3715_v10  ;;  %v3722_v12 = vrot.slane %v12189_v5, 2  ;;  %v3724_v25 = vrot.slane %v12151_v42, 1 }
 0x4f6   : > { %3756 = vst.msk [vmem:[#allocation2 + $0xb8] sm:$0xff] %vm827_vm0, %v3714_v38  ;;  %v3163_v54 = vsel %vm2786_vm5, %v3162_v60, %v3161_v47  ;;  %v3719_v32 = vsel %vm2777_vm2, %v3718_v41, %v3717_v43  ;;  %v3727_v35 = vrot.slane %v12197_v45, 7  ;;  %v3168_v6 = vrot.slane %v12239_v1, 2 }
 0x4f7   : > { %v2903_v34 = vpop.permute.xlu1 %2902  ;;  %v3165_v61 = vsel %vm2789_vm6, %v3164_v62, %v3163_v54  ;;  %v3721_v22 = vsel %vm2780_vm3, %v3720_v31, %v3719_v32  ;;  %v3169_v5 = vrot.slane %v12220_v36, 1  ;;  %v3172_v53 = vrot.slane %v12245_v29, 7 }
 0x4f8   : > { %2922 = vst.msk [vmem:[#allocation2 + $0xa8] sm:$0xff] %vm2916_vm8, %v2903_v34  ;;  %v3167_v9 = vsel %vm2792_vm7, %v3166_v23, %v3165_v61  ;;  %v3723_v17 = vsel %vm2783_vm4, %v3722_v12, %v3721_v22  ;;  %v3174_v42 = vrot.slane %v12327_v51, 6  ;;  %v3176_v4 = vrot.slane %v12292_v56, 5 }
 0x4f9   : > { %3196 = vst.msk [vmem:[#allocation2 + $0xc8] sm:$0xff] %vm827_vm0, %v3167_v9  ;;  %v3725_v45 = vsel %vm2786_vm5, %v3724_v25, %v3723_v17  ;;  %v3170_v3 = vsel %vm2774_vm1, %v3169_v5, %v3168_v6  ;;  %v3178_v14 = vrot.slane %v12358_v16, 4  ;;  %v3729_v49 = vrot.slane %v12239_v1, 6 }
 0x4fa   : > { %v3726_v27 = vsel %vm2789_vm6, %v12214_v0, %v3725_v45  ;;  %v3171_v33 = vsel %vm2777_vm2, %v12286_v39, %v3170_v3  ;;  %v3730_v58 = vrot.slane %v12220_v36, 5  ;;  %v3732_v19 = vrot.slane %v12286_v39, 4 }
 0x4fb   : > { %v3608_v40 = vpop.permute.xlu0 %3607  ;;  %v3728_v8 = vsel %vm2792_vm7, %v3727_v35, %v3726_v27  ;;  %v3173_v44 = vsel %vm2780_vm3, %v3172_v53, %v3171_v33  ;;  %v3736_v11 = vrot.slane %v12327_v51, 2  ;;  %v3180_v1 = vrot.slane %v12333_v28, 3 }
 0x4fc   : > { %3627 = vst.msk [vmem:[#allocation2 + $0x98] sm:$0xff] %vm3061_vm10, %v3608_v40  ;;  %v3175_v0 = vsel %vm2783_vm4, %v3174_v42, %v3173_v44  ;;  %v3731_v37 = vsel %vm2774_vm1, %v3730_v58, %v3729_v49  ;;  %v3734_v50 = vrot.slane %v12245_v29, 3  ;;  %v3738_v51 = vrot.slane %v12292_v56, 1 }
 0x4fd   : > { %3757 = vst.msk [vmem:[#allocation2 + $0xd0] sm:$0xff] %vm827_vm0, %v3728_v8  ;;  %v3177_v18 = vsel %vm2786_vm5, %v3176_v4, %v3175_v0  ;;  %v3733_v36 = vsel %vm2777_vm2, %v3732_v19, %v3731_v37  ;;  %v3741_v63 = vrot.slane %v12333_v28, 7 }
 0x4fe   : > { %v3179_v26 = vsel %vm2789_vm6, %v3178_v14, %v3177_v18  ;;  %v3735_v13 = vsel %vm2780_vm3, %v3734_v50, %v3733_v36 }
 0x4ff   : > { %v3048_v48 = vpop.permute.xlu1 %3047  ;;  %v3181_v39 = vsel %vm2792_vm7, %v3180_v1, %v3179_v26  ;;  %v3737_v7 = vsel %vm2783_vm4, %v3736_v11, %v3735_v13 }
 0x500   : > { %3067 = vst.msk [vmem:[#allocation2 + $0xa8] sm:$0xff] %vm3061_vm10, %v3048_v48  ;;  %v3739_v29 = vsel %vm2786_vm5, %v3738_v51, %v3737_v7 }
 0x501   : > { %3197 = vst.msk [vmem:[#allocation2 + $0xe0] sm:$0xff] %vm827_vm0, %v3181_v39  ;;  %v3740_v15 = vsel %vm2789_vm6, %v12358_v16, %v3739_v29 }
 0x502   : > { %v3742_v30 = vsel %vm2792_vm7, %v3741_v63, %v3740_v15 }
 0x503   : > { %v3880_v59 = vpop.permute.xlu0 %3879  ;;  %3758 = vst.msk [vmem:[#allocation2 + $0xe8] sm:$0xff] %vm827_vm0, %v3742_v30 }
 0x504   : > { %3899 = vst.msk [vmem:[#allocation2 + $0xa0] sm:$0xff] %vm3334_vm11, %v3880_v59 }
 0x507   : > { %v3321_v60 = vpop.permute.xlu1 %3320 }
 0x508   : > { %3340 = vst.msk [vmem:[#allocation2 + $0xb0] sm:$0xff] %vm3334_vm11, %v3321_v60 }
 0x50b   : > { %v3466_v56 = vpop.permute.xlu1 %3465 }
 0x50c   : > { %3484 = vst.msk [vmem:[#allocation2 + $0xb0] sm:$0xff] %vm2916_vm8, %v3466_v56 }
 0x50f   : > { %v3610_v28 = vpop.permute.xlu1 %3609 }
 0x510   : > { %3628 = vst.msk [vmem:[#allocation2 + $0xb0] sm:$0xff] %vm3061_vm10, %v3610_v28 }
 0x511   : > { %v2905_v24 = vpop.permute.xlu0 %2904 }
 0x512   : > { %2923 = vst.msk [vmem:[#allocation2 + $0xc0] sm:$0xff] %vm2916_vm8, %v2905_v24 }
 0x517   : > { %v3882_v46 = vpop.permute.xlu1 %3881 }
 0x518   : > { %3900 = vst.msk [vmem:[#allocation2 + $0xb8] sm:$0xff] %vm3334_vm11, %v3882_v46 }
 0x519   : > { %v3050_v16 = vpop.permute.xlu0 %3049 }
 0x51a   : > { %3068 = vst.msk [vmem:[#allocation2 + $0xc0] sm:$0xff] %vm3061_vm10, %v3050_v16 }
 0x51e   : > { %v3323_v62 = vpop.permute.xlu0 %3322 }
 0x51f   : > { %3341 = vst.msk [vmem:[#allocation2 + $0xc8] sm:$0xff] %vm3334_vm11, %v3323_v62 }
 0x522   : > { %v3468_v23 = vpop.permute.xlu0 %3467 }
 0x523   : > { %3485 = vst.msk [vmem:[#allocation2 + $0xc8] sm:$0xff] %vm2916_vm8, %v3468_v23 }
 0x524   : > { %v2907_v20 = vpop.permute.xlu1 %2906 }
 0x525   : > { %2924 = vst.msk [vmem:[#allocation2 + $0xd8] sm:$0xff] %vm2916_vm8, %v2907_v20 }
 0x528   : > { %v3612_v2 = vpop.permute.xlu0 %3611 }
 0x529   : > { %3629 = vst.msk [vmem:[#allocation2 + $0xc8] sm:$0xff] %vm3061_vm10, %v3612_v2 }
 0x52d   : > { %v3052_v52 = vpop.permute.xlu1 %3051 }
 0x52e   : > { %3069 = vst.msk [vmem:[#allocation2 + $0xd8] sm:$0xff] %vm3061_vm10, %v3052_v52 }
 0x52f   : > { %v3884_v10 = vpop.permute.xlu0 %3883 }
 0x530   : > { %3901 = vst.msk [vmem:[#allocation2 + $0xd0] sm:$0xff] %vm3334_vm11, %v3884_v10 }
 0x532   : > { %v3325_v55 = vpop.permute.xlu1 %3324 }
 0x533   : > { %3342 = vst.msk [vmem:[#allocation2 + $0xe0] sm:$0xff] %vm3334_vm11, %v3325_v55 }
 0x53a   : > { %v3470_v21 = vpop.permute.xlu1 %3469 }
 0x53b   : > { %3486 = vst.msk [vmem:[#allocation2 + $0xe0] sm:$0xff] %vm2916_vm8, %v3470_v21 }
 0x53e   : > { %v3614_v57 = vpop.permute.xlu1 %3613 }
 0x53f   : > { %3630 = vst.msk [vmem:[#allocation2 + $0xe0] sm:$0xff] %vm3061_vm10, %v3614_v57 }
 0x542   : > { %v3886_v41 = vpop.permute.xlu1 %3885 }
 0x543   : > { %3902 = vst.msk [vmem:[#allocation2 + $0xe8] sm:$0xff] %vm3334_vm11, %v3886_v41 }
 0x544 PF: > { %s13700_s30 = sld [smem:[#allocation29_spill]] }
 0x54a   : > { %p7983_p8 = scmp.ge.s32.totalorder %s13700_s30, 4 }
 0x54b   : > { %v9644_v31 = vld [vmem:[%s10947_s17 + $0x184] ss:$8 sps:$4 sm:$0xff] (!%p7983_p8)   ;;  %v10510_v47 = vmov (!%p7983_p8), 0   ;;  %v9648_v43 = vld [vmem:[%s10947_s17 + $0x180] ss:$8 sps:$4 sm:$0xff] (!%p7983_p8)   ;;  %v12910_v59 = vld [vmem:[#allocation2 + $0x40] sm:$0xff] (!%p7983_p8) }
 0x54c   : > { %3906 = sbr.rel (%p7983_p8) target bundleno = 1976 (0x7b8), region = 120  ;;  %v9646_v38 = vld [vmem:[%s10947_s17 + $0x104] ss:$8 sps:$4 sm:$0xff] (!%p7983_p8)   ;;  %4808 = vmatprep.mubr.bf16.mxu0 (!%p7983_p8), %v10510_v47  ;;  %4317 = vmatprep.subr.bf16.mxu1 (!%p7983_p8), %v9644_v31  ;;  %v9649_v12 = vld [vmem:[%s10947_s17 + $0x100] ss:$8 sps:$4 sm:$0xff] (!%p7983_p8)   ;;  %v12933_v10 = vld [vmem:[#allocation2 + $0x20] sm:$0xff] (!%p7983_p8) }
 0x54d   : > { %4776 = vmatprep.subr.bf16.mxu0 (!%p7983_p8), %v9646_v38  ;;  %v9650_v34 = vld [vmem:[%s10947_s17 + $0x194] ss:$8 sps:$4 sm:$0xff] (!%p7983_p8)   ;;  %4318 = vmatpush1.bf16.msra.mxu1 (!%p7983_p8), %v9648_v43  ;;  %v9654_v32 = vld [vmem:[%s10947_s17 + $0x190] ss:$8 sps:$4 sm:$0xff] (!%p7983_p8)   ;;  %v9656_v35 = vld [vmem:[%s10947_s17 + $0x1a4] ss:$8 sps:$4 sm:$0xff] (!%p7983_p8)  }
 0x54e   : > { %4777 = vmatpush1.bf16.msra.mxu0 (!%p7983_p8), %v9649_v12  ;;  %v9652_v54 = vld [vmem:[%s10947_s17 + $0x114] ss:$8 sps:$4 sm:$0xff] (!%p7983_p8)   ;;  %4319 = vmatprep.subr.bf16.mxu1 (!%p7983_p8), %v9650_v34  ;;  %v9655_v25 = vld [vmem:[%s10947_s17 + $0x110] ss:$8 sps:$4 sm:$0xff] (!%p7983_p8)   ;;  %v9658_v61 = vld [vmem:[%s10947_s17 + $0x124] ss:$8 sps:$4 sm:$0xff] (!%p7983_p8)  }
 0x54f   : > { %4778 = vmatprep.subr.bf16.mxu0 (!%p7983_p8), %v9652_v54  ;;  %v9660_v22 = vld [vmem:[%s10947_s17 + $0x1a0] ss:$8 sps:$4 sm:$0xff] (!%p7983_p8)   ;;  %v9662_v5 = vld [vmem:[%s10947_s17 + $0x1b4] ss:$8 sps:$4 sm:$0xff] (!%p7983_p8)   ;;  %v9666_v17 = vld [vmem:[%s10947_s17 + $0x1b0] ss:$8 sps:$4 sm:$0xff] (!%p7983_p8)  }
 0x550   : > { %v9661_v6 = vld [vmem:[%s10947_s17 + $0x120] ss:$8 sps:$4 sm:$0xff] (!%p7983_p8)   ;;  %v9664_v9 = vld [vmem:[%s10947_s17 + $0x134] ss:$8 sps:$4 sm:$0xff] (!%p7983_p8)   ;;  %v9667_v53 = vld [vmem:[%s10947_s17 + $0x130] ss:$8 sps:$4 sm:$0xff] (!%p7983_p8)  }
 0x551   : > { %4320 = vmatpush1.bf16.msra.mxu1 (!%p7983_p8), %v9654_v32  ;;  %v9668_v42 = vld [vmem:[%s10947_s17 + $0x1c4] ss:$8 sps:$4 sm:$0xff] (!%p7983_p8)   ;;  %v9672_v3 = vld [vmem:[%s10947_s17 + $0x1c0] ss:$8 sps:$4 sm:$0xff] (!%p7983_p8)   ;;  %v9674_v40 = vld [vmem:[%s10947_s17 + $0x1d4] ss:$8 sps:$4 sm:$0xff] (!%p7983_p8)  }
 0x552   : > { %4779 = vmatpush1.bf16.msra.mxu0 (!%p7983_p8), %v9655_v25  ;;  %4321 = vmatprep.subr.bf16.mxu1 (!%p7983_p8), %v9656_v35  ;;  %v9670_v45 = vld [vmem:[%s10947_s17 + $0x144] ss:$8 sps:$4 sm:$0xff] (!%p7983_p8)   ;;  %v9673_v4 = vld [vmem:[%s10947_s17 + $0x140] ss:$8 sps:$4 sm:$0xff] (!%p7983_p8)   ;;  %v9676_v27 = vld [vmem:[%s10947_s17 + $0x154] ss:$8 sps:$4 sm:$0xff] (!%p7983_p8)  }
 0x553   : > { %4780 = vmatprep.subr.bf16.mxu0 %v9658_v61  ;;  %v9678_v33 = vld [vmem:[%s10947_s17 + $0x1d0] ss:$8 sps:$4 sm:$0xff]   ;;  %v9680_v49 = vld [vmem:[%s10947_s17 + $0x1e4] ss:$8 sps:$4 sm:$0xff]   ;;  %v9684_v44 = vld [vmem:[%s10947_s17 + $0x1e0] ss:$8 sps:$4 sm:$0xff]  }
 0x554   : > { %v9679_v14 = vld [vmem:[%s10947_s17 + $0x150] ss:$8 sps:$4 sm:$0xff]   ;;  %v9682_v8 = vld [vmem:[%s10947_s17 + $0x164] ss:$8 sps:$4 sm:$0xff]   ;;  %v9685_v58 = vld [vmem:[%s10947_s17 + $0x160] ss:$8 sps:$4 sm:$0xff]  }
 0x555   : > { %4322 = vmatpush1.bf16.msra.mxu1 %v9660_v22  ;;  %v9686_v19 = vld [vmem:[%s10947_s17 + $0x1f4] ss:$8 sps:$4 sm:$0xff]   ;;  %v9690_v11 = vld [vmem:[%s10947_s17 + $0x1f0] ss:$8 sps:$4 sm:$0xff]   ;;  %v9692_v1 = vld [vmem:[%s10947_s17 + $0x204] ss:$8 sps:$4 sm:$0xff]  }
 0x556   : > { %4781 = vmatpush1.bf16.msra.mxu0 %v9661_v6  ;;  %4323 = vmatprep.subr.bf16.mxu1 %v9662_v5  ;;  %v9688_v0 = vld [vmem:[%s10947_s17 + $0x174] ss:$8 sps:$4 sm:$0xff]   ;;  %v9691_v18 = vld [vmem:[%s10947_s17 + $0x170] ss:$8 sps:$4 sm:$0xff]   ;;  %v3909_v37 = vld [vmem:[#allocation2 + $0x10] sm:$0xff]  ;;  %vm6438_vm13 = vcmask 1048064  }
 0x557   : > { %4782 = vmatprep.subr.bf16.mxu0 %v9664_v9  ;;  %v12899_v50 = vld [vmem:[#allocation2 + $0x28] sm:$0xff]  ;;  %v9696_v48 = vld [vmem:[%s10947_s17 + $0x404] ss:$8 sps:$4 sm:$0xff]   ;;  %v12951_v54 = vld [vmem:[#allocation2 + $0xa0] sm:$0xff]  ;;  %vm6405_vm14 = vcmask 523264  }
 0x558   : > { %v3933_v26 = vpack.c.bf16 %v12899_v50, %v3909_v37  ;;  %v9694_v36 = vld [vmem:[%s10947_s17 + $0x400] ss:$8 sps:$4 sm:$0xff]   ;;  %v9698_v13 = vld [vmem:[%s10947_s17 + $0x214] ss:$8 sps:$4 sm:$0xff]   ;;  %v9700_v63 = vld [vmem:[%s10947_s17 + $0x410] ss:$8 sps:$4 sm:$0xff]  }
 0x559   : > { %4324 = vmatpush1.bf16.msra.mxu1 %v9666_v17  ;;  %v9697_v39 = vld [vmem:[%s10947_s17 + $0x200] ss:$8 sps:$4 sm:$0xff]   ;;  %v9702_v51 = vld [vmem:[%s10947_s17 + $0x414] ss:$8 sps:$4 sm:$0xff]   ;;  %v9703_v7 = vld [vmem:[%s10947_s17 + $0x210] ss:$8 sps:$4 sm:$0xff]  }
 0x55a   : > { %4783 = vmatpush1.bf16.msra.mxu0 %v9667_v53  ;;  %4325 = vmatprep.subr.bf16.mxu1 %v9668_v42  ;;  %v9704_v29 = vld [vmem:[%s10947_s17 + $0x224] ss:$8 sps:$4 sm:$0xff]   ;;  %v9706_v56 = vld [vmem:[%s10947_s17 + $0x420] ss:$8 sps:$4 sm:$0xff]   ;;  %v9710_v24 = vld [vmem:[%s10947_s17 + $0x234] ss:$8 sps:$4 sm:$0xff]  }
 0x55b   : > { %4784 = vmatprep.subr.bf16.mxu0 %v9670_v45  ;;  %v12912_v15 = vld [vmem:[#allocation2 + $0x58] sm:$0xff]  ;;  %v9714_v46 = vld [vmem:[%s10947_s17 + $0x434] ss:$8 sps:$4 sm:$0xff]   ;;  %v12928_v20 = vld [vmem:[#allocation2 + $0x70] sm:$0xff] }
 0x55c   : > { %v9708_v30 = vld [vmem:[%s10947_s17 + $0x424] ss:$8 sps:$4 sm:$0xff]   ;;  %v12918_v60 = vpack.c.bf16 %v12912_v15, %v12910_v59  ;;  %v9709_v28 = vld [vmem:[%s10947_s17 + $0x220] ss:$8 sps:$4 sm:$0xff]   ;;  %v9712_v16 = vld [vmem:[%s10947_s17 + $0x430] ss:$8 sps:$4 sm:$0xff]  }
 0x55d   : > { %4326 = vmatpush1.bf16.msra.mxu1 %v9672_v3  ;;  %v9715_v62 = vld [vmem:[%s10947_s17 + $0x230] ss:$8 sps:$4 sm:$0xff]   ;;  %v9716_v23 = vld [vmem:[%s10947_s17 + $0x244] ss:$8 sps:$4 sm:$0xff]   ;;  %v9718_v41 = vld [vmem:[%s10947_s17 + $0x440] ss:$8 sps:$4 sm:$0xff]  }
 0x55e   : > { %4785 = vmatpush1.bf16.msra.mxu0 %v9673_v4  ;;  %4327 = vmatprep.subr.bf16.mxu1 %v9674_v40  ;;  %v12930_v2 = vld [vmem:[#allocation2 + $0x88] sm:$0xff]  ;;  %v9720_v52 = vld [vmem:[%s10947_s17 + $0x444] ss:$8 sps:$4 sm:$0xff]  }
 0x55f   : > { %4786 = vmatprep.subr.bf16.mxu0 %v9676_v27  ;;  %v12935_v55 = vld [vmem:[#allocation2 + $0x38] sm:$0xff]  ;;  %v12942_v57 = vpack.c.bf16 %v12930_v2, %v12928_v20  ;;  %v9722_v38 = vld [vmem:[%s10947_s17 + $0x254] ss:$8 sps:$4 sm:$0xff]   ;;  %v12971_v45 = vld [vmem:[#allocation2 + $0x30] sm:$0xff] }
 0x560   : > { %v4017_v21 = vpack.c.bf16 %v12935_v55, %v12933_v10  ;;  %v9721_v31 = vld [vmem:[%s10947_s17 + $0x240] ss:$8 sps:$4 sm:$0xff]   ;;  %v9726_v43 = vld [vmem:[%s10947_s17 + $0x454] ss:$8 sps:$4 sm:$0xff]   ;;  %v9724_v12 = vld [vmem:[%s10947_s17 + $0x450] ss:$8 sps:$4 sm:$0xff]  }
 0x561   : > { %4328 = vmatpush1.bf16.msra.mxu1 %v9678_v33  ;;  %v9727_v34 = vld [vmem:[%s10947_s17 + $0x250] ss:$8 sps:$4 sm:$0xff]   ;;  %v9728_v25 = vld [vmem:[%s10947_s17 + $0x264] ss:$8 sps:$4 sm:$0xff]   ;;  %v9730_v22 = vld [vmem:[%s10947_s17 + $0x460] ss:$8 sps:$4 sm:$0xff]  }
 0x562   : > { %4787 = vmatpush1.bf16.msra.mxu0 %v9679_v14  ;;  %4329 = vmatprep.subr.bf16.mxu1 %v9680_v49  ;;  %v12953_v32 = vld [vmem:[#allocation2 + $0xb8] sm:$0xff]  ;;  %v9734_v5 = vld [vmem:[%s10947_s17 + $0x274] ss:$8 sps:$4 sm:$0xff]   ;;  %v12979_v33 = vld [vmem:[#allocation2 + $0x50] sm:$0xff] }
 0x563   : > { %4788 = vmatprep.subr.bf16.mxu0 %v9682_v8  ;;  %4349 = vmatprep.mubr.bf16.mxu1 %v4017_v21  ;;  %v9732_v35 = vld [vmem:[%s10947_s17 + $0x464] ss:$8 sps:$4 sm:$0xff]   ;;  %v12960_v61 = vpack.c.bf16 %v12953_v32, %v12951_v54  ;;  %v9733_v6 = vld [vmem:[%s10947_s17 + $0x260] ss:$8 sps:$4 sm:$0xff]   ;;  %v9738_v9 = vld [vmem:[%s10947_s17 + $0x474] ss:$8 sps:$4 sm:$0xff]  }
 0x564   : > { %v9736_v17 = vld [vmem:[%s10947_s17 + $0x470] ss:$8 sps:$4 sm:$0xff]   ;;  %v9742_v3 = vld [vmem:[%s10947_s17 + $0x284] ss:$8 sps:$4 sm:$0xff]   ;;  %v9740_v40 = vld [vmem:[%s10947_s17 + $0x280] ss:$8 sps:$4 sm:$0xff]  }
 0x565   : > { %4330 = vmatpush1.bf16.msra.mxu1 %v9684_v44  ;;  %v9739_v53 = vld [vmem:[%s10947_s17 + $0x270] ss:$8 sps:$4 sm:$0xff]   ;;  %v9745_v4 = vld [vmem:[%s10947_s17 + $0x484] ss:$8 sps:$4 sm:$0xff]   ;;  %v9743_v49 = vld [vmem:[%s10947_s17 + $0x480] ss:$8 sps:$4 sm:$0xff]  }
 0x566   : > { %4789 = vmatpush1.bf16.msra.mxu0 %v9685_v58  ;;  %4331 = vmatprep.subr.bf16.mxu1 %v9686_v19  ;;  %v12969_v42 = vld [vmem:[#allocation2 + $0x18] sm:$0xff]  ;;  %v12981_v14 = vld [vmem:[#allocation2 + $0x68] sm:$0xff] }
 0x567   : > { %4790 = vmatprep.subr.bf16.mxu0 %v9688_v0  ;;  %v4016_v27 = vpack.c.bf16 %v12971_v45, %v12969_v42  ;;  %v9748_v8 = vld [vmem:[%s10947_s17 + $0x294] ss:$8 sps:$4 sm:$0xff]   ;;  %v9746_v58 = vld [vmem:[%s10947_s17 + $0x290] ss:$8 sps:$4 sm:$0xff]   ;;  %v12989_v19 = vpack.c.bf16 %v12981_v14, %v12979_v33  ;;  %v9757_v37 = vld [vmem:[%s10947_s17 + $0x4a4] ss:$8 sps:$4 sm:$0xff]  }
 0x568   : > { %v9751_v44 = vld [vmem:[%s10947_s17 + $0x494] ss:$8 sps:$4 sm:$0xff]   ;;  %v9749_v0 = vld [vmem:[%s10947_s17 + $0x490] ss:$8 sps:$4 sm:$0xff]  }
 0x569   : > { %4332 = vmatpush1.bf16.msra.mxu1 %v9690_v11  ;;  %v9754_v11 = vld [vmem:[%s10947_s17 + $0x2a4] ss:$8 sps:$4 sm:$0xff]   ;;  %v9772_v21 = vld [vmem:[%s10947_s17 + $0x2d4] ss:$8 sps:$4 sm:$0xff]  }
 0x56a   : > { %4791 = vmatpush1.bf16.msra.mxu0 %v9691_v18  ;;  %4333 = vmatprep.subr.bf16.mxu1 %v9692_v1  ;;  %v12994_v18 = vld [vmem:[#allocation2 + $0x48] sm:$0xff]  ;;  %v12996_v1 = vld [vmem:[#allocation2 + $0x60] sm:$0xff] }
 0x56b   : > { %5248 = vmatprep.subr.bf16.mxu0 %v9696_v48  ;;  %v9752_v48 = vld [vmem:[%s10947_s17 + $0x2a0] ss:$8 sps:$4 sm:$0xff]  }
 0x56d   : > { %4809 = vmatmul.mubr.bf16.vlgmr.msra.gmra.mrb[0].mxu0 %v3933_v26  ;;  %4334 = vmatpush1.bf16.msra.mxu1 %v9697_v39  ;;  %v9755_v26 = vld [vmem:[%s10947_s17 + $0x4a0] ss:$8 sps:$4 sm:$0xff]   ;;  %v13007_v39 = vld [vmem:[#allocation2 + $0x80] sm:$0xff] }
 0x56e   : > { %5249 = vmatpush1.bf16.msra.mxu0 %v9694_v36  ;;  %4335 = vmatprep.subr.bf16.mxu1 %v9698_v13  ;;  %v13005_v36 = vpack.c.bf16 %v12996_v1, %v12994_v18  ;;  %v13009_v13 = vld [vmem:[#allocation2 + $0x98] sm:$0xff] }
 0x56f   : > { %5250 = vmatprep.subr.bf16.mxu0 %v9702_v51  ;;  %4818 = vmatprep.mubr.bf16.mxu0 %v10510_v47  ;;  %v9760_v51 = vld [vmem:[%s10947_s17 + $0x2b4] ss:$8 sps:$4 sm:$0xff]  }
 0x571   : > { %4336 = vmatpush1.bf16.msra.mxu1 %v9703_v7  ;;  %v9758_v7 = vld [vmem:[%s10947_s17 + $0x2b0] ss:$8 sps:$4 sm:$0xff]  }
 0x572   : > { %5251 = vmatpush1.bf16.msra.mxu0 %v9700_v63  ;;  %4337 = vmatprep.subr.bf16.mxu1 %v9704_v29  ;;  %v9763_v63 = vld [vmem:[%s10947_s17 + $0x4b4] ss:$8 sps:$4 sm:$0xff]   ;;  %v9761_v29 = vld [vmem:[%s10947_s17 + $0x4b0] ss:$8 sps:$4 sm:$0xff]  }
 0x573   : > { %5252 = vmatprep.subr.bf16.mxu0 %v9708_v30  ;;  %v13017_v30 = vpack.c.bf16 %v13009_v13, %v13007_v39 }
 0x575   : > { %4819 = vmatmul.mubr.bf16.gmra.mrb[4].mxu0 %v12918_v60  ;;  %4338 = vmatpush1.bf16.msra.mxu1 %v9709_v28  ;;  %v13024_v28 = vld [vmem:[#allocation2 + $0x90] sm:$0xff] }
 0x576   : > { %5253 = vmatpush1.bf16.msra.mxu0 %v9706_v56  ;;  %4339 = vmatprep.subr.bf16.mxu1 %v9710_v24  ;;  %v13021_v56 = vld [vmem:[#allocation2 + $0x78] sm:$0xff] }
 0x577   : > { %5254 = vmatprep.subr.bf16.mxu0 %v9714_v46  ;;  %4828 = vmatprep.mubr.bf16.mxu0 %v10510_v47  ;;  %v9769_v24 = vld [vmem:[%s10947_s17 + $0x4c4] ss:$8 sps:$4 sm:$0xff]   ;;  %v9764_v46 = vld [vmem:[%s10947_s17 + $0x2c0] ss:$8 sps:$4 sm:$0xff]  }
 0x579   : > { %4340 = vmatpush1.bf16.msra.mxu1 %v9715_v62  ;;  %v13033_v62 = vpack.c.bf16 %v13024_v28, %v13021_v56 }
 0x57a   : > { %5255 = vmatpush1.bf16.msra.mxu0 %v9712_v16  ;;  %4341 = vmatprep.subr.bf16.mxu1 %v9716_v23  ;;  %v9767_v16 = vld [vmem:[%s10947_s17 + $0x4c0] ss:$8 sps:$4 sm:$0xff]  }
 0x57b   : > { %5256 = vmatprep.subr.bf16.mxu0 %v9720_v52  ;;  %v13035_v23 = vld [vmem:[#allocation2 + $0xb0] sm:$0xff]  ;;  %v4014_v52 = vld [vmem:[#allocation2 + $0xc8] sm:$0xff] }
 0x57d   : > { %4829 = vmatmul.mubr.bf16.gmra.mrb[8].mxu0 %v12942_v57  ;;  %4342 = vmatpush1.bf16.msra.mxu1 %v9721_v31  ;;  %v9773_v31 = vld [vmem:[%s10947_s17 + $0x4d0] ss:$8 sps:$4 sm:$0xff]  }
 0x57e   : > { %5257 = vmatpush1.bf16.msra.mxu0 %v9718_v41  ;;  %4343 = vmatprep.subr.bf16.mxu1 %v9722_v38  ;;  %v9770_v41 = vld [vmem:[%s10947_s17 + $0x2d0] ss:$8 sps:$4 sm:$0xff]   ;;  %v13042_v38 = vpack.c.bf16 %v4014_v52, %v13035_v23  ;;  %v9823_v52 = vld [vmem:[%s10947_s17 + $0x554] ss:$8 sps:$4 sm:$0xff]  }
 0x57f   : > { %5258 = vmatprep.subr.bf16.mxu0 %v9726_v43  ;;  %4838 = vmatprep.mubr.bf16.mxu0 %v10510_v47  ;;  %v9778_v43 = vld [vmem:[%s10947_s17 + $0x2e4] ss:$8 sps:$4 sm:$0xff]  }
 0x581   : > { %4344 = vmatpush1.bf16.msra.mxu1 %v9727_v34  ;;  %v4013_v34 = vld [vmem:[#allocation2 + $0xc0] sm:$0xff] }
 0x582   : > { %5259 = vmatpush1.bf16.msra.mxu0 %v9724_v12  ;;  %4345 = vmatprep.subr.bf16.mxu1 %v9728_v25  ;;  %v13046_v12 = vld [vmem:[#allocation2 + $0xa8] sm:$0xff]  ;;  %v9781_v25 = vld [vmem:[%s10947_s17 + $0x4e4] ss:$8 sps:$4 sm:$0xff]  }
 0x583   : > { %5260 = vmatprep.subr.bf16.mxu0 %v9732_v35  ;;  %v9776_v35 = vld [vmem:[%s10947_s17 + $0x2e0] ss:$8 sps:$4 sm:$0xff]  }
 0x585   : > { %4839 = vmatmul.mubr.bf16.gmra.mrb[12].mxu0 %v12960_v61  ;;  %4346 = vmatpush1.bf16.msra.mxu1 %v9733_v6  ;;  %v13055_v6 = vpack.c.bf16 %v4013_v34, %v13046_v12  ;;  %v3908_v34 = vld [vmem:[#allocation2 + $0x8] sm:$0xff] }
 0x586   : > { %5261 = vmatpush1.bf16.msra.mxu0 %v9730_v22  ;;  %4347 = vmatprep.subr.bf16.mxu1 %v9734_v5  ;;  %v9779_v22 = vld [vmem:[%s10947_s17 + $0x4e0] ss:$8 sps:$4 sm:$0xff]   ;;  %v9787_v5 = vld [vmem:[%s10947_s17 + $0x4f4] ss:$8 sps:$4 sm:$0xff]  }
 0x587   : > { %5262 = vmatprep.subr.bf16.mxu0 %v9738_v9  ;;  %5280 = vmatprep.mubr.bf16.mxu0 %v10510_v47  ;;  %v13059_v9 = vld [vmem:[#allocation2 + $0xd0] sm:$0xff] }
 0x589   : > { %4348 = vmatpush1.bf16.msra.mxu1 %v9739_v53  ;;  %v9782_v53 = vld [vmem:[%s10947_s17 + $0x2f0] ss:$8 sps:$4 sm:$0xff]  }
 0x58a   : > { %5263 = vmatpush1.bf16.msra.mxu0 %v9736_v17  ;;  %4390 = vmatprep.subr.bf16.mxu1 %v9742_v3  ;;  %v13062_v17 = vld [vmem:[#allocation2 + $0xe8] sm:$0xff] }
 0x58b   : > { %5663 = vmatprep.subr.bf16.mxu0 %v9745_v4  ;;  %v9785_v3 = vld [vmem:[%s10947_s17 + $0x4f0] ss:$8 sps:$4 sm:$0xff]   ;;  %v4885_v4 = vpack.c.bf16 %v13062_v17, %v13059_v9 }
 0x58c   : > { %4350 = vmatmul.mubr.bf16.vlgmr.msra.gmra.mrb[0].mxu1 %v4016_v27  ;;  %v9793_v27 = vld [vmem:[%s10947_s17 + $0x504] ss:$8 sps:$4 sm:$0xff]  }
 0x58d   : > { %5281 = vmatmul.mubr.bf16.vlgmr.msra.gmra.mrb[16].mxu0 %v12918_v60  ;;  %4391 = vmatpush1.bf16.msra.mxu1 %v9740_v40  ;;  %v9766_v60 = vld [vmem:[%s10947_s17 + $0x2c4] ss:$8 sps:$4 sm:$0xff]  }
 0x58e   : > { %5664 = vmatpush1.bf16.msra.mxu0 %v9743_v49  ;;  %4392 = vmatprep.subr.bf16.mxu1 %v9748_v8  ;;  %v9790_v40 = vld [vmem:[%s10947_s17 + $0x4] ss:$8 sps:$4 sm:$0xff]   ;;  %v4018_v49 = vpack.c.bf16 %v12910_v59, %v12899_v50  ;;  %v9788_v8 = vld [vmem:[%s10947_s17] ss:$8 sps:$4 sm:$0xff]   ;;  %v9794_v50 = vld [vmem:[%s10947_s17 + $0x10] ss:$8 sps:$4 sm:$0xff]  }
 0x58f   : > { %5665 = vmatprep.subr.bf16.mxu0 %v9751_v44  ;;  %4359 = vmatprep.mubr.bf16.mxu1 %v12989_v19  ;;  %v9791_v44 = vld [vmem:[%s10947_s17 + $0x500] ss:$8 sps:$4 sm:$0xff]   ;;  %v9797_v59 = vld [vmem:[%s10947_s17 + $0x510] ss:$8 sps:$4 sm:$0xff]  }
 0x590   : > { %5290 = vmatprep.mubr.bf16.mxu0 %v10510_v47 }
 0x591   : > { %4393 = vmatpush1.bf16.msra.mxu1 %v9746_v58  ;;  %v9796_v58 = vld [vmem:[%s10947_s17 + $0x14] ss:$8 sps:$4 sm:$0xff]  }
 0x592   : > { %5666 = vmatpush1.bf16.msra.mxu0 %v9749_v0  ;;  %4394 = vmatprep.subr.bf16.mxu1 %v9754_v11  ;;  %v9799_v0 = vld [vmem:[%s10947_s17 + $0x514] ss:$8 sps:$4 sm:$0xff]   ;;  %v9805_v11 = vld [vmem:[%s10947_s17 + $0x524] ss:$8 sps:$4 sm:$0xff]  }
 0x593   : > { %5667 = vmatprep.subr.bf16.mxu0 %v9757_v37  ;;  %v13085_v37 = vpack.c.bf16 %v12928_v20, %v12912_v15  ;;  %v9806_v15 = vld [vmem:[%s10947_s17 + $0x30] ss:$8 sps:$4 sm:$0xff]  }
 0x594   : > { %4360 = vmatmul.mubr.bf16.gmra.mrb[4].mxu1 %v13005_v36  ;;  %v9809_v20 = vld [vmem:[%s10947_s17 + $0x530] ss:$8 sps:$4 sm:$0xff]  }
 0x595   : > { %5291 = vmatmul.mubr.bf16.gmra.mrb[20].mxu0 %v12942_v57  ;;  %4395 = vmatpush1.bf16.msra.mxu1 %v9752_v48  ;;  %v9775_v57 = vld [vmem:[%s10947_s17 + $0x4d4] ss:$8 sps:$4 sm:$0xff]   ;;  %v9800_v48 = vld [vmem:[%s10947_s17 + $0x20] ss:$8 sps:$4 sm:$0xff]  }
 0x596   : > { %5668 = vmatpush1.bf16.msra.mxu0 %v9755_v26  ;;  %4396 = vmatprep.subr.bf16.mxu1 %v9760_v51  ;;  %v9803_v26 = vld [vmem:[%s10947_s17 + $0x520] ss:$8 sps:$4 sm:$0xff]   ;;  %v9808_v51 = vld [vmem:[%s10947_s17 + $0x34] ss:$8 sps:$4 sm:$0xff]  }
 0x597   : > { %5669 = vmatprep.subr.bf16.mxu0 %v9763_v63  ;;  %4369 = vmatprep.mubr.bf16.mxu1 %v13017_v30  ;;  %v9811_v63 = vld [vmem:[%s10947_s17 + $0x534] ss:$8 sps:$4 sm:$0xff]  }
 0x598   : > { %5300 = vmatprep.mubr.bf16.mxu0 %v10510_v47 }
 0x599   : > { %4397 = vmatpush1.bf16.msra.mxu1 %v9758_v7  ;;  %v9814_v7 = vld [vmem:[%s10947_s17 + $0x44] ss:$8 sps:$4 sm:$0xff]  }
 0x59a   : > { %5670 = vmatpush1.bf16.msra.mxu0 %v9761_v29  ;;  %4398 = vmatprep.subr.bf16.mxu1 %v9766_v60  ;;  %v9817_v29 = vld [vmem:[%s10947_s17 + $0x544] ss:$8 sps:$4 sm:$0xff]   ;;  %v9812_v60 = vld [vmem:[%s10947_s17 + $0x40] ss:$8 sps:$4 sm:$0xff]  }
 0x59b   : > { %5671 = vmatprep.subr.bf16.mxu0 %v9769_v24  ;;  %v4024_v24 = vpack.c.bf16 %v12951_v54, %v12930_v2  ;;  %v9829_v2 = vld [vmem:[%s10947_s17 + $0x564] ss:$8 sps:$4 sm:$0xff]   ;;  %v9824_v54 = vld [vmem:[%s10947_s17 + $0x60] ss:$8 sps:$4 sm:$0xff]  }
 0x59c   : > { %4370 = vmatmul.mubr.bf16.gmra.mrb[8].mxu1 %v13033_v62 }
 0x59d   : > { %5301 = vmatmul.mubr.bf16.gmra.mrb[24].mxu0 %v12960_v61  ;;  %4399 = vmatpush1.bf16.msra.mxu1 %v9764_v46  ;;  %v9784_v61 = vld [vmem:[%s10947_s17 + $0x2f4] ss:$8 sps:$4 sm:$0xff]   ;;  %v9815_v46 = vld [vmem:[%s10947_s17 + $0x540] ss:$8 sps:$4 sm:$0xff]  }
 0x59e   : > { %5672 = vmatpush1.bf16.msra.mxu0 %v9767_v16  ;;  %4400 = vmatprep.subr.bf16.mxu1 %v9772_v21  ;;  %v9820_v16 = vld [vmem:[%s10947_s17 + $0x54] ss:$8 sps:$4 sm:$0xff]   ;;  %v9818_v21 = vld [vmem:[%s10947_s17 + $0x50] ss:$8 sps:$4 sm:$0xff]  }
 0x59f   : > { %5673 = vmatprep.subr.bf16.mxu0 %v9775_v57  ;;  %4379 = vmatprep.mubr.bf16.mxu1 %v13042_v38  ;;  %v9821_v57 = vld [vmem:[%s10947_s17 + $0x550] ss:$8 sps:$4 sm:$0xff]  }
 0x5a0   : > { %5310 = vmatprep.mubr.bf16.mxu0 %v10510_v47 }
 0x5a1   : > { %4401 = vmatpush1.bf16.msra.mxu1 %v9770_v41  ;;  %v9826_v41 = vld [vmem:[%s10947_s17 + $0x64] ss:$8 sps:$4 sm:$0xff]  }
 0x5a2   : > { %5674 = vmatpush1.bf16.msra.mxu0 %v9773_v31  ;;  %4402 = vmatprep.subr.bf16.mxu1 %v9778_v43  ;;  %v9827_v31 = vld [vmem:[%s10947_s17 + $0x560] ss:$8 sps:$4 sm:$0xff]   ;;  %v4027_v43 = vpack.c.bf16 %v13059_v9, %v12953_v32  ;;  %v9838_v32 = vld [vmem:[%s10947_s17 + $0x84] ss:$8 sps:$4 sm:$0xff]  }
 0x5a3   : > { %5675 = vmatprep.subr.bf16.mxu0 %v9781_v25  ;;  %v9832_v25 = vld [vmem:[%s10947_s17 + $0x74] ss:$8 sps:$4 sm:$0xff]  }
 0x5a4   : > { %4380 = vmatmul.mubr.bf16.gmra.mrb[12].mxu1 %v13055_v6 }
 0x5a5   : > { %4403 = vmatpush1.bf16.msra.mxu1 %v9776_v35  ;;  %4422 = vmatprep.mubr.bf16.mxu1 %v10510_v47  ;;  %v9835_v35 = vld [vmem:[%s10947_s17 + $0x574] ss:$8 sps:$4 sm:$0xff]  }
 0x5a6   : > { %5676 = vmatpush1.bf16.msra.mxu0 %v9779_v22  ;;  %4404 = vmatprep.subr.bf16.mxu1 %v9784_v61  ;;  %v3932_v22 = vpack.c.bf16 %v12933_v10, %v3908_v34  ;;  %v9830_v61 = vld [vmem:[%s10947_s17 + $0x70] ss:$8 sps:$4 sm:$0xff]   ;;  %v9844_v10 = vld [vmem:[%s10947_s17 + $0x94] ss:$8 sps:$4 sm:$0xff]  }
 0x5a7   : > { %5677 = vmatprep.subr.bf16.mxu0 %v9787_v5  ;;  %5311 = vmatmul.mubr.bf16.gmra.mrb[28].mxu0 %v4885_v4  ;;  %v9833_v5 = vld [vmem:[%s10947_s17 + $0x570] ss:$8 sps:$4 sm:$0xff]   ;;  %v9839_v4 = vld [vmem:[%s10947_s17 + $0x580] ss:$8 sps:$4 sm:$0xff]  }
 0x5a8   : > { %5695 = vmatprep.mubr.bf16.mxu0 %v12989_v19  ;;  %v9802_v19 = vld [vmem:[%s10947_s17 + $0x24] ss:$8 sps:$4 sm:$0xff]  }
 0x5a9   : > { %4405 = vmatpush1.bf16.msra.mxu1 %v9782_v53  ;;  %v9841_v53 = vld [vmem:[%s10947_s17 + $0x584] ss:$8 sps:$4 sm:$0xff]  }
 0x5aa   : > { %5678 = vmatpush1.bf16.msra.mxu0 %v9785_v3  ;;  %4703 = vmatprep.subr.bf16.mxu1 %v9790_v40  ;;  %v9836_v3 = vld [vmem:[%s10947_s17 + $0x80] ss:$8 sps:$4 sm:$0xff]   ;;  %v9847_v40 = vld [vmem:[%s10947_s17 + $0x594] ss:$8 sps:$4 sm:$0xff]  }
 0x5ab   : > { %5679 = vmatprep.subr.bf16.mxu0 %v9793_v27  ;;  %v9842_v27 = vld [vmem:[%s10947_s17 + $0x90] ss:$8 sps:$4 sm:$0xff]  }
 0x5ac   : > { %4423 = vmatmul.mubr.bf16.vlgmr.msra.gmra.mrb[0].mxu1 %v4018_v49  ;;  %v9845_v49 = vld [vmem:[%s10947_s17 + $0x590] ss:$8 sps:$4 sm:$0xff]  }
 0x5ad   : > { %4704 = vmatpush1.bf16.msra.mxu1 %v9788_v8  ;;  %4432 = vmatprep.mubr.bf16.mxu1 %v10510_v47  ;;  %v9850_v8 = vld [vmem:[%s10947_s17 + $0xa4] ss:$8 sps:$4 sm:$0xff]  }
 0x5ae   : > { %5680 = vmatpush1.bf16.msra.mxu0 %v9791_v44  ;;  %4705 = vmatprep.subr.bf16.mxu1 %v9796_v58  ;;  %v9853_v44 = vld [vmem:[%s10947_s17 + $0x5a4] ss:$8 sps:$4 sm:$0xff]   ;;  %v9848_v58 = vld [vmem:[%s10947_s17 + $0xa0] ss:$8 sps:$4 sm:$0xff]  }
 0x5af   : > { %5681 = vmatprep.subr.bf16.mxu0 %v9799_v0  ;;  %v9851_v0 = vld [vmem:[%s10947_s17 + $0x5a0] ss:$8 sps:$4 sm:$0xff]  }
 0x5b1   : > { %4706 = vmatpush1.bf16.msra.mxu1 %v9794_v50  ;;  %v9859_v50 = vld [vmem:[%s10947_s17 + $0x5b4] ss:$8 sps:$4 sm:$0xff]  }
 0x5b2   : > { %5682 = vmatpush1.bf16.msra.mxu0 %v9797_v59  ;;  %4707 = vmatprep.subr.bf16.mxu1 %v9802_v19  ;;  %v9854_v59 = vld [vmem:[%s10947_s17 + $0xb0] ss:$8 sps:$4 sm:$0xff]  }
 0x5b3   : > { %5683 = vmatprep.subr.bf16.mxu0 %v9805_v11  ;;  %v9857_v19 = vld [vmem:[%s10947_s17 + $0x5b0] ss:$8 sps:$4 sm:$0xff]   ;;  %v9865_v11 = vld [vmem:[%s10947_s17 + $0x5c4] ss:$8 sps:$4 sm:$0xff]  }
 0x5b4   : > { %4433 = vmatmul.mubr.bf16.gmra.mrb[4].mxu1 %v13085_v37 }
 0x5b5   : > { %4708 = vmatpush1.bf16.msra.mxu1 %v9800_v48  ;;  %4442 = vmatprep.mubr.bf16.mxu1 %v10510_v47  ;;  %v9860_v48 = vld [vmem:[%s10947_s17 + $0xc0] ss:$8 sps:$4 sm:$0xff]  }
 0x5b6   : > { %5684 = vmatpush1.bf16.msra.mxu0 %v9803_v26  ;;  %4709 = vmatprep.subr.bf16.mxu1 %v9808_v51  ;;  %v13140_v26 = vld [vmem:[#allocation2 + $0xe0] sm:$0xff]  ;;  %v13142_v51 = vld [vmem:[#allocation2 + $0xf8] sm:$0xff] }
 0x5b7   : > { %5685 = vmatprep.subr.bf16.mxu0 %v9811_v63  ;;  %v9868_v63 = vld [vmem:[%s10947_s17 + $0xd4] ss:$8 sps:$4 sm:$0xff]  }
 0x5b9   : > { %4710 = vmatpush1.bf16.msra.mxu1 %v9806_v15  ;;  %v9871_v15 = vld [vmem:[%s10947_s17 + $0x5d4] ss:$8 sps:$4 sm:$0xff]  }
 0x5ba   : > { %5686 = vmatpush1.bf16.msra.mxu0 %v9809_v20  ;;  %4711 = vmatprep.subr.bf16.mxu1 %v9814_v7  ;;  %v9866_v20 = vld [vmem:[%s10947_s17 + $0xd0] ss:$8 sps:$4 sm:$0xff]   ;;  %v5372_v7 = vpack.c.bf16 %v13142_v51, %v13140_v26 }
 0x5bb   : > { %5687 = vmatprep.subr.bf16.mxu0 %v9817_v29  ;;  %v13152_v29 = vld [vmem:[#allocation2 + $0xd8] sm:$0xff] }
 0x5bc   : > { %4443 = vmatmul.mubr.bf16.gmra.mrb[8].mxu1 %v4024_v24  ;;  %v9874_v24 = vld [vmem:[%s10947_s17 + $0xe4] ss:$8 sps:$4 sm:$0xff]  }
 0x5bd   : > { %4712 = vmatpush1.bf16.msra.mxu1 %v9812_v60  ;;  %4452 = vmatprep.mubr.bf16.mxu1 %v10510_v47  ;;  %v13154_v60 = vld [vmem:[#allocation2 + $0xf0] sm:$0xff] }
 0x5be   : > { %5688 = vmatpush1.bf16.msra.mxu0 %v9815_v46  ;;  %4713 = vmatprep.subr.bf16.mxu1 %v9820_v16  ;;  %v9877_v46 = vld [vmem:[%s10947_s17 + $0x5e4] ss:$8 sps:$4 sm:$0xff]   ;;  %v9872_v16 = vld [vmem:[%s10947_s17 + $0xe0] ss:$8 sps:$4 sm:$0xff]  }
 0x5bf   : > { %5689 = vmatprep.subr.bf16.mxu0 %v9823_v52  ;;  %v9875_v52 = vld [vmem:[%s10947_s17 + $0x5e0] ss:$8 sps:$4 sm:$0xff]  }
 0x5c1   : > { %4714 = vmatpush1.bf16.msra.mxu1 %v9818_v21  ;;  %v9880_v21 = vld [vmem:[%s10947_s17 + $0xf4] ss:$8 sps:$4 sm:$0xff]  }
 0x5c2   : > { %5690 = vmatpush1.bf16.msra.mxu0 %v9821_v57  ;;  %4715 = vmatprep.subr.bf16.mxu1 %v9826_v41  ;;  %v9883_v57 = vld [vmem:[%s10947_s17 + $0x5f4] ss:$8 sps:$4 sm:$0xff]   ;;  %v9878_v41 = vld [vmem:[%s10947_s17 + $0xf0] ss:$8 sps:$4 sm:$0xff]  }
 0x5c3   : > { %5691 = vmatprep.subr.bf16.mxu0 %v9829_v2  ;;  %v9881_v2 = vld [vmem:[%s10947_s17 + $0x5f0] ss:$8 sps:$4 sm:$0xff]  }
 0x5c4   : > { %4453 = vmatmul.mubr.bf16.gmra.mrb[12].mxu1 %v4027_v43  ;;  %v9889_v43 = vld [vmem:[%s10947_s17 + $0x604] ss:$8 sps:$4 sm:$0xff]  }
 0x5c5   : > { %4716 = vmatpush1.bf16.msra.mxu1 %v9824_v54  ;;  %4735 = vmatprep.mubr.bf16.mxu1 %v3932_v22  ;;  %v3907_v54 = vld [vmem:[#allocation2] sm:$0xff] }
 0x5c6   : > { %5692 = vmatpush1.bf16.msra.mxu0 %v9827_v31  ;;  %4717 = vmatprep.subr.bf16.mxu1 %v9832_v25  ;;  %v9886_v31 = vld [vmem:[%s10947_s17 + $0x304] ss:$8 sps:$4 sm:$0xff]   ;;  %v3931_v34 = vpack.c.bf16 %v12969_v42, %v3907_v54  ;;  %v9884_v25 = vld [vmem:[%s10947_s17 + $0x300] ss:$8 sps:$4 sm:$0xff]   ;;  %v9892_v22 = vld [vmem:[%s10947_s17 + $0x314] ss:$8 sps:$4 sm:$0xff]  }
 0x5c7   : > { %5693 = vmatprep.subr.bf16.mxu0 %v9835_v35  ;;  %v9887_v35 = vld [vmem:[%s10947_s17 + $0x600] ss:$8 sps:$4 sm:$0xff]   ;;  %v9898_v42 = vld [vmem:[%s10947_s17 + $0x324] ss:$8 sps:$4 sm:$0xff]   ;;  %v9938_v54 = vld [vmem:[%s10947_s17 + $0x390] ss:$8 sps:$4 sm:$0xff]  }
 0x5c9   : > { %4718 = vmatpush1.bf16.msra.mxu1 %v9830_v61  ;;  %v9895_v61 = vld [vmem:[%s10947_s17 + $0x614] ss:$8 sps:$4 sm:$0xff]  }
 0x5ca   : > { %5694 = vmatpush1.bf16.msra.mxu0 %v9833_v5  ;;  %4719 = vmatprep.subr.bf16.mxu1 %v9838_v32  ;;  %v9890_v5 = vld [vmem:[%s10947_s17 + $0x310] ss:$8 sps:$4 sm:$0xff]   ;;  %v3935_v32 = vpack.c.bf16 %v12979_v33, %v12935_v55  ;;  %v3934_v55 = vpack.c.bf16 %v12994_v18, %v12971_v45  ;;  %v9896_v33 = vld [vmem:[%s10947_s17 + $0x320] ss:$8 sps:$4 sm:$0xff]  }
 0x5cb   : > { %5736 = vmatprep.subr.bf16.mxu0 %v9841_v53  ;;  %v9893_v53 = vld [vmem:[%s10947_s17 + $0x610] ss:$8 sps:$4 sm:$0xff]  }
 0x5cc   : > { %v9902_v45 = vld [vmem:[%s10947_s17 + $0x330] ss:$8 sps:$4 sm:$0xff]  }
 0x5cd   : > { %5696 = vmatmul.mubr.bf16.vlgmr.msra.gmra.mrb[16].mxu0 %v13005_v36  ;;  %4720 = vmatpush1.bf16.msra.mxu1 %v9836_v3  ;;  %v9856_v36 = vld [vmem:[%s10947_s17 + $0xb4] ss:$8 sps:$4 sm:$0xff]   ;;  %v9905_v18 = vld [vmem:[%s10947_s17 + $0x630] ss:$8 sps:$4 sm:$0xff]  }
 0x5ce   : > { %5737 = vmatpush1.bf16.msra.mxu0 %v9839_v4  ;;  %4721 = vmatprep.subr.bf16.mxu1 %v9844_v10  ;;  %v13180_v3 = vld [vmem:[#allocation2 + $0x88] sm:$0xff]  ;;  %v13182_v4 = vld [vmem:[#allocation2 + $0xa0] sm:$0xff]  ;;  %v9901_v10 = vld [vmem:[%s10947_s17 + $0x624] ss:$8 sps:$4 sm:$0xff]  }
 0x5cf   : > { %5738 = vmatprep.subr.bf16.mxu0 %v9847_v40  ;;  %5705 = vmatprep.mubr.bf16.mxu0 %v13017_v30  ;;  %v9862_v30 = vld [vmem:[%s10947_s17 + $0xc4] ss:$8 sps:$4 sm:$0xff]   ;;  %v5367_v40 = vpack.c.bf16 %v13182_v4, %v13180_v3 }
 0x5d1   : > { %4722 = vmatpush1.bf16.msra.mxu1 %v9842_v27  ;;  %v9904_v27 = vld [vmem:[%s10947_s17 + $0x334] ss:$8 sps:$4 sm:$0xff]  }
 0x5d2   : > { %5739 = vmatpush1.bf16.msra.mxu0 %v9845_v49  ;;  %4723 = vmatprep.subr.bf16.mxu1 %v9850_v8  ;;  %v9907_v49 = vld [vmem:[%s10947_s17 + $0x634] ss:$8 sps:$4 sm:$0xff]   ;;  %v3938_v8 = vpack.c.bf16 %v13007_v39, %v12981_v14  ;;  %v3937_v14 = vpack.c.bf16 %v13021_v56, %v12996_v1  ;;  %v9908_v39 = vld [vmem:[%s10947_s17 + $0x340] ss:$8 sps:$4 sm:$0xff]   ;;  %v9914_v1 = vld [vmem:[%s10947_s17 + $0x350] ss:$8 sps:$4 sm:$0xff]  }
 0x5d3   : > { %5740 = vmatprep.subr.bf16.mxu0 %v9853_v44  ;;  %v13198_v44 = vld [vmem:[#allocation2 + $0xb8] sm:$0xff] }
 0x5d4   : > { %v9917_v56 = vld [vmem:[%s10947_s17 + $0x650] ss:$8 sps:$4 sm:$0xff]  }
 0x5d5   : > { %5706 = vmatmul.mubr.bf16.gmra.mrb[20].mxu0 %v13033_v62  ;;  %4724 = vmatpush1.bf16.msra.mxu1 %v9848_v58  ;;  %v9863_v62 = vld [vmem:[%s10947_s17 + $0x5c0] ss:$8 sps:$4 sm:$0xff]   ;;  %v9910_v58 = vld [vmem:[%s10947_s17 + $0x344] ss:$8 sps:$4 sm:$0xff]  }
 0x5d6   : > { %5741 = vmatpush1.bf16.msra.mxu0 %v9851_v0  ;;  %4725 = vmatprep.subr.bf16.mxu1 %v9856_v36  ;;  %v9913_v0 = vld [vmem:[%s10947_s17 + $0x644] ss:$8 sps:$4 sm:$0xff]   ;;  %v5370_v36 = vpack.c.bf16 %v13059_v9, %v13198_v44  ;;  %v13215_v9 = vld [vmem:[#allocation2 + $0x100] sm:$0xff] }
 0x5d7   : > { %5742 = vmatprep.subr.bf16.mxu0 %v9859_v50  ;;  %5715 = vmatprep.mubr.bf16.mxu0 %v13042_v38  ;;  %v9869_v38 = vld [vmem:[%s10947_s17 + $0x5d0] ss:$8 sps:$4 sm:$0xff]   ;;  %v9911_v50 = vld [vmem:[%s10947_s17 + $0x640] ss:$8 sps:$4 sm:$0xff]  }
 0x5d9   : > { %4726 = vmatpush1.bf16.msra.mxu1 %v9854_v59  ;;  %v9916_v59 = vld [vmem:[%s10947_s17 + $0x354] ss:$8 sps:$4 sm:$0xff]  }
 0x5da   : > { %5743 = vmatpush1.bf16.msra.mxu0 %v9857_v19  ;;  %4727 = vmatprep.subr.bf16.mxu1 %v9862_v30  ;;  %v9919_v19 = vld [vmem:[%s10947_s17 + $0x654] ss:$8 sps:$4 sm:$0xff]   ;;  %v3941_v30 = vpack.c.bf16 %v13035_v23, %v13009_v13  ;;  %v4851_v13 = vld [vmem:[#allocation2 + $0x38] sm:$0xff]  ;;  %v3940_v23 = vpack.c.bf16 %v13046_v12, %v13024_v28 }
 0x5db   : > { %5744 = vmatprep.subr.bf16.mxu0 %v9865_v11  ;;  %v9922_v11 = vld [vmem:[%s10947_s17 + $0x364] ss:$8 sps:$4 sm:$0xff]   ;;  %v9926_v12 = vld [vmem:[%s10947_s17 + $0x370] ss:$8 sps:$4 sm:$0xff]  }
 0x5dd   : > { %5716 = vmatmul.mubr.bf16.gmra.mrb[24].mxu0 %v13055_v6  ;;  %4728 = vmatpush1.bf16.msra.mxu1 %v9860_v48  ;;  %v5371_v6 = vpack.c.bf16 %v13154_v60, %v13152_v29  ;;  %v9925_v48 = vld [vmem:[%s10947_s17 + $0x664] ss:$8 sps:$4 sm:$0xff]  }
 0x5de   : > { %5745 = vmatpush1.bf16.msra.mxu0 %v9863_v62  ;;  %4729 = vmatprep.subr.bf16.mxu1 %v9868_v63  ;;  %v5373_v62 = vpack.c.bf16 %v13215_v9, %v13062_v17  ;;  %v4854_v63 = vld [vmem:[#allocation2 + $0x50] sm:$0xff]  ;;  %v9929_v17 = vld [vmem:[%s10947_s17 + $0x670] ss:$8 sps:$4 sm:$0xff]  }
 0x5df   : > { %5746 = vmatprep.subr.bf16.mxu0 %v9871_v15  ;;  %5725 = vmatprep.mubr.bf16.mxu0 %v5372_v7  ;;  %v5827_v15 = vld [vmem:[#allocation2 + $0x68] sm:$0xff] }
 0x5e0   : > { %v9920_v7 = vld [vmem:[%s10947_s17 + $0x360] ss:$8 sps:$4 sm:$0xff]  }
 0x5e1   : > { %4730 = vmatpush1.bf16.msra.mxu1 %v9866_v20  ;;  %v5830_v20 = vld [vmem:[#allocation2 + $0x80] sm:$0xff] }
 0x5e2   : > { %5747 = vmatpush1.bf16.msra.mxu0 %v9869_v38  ;;  %4731 = vmatprep.subr.bf16.mxu1 %v9874_v24  ;;  %v9923_v38 = vld [vmem:[%s10947_s17 + $0x660] ss:$8 sps:$4 sm:$0xff]   ;;  %v9928_v24 = vld [vmem:[%s10947_s17 + $0x374] ss:$8 sps:$4 sm:$0xff]   ;;  %v13228_v28 = vpack.c.bf16 %v5830_v20, %v5827_v15 }
 0x5e3   : > { %5748 = vmatprep.subr.bf16.mxu0 %v9877_v46  ;;  %v9931_v46 = vld [vmem:[%s10947_s17 + $0x674] ss:$8 sps:$4 sm:$0xff]   ;;  %v5832_v15 = vld [vmem:[#allocation2 + $0x90] sm:$0xff] }
 0x5e4   : > { %v5835_v20 = vld [vmem:[#allocation2 + $0xa8] sm:$0xff] }
 0x5e5   : > { %5726 = vmatmul.mubr.bf16.gmra.mrb[28].mxu0 %v5371_v6  ;;  %4732 = vmatpush1.bf16.msra.mxu1 %v9872_v16  ;;  %v4875_v16 = vpack.c.bf16 %v4854_v63, %v4851_v13  ;;  %v9934_v6 = vld [vmem:[%s10947_s17 + $0x384] ss:$8 sps:$4 sm:$0xff]   ;;  %v9980_v13 = vld [vmem:[%s10947_s17 + $0x700] ss:$8 sps:$4 sm:$0xff]   ;;  %v9983_v63 = vld [vmem:[%s10947_s17 + $0x710] ss:$8 sps:$4 sm:$0xff]  }
 0x5e6   : > { %5749 = vmatpush1.bf16.msra.mxu0 %v9875_v52  ;;  %4733 = vmatprep.subr.bf16.mxu1 %v9880_v21  ;;  %v9937_v52 = vld [vmem:[%s10947_s17 + $0x684] ss:$8 sps:$4 sm:$0xff]   ;;  %v9932_v21 = vld [vmem:[%s10947_s17 + $0x380] ss:$8 sps:$4 sm:$0xff]  }
 0x5e7   : > { %5750 = vmatprep.subr.bf16.mxu0 %v9883_v57  ;;  %5768 = vmatprep.mubr.bf16.mxu0 %v10510_v47  ;;  %v9935_v57 = vld [vmem:[%s10947_s17 + $0x680] ss:$8 sps:$4 sm:$0xff]  }
 0x5e9   : > { %4734 = vmatpush1.bf16.msra.mxu1 %v9878_v41  ;;  %v9940_v41 = vld [vmem:[%s10947_s17 + $0x394] ss:$8 sps:$4 sm:$0xff]  }
 0x5ea   : > { %5751 = vmatpush1.bf16.msra.mxu0 %v9881_v2  ;;  %5175 = vmatprep.subr.bf16.mxu1 %v9886_v31  ;;  %v9943_v2 = vld [vmem:[%s10947_s17 + $0x694] ss:$8 sps:$4 sm:$0xff]   ;;  %v9941_v31 = vld [vmem:[%s10947_s17 + $0x690] ss:$8 sps:$4 sm:$0xff]  }
 0x5eb   : > { %6151 = vmatprep.subr.bf16.mxu0 %v9889_v43  ;;  %v9946_v43 = vld [vmem:[%s10947_s17 + $0x3a4] ss:$8 sps:$4 sm:$0xff]  }
 0x5ec   : > { %4736 = vmatmul.mubr.bf16.vlgmr.msra.gmra.mrb[0].mxu1 %v3931_v34  ;;  %v9949_v34 = vld [vmem:[%s10947_s17 + $0x6a4] ss:$8 sps:$4 sm:$0xff]  }
 0x5ed   : > { %5769 = vmatmul.mubr.bf16.vlgmr.msra.gmra.mrb[16].mxu0 %v13085_v37  ;;  %5176 = vmatpush1.bf16.msra.mxu1 %v9884_v25  ;;  %v9899_v37 = vld [vmem:[%s10947_s17 + $0x620] ss:$8 sps:$4 sm:$0xff]  }
 0x5ee   : > { %6152 = vmatpush1.bf16.msra.mxu0 %v9887_v35  ;;  %5177 = vmatprep.subr.bf16.mxu1 %v9892_v22  ;;  %v9944_v25 = vld [vmem:[%s10947_s17 + $0x3a0] ss:$8 sps:$4 sm:$0xff]   ;;  %v9952_v22 = vld [vmem:[%s10947_s17 + $0x3b4] ss:$8 sps:$4 sm:$0xff]  }
 0x5ef   : > { %6153 = vmatprep.subr.bf16.mxu0 %v9895_v61  ;;  %4745 = vmatprep.mubr.bf16.mxu1 %v3935_v32  ;;  %v9947_v35 = vld [vmem:[%s10947_s17 + $0x6a0] ss:$8 sps:$4 sm:$0xff]   ;;  %v9955_v61 = vld [vmem:[%s10947_s17 + $0x6b4] ss:$8 sps:$4 sm:$0xff]   ;;  %v9953_v32 = vld [vmem:[%s10947_s17 + $0x6b0] ss:$8 sps:$4 sm:$0xff]  }
 0x5f0   : > { %5778 = vmatprep.mubr.bf16.mxu0 %v10510_v47 }
 0x5f1   : > { %5178 = vmatpush1.bf16.msra.mxu1 %v9890_v5  ;;  %v9950_v5 = vld [vmem:[%s10947_s17 + $0x3b0] ss:$8 sps:$4 sm:$0xff]  }
 0x5f2   : > { %6154 = vmatpush1.bf16.msra.mxu0 %v9893_v53  ;;  %5179 = vmatprep.subr.bf16.mxu1 %v9898_v42  ;;  %v9958_v53 = vld [vmem:[%s10947_s17 + $0x3c4] ss:$8 sps:$4 sm:$0xff]  }
 0x5f3   : > { %6155 = vmatprep.subr.bf16.mxu0 %v9901_v10  ;;  %v9961_v42 = vld [vmem:[%s10947_s17 + $0x6c4] ss:$8 sps:$4 sm:$0xff]   ;;  %v9956_v10 = vld [vmem:[%s10947_s17 + $0x3c0] ss:$8 sps:$4 sm:$0xff]  }
 0x5f4   : > { %4746 = vmatmul.mubr.bf16.gmra.mrb[4].mxu1 %v3934_v55  ;;  %v9959_v55 = vld [vmem:[%s10947_s17 + $0x6c0] ss:$8 sps:$4 sm:$0xff]  }
 0x5f5   : > { %5779 = vmatmul.mubr.bf16.gmra.mrb[20].mxu0 %v5367_v40  ;;  %5180 = vmatpush1.bf16.msra.mxu1 %v9896_v33  ;;  %v9964_v33 = vld [vmem:[%s10947_s17 + $0x3d4] ss:$8 sps:$4 sm:$0xff]   ;;  %v9962_v40 = vld [vmem:[%s10947_s17 + $0x3d0] ss:$8 sps:$4 sm:$0xff]  }
 0x5f6   : > { %6156 = vmatpush1.bf16.msra.mxu0 %v9899_v37  ;;  %5181 = vmatprep.subr.bf16.mxu1 %v9904_v27  ;;  %v9967_v37 = vld [vmem:[%s10947_s17 + $0x6d4] ss:$8 sps:$4 sm:$0xff]   ;;  %v9965_v27 = vld [vmem:[%s10947_s17 + $0x6d0] ss:$8 sps:$4 sm:$0xff]  }
 0x5f7   : > { %6157 = vmatprep.subr.bf16.mxu0 %v9907_v49  ;;  %4755 = vmatprep.mubr.bf16.mxu1 %v3938_v8  ;;  %v9970_v49 = vld [vmem:[%s10947_s17 + $0x3e4] ss:$8 sps:$4 sm:$0xff]  }
 0x5f8   : > { %5788 = vmatprep.mubr.bf16.mxu0 %v10510_v47  ;;  %v9973_v8 = vld [vmem:[%s10947_s17 + $0x6e4] ss:$8 sps:$4 sm:$0xff]  }
 0x5f9   : > { %5182 = vmatpush1.bf16.msra.mxu1 %v9902_v45  ;;  %v9968_v45 = vld [vmem:[%s10947_s17 + $0x3e0] ss:$8 sps:$4 sm:$0xff]  }
 0x5fa   : > { %6158 = vmatpush1.bf16.msra.mxu0 %v9905_v18  ;;  %5183 = vmatprep.subr.bf16.mxu1 %v9910_v58  ;;  %v9971_v18 = vld [vmem:[%s10947_s17 + $0x6e0] ss:$8 sps:$4 sm:$0xff]   ;;  %v9976_v58 = vld [vmem:[%s10947_s17 + $0x3f4] ss:$8 sps:$4 sm:$0xff]  }
 0x5fb   : > { %6159 = vmatprep.subr.bf16.mxu0 %v9913_v0  ;;  %v9979_v0 = vld [vmem:[%s10947_s17 + $0x6f4] ss:$8 sps:$4 sm:$0xff]  }
 0x5fc   : > { %4756 = vmatmul.mubr.bf16.gmra.mrb[8].mxu1 %v3937_v14  ;;  %v9974_v14 = vld [vmem:[%s10947_s17 + $0x3f0] ss:$8 sps:$4 sm:$0xff]  }
 0x5fd   : > { %5789 = vmatmul.mubr.bf16.gmra.mrb[24].mxu0 %v5370_v36  ;;  %5184 = vmatpush1.bf16.msra.mxu1 %v9908_v39  ;;  %v9977_v39 = vld [vmem:[%s10947_s17 + $0x6f0] ss:$8 sps:$4 sm:$0xff]   ;;  %v4850_v36 = vld [vmem:[#allocation2 + $0x30] sm:$0xff] }
 0x5fe   : > { %6160 = vmatpush1.bf16.msra.mxu0 %v9911_v50  ;;  %5185 = vmatprep.subr.bf16.mxu1 %v9916_v59  ;;  %v4853_v50 = vld [vmem:[#allocation2 + $0x48] sm:$0xff]  ;;  %v5826_v59 = vld [vmem:[#allocation2 + $0x60] sm:$0xff] }
 0x5ff   : > { %6161 = vmatprep.subr.bf16.mxu0 %v9919_v19  ;;  %4765 = vmatprep.mubr.bf16.mxu1 %v3941_v30  ;;  %v5829_v19 = vld [vmem:[#allocation2 + $0x78] sm:$0xff] }
 0x600   : > { %5798 = vmatprep.mubr.bf16.mxu0 %v10510_v47  ;;  %v9982_v30 = vld [vmem:[%s10947_s17 + $0x704] ss:$8 sps:$4 sm:$0xff]  }
 0x601   : > { %5186 = vmatpush1.bf16.msra.mxu1 %v9914_v1  ;;  %v4874_v1 = vpack.c.bf16 %v4853_v50, %v4850_v36 }
 0x602   : > { %6162 = vmatpush1.bf16.msra.mxu0 %v9917_v56  ;;  %5187 = vmatprep.subr.bf16.mxu1 %v9922_v11  ;;  %v5850_v56 = vpack.c.bf16 %v5829_v19, %v5826_v59  ;;  %v5833_v11 = vld [vmem:[#allocation2 + $0x98] sm:$0xff] }
 0x603   : > { %6163 = vmatprep.subr.bf16.mxu0 %v9925_v48  ;;  %v5836_v48 = vld [vmem:[#allocation2 + $0xb0] sm:$0xff] }
 0x604   : > { %4766 = vmatmul.mubr.bf16.gmra.mrb[12].mxu1 %v3940_v23  ;;  %v9985_v23 = vld [vmem:[%s10947_s17 + $0x714] ss:$8 sps:$4 sm:$0xff]  }
 0x605   : > { %5799 = vmatmul.mubr.bf16.gmra.mrb[28].mxu0 %v5373_v62  ;;  %5188 = vmatpush1.bf16.msra.mxu1 %v9920_v7  ;;  %v5854_v62 = vpack.c.bf16 %v5836_v48, %v5833_v11  ;;  %v9988_v7 = vld [vmem:[%s10947_s17 + $0x724] ss:$8 sps:$4 sm:$0xff]  }
 0x606   : > { %6164 = vmatpush1.bf16.msra.mxu0 %v9923_v38  ;;  %5189 = vmatprep.subr.bf16.mxu1 %v9928_v24  ;;  %v5853_v38 = vpack.c.bf16 %v5835_v20, %v5832_v15  ;;  %v5839_v24 = vld [vmem:[#allocation2 + $0xc8] sm:$0xff] }
 0x607   : > { %6165 = vmatprep.subr.bf16.mxu0 %v9931_v46  ;;  %5207 = vmatprep.mubr.bf16.mxu1 %v4875_v16  ;;  %v9986_v46 = vld [vmem:[%s10947_s17 + $0x720] ss:$8 sps:$4 sm:$0xff]   ;;  %v9991_v16 = vld [vmem:[%s10947_s17 + $0x734] ss:$8 sps:$4 sm:$0xff]  }
 0x608   : > { %6183 = vmatprep.mubr.bf16.mxu0 %v13228_v28 }
 0x609   : > { %5190 = vmatpush1.bf16.msra.mxu1 %v9926_v12  ;;  %v5857_v12 = vpack.c.bf16 %v13140_v26, %v5839_v24  ;;  %v9992_v26 = vld [vmem:[%s10947_s17 + $0x740] ss:$8 sps:$4 sm:$0xff]  }
 0x60a   : > { %6166 = vmatpush1.bf16.msra.mxu0 %v9929_v17  ;;  %5191 = vmatprep.subr.bf16.mxu1 %v9934_v6  ;;  %v9989_v17 = vld [vmem:[%s10947_s17 + $0x730] ss:$8 sps:$4 sm:$0xff]   ;;  %v9994_v6 = vld [vmem:[%s10947_s17 + $0x744] ss:$8 sps:$4 sm:$0xff]  }
 0x60b   : > { %6167 = vmatprep.subr.bf16.mxu0 %v9937_v52 }
 0x60d   : > { %5192 = vmatpush1.bf16.msra.mxu1 %v9932_v21  ;;  %v5848_v21 = vld [vmem:[#allocation2 + $0x110] sm:$0xff] }
 0x60e   : > { %6168 = vmatpush1.bf16.msra.mxu0 %v9935_v57  ;;  %5193 = vmatprep.subr.bf16.mxu1 %v9940_v41  ;;  %v9997_v57 = vld [vmem:[%s10947_s17 + $0x754] ss:$8 sps:$4 sm:$0xff]   ;;  %v5860_v41 = vpack.c.bf16 %v5848_v21, %v13142_v51  ;;  %v9998_v51 = vld [vmem:[%s10947_s17 + $0x760] ss:$8 sps:$4 sm:$0xff]  }
 0x60f   : > { %6169 = vmatprep.subr.bf16.mxu0 %v9943_v2  ;;  %v9995_v2 = vld [vmem:[%s10947_s17 + $0x750] ss:$8 sps:$4 sm:$0xff]  }
 0x611   : > { %5194 = vmatpush1.bf16.msra.mxu1 %v9938_v54  ;;  %v5847_v54 = vld [vmem:[#allocation2 + $0x108] sm:$0xff] }
 0x612   : > { %6170 = vmatpush1.bf16.msra.mxu0 %v9941_v31  ;;  %5195 = vmatprep.subr.bf16.mxu1 %v9946_v43 }
 0x613   : > { %6171 = vmatprep.subr.bf16.mxu0 %v9949_v34  ;;  %v5859_v34 = vpack.c.bf16 %v5847_v54, %v13154_v60 }
 0x615   : > { %5196 = vmatpush1.bf16.msra.mxu1 %v9944_v25 }
 0x616   : > { %6172 = vmatpush1.bf16.msra.mxu0 %v9947_v35  ;;  %5197 = vmatprep.subr.bf16.mxu1 %v9952_v22  ;;  %v10003_v22 = vld [vmem:[%s10947_s17 + $0x774] ss:$8 sps:$4 sm:$0xff]  }
 0x617   : > { %6173 = vmatprep.subr.bf16.mxu0 %v9955_v61  ;;  %v10001_v61 = vld [vmem:[%s10947_s17 + $0x770] ss:$8 sps:$4 sm:$0xff]  }
 0x619   : > { %5198 = vmatpush1.bf16.msra.mxu1 %v9950_v5  ;;  %v5828_v5 = vld [vmem:[#allocation2 + $0x70] sm:$0xff] }
 0x61a   : > { %6174 = vmatpush1.bf16.msra.mxu0 %v9953_v32  ;;  %5199 = vmatprep.subr.bf16.mxu1 %v9958_v53  ;;  %v5840_v32 = vld [vmem:[#allocation2 + $0xd0] sm:$0xff]  ;;  %v5843_v53 = vld [vmem:[#allocation2 + $0xe8] sm:$0xff] }
 0x61b   : > { %6175 = vmatprep.subr.bf16.mxu0 %v9961_v42 }
 0x61d   : > { %5200 = vmatpush1.bf16.msra.mxu1 %v9956_v10  ;;  %v5852_v10 = vpack.c.bf16 %v13180_v3, %v5828_v5 }
 0x61e   : > { %6176 = vmatpush1.bf16.msra.mxu0 %v9959_v55  ;;  %5201 = vmatprep.subr.bf16.mxu1 %v9964_v33  ;;  %v5858_v55 = vpack.c.bf16 %v5843_v53, %v5840_v32 }
 0x61f   : > { %6177 = vmatprep.subr.bf16.mxu0 %v9967_v37 }
 0x621   : > { %5202 = vmatpush1.bf16.msra.mxu1 %v9962_v40  ;;  %v5849_v40 = vld [vmem:[#allocation2 + $0x118] sm:$0xff] }
 0x622   : > { %6178 = vmatpush1.bf16.msra.mxu0 %v9965_v27  ;;  %5203 = vmatprep.subr.bf16.mxu1 %v9970_v49 }
 0x623   : > { %6179 = vmatprep.subr.bf16.mxu0 %v9973_v8  ;;  %v5855_v8 = vpack.c.bf16 %v13198_v44, %v13182_v4 }
 0x625   : > { %5204 = vmatpush1.bf16.msra.mxu1 %v9968_v45  ;;  %v5861_v45 = vpack.c.bf16 %v5849_v40, %v13215_v9 }
 0x626   : > { %6180 = vmatpush1.bf16.msra.mxu0 %v9971_v18  ;;  %5205 = vmatprep.subr.bf16.mxu1 %v9976_v58 }
 0x627   : > { %6181 = vmatprep.subr.bf16.mxu0 %v9979_v0 }
 0x629   : > { %5206 = vmatpush1.bf16.msra.mxu1 %v9974_v14 }
 0x62a   : > { %6182 = vmatpush1.bf16.msra.mxu0 %v9977_v39  ;;  %9267 = vmatprep.subr.bf16.mxu1 %v9982_v30 }
 0x62b   : > { %6224 = vmatprep.subr.bf16.mxu0 %v9982_v30 }
 0x62c   : > { %5208 = vmatmul.mubr.bf16.vlgmr.msra.gmra.mrb[16].mxu1 %v4874_v1 }
 0x62d   : > { %6184 = vmatmul.mubr.bf16.vlgmr.msra.gmra.mrb[16].mxu0 %v5850_v56  ;;  %9275 = vmatpush1.bf16.msra.mxu1 %v9980_v13 }
 0x62e   : > { %6225 = vmatpush1.bf16.msra.mxu0 %v9980_v13  ;;  %9268 = vmatprep.subr.bf16.mxu1 %v9985_v23 }
 0x62f   : > { %6226 = vmatprep.subr.bf16.mxu0 %v9985_v23  ;;  %5217 = vmatprep.mubr.bf16.mxu1 %v13228_v28  ;;  %v5838_v28 = vld [vmem:[#allocation2 + $0xc0] sm:$0xff] }
 0x630   : > { %6193 = vmatprep.mubr.bf16.mxu0 %v5854_v62  ;;  %v5856_v52 = vpack.c.bf16 %v13152_v29, %v5838_v28  ;;  %v10000_v29 = vld [vmem:[%s10947_s17 + $0x764] ss:$8 sps:$4 sm:$0xff]   ;;  %s10511_s17 = smov 64  }
 0x631   : > { %9276 = vmatpush1.bf16.msra.mxu1 %v9983_v63 }
 0x632   : > { %6227 = vmatpush1.bf16.msra.mxu0 %v9983_v63  ;;  %9269 = vmatprep.subr.bf16.mxu1 %v9988_v7 }
 0x633   : > { %6228 = vmatprep.subr.bf16.mxu0 %v9988_v7 }
 0x634   : > { %5218 = vmatmul.mubr.bf16.gmra.mrb[20].mxu1 %v5850_v56 }
 0x635   : > { %6194 = vmatmul.mubr.bf16.gmra.mrb[20].mxu0 %v5853_v38  ;;  %9277 = vmatpush1.bf16.msra.mxu1 %v9986_v46 }
 0x636   : > { %6229 = vmatpush1.bf16.msra.mxu0 %v9986_v46  ;;  %9270 = vmatprep.subr.bf16.mxu1 %v9991_v16 }
 0x637   : > { %6230 = vmatprep.subr.bf16.mxu0 %v9991_v16  ;;  %5227 = vmatprep.mubr.bf16.mxu1 %v5854_v62 }
 0x638   : > { %6203 = vmatprep.mubr.bf16.mxu0 %v5857_v12 }
 0x639   : > { %9278 = vmatpush1.bf16.msra.mxu1 %v9989_v17 }
 0x63a   : > { %6231 = vmatpush1.bf16.msra.mxu0 %v9989_v17  ;;  %9271 = vmatprep.subr.bf16.mxu1 %v9994_v6 }
 0x63b   : > { %6232 = vmatprep.subr.bf16.mxu0 %v9994_v6 }
 0x63c   : > { %5228 = vmatmul.mubr.bf16.gmra.mrb[24].mxu1 %v5853_v38 }
 0x63d   : > { %6204 = vmatmul.mubr.bf16.gmra.mrb[24].mxu0 %v5856_v52  ;;  %9279 = vmatpush1.bf16.msra.mxu1 %v9992_v26 }
 0x63e   : > { %6233 = vmatpush1.bf16.msra.mxu0 %v9992_v26  ;;  %9272 = vmatprep.subr.bf16.mxu1 %v9997_v57 }
 0x63f   : > { %6234 = vmatprep.subr.bf16.mxu0 %v9997_v57  ;;  %5237 = vmatprep.mubr.bf16.mxu1 %v5857_v12 }
 0x640   : > { %v4810_v31 = vpop.f32.mrb[0].mxu0  ;;  %6213 = vmatprep.mubr.bf16.mxu0 %v5860_v41 }
 0x641   : > { %v4812_v43 = vpop.f32.mrb[1].mxu0  ;;  %9280 = vmatpush1.bf16.msra.mxu1 %v9995_v2 }
 0x642   : > { %v4814_v25 = vpop.f32.mrb[2].mxu0  ;;  %6235 = vmatpush1.bf16.msra.mxu0 %v9995_v2  ;;  %9273 = vmatprep.subr.bf16.mxu1 %v10000_v29 }
 0x643   : > { %v4816_v35 = vpop.f32.mrb[3].mxu0  ;;  %6236 = vmatprep.subr.bf16.mxu0 %v10000_v29 }
 0x644   : > { %5238 = vmatmul.mubr.bf16.gmra.mrb[28].mxu1 %v5856_v52 }
 0x645   : > { %6214 = vmatmul.mubr.bf16.gmra.mrb[28].mxu0 %v5859_v34  ;;  %9281 = vmatpush1.bf16.msra.mxu1 %v9998_v51 }
 0x646   : > { %6237 = vmatpush1.bf16.msra.mxu0 %v9998_v51  ;;  %9274 = vmatprep.subr.bf16.mxu1 %v10003_v22 }
 0x647   : > { %6238 = vmatprep.subr.bf16.mxu0 %v10003_v22  ;;  %6256 = vmatprep.mubr.bf16.mxu0 %v10510_v47 }
 0x648   : > { %v4820_v42 = vpop.f32.mrb[4].mxu0  ;;  %6276 = vmatprep.mubr.bf16.mxu1 %v10510_v47 }
 0x649   : > { %v4822_v60 = vpop.f32.mrb[5].mxu0  ;;  %9282 = vmatpush1.bf16.msra.mxu1 %v10001_v61 }
 0x64a   : > { %v4824_v33 = vpop.f32.mrb[6].mxu0  ;;  %6239 = vmatpush1.bf16.msra.mxu0 %v10001_v61 }
 0x64b   : > { %v4826_v37 = vpop.f32.mrb[7].mxu0 }
 0x64c   : > { %6277 = vmatmul.mubr.bf16.vlgmr.msra.gmra.mrb[32].mxu1 %v5858_v55 }
 0x64d   : > { %6257 = vmatmul.mubr.bf16.vlgmr.msra.gmra.mrb[16].mxu0 %v5852_v10  ;;  %6286 = vmatprep.mubr.bf16.mxu1 %v10510_v47 }
 0x64e   : > { %6266 = vmatprep.mubr.bf16.mxu0 %v10510_v47 }
 0x650   : > { %v4830_v27 = vpop.f32.mrb[8].mxu0 }
 0x651   : > { %v4832_v49 = vpop.f32.mrb[9].mxu0 }
 0x652   : > { %v4834_v3 = vpop.f32.mrb[10].mxu0 }
 0x653   : > { %v4836_v18 = vpop.f32.mrb[11].mxu0 }
 0x654   : > { %6287 = vmatmul.mubr.bf16.gmra.mrb[36].mxu1 %v5861_v45 }
 0x655   : > { %6267 = vmatmul.mubr.bf16.gmra.mrb[20].mxu0 %v5855_v8 }
 0x658   : > { %v4840_v58 = vpop.f32.mrb[12].mxu0 }
 0x659   : > { %v4842_v0 = vpop.f32.mrb[13].mxu0 }
 0x65a   : > { %v4844_v14 = vpop.f32.mrb[14].mxu0 }
 0x65b   : > { %v4846_v39 = vpop.f32.mrb[15].mxu0 }
 0x6bf   : > { %v4737_v36 = vpop.f32.mrb[0].mxu1 }
 0x6c0   : > { %v9283_v50 = vadd.f32 %v4810_v31, %v4737_v36  ;;  %v4739_v59 = vpop.f32.mrb[1].mxu1 }
 0x6c1   : > { %v9286_v47 = vadd.f32 %v4812_v43, %v4739_v59  ;;  %v4741_v19 = vpop.f32.mrb[2].mxu1 }
 0x6c2   : > { %v9289_v30 = vadd.f32 %v4814_v25, %v4741_v19  ;;  %v4743_v1 = vpop.f32.mrb[3].mxu1 }
 0x6c3   : > { %v9292_v56 = vadd.f32 %v4816_v35, %v4743_v1 }
 0x6c7   : > { %v4747_v11 = vpop.f32.mrb[4].mxu1 }
 0x6c8   : > { %v9295_v4 = vadd.f32 %v4820_v42, %v4747_v11  ;;  %v4749_v44 = vpop.f32.mrb[5].mxu1 }
 0x6c9   : > { %v9298_v9 = vadd.f32 %v4822_v60, %v4749_v44  ;;  %v4751_v48 = vpop.f32.mrb[6].mxu1 }
 0x6ca   : > { %v9301_v13 = vadd.f32 %v4824_v33, %v4751_v48  ;;  %v4753_v23 = vpop.f32.mrb[7].mxu1 }
 0x6cb   : > { %v9304_v62 = vadd.f32 %v4826_v37, %v4753_v23 }
 0x6cf   : > { %v4757_v63 = vpop.f32.mrb[8].mxu1 }
 0x6d0   : > { %v9307_v15 = vadd.f32 %v4830_v27, %v4757_v63  ;;  %v4759_v20 = vpop.f32.mrb[9].mxu1 }
 0x6d1   : > { %v9311_v7 = vadd.f32 %v4832_v49, %v4759_v20  ;;  %v4761_v38 = vpop.f32.mrb[10].mxu1 }
 0x6d2   : > { %v9315_v24 = vadd.f32 %v4834_v3, %v4761_v38  ;;  %v4763_v46 = vpop.f32.mrb[11].mxu1 }
 0x6d3   : > { %v9319_v16 = vadd.f32 %v4836_v18, %v4763_v46 }
 0x6d7   : > { %v4767_v12 = vpop.f32.mrb[12].mxu1 }
 0x6d8   : > { %v9323_v17 = vadd.f32 %v4840_v58, %v4767_v12  ;;  %v4769_v28 = vpop.f32.mrb[13].mxu1  ;;  %v6315_v58 = vlaneseq }
 0x6d9   : > { %v9327_v6 = vadd.f32 %v4842_v0, %v4769_v28  ;;  %v4771_v52 = vpop.f32.mrb[14].mxu1 }
 0x6da   : > { %v9331_v21 = vadd.f32 %v4844_v14, %v4771_v52  ;;  %v4773_v26 = vpop.f32.mrb[15].mxu1 }
 0x6db   : > { %v9335_v57 = vadd.f32 %v4846_v39, %v4773_v26 }
 0x6ff   : > { %v5209_v41 = vpop.f32.mrb[16].mxu1 }
 0x700   : > { %v9284_v2 = vadd.f32 %v9283_v50, %v5209_v41  ;;  %v5211_v54 = vpop.f32.mrb[17].mxu1  ;;  %v6316_v50 = vshrl.u32 %v6315_v58, 7 }
 0x701   : > { %v9287_v29 = vadd.f32 %v9286_v47, %v5211_v54  ;;  %v5213_v31 = vpop.f32.mrb[18].mxu1 }
 0x702   : > { %v9290_v43 = vadd.f32 %v9289_v30, %v5213_v31  ;;  %v5215_v34 = vpop.f32.mrb[19].mxu1  ;;  %v6317_v23 = vsub.s32 0, %v6316_v50  ;;  %v6321_v20 = vsub.s32 1, %v6316_v50 }
 0x703   : > { %v13294_v25 = vadd.f32 %v9292_v56, %v5215_v34 }
 0x707   : > { %v5219_v51 = vpop.f32.mrb[20].mxu1 }
 0x708   : > { %v13296_v35 = vadd.f32 %v9295_v4, %v5219_v51  ;;  %v5221_v22 = vpop.f32.mrb[21].mxu1 }
 0x709   : > { %v13298_v61 = vadd.f32 %v9298_v9, %v5221_v22  ;;  %v5223_v5 = vpop.f32.mrb[22].mxu1 }
 0x70a   : > { %v13300_v32 = vadd.f32 %v9301_v13, %v5223_v5  ;;  %v5225_v53 = vpop.f32.mrb[23].mxu1 }
 0x70b   : > { %v13302_v42 = vadd.f32 %v9304_v62, %v5225_v53 }
 0x70f   : > { %v5229_v60 = vpop.f32.mrb[24].mxu1 }
 0x710   : > { %v6205_v10 = vpop.f32.mrb[24].mxu0  ;;  %v9308_v55 = vadd.f32 %v9307_v15, %v5229_v60  ;;  %v5231_v33 = vpop.f32.mrb[25].mxu1  ;;  %v6313_v15 = vld [vmem:[%s563_s15] sm:$0x3] }
 0x711   : > { %v6207_v37 = vpop.f32.mrb[25].mxu0  ;;  %v9312_v40 = vadd.f32 %v9311_v7, %v5231_v33  ;;  %v5233_v27 = vpop.f32.mrb[26].mxu1  ;;  %v13308_v12 = vrot.slane %v6313_v15, %v6321_v20 }
 0x712   : > { %v6209_v49 = vpop.f32.mrb[26].mxu0  ;;  %v9309_v8 = vadd.f32 %v9308_v55, %v6205_v10  ;;  %v9316_v45 = vadd.f32 %v9315_v24, %v5233_v27  ;;  %v5235_v3 = vpop.f32.mrb[27].mxu1  ;;  %v13306_v24 = vrot.slane %v6313_v15, %v6317_v23 }
 0x713   : > { %v6211_v18 = vpop.f32.mrb[27].mxu0  ;;  %v9313_v0 = vadd.f32 %v9312_v40, %v6207_v37  ;;  %v9320_v14 = vadd.f32 %v9319_v16, %v5235_v3 }
 0x714   : > { %v9317_v39 = vadd.f32 %v9316_v45, %v6209_v49 }
 0x715   : > { %v9321_v36 = vadd.f32 %v9320_v14, %v6211_v18 }
 0x717   : > { %v5239_v59 = vpop.f32.mrb[28].mxu1 }
 0x718   : > { %v6215_v47 = vpop.f32.mrb[28].mxu0  ;;  %v9324_v19 = vadd.f32 %v9323_v17, %v5239_v59  ;;  %v5241_v30 = vpop.f32.mrb[29].mxu1 }
 0x719   : > { %v6217_v1 = vpop.f32.mrb[29].mxu0  ;;  %v9328_v56 = vadd.f32 %v9327_v6, %v5241_v30  ;;  %v5243_v11 = vpop.f32.mrb[30].mxu1 }
 0x71a   : > { %v6219_v4 = vpop.f32.mrb[30].mxu0  ;;  %v9325_v44 = vadd.f32 %v9324_v19, %v6215_v47  ;;  %v9332_v9 = vadd.f32 %v9331_v21, %v5243_v11  ;;  %v5245_v48 = vpop.f32.mrb[31].mxu1 }
 0x71b   : > { %v6221_v13 = vpop.f32.mrb[31].mxu0  ;;  %v9329_v62 = vadd.f32 %v9328_v56, %v6217_v1  ;;  %v9336_v63 = vadd.f32 %v9335_v57, %v5245_v48 }
 0x71c   : > { %v9333_v7 = vadd.f32 %v9332_v9, %v6219_v4 }
 0x71d   : > { %v9337_v38 = vadd.f32 %v9336_v63, %v6221_v13 }
 0x71f   : > { %v6278_v16 = vpop.f32.mrb[32].mxu1 }
 0x720   : > { %v6258_v46 = vpop.f32.mrb[16].mxu0  ;;  %v9310_v28 = vadd.f32 %v9309_v8, %v6278_v16  ;;  %v6280_v52 = vpop.f32.mrb[33].mxu1 }
 0x721   : > { %v9285_v17 = vadd.f32 %v9284_v2, %v6258_v46  ;;  %v6260_v6 = vpop.f32.mrb[17].mxu0  ;;  %v9314_v26 = vadd.f32 %v9313_v0, %v6280_v52  ;;  %v6282_v54 = vpop.f32.mrb[34].mxu1 }
 0x722   : > { %v9288_v21 = vadd.f32 %v9287_v29, %v6260_v6  ;;  %v6262_v41 = vpop.f32.mrb[18].mxu0  ;;  %v9318_v31 = vadd.f32 %v9317_v39, %v6282_v54  ;;  %v6284_v51 = vpop.f32.mrb[35].mxu1  ;;  %v6333_v2 = vadd.f32 %v9310_v28, %v13306_v24 }
 0x723   : > { %v9291_v57 = vadd.f32 %v9290_v43, %v6262_v41  ;;  %v6264_v34 = vpop.f32.mrb[19].mxu0  ;;  %v6325_v22 = vadd.f32 %v9285_v17, %v13306_v24  ;;  %v9322_v53 = vadd.f32 %v9321_v36, %v6284_v51  ;;  %v6334_v60 = vadd.f32 %v9314_v26, %v13308_v12 }
 0x724   : > { %v9294_v5 = vadd.f32 %v13294_v25, %v6264_v34  ;;  %v6349_v37 = vmax.f32 %v6333_v2, 0.0  ;;  %v6326_v40 = vadd.f32 %v9288_v21, %v13308_v12  ;;  %v6335_v30 = vadd.f32 %v9318_v31, %v13306_v24 }
 0x725   : > { %v6341_v10 = vmax.f32 %v6325_v22, 0.0  ;;  %v6327_v55 = vadd.f32 %v9291_v57, %v13306_v24  ;;  %v6350_v29 = vmax.f32 %v6334_v60, 0.0 }
 0x726   : > { %v6328_v3 = vadd.f32 %v9294_v5, %v13308_v12  ;;  %v6342_v19 = vmax.f32 %v6326_v40, 0.0 }
 0x727   : > { %6373 = vrot.lane.b32.xlu0 %v6341_v10, %s10511_s17  ;;  %6391 = vrot.lane.b32.xlu1 %v6350_v29, %s10511_s17  ;;  %v6288_v33 = vpop.f32.mrb[36].mxu1  ;;  %v6343_v45 = vmax.f32 %v6327_v55, 0.0 }
 0x728   : > { %v6268_v43 = vpop.f32.mrb[20].mxu0  ;;  %v9326_v27 = vadd.f32 %v9325_v44, %v6288_v33  ;;  %v6290_v8 = vpop.f32.mrb[37].mxu1  ;;  %v6344_v1 = vmax.f32 %v6328_v3, 0.0 }
 0x729   : > { %v9297_v25 = vadd.f32 %v13296_v35, %v6268_v43  ;;  %v6270_v49 = vpop.f32.mrb[21].mxu0  ;;  %v9330_v58 = vadd.f32 %v9329_v62, %v6290_v8  ;;  %v6292_v14 = vpop.f32.mrb[38].mxu1 }
 0x72a   : > { %v9300_v18 = vadd.f32 %v13298_v61, %v6270_v49  ;;  %v6272_v0 = vpop.f32.mrb[22].mxu0  ;;  %v9334_v36 = vadd.f32 %v9333_v7, %v6292_v14  ;;  %v6294_v59 = vpop.f32.mrb[39].mxu1  ;;  %v6336_v61 = vadd.f32 %v9322_v53, %v13308_v12  ;;  %v6337_v44 = vadd.f32 %v9326_v27, %v13306_v24 }
 0x72b   : > { %v9303_v39 = vadd.f32 %v13300_v32, %v6272_v0  ;;  %v6274_v50 = vpop.f32.mrb[23].mxu0  ;;  %6389 = vrot.lane.b32.xlu0 %v6349_v37, %s10511_s17  ;;  %v9338_v47 = vadd.f32 %v9337_v38, %v6294_v59  ;;  %6377 = vrot.lane.b32.xlu1 %v6343_v45, %s10511_s17  ;;  %v6351_v32 = vmax.f32 %v6335_v30, 0.0  ;;  %v6329_v56 = vadd.f32 %v9297_v25, %v13306_v24 }
 0x72c   : > { %v9306_v35 = vadd.f32 %v13302_v42, %v6274_v50  ;;  %v6352_v11 = vmax.f32 %v6336_v61, 0.0  ;;  %v6330_v4 = vadd.f32 %v9300_v18, %v13308_v12  ;;  %v6338_v48 = vadd.f32 %v9330_v58, %v13308_v12 }
 0x72d   : > { %v6345_v42 = vmax.f32 %v6329_v56, 0.0  ;;  %v6353_v13 = vmax.f32 %v6337_v44, 0.0  ;;  %v6331_v23 = vadd.f32 %v9303_v39, %v13306_v24  ;;  %v6339_v20 = vadd.f32 %v9334_v36, %v13306_v24 }
 0x72e   : > { %v6346_v9 = vmax.f32 %v6330_v4, 0.0  ;;  %v6354_v62 = vmax.f32 %v6338_v48, 0.0  ;;  %v6332_v63 = vadd.f32 %v9306_v35, %v13308_v12  ;;  %v6340_v38 = vadd.f32 %v9338_v47, %v13308_v12 }
 0x72f   : > { %6375 = vrot.lane.b32.xlu0 %v6342_v19, %s10511_s17  ;;  %6379 = vrot.lane.b32.xlu1 %v6344_v1, %s10511_s17  ;;  %v6347_v15 = vmax.f32 %v6331_v23, 0.0  ;;  %v6355_v46 = vmax.f32 %v6339_v20, 0.0 }
 0x730   : > { %v6348_v7 = vmax.f32 %v6332_v63, 0.0  ;;  %v6356_v16 = vmax.f32 %v6340_v38, 0.0 }
 0x733   : > { %6393 = vrot.lane.b32.xlu0 %v6351_v32, %s10511_s17  ;;  %6395 = vrot.lane.b32.xlu1 %v6352_v11, %s10511_s17 }
 0x737   : > { %6381 = vrot.lane.b32.xlu0 %v6345_v42, %s10511_s17  ;;  %6383 = vrot.lane.b32.xlu1 %v6346_v9, %s10511_s17 }
 0x73b   : > { %6397 = vrot.lane.b32.xlu0 %v6353_v13, %s10511_s17  ;;  %6399 = vrot.lane.b32.xlu1 %v6354_v62, %s10511_s17 }
 0x73f   : > { %6385 = vrot.lane.b32.xlu0 %v6347_v15, %s10511_s17  ;;  %6387 = vrot.lane.b32.xlu1 %v6348_v7, %s10511_s17 }
 0x743   : > { %6401 = vrot.lane.b32.xlu0 %v6355_v46, %s10511_s17  ;;  %6403 = vrot.lane.b32.xlu1 %v6356_v16, %s10511_s17 }
 0x799   : > { %v6374_v17 = vpop.permute.xlu0 %6373  ;;  %v6392_v28 = vpop.permute.xlu1 %6391 }
 0x79a   : > { %6439 = vst.msk [vmem:[#allocation2 + $0x30] sm:$0xff] %vm6438_vm13, %v6374_v17 }
 0x79b   : > { %6453 = vst.msk [vmem:[#allocation2 + $0xa0] sm:$0xff] %vm6405_vm14, %v6392_v28 }
 0x79d   : > { %v6390_v24 = vpop.permute.xlu0 %6389  ;;  %v6378_v6 = vpop.permute.xlu1 %6377 }
 0x79e   : > { %v6410_v12 = vsel %vm6405_vm14, %v6390_v24, %v6392_v28  ;;  %6451 = vst.msk [vmem:[#allocation2 + $0x90] sm:$0xff] %vm6438_vm13, %v6390_v24  ;;  %6442 = vst.msk [vmem:[#allocation2 + $0x48] sm:$0xff] %vm6438_vm13, %v6378_v6 }
 0x79f   : > { %6452 = vst [vmem:[#allocation2 + $0x98] sm:$0xff] %v6410_v12 }
 0x7a1   : > { %v6376_v52 = vpop.permute.xlu0 %6375  ;;  %v6380_v26 = vpop.permute.xlu1 %6379 }
 0x7a2   : > { %v6406_v21 = vsel %vm6405_vm14, %v6374_v17, %v6376_v52  ;;  %6441 = vst.msk [vmem:[#allocation2 + $0x40] sm:$0xff] %vm6405_vm14, %v6376_v52  ;;  %v6407_v41 = vsel %vm6405_vm14, %v6378_v6, %v6380_v26  ;;  %6444 = vst.msk [vmem:[#allocation2 + $0x58] sm:$0xff] %vm6405_vm14, %v6380_v26 }
 0x7a3   : > { %6440 = vst [vmem:[#allocation2 + $0x38] sm:$0xff] %v6406_v21  ;;  %6443 = vst [vmem:[#allocation2 + $0x50] sm:$0xff] %v6407_v41 }
 0x7a5   : > { %v6394_v54 = vpop.permute.xlu0 %6393  ;;  %v6396_v57 = vpop.permute.xlu1 %6395 }
 0x7a6   : > { %6454 = vst.msk [vmem:[#allocation2 + $0xa8] sm:$0xff] %vm6438_vm13, %v6394_v54  ;;  %v6411_v31 = vsel %vm6405_vm14, %v6394_v54, %v6396_v57 }
 0x7a7   : > { %6456 = vst.msk [vmem:[#allocation2 + $0xb8] sm:$0xff] %vm6405_vm14, %v6396_v57  ;;  %6455 = vst [vmem:[#allocation2 + $0xb0] sm:$0xff] %v6411_v31 }
 0x7a9   : > { %v6382_v34 = vpop.permute.xlu0 %6381  ;;  %v6384_v51 = vpop.permute.xlu1 %6383 }
 0x7aa   : > { %6445 = vst.msk [vmem:[#allocation2 + $0x60] sm:$0xff] %vm6438_vm13, %v6382_v34  ;;  %v6408_v22 = vsel %vm6405_vm14, %v6382_v34, %v6384_v51 }
 0x7ab   : > { %6447 = vst.msk [vmem:[#allocation2 + $0x70] sm:$0xff] %vm6405_vm14, %v6384_v51  ;;  %6446 = vst [vmem:[#allocation2 + $0x68] sm:$0xff] %v6408_v22 }
 0x7ad   : > { %v6398_v5 = vpop.permute.xlu0 %6397  ;;  %v6400_v53 = vpop.permute.xlu1 %6399 }
 0x7ae   : > { %6457 = vst.msk [vmem:[#allocation2 + $0xc0] sm:$0xff] %vm6438_vm13, %v6398_v5  ;;  %v6412_v60 = vsel %vm6405_vm14, %v6398_v5, %v6400_v53 }
 0x7af   : > { %6459 = vst.msk [vmem:[#allocation2 + $0xd0] sm:$0xff] %vm6405_vm14, %v6400_v53  ;;  %6458 = vst [vmem:[#allocation2 + $0xc8] sm:$0xff] %v6412_v60 }
 0x7b1   : > { %v6386_v2 = vpop.permute.xlu0 %6385  ;;  %v6388_v10 = vpop.permute.xlu1 %6387 }
 0x7b2   : > { %6448 = vst.msk [vmem:[#allocation2 + $0x78] sm:$0xff] %vm6438_vm13, %v6386_v2  ;;  %v6409_v55 = vsel %vm6405_vm14, %v6386_v2, %v6388_v10 }
 0x7b3   : > { %6450 = vst.msk [vmem:[#allocation2 + $0x88] sm:$0xff] %vm6405_vm14, %v6388_v10  ;;  %6449 = vst [vmem:[#allocation2 + $0x80] sm:$0xff] %v6409_v55 }
 0x7b5   : > { %v6402_v29 = vpop.permute.xlu0 %6401  ;;  %v6404_v43 = vpop.permute.xlu1 %6403 }
 0x7b6   : > { %6460 = vst.msk [vmem:[#allocation2 + $0xd8] sm:$0xff] %vm6438_vm13, %v6402_v29  ;;  %v6413_v33 = vsel %vm6405_vm14, %v6402_v29, %v6404_v43 }
 0x7b7   : > { %6462 = vst.msk [vmem:[#allocation2 + $0xe8] sm:$0xff] %vm6405_vm14, %v6404_v43  ;;  %6461 = vst [vmem:[#allocation2 + $0xe0] sm:$0xff] %v6413_v33 }
 0x7b8 PF: > { %s13701_s1 = sld [smem:[#allocation29_spill]] }
 0x7be   : > { %p8416_p12 = scmp.ne.s32.totalorder %s13701_s1, 4 }
 0x7bf   : > { %v10004_v37 = vld [vmem:[#allocation18 + $0x100] sm:$0xff] (!%p8416_p12)   ;;  %v10007_v27 = vld [vmem:[#allocation18 + $0x108] sm:$0xff] (!%p8416_p12)   ;;  %v10010_v45 = vld [vmem:[#allocation18 + $0x110] sm:$0xff] (!%p8416_p12)  }
 0x7c0   : > { %6466 = sbr.rel (%p8416_p12) target bundleno = 2329 (0x919), region = 124  ;;  %v10005_v40 = vld [vmem:[#allocation18 + $0x140] sm:$0xff] (!%p8416_p12)   ;;  %8699 = vmatprep.subr.bf16.mxu0 (!%p8416_p12), %v10004_v37  ;;  %v10008_v49 = vld [vmem:[#allocation18 + $0x148] sm:$0xff] (!%p8416_p12)   ;;  %v10011_v3 = vld [vmem:[#allocation18 + $0x150] sm:$0xff] (!%p8416_p12)  }
 0x7c1   : > { %v10006_v25 = vld [vmem:[#allocation18 + $0xc0] sm:$0xff] (!%p8416_p12)   ;;  %9167 = vmatprep.subr.bf16.mxu1 (!%p8416_p12), %v10005_v40  ;;  %v10009_v8 = vld [vmem:[#allocation18 + $0xc8] sm:$0xff] (!%p8416_p12)   ;;  %v10012_v18 = vld [vmem:[#allocation18 + $0xd0] sm:$0xff] (!%p8416_p12)  }
 0x7c2   : > { %8700 = vmatpush3.bf16.msra.mxu0 (!%p8416_p12), %v10006_v25  ;;  %9168 = vmatpush3.bf16.msra.mxu1 (!%p8416_p12), %v10005_v40  ;;  %v10013_v58 = vld [vmem:[#allocation18 + $0x118] sm:$0xff] (!%p8416_p12)   ;;  %v10016_v39 = vld [vmem:[#allocation18 + $0x120] sm:$0xff] (!%p8416_p12)   ;;  %v10019_v59 = vld [vmem:[#allocation18 + $0x128] sm:$0xff] (!%p8416_p12)  }
 0x7c3   : > { %8701 = vmatprep.subr.bf16.mxu0 (!%p8416_p12), %v10007_v27  ;;  %9169 = vmatprep.subr.bf16.mxu1 (!%p8416_p12), %v10008_v49  ;;  %v10014_v0 = vld [vmem:[#allocation18 + $0x158] sm:$0xff] (!%p8416_p12)   ;;  %v10017_v36 = vld [vmem:[#allocation18 + $0x160] sm:$0xff] (!%p8416_p12)   ;;  %v10020_v35 = vld [vmem:[#allocation18 + $0x168] sm:$0xff] (!%p8416_p12)  }
 0x7c4   : > { %v10015_v14 = vld [vmem:[#allocation18 + $0xd8] sm:$0xff] (!%p8416_p12)   ;;  %v10018_v50 = vld [vmem:[#allocation18 + $0xe0] sm:$0xff] (!%p8416_p12)   ;;  %v10021_v47 = vld [vmem:[#allocation18 + $0xe8] sm:$0xff] (!%p8416_p12)  }
 0x7c5   : > { %v10022_v19 = vld [vmem:[#allocation18 + $0x130] sm:$0xff] (!%p8416_p12)   ;;  %v10025_v61 = vld [vmem:[#allocation18 + $0x138] sm:$0xff] (!%p8416_p12)   ;;  %v13372_v32 = vld [vmem:[#allocation2 + $0x38] sm:$0xff] (!%p8416_p12) }
 0x7c6   : > { %8702 = vmatpush3.bf16.msra.mxu0 (!%p8416_p12), %v10009_v8  ;;  %9170 = vmatpush3.bf16.msra.mxu1 (!%p8416_p12), %v10008_v49  ;;  %v10023_v30 = vld [vmem:[#allocation18 + $0x170] sm:$0xff] (!%p8416_p12)   ;;  %v13374_v56 = vld [vmem:[#allocation2 + $0x50] sm:$0xff] (!%p8416_p12)  ;;  %v13380_v44 = vld [vmem:[#allocation2 + $0x58] sm:$0xff] (!%p8416_p12) }
 0x7c7   : > { %8703 = vmatprep.subr.bf16.mxu0 %v10010_v45  ;;  %9171 = vmatprep.subr.bf16.mxu1 %v10011_v3  ;;  %v10024_v1 = vld [vmem:[#allocation18 + $0xf0] sm:$0xff]   ;;  %v10026_v11 = vld [vmem:[#allocation18 + $0x178] sm:$0xff]   ;;  %v6578_v4 = vpack.c.bf16 %v13374_v56, %v13372_v32  ;;  %v10028_v62 = vld [vmem:[#allocation18 + $0x40] sm:$0xff]  }
 0x7c8   : > { %v13378_v42 = vld [vmem:[#allocation2 + $0x40] sm:$0xff]  ;;  %v10027_v9 = vld [vmem:[#allocation18 + $0xf8] sm:$0xff]   ;;  %v10029_v20 = vld [vmem:[#allocation18 + $0x80] sm:$0xff]  }
 0x7c9   : > { %v13382_v48 = vld [vmem:[#allocation2 + $0x30] sm:$0xff]  ;;  %v13384_v13 = vld [vmem:[#allocation2 + $0x48] sm:$0xff]  ;;  %v6579_v23 = vpack.c.bf16 %v13380_v44, %v13378_v42  ;;  %6814 = vmatprep.mubr.bf16.mxu0 %v6578_v4  ;;  %v10031_v17 = vld [vmem:[#allocation18 + $0x48] sm:$0xff]  }
 0x7ca   : > { %8704 = vmatpush3.bf16.msra.mxu0 %v10012_v18  ;;  %9172 = vmatpush3.bf16.msra.mxu1 %v10011_v3  ;;  %v13388_v63 = vld [vmem:[#allocation2 + $0x70] sm:$0xff]  ;;  %v13390_v15 = vld [vmem:[#allocation2 + $0x88] sm:$0xff]  ;;  %v6577_v7 = vpack.c.bf16 %v13384_v13, %v13382_v48  ;;  %v10032_v28 = vld [vmem:[#allocation18 + $0x88] sm:$0xff]  }
 0x7cb   : > { %8705 = vmatprep.subr.bf16.mxu0 %v10013_v58  ;;  %9173 = vmatprep.subr.bf16.mxu1 %v10014_v0  ;;  %v6582_v38 = vpack.c.bf16 %v13390_v15, %v13388_v63  ;;  %v10030_v46 = vld [vmem:[#allocation18] sm:$0xff]   ;;  %v13396_v16 = vld [vmem:[#allocation2 + $0x68] sm:$0xff]  ;;  %v13398_v24 = vld [vmem:[#allocation2 + $0x80] sm:$0xff] }
 0x7cc   : > { %9183 = vmatprep.mubr.bf16.mxu1 %v6579_v23  ;;  %v10033_v12 = vld [vmem:[#allocation18 + $0x8] sm:$0xff]   ;;  %v6581_v6 = vpack.c.bf16 %v13398_v24, %v13396_v16  ;;  %v10034_v26 = vld [vmem:[#allocation18 + $0x50] sm:$0xff]   ;;  %v10037_v31 = vld [vmem:[#allocation18 + $0x58] sm:$0xff]  }
 0x7cd   : > { %v13402_v52 = vld [vmem:[#allocation2 + $0x60] sm:$0xff]  ;;  %v13404_v21 = vld [vmem:[#allocation2 + $0x78] sm:$0xff]  ;;  %v13410_v51 = vld [vmem:[#allocation2 + $0xb0] sm:$0xff] }
 0x7ce   : > { %8706 = vmatpush3.bf16.msra.mxu0 %v10015_v14  ;;  %9174 = vmatpush3.bf16.msra.mxu1 %v10014_v0  ;;  %v10035_v41 = vld [vmem:[#allocation18 + $0x90] sm:$0xff]   ;;  %v6580_v54 = vpack.c.bf16 %v13404_v21, %v13402_v52  ;;  %v13408_v34 = vld [vmem:[#allocation2 + $0x98] sm:$0xff]  ;;  %v10038_v22 = vld [vmem:[#allocation18 + $0x98] sm:$0xff]  }
 0x7cf   : > { %8707 = vmatprep.subr.bf16.mxu0 %v10016_v39  ;;  %9175 = vmatprep.subr.bf16.mxu1 %v10017_v36  ;;  %v10036_v57 = vld [vmem:[#allocation18 + $0x10] sm:$0xff]   ;;  %v10039_v5 = vld [vmem:[#allocation18 + $0x18] sm:$0xff]   ;;  %v6584_v53 = vpack.c.bf16 %v13410_v51, %v13408_v34  ;;  %v10040_v10 = vld [vmem:[#allocation18 + $0x60] sm:$0xff]  }
 0x7d0   : > { %v13414_v60 = vld [vmem:[#allocation2 + $0x90] sm:$0xff]  ;;  %v13416_v2 = vld [vmem:[#allocation2 + $0xa8] sm:$0xff]  ;;  %v13422_v37 = vld [vmem:[#allocation2 + $0xe0] sm:$0xff] }
 0x7d1   : > { %v10041_v55 = vld [vmem:[#allocation18 + $0xa0] sm:$0xff]   ;;  %v6583_v29 = vpack.c.bf16 %v13416_v2, %v13414_v60  ;;  %v13420_v33 = vld [vmem:[#allocation2 + $0xc8] sm:$0xff]  ;;  %v10043_v40 = vld [vmem:[#allocation18 + $0x68] sm:$0xff]  }
 0x7d2   : > { %8708 = vmatpush3.bf16.msra.mxu0 %v10018_v50  ;;  %9176 = vmatpush3.bf16.msra.mxu1 %v10017_v36  ;;  %v10042_v43 = vld [vmem:[#allocation18 + $0x20] sm:$0xff]   ;;  %v10044_v25 = vld [vmem:[#allocation18 + $0xa8] sm:$0xff]   ;;  %v6587_v45 = vpack.c.bf16 %v13422_v37, %v13420_v33  ;;  %v13433_v14 = vld [vmem:[#allocation2 + $0xe8] sm:$0xff] }
 0x7d3   : > { %8709 = vmatprep.subr.bf16.mxu0 %v10019_v59  ;;  %9177 = vmatprep.subr.bf16.mxu1 %v10020_v35  ;;  %v6567_v27 = vld [vmem:[#allocation2 + $0xa0] sm:$0xff]  ;;  %v13424_v49 = vld [vmem:[#allocation2 + $0xb8] sm:$0xff]  ;;  %v6573_v0 = vld [vmem:[#allocation2 + $0xd0] sm:$0xff] }
 0x7d4   : > { %v10045_v8 = vld [vmem:[#allocation18 + $0x28] sm:$0xff]   ;;  %v6585_v18 = vpack.c.bf16 %v13424_v49, %v6567_v27  ;;  %v10046_v39 = vld [vmem:[#allocation18 + $0x70] sm:$0xff]   ;;  %v6588_v36 = vpack.c.bf16 %v13433_v14, %v6573_v0  ;;  %v10052_v23 = vld [vmem:[#allocation18 + $0x1c0] sm:$0xff]  }
 0x7d5   : > { %v13428_v3 = vld [vmem:[#allocation2 + $0xc0] sm:$0xff]  ;;  %v13431_v58 = vld [vmem:[#allocation2 + $0xd8] sm:$0xff] }
 0x7d6   : > { %8710 = vmatpush3.bf16.msra.mxu0 %v10021_v47  ;;  %9178 = vmatpush3.bf16.msra.mxu1 %v10020_v35  ;;  %v10047_v50 = vld [vmem:[#allocation18 + $0xb0] sm:$0xff]   ;;  %v6586_v59 = vpack.c.bf16 %v13431_v58, %v13428_v3  ;;  %v10049_v47 = vld [vmem:[#allocation18 + $0x78] sm:$0xff]  }
 0x7d7   : > { %8711 = vmatprep.subr.bf16.mxu0 %v10022_v19  ;;  %9179 = vmatprep.subr.bf16.mxu1 %v10023_v30  ;;  %v10048_v35 = vld [vmem:[#allocation18 + $0x30] sm:$0xff]  }
 0x7d8   : > { %v6469_v19 = vld [vmem:[#allocation2 + $0x20] sm:$0xff] }
 0x7d9   : > { %v6493_v4 = vpack.c.bf16 %v13372_v32, %v6469_v19  ;;  %v10056_v32 = vld [vmem:[#allocation18 + $0x208] sm:$0xff]  }
 0x7da   : > { %8712 = vmatpush3.bf16.msra.mxu0 %v10024_v1  ;;  %9180 = vmatpush3.bf16.msra.mxu1 %v10023_v30  ;;  %v6470_v30 = vld [vmem:[#allocation2 + $0x28] sm:$0xff] }
 0x7db   : > { %8713 = vmatprep.subr.bf16.mxu0 %v10025_v61  ;;  %9181 = vmatprep.subr.bf16.mxu1 %v10026_v11  ;;  %v10050_v1 = vld [vmem:[#allocation18 + $0xb8] sm:$0xff]   ;;  %v6494_v61 = vpack.c.bf16 %v13378_v42, %v6470_v30  ;;  %v10055_v42 = vld [vmem:[#allocation18 + $0x1c8] sm:$0xff]  }
 0x7de   : > { %8714 = vmatpush3.bf16.msra.mxu0 %v10027_v9  ;;  %9182 = vmatpush3.bf16.msra.mxu1 %v10026_v11  ;;  %v10051_v11 = vld [vmem:[#allocation18 + $0x38] sm:$0xff]   ;;  %v6468_v9 = vld [vmem:[#allocation2 + $0x18] sm:$0xff] }
 0x7df   : > { %8751 = vmatprep.subr.bf16.mxu0 %v10028_v62  ;;  %9191 = vmatprep.subr.bf16.mxu1 %v10029_v20  ;;  %v10053_v62 = vld [vmem:[#allocation18 + $0x200] sm:$0xff]  }
 0x7e1   : > { %6815 = vmatmul.mubr.bf16.vlgmr.msra.gmra.mrb[0].mxu0 %v6577_v7  ;;  %9184 = vmatmul.mubr.bf16.vlgmr.msra.gmra.mrb[0].mxu1 %v6582_v38  ;;  %v6497_v7 = vpack.c.bf16 %v13388_v63, %v13380_v44  ;;  %v10054_v38 = vld [vmem:[#allocation18 + $0x180] sm:$0xff]   ;;  %v10058_v44 = vld [vmem:[#allocation18 + $0x1d0] sm:$0xff]  }
 0x7e2   : > { %8752 = vmatpush3.bf16.msra.mxu0 %v10030_v46  ;;  %9192 = vmatpush3.bf16.msra.mxu1 %v10029_v20  ;;  %v6492_v20 = vpack.c.bf16 %v13382_v48, %v6468_v9  ;;  %v13445_v46 = vpack.c.bf16 %v13396_v16, %v13374_v56  ;;  %v10057_v48 = vld [vmem:[#allocation18 + $0x188] sm:$0xff]   ;;  %v10059_v63 = vld [vmem:[#allocation18 + $0x210] sm:$0xff]   ;;  %v6495_v56 = vpack.c.bf16 %v13402_v52, %v13384_v13  ;;  %v10065_v13 = vld [vmem:[#allocation18 + $0x220] sm:$0xff]  }
 0x7e3   : > { %8753 = vmatprep.subr.bf16.mxu0 %v10031_v17  ;;  %9193 = vmatprep.subr.bf16.mxu1 %v10032_v28  ;;  %v13448_v17 = vpack.c.bf16 %v6567_v27, %v13390_v15  ;;  %v10060_v16 = vld [vmem:[#allocation18 + $0x190] sm:$0xff]   ;;  %v6503_v15 = vpack.c.bf16 %v6573_v0, %v13424_v49  ;;  %v6498_v52 = vpack.c.bf16 %v13414_v60, %v13404_v21  ;;  %v10073_v60 = vld [vmem:[#allocation18 + $0x1f8] sm:$0xff]  }
 0x7e4   : > { %6822 = vmatprep.mubr.bf16.mxu0 %v6581_v6  ;;  %9187 = vmatprep.mubr.bf16.mxu1 %v6585_v18  ;;  %v6499_v6 = vpack.c.bf16 %v13408_v34, %v13398_v24  ;;  %v10067_v24 = vld [vmem:[#allocation18 + $0x1e8] sm:$0xff]   ;;  %v6501_v21 = vpack.c.bf16 %v13428_v3, %v13416_v2 }
 0x7e5   : > { %v10069_v34 = vld [vmem:[#allocation18 + $0x1a8] sm:$0xff]  }
 0x7e6   : > { %8754 = vmatpush3.bf16.msra.mxu0 %v10033_v12  ;;  %9194 = vmatpush3.bf16.msra.mxu1 %v10032_v28  ;;  %v10061_v28 = vld [vmem:[#allocation18 + $0x1d8] sm:$0xff]   ;;  %v7210_v2 = vld [vmem:[#allocation2 + $0x100] sm:$0xff] }
 0x7e7   : > { %8755 = vmatprep.subr.bf16.mxu0 %v10034_v26  ;;  %9195 = vmatprep.subr.bf16.mxu1 %v10035_v41  ;;  %v10062_v12 = vld [vmem:[#allocation18 + $0x218] sm:$0xff]  }
 0x7e8   : > { %v10063_v26 = vld [vmem:[#allocation18 + $0x198] sm:$0xff]  }
 0x7e9   : > { %6823 = vmatmul.mubr.bf16.gmra.mrb[4].mxu0 %v6580_v54  ;;  %9188 = vmatmul.mubr.bf16.gmra.mrb[4].mxu1 %v6588_v36  ;;  %v10066_v54 = vld [vmem:[#allocation18 + $0x1a0] sm:$0xff]  }
 0x7ea   : > { %8756 = vmatpush3.bf16.msra.mxu0 %v10036_v57  ;;  %9196 = vmatpush3.bf16.msra.mxu1 %v10035_v41  ;;  %v10064_v41 = vld [vmem:[#allocation18 + $0x1e0] sm:$0xff]   ;;  %v10068_v57 = vld [vmem:[#allocation18 + $0x228] sm:$0xff]  }
 0x7eb   : > { %8757 = vmatprep.subr.bf16.mxu0 %v10037_v31  ;;  %9197 = vmatprep.subr.bf16.mxu1 %v10038_v22  ;;  %v6502_v31 = vpack.c.bf16 %v13420_v33, %v13410_v51  ;;  %v10075_v51 = vld [vmem:[#allocation18 + $0x1b8] sm:$0xff]  }
 0x7ec   : > { %6830 = vmatprep.mubr.bf16.mxu0 %v6584_v53  ;;  %9207 = vmatprep.mubr.bf16.mxu1 %v6494_v61  ;;  %v10072_v53 = vld [vmem:[#allocation18 + $0x1b0] sm:$0xff]   ;;  %v7208_v33 = vld [vmem:[#allocation2 + $0xf0] sm:$0xff] }
 0x7ee   : > { %8758 = vmatpush3.bf16.msra.mxu0 %v10039_v5  ;;  %9198 = vmatpush3.bf16.msra.mxu1 %v10038_v22  ;;  %v10070_v22 = vld [vmem:[#allocation18 + $0x1f0] sm:$0xff]  }
 0x7ef   : > { %8759 = vmatprep.subr.bf16.mxu0 %v10040_v10  ;;  %9199 = vmatprep.subr.bf16.mxu1 %v10041_v55  ;;  %v10071_v5 = vld [vmem:[#allocation18 + $0x230] sm:$0xff]   ;;  %v10074_v10 = vld [vmem:[#allocation18 + $0x238] sm:$0xff]  }
 0x7f1   : > { %6831 = vmatmul.mubr.bf16.gmra.mrb[8].mxu0 %v6583_v29  ;;  %v7209_v29 = vld [vmem:[#allocation2 + $0xf8] sm:$0xff] }
 0x7f2   : > { %8760 = vmatpush3.bf16.msra.mxu0 %v10042_v43  ;;  %9200 = vmatpush3.bf16.msra.mxu1 %v10041_v55  ;;  %v7222_v55 = vpack.c.bf16 %v7210_v2, %v13433_v14  ;;  %v7221_v43 = vpack.c.bf16 %v7209_v29, %v13422_v37 }
 0x7f3   : > { %8761 = vmatprep.subr.bf16.mxu0 %v10043_v40  ;;  %9201 = vmatprep.subr.bf16.mxu1 %v10044_v25  ;;  %v7220_v40 = vpack.c.bf16 %v7208_v33, %v13431_v58 }
 0x7f4   : > { %6838 = vmatprep.mubr.bf16.mxu0 %v6587_v45 }
 0x7f6   : > { %8762 = vmatpush3.bf16.msra.mxu0 %v10045_v8  ;;  %9202 = vmatpush3.bf16.msra.mxu1 %v10044_v25 }
 0x7f7   : > { %8763 = vmatprep.subr.bf16.mxu0 %v10046_v39  ;;  %9203 = vmatprep.subr.bf16.mxu1 %v10047_v50 }
 0x7f9   : > { %6839 = vmatmul.mubr.bf16.gmra.mrb[12].mxu0 %v6586_v59 }
 0x7fa   : > { %8764 = vmatpush3.bf16.msra.mxu0 %v10048_v35  ;;  %9204 = vmatpush3.bf16.msra.mxu1 %v10047_v50 }
 0x7fb   : > { %8765 = vmatprep.subr.bf16.mxu0 %v10049_v47  ;;  %9205 = vmatprep.subr.bf16.mxu1 %v10050_v1 }
 0x7fc   : > { %7088 = vmatprep.mubr.bf16.mxu0 %v6493_v4 }
 0x7fe   : > { %8766 = vmatpush3.bf16.msra.mxu0 %v10051_v11  ;;  %9206 = vmatpush3.bf16.msra.mxu1 %v10050_v1 }
 0x7ff   : > { %8803 = vmatprep.subr.bf16.mxu0 %v10052_v23  ;;  %9215 = vmatprep.subr.bf16.mxu1 %v10053_v62 }
 0x801   : > { %7089 = vmatmul.mubr.bf16.vlgmr.msra.gmra.mrb[16].mxu0 %v6492_v20  ;;  %9208 = vmatmul.mubr.bf16.vlgmr.msra.gmra.mrb[0].mxu1 %v6497_v7 }
 0x802   : > { %8804 = vmatpush3.bf16.msra.mxu0 %v10054_v38  ;;  %9216 = vmatpush3.bf16.msra.mxu1 %v10053_v62 }
 0x803   : > { %8805 = vmatprep.subr.bf16.mxu0 %v10055_v42  ;;  %9217 = vmatprep.subr.bf16.mxu1 %v10056_v32 }
 0x804   : > { %7096 = vmatprep.mubr.bf16.mxu0 %v13445_v46  ;;  %9211 = vmatprep.mubr.bf16.mxu1 %v13448_v17 }
 0x806   : > { %8806 = vmatpush3.bf16.msra.mxu0 %v10057_v48  ;;  %9218 = vmatpush3.bf16.msra.mxu1 %v10056_v32 }
 0x807   : > { %8807 = vmatprep.subr.bf16.mxu0 %v10058_v44  ;;  %9219 = vmatprep.subr.bf16.mxu1 %v10059_v63 }
 0x809   : > { %7097 = vmatmul.mubr.bf16.gmra.mrb[20].mxu0 %v6495_v56  ;;  %9212 = vmatmul.mubr.bf16.gmra.mrb[4].mxu1 %v6503_v15 }
 0x80a   : > { %8808 = vmatpush3.bf16.msra.mxu0 %v10060_v16  ;;  %9220 = vmatpush3.bf16.msra.mxu1 %v10059_v63 }
 0x80b   : > { %8809 = vmatprep.subr.bf16.mxu0 %v10061_v28  ;;  %9221 = vmatprep.subr.bf16.mxu1 %v10062_v12 }
 0x80c   : > { %7104 = vmatprep.mubr.bf16.mxu0 %v6499_v6  ;;  %9231 = vmatprep.mubr.bf16.mxu1 %v6497_v7 }
 0x80e   : > { %8810 = vmatpush3.bf16.msra.mxu0 %v10063_v26  ;;  %9222 = vmatpush3.bf16.msra.mxu1 %v10062_v12 }
 0x80f   : > { %8811 = vmatprep.subr.bf16.mxu0 %v10064_v41  ;;  %9223 = vmatprep.subr.bf16.mxu1 %v10065_v13 }
 0x811   : > { %7105 = vmatmul.mubr.bf16.gmra.mrb[24].mxu0 %v6498_v52 }
 0x812   : > { %8812 = vmatpush3.bf16.msra.mxu0 %v10066_v54  ;;  %9224 = vmatpush3.bf16.msra.mxu1 %v10065_v13 }
 0x813   : > { %8813 = vmatprep.subr.bf16.mxu0 %v10067_v24  ;;  %9225 = vmatprep.subr.bf16.mxu1 %v10068_v57 }
 0x814   : > { %7112 = vmatprep.mubr.bf16.mxu0 %v6502_v31 }
 0x816   : > { %8814 = vmatpush3.bf16.msra.mxu0 %v10069_v34  ;;  %9226 = vmatpush3.bf16.msra.mxu1 %v10068_v57 }
 0x817   : > { %8815 = vmatprep.subr.bf16.mxu0 %v10070_v22  ;;  %9227 = vmatprep.subr.bf16.mxu1 %v10071_v5 }
 0x819   : > { %7113 = vmatmul.mubr.bf16.gmra.mrb[28].mxu0 %v6501_v21 }
 0x81a   : > { %8816 = vmatpush3.bf16.msra.mxu0 %v10072_v53  ;;  %9228 = vmatpush3.bf16.msra.mxu1 %v10071_v5 }
 0x81b   : > { %8817 = vmatprep.subr.bf16.mxu0 %v10073_v60  ;;  %9229 = vmatprep.subr.bf16.mxu1 %v10074_v10 }
 0x81c   : > { %7448 = vmatprep.mubr.bf16.mxu0 %v13445_v46 }
 0x81e   : > { %8818 = vmatpush3.bf16.msra.mxu0 %v10075_v51  ;;  %9230 = vmatpush3.bf16.msra.mxu1 %v10074_v10 }
 0x821   : > { %7449 = vmatmul.mubr.bf16.vlgmr.msra.gmra.mrb[32].mxu0 %v6495_v56  ;;  %9232 = vmatmul.mubr.bf16.vlgmr.msra.gmra.mrb[0].mxu1 %v13448_v17 }
 0x822   : > { %7456 = vmatprep.mubr.bf16.mxu0 %v6499_v6  ;;  %9235 = vmatprep.mubr.bf16.mxu1 %v6503_v15 }
 0x829   : > { %7457 = vmatmul.mubr.bf16.gmra.mrb[36].mxu0 %v6498_v52  ;;  %9236 = vmatmul.mubr.bf16.gmra.mrb[4].mxu1 %v7222_v55 }
 0x82a   : > { %7464 = vmatprep.mubr.bf16.mxu0 %v6502_v31 }
 0x831   : > { %7465 = vmatmul.mubr.bf16.gmra.mrb[40].mxu0 %v6501_v21 }
 0x832   : > { %7472 = vmatprep.mubr.bf16.mxu0 %v7221_v43 }
 0x839   : > { %7473 = vmatmul.mubr.bf16.gmra.mrb[44].mxu0 %v7220_v40 }
 0x8b4   : > { %v8715_v25 = vpop.f32.mrb[0].mxu0 }
 0x8b5   : > { %v8716_v27 = vpop.f32.mrb[1].mxu0 }
 0x8b6   : > { %v8717_v49 = vadd.f32 %v8716_v27, %v8715_v25  ;;  %v8718_v8 = vpop.f32.mrb[2].mxu0 }
 0x8b7   : > { %v8719_v45 = vpop.f32.mrb[3].mxu0 }
 0x8b8   : > { %v8720_v3 = vadd.f32 %v8719_v45, %v8718_v8  ;;  %v8489_v8 = vld [vmem:[#allocation20] ss:$0 sm:$0xff] }
 0x8bc   : > { %v8721_v18 = vpop.f32.mrb[4].mxu0 }
 0x8bd   : > { %v8722_v0 = vpop.f32.mrb[5].mxu0 }
 0x8be   : > { %v8723_v14 = vadd.f32 %v8722_v0, %v8721_v18  ;;  %v8724_v39 = vpop.f32.mrb[6].mxu0 }
 0x8bf   : > { %v8725_v36 = vpop.f32.mrb[7].mxu0 }
 0x8c0   : > { %v8726_v50 = vadd.f32 %v8725_v36, %v8724_v39 }
 0x8c4   : > { %v8727_v59 = vpop.f32.mrb[8].mxu0 }
 0x8c5   : > { %v8728_v37 = vpop.f32.mrb[9].mxu0 }
 0x8c6   : > { %v8729_v35 = vadd.f32 %v8728_v37, %v8727_v59  ;;  %v8730_v47 = vpop.f32.mrb[10].mxu0 }
 0x8c7   : > { %v8731_v19 = vpop.f32.mrb[11].mxu0 }
 0x8c8   : > { %v8732_v30 = vadd.f32 %v8731_v19, %v8730_v47 }
 0x8cc   : > { %v8733_v58 = vpop.f32.mrb[12].mxu0 }
 0x8cd   : > { %v8734_v1 = vpop.f32.mrb[13].mxu0 }
 0x8ce   : > { %v8735_v61 = vadd.f32 %v8734_v1, %v8733_v58  ;;  %v8736_v11 = vpop.f32.mrb[14].mxu0 }
 0x8cf   : > { %v8737_v4 = vpop.f32.mrb[15].mxu0 }
 0x8d0   : > { %v8738_v9 = vadd.f32 %v8737_v4, %v8736_v11 }
 0x8d4   : > { %v8767_v23 = vpop.f32.mrb[16].mxu0 }
 0x8d5   : > { %v8768_v62 = vpop.f32.mrb[17].mxu0 }
 0x8d6   : > { %v8769_v20 = vadd.f32 %v8768_v62, %v8767_v23  ;;  %v8770_v7 = vpop.f32.mrb[18].mxu0 }
 0x8d7   : > { %v8771_v38 = vpop.f32.mrb[19].mxu0 }
 0x8d8   : > { %v9430_v42 = vadd.f32 %v8769_v20, %v8717_v49  ;;  %v8772_v32 = vadd.f32 %v8771_v38, %v8770_v7 }
 0x8da   : > { %v9436_v46 = vadd.f32 %v8772_v32, %v8720_v3 }
 0x8dc   : > { %v8773_v17 = vpop.f32.mrb[20].mxu0 }
 0x8dd   : > { %v8774_v48 = vpop.f32.mrb[21].mxu0 }
 0x8de   : > { %v8775_v44 = vadd.f32 %v8774_v48, %v8773_v17  ;;  %v8776_v63 = vpop.f32.mrb[22].mxu0 }
 0x8df   : > { %v8777_v56 = vpop.f32.mrb[23].mxu0 }
 0x8e0   : > { %v9427_v16 = vadd.f32 %v8775_v44, %v8723_v14  ;;  %v8778_v15 = vadd.f32 %v8777_v56, %v8776_v63 }
 0x8e2   : > { %v9433_v28 = vadd.f32 %v8778_v15, %v8726_v50 }
 0x8e4   : > { %v8779_v12 = vpop.f32.mrb[24].mxu0 }
 0x8e5   : > { %v8780_v6 = vpop.f32.mrb[25].mxu0 }
 0x8e6   : > { %v8781_v26 = vadd.f32 %v8780_v6, %v8779_v12  ;;  %v8782_v41 = vpop.f32.mrb[26].mxu0 }
 0x8e7   : > { %v8783_v13 = vpop.f32.mrb[27].mxu0 }
 0x8e8   : > { %v9442_v52 = vadd.f32 %v8781_v26, %v8729_v35  ;;  %v8784_v54 = vadd.f32 %v8783_v13, %v8782_v41 }
 0x8ea   : > { %v9448_v24 = vadd.f32 %v8784_v54, %v8732_v30 }
 0x8ec   : > { %v8785_v57 = vpop.f32.mrb[28].mxu0 }
 0x8ed   : > { %v8786_v31 = vpop.f32.mrb[29].mxu0 }
 0x8ee   : > { %v8787_v34 = vadd.f32 %v8786_v31, %v8785_v57  ;;  %v8788_v22 = vpop.f32.mrb[30].mxu0 }
 0x8ef   : > { %v8789_v5 = vpop.f32.mrb[31].mxu0 }
 0x8f0   : > { %v9439_v21 = vadd.f32 %v8787_v34, %v8735_v61  ;;  %v8790_v53 = vadd.f32 %v8789_v5, %v8788_v22 }
 0x8f2   : > { %v9445_v60 = vadd.f32 %v8790_v53, %v8738_v9 }
 0x8f4   : > { %v8819_v10 = vpop.f32.mrb[32].mxu0  ;;  %v9233_v51 = vpop.f32.mrb[0].mxu1 }
 0x8f5   : > { %v8820_v2 = vpop.f32.mrb[33].mxu0  ;;  %v7515_v55 = vpop.f32.mrb[1].mxu1 }
 0x8f6   : > { %v8821_v29 = vadd.f32 %v8820_v2, %v8819_v10  ;;  %v8822_v43 = vpop.f32.mrb[34].mxu0  ;;  %v9234_v33 = vpop.f32.mrb[2].mxu1 }
 0x8f7   : > { %v8823_v40 = vpop.f32.mrb[35].mxu0  ;;  %v7518_v25 = vpop.f32.mrb[3].mxu1 }
 0x8f8   : > { %v9431_v27 = vadd.f32 %v9430_v42, %v8821_v29  ;;  %v8824_v49 = vadd.f32 %v8823_v40, %v8822_v43 }
 0x8fa   : > { %v9432_v45 = vadd.f32 %v9431_v27, %v7515_v55  ;;  %v9437_v3 = vadd.f32 %v9436_v46, %v8824_v49 }
 0x8fc   : > { %v7561_v18 = vadd.f32 %v9432_v45, %v8489_v8  ;;  %v9438_v0 = vadd.f32 %v9437_v3, %v7518_v25  ;;  %v8825_v14 = vpop.f32.mrb[36].mxu0  ;;  %v9237_v39 = vpop.f32.mrb[4].mxu1 }
 0x8fd   : > { %v8826_v36 = vpop.f32.mrb[37].mxu0  ;;  %v7531_v50 = vpop.f32.mrb[5].mxu1 }
 0x8fe   : > { %7569 = vst [vmem:[#allocation21] sm:$0xff] %v7561_v18  ;;  %v7562_v59 = vadd.f32 %v9438_v0, %v8489_v8  ;;  %v8827_v37 = vadd.f32 %v8826_v36, %v8825_v14  ;;  %v8828_v35 = vpop.f32.mrb[38].mxu0  ;;  %v9238_v47 = vpop.f32.mrb[6].mxu1 }
 0x8ff   : > { %v8829_v19 = vpop.f32.mrb[39].mxu0  ;;  %v7534_v30 = vpop.f32.mrb[7].mxu1 }
 0x900   : > { %7570 = vst [vmem:[#allocation21 + $0x8] sm:$0xff] %v7562_v59  ;;  %v9428_v58 = vadd.f32 %v9427_v16, %v8827_v37  ;;  %v8830_v1 = vadd.f32 %v8829_v19, %v8828_v35 }
 0x902   : > { %v9429_v61 = vadd.f32 %v9428_v58, %v9233_v51  ;;  %v9434_v11 = vadd.f32 %v9433_v28, %v8830_v1 }
 0x904   : > { %v7563_v4 = vadd.f32 %v9429_v61, %v8489_v8  ;;  %v9435_v9 = vadd.f32 %v9434_v11, %v9234_v33  ;;  %v8831_v23 = vpop.f32.mrb[40].mxu0 }
 0x905   : > { %v8832_v62 = vpop.f32.mrb[41].mxu0 }
 0x906   : > { %7571 = vst [vmem:[#allocation21 + $0x10] sm:$0xff] %v7563_v4  ;;  %v7564_v20 = vadd.f32 %v9435_v9, %v8489_v8  ;;  %v8833_v7 = vadd.f32 %v8832_v62, %v8831_v23  ;;  %v8834_v38 = vpop.f32.mrb[42].mxu0 }
 0x907   : > { %v8835_v42 = vpop.f32.mrb[43].mxu0 }
 0x908   : > { %7572 = vst [vmem:[#allocation21 + $0x18] sm:$0xff] %v7564_v20  ;;  %v9443_v32 = vadd.f32 %v9442_v52, %v8833_v7  ;;  %v8836_v46 = vadd.f32 %v8835_v42, %v8834_v38 }
 0x90a   : > { %v9444_v17 = vadd.f32 %v9443_v32, %v7531_v50  ;;  %v9449_v48 = vadd.f32 %v9448_v24, %v8836_v46 }
 0x90c   : > { %v7565_v44 = vadd.f32 %v9444_v17, %v8489_v8  ;;  %v9450_v63 = vadd.f32 %v9449_v48, %v7534_v30  ;;  %v8837_v56 = vpop.f32.mrb[44].mxu0 }
 0x90d   : > { %v8838_v16 = vpop.f32.mrb[45].mxu0 }
 0x90e   : > { %7573 = vst [vmem:[#allocation21 + $0x20] sm:$0xff] %v7565_v44  ;;  %v7566_v15 = vadd.f32 %v9450_v63, %v8489_v8  ;;  %v8839_v28 = vadd.f32 %v8838_v16, %v8837_v56  ;;  %v8840_v12 = vpop.f32.mrb[46].mxu0 }
 0x90f   : > { %v8841_v6 = vpop.f32.mrb[47].mxu0 }
 0x910   : > { %7574 = vst [vmem:[#allocation21 + $0x28] sm:$0xff] %v7566_v15  ;;  %v9440_v26 = vadd.f32 %v9439_v21, %v8839_v28  ;;  %v8842_v41 = vadd.f32 %v8841_v6, %v8840_v12 }
 0x912   : > { %v9441_v13 = vadd.f32 %v9440_v26, %v9237_v39  ;;  %v9446_v54 = vadd.f32 %v9445_v60, %v8842_v41 }
 0x914   : > { %v7567_v57 = vadd.f32 %v9441_v13, %v8489_v8  ;;  %v9447_v31 = vadd.f32 %v9446_v54, %v9238_v47 }
 0x916   : > { %7575 = vst [vmem:[#allocation21 + $0x30] sm:$0xff] %v7567_v57  ;;  %v7568_v52 = vadd.f32 %v9447_v31, %v8489_v8 }
 0x918   : > { %7576 = vst [vmem:[#allocation21 + $0x38] sm:$0xff] %v7568_v52 }
 0x919 PF: > { %p9568_p9 = scmp.eq.s32.totalorder %s10611_s29, 4  ;;  %s10512_s15 = smov [#allocation21]  }
 0x91a   : > { %s7586_s20 = sshll.u32 %s10512_s15, 4  ;;  %s7587_s20 = int_to_ptr.vmem [resolvable:$true] %s7586_s20 }
 0x91b   : > { %s10388_s0 = scalar_lea.vmem %s7587_s20, 1024  ;;  %p10395_p2 = scmp.lt.s32.totalorder %s7587_s20, %s7587_s20 }
 0x91c   : > { %p10389_p11 = scmp.ne.s32.totalorder %s7587_s20, %s10388_s0  ;;  %p10396_p3 = scmp.lt.s32.totalorder %s10388_s0, %s10388_s0 }
 0x91e   : > { %p10390_p1 = pnand %p10389_p11, %p9568_p9  ;;  %p10397_p4 = por %p10396_p3, %p10395_p2 }
 0x920   : > { %p10391_p13 = pneg %p10390_p1 }
 0x922   : > { %p10398_p6 = pnand %p10397_p4, %p10391_p13 }
 0x924   : > { %10401 = shalt.err (!%p10398_p6)
}
 0x925   : > { %s13702_s24 = sld [smem:[#allocation68_spill]] }
 0x92b   : > { %s13703_s18 = smov %s13702_s24  ;;  %s10402_s8 = scalar_lea.hbm %s13702_s24, 1024 }
 0x92c   : > { %p10403_p7 = scmp.ne.s32.totalorder %s13703_s18, %s10402_s8  ;;  %p10408_p5 = scmp.lt.u32.totalorder %s10402_s8, %s13703_s18 }
 0x92e   : > { %p10404_p10 = pnand %p10403_p7, %p9568_p9 }
 0x930   : > { %p10405_p0 = pneg %p10404_p10 }
 0x932   : > { %p10410_p8 = pnand %p10408_p5, %p10405_p0 }
 0x934   : > { %10413 = shalt.err (!%p10410_p8)
}
 0x935   : > { %s10513_s14 = smov 128   ;;  %s10514_s2 = smov 8  }
 0x936   : > { %9511 = dma.vmem_to_hbm [thread:$0]  (%p9568_p9), %s7587_s20, 1024, %s13703_s18, [#allocation5], %s10513_s14, %s10513_s14, %s10514_s2  }
 0x937   : > { %10463 = dma.done.wait (%p9568_p9), [#allocation5], 1024  }
 0x938   : > { %10465 = vsyncadd (%p9568_p9), [#allocation5], 4294966272 }
 0x939 PF: > { %s31_s26 = sadd.s32 1, %s10488_s26   ;;  %s13704_s1 = smov %s10768_s21 }
 0x93a   : > { %p28_p12 = scmp.ge.s32.totalorder %s31_s26, 7   ;;  %s13705_s21 = smov %s10472_s22 }
 0x93b   : > { %s13706_s22 = smov %s10476_s23  ;;  %s13707_s23 = smov %s13704_s1 }
 0x93c   : > { %s13708_s24 = smov %s10484_s25  ;;  %s13709_s25 = smov %s13711_s19 }
 0x93d   :  { %30 = sbr.rel (!%p28_p12) target bundleno = 20 (0x14), region = 182 }
 0x944   :  { %7602 = vsyncpa [#allocation4], 1 }
 0x945   :  { %7604 = vsyncpa [#allocation4 + $0x1], 1 }
 0x946   :  { %7605 = vsyncpa [#allocation7], 1 }
 0x947   :  { %7606 = vsyncpa [#allocation10], 1 }
 0x948   :  { %7607 = vsyncpa [#allocation13], 1 }
 0x949   :  { %7608 = vsyncpa [#allocation16], 1 }
 0x94a   :  { %7610 = vsyncpa [#allocation16 + $0x1], 1 }
 0x94b   :  { %7611 = vsyncpa [#allocation19], 1 }
 0x94c   :  { %7612 = vsyncpa [#allocation5], 1 }
 0x94d   :  { %7614 = vsyncpa [#allocation5 + $0x1], 1 }

</bundles_post_ra>
